<compile_context>
chip_gen: v7x
topology: tpu7x:2x2x1
jax: 0.10.0
libtpu: 0.0.40
codegen_flags: <defaults>
</compile_context>

<pallas_src>
import math

import numpy as np
import jax
import jax.numpy as jnp
from jax.experimental import pallas as pl
from jax.experimental.pallas import tpu as pltpu

SQRT1_2 = 0.7071067811865476
TILE_B = 128      # samples per grid step (lane dimension of every activation)


# ---------------------------------------------------------------------------
# 2-qubit gate helpers. State = 8 real arrays (re, im) for basis |q1 q0> in order
# |00>, |01>, |10>, |11>.  Shape-agnostic (kernel uses (1, TILE_B), reference (B, 1)).
# ---------------------------------------------------------------------------
def _hadamard(st, q):
    r0, i0, r1, i1, r2, i2, r3, i3 = st
    if q == 0:
        return (SQRT1_2 * (r0 + r1), SQRT1_2 * (i0 + i1),
                SQRT1_2 * (r0 - r1), SQRT1_2 * (i0 - i1),
                SQRT1_2 * (r2 + r3), SQRT1_2 * (i2 + i3),
                SQRT1_2 * (r2 - r3), SQRT1_2 * (i2 - i3))
    return (SQRT1_2 * (r0 + r2), SQRT1_2 * (i0 + i2),
            SQRT1_2 * (r1 + r3), SQRT1_2 * (i1 + i3),
            SQRT1_2 * (r0 - r2), SQRT1_2 * (i0 - i2),
            SQRT1_2 * (r1 - r3), SQRT1_2 * (i1 - i3))


def _phase(st, q, phi):
    r0, i0, r1, i1, r2, i2, r3, i3 = st
    c, s = jnp.cos(phi), jnp.sin(phi)
    if q == 0:  # basis indices with q0 = 1 -> {1, 3}
        return (r0, i0, r1 * c - i1 * s, r1 * s + i1 * c,
                r2, i2, r3 * c - i3 * s, r3 * s + i3 * c)
    return (r0, i0, r1, i1,
            r2 * c - i2 * s, r2 * s + i2 * c,
            r3 * c - i3 * s, r3 * s + i3 * c)


def _cx01(st):  # control q0, target q1: swaps basis indices 1 and 3
    r0, i0, r1, i1, r2, i2, r3, i3 = st
    return (r0, i0, r3, i3, r2, i2, r1, i1)


def _ry_cs(st, q, c, s):  # RY(theta) with c = cos(theta/2), s = sin(theta/2) given
    r0, i0, r1, i1, r2, i2, r3, i3 = st
    if q == 0:  # pairs (0,1), (2,3)
        return (c * r0 - s * r1, c * i0 - s * i1,
                s * r0 + c * r1, s * i0 + c * i1,
                c * r2 - s * r3, c * i2 - s * i3,
                s * r2 + c * r3, s * i2 + c * i3)
    return (c * r0 - s * r2, c * i0 - s * i2,
            c * r1 - s * r3, c * i1 - s * i3,
            s * r0 + c * r2, s * i0 + c * i2,
            s * r1 + c * r3, s * i1 + c * i3)


# ---------------------------------------------------------------------------
# Fused kernel. One grid step processes TILE_B samples, feature-major:
#   x_ref : (784, TILE_B)    raw images, rows = pixel r*28+c, cols = samples
#   t1    : (1152, 784)      conv1 Toeplitz; out row = phase1*288 + (pu*12+pv)*2 + c1
#   t2    : (1024, 288)      conv2 Toeplitz; out row = phase2*256 + (h2*4+w2)*16 + c2
#   w3    : (64, 256)        fc1 with columns permuted to the (spatial*16 + c2) order
#   w4    : (2, 64)          fc2 (torch (out,in) layout used directly)
#   o_ref : (2, TILE_B)      rows [y ; 1-y] (wrapper transposes back to (B, 2))
# ---------------------------------------------------------------------------
def hybrid_qnn_kernel(x_ref, t1_ref, b1_ref, t2_ref, b2_ref, w3_ref, b3_ref,
                      w4_ref, b4_ref, qcs_ref, lin3_ref, o_ref):
    # ---- conv1 (MXU) + 2x2 max-pool (rows blocked by pooling phase) + bias + ReLU -----
    y1 = jnp.dot(t1_ref[...], x_ref[...], preferred_element_type=jnp.float32)  # (1152, TB)
    p1 = jnp.maximum(jnp.maximum(y1[0:288], y1[288:576]),
                     jnp.maximum(y1[576:864], y1[864:1152]))                   # (288, TB)
    p1 = jnp.maximum(p1 + b1_ref[...], 0.0)   # bias const/channel: max/ReLU commute

    # ---- conv2 (MXU) + 2x2 max-pool + bias + ReLU --------------------------------------
    y2 = jnp.dot(t2_ref[...], p1, preferred_element_type=jnp.float32)          # (1024, TB)
    a2 = jnp.maximum(jnp.maximum(y2[0:256], y2[256:512]),
                     jnp.maximum(y2[512:768], y2[768:1024]))                   # (256, TB)
    a2 = jnp.maximum(a2 + b2_ref[...], 0.0)
    # Dropout2d: inference-mode identity.

    # ---- fc1 + ReLU, fc2 -> QNN input features -----------------------------------------
    hid = jnp.dot(w3_ref[...], a2, preferred_element_type=jnp.float32) + b3_ref[...]
    hid = jnp.maximum(hid, 0.0)                                                # (64, TB)
    f = jnp.dot(w4_ref[...], hid, preferred_element_type=jnp.float32) + b4_ref[...]  # (2, TB)
    x0 = f[0:1, :]                                                             # (1, TB)
    x1 = f[1:2, :]

    # ---- exact 2-qubit statevector simulation, vectorized over lanes -------------------
    one = jnp.ones_like(x0)
    zero = jnp.zeros_like(x0)
    st = (one, zero, zero, zero, zero, zero, zero, zero)       # |00>

    # ZZFeatureMap(2), reps=2: phi_i(x)=x_i, phi_ij(x)=(pi-x_i)(pi-x_j)
    for _ in range(2):
        st = _hadamard(st, 0)
        st = _hadamard(st, 1)
        st = _phase(st, 0, 2.0 * x0)
        st = _phase(st, 1, 2.0 * x1)
        st = _cx01(st)
        st = _phase(st, 1, 2.0 * (math.pi - x0) * (math.pi - x1))
        st = _cx01(st)

    # RealAmplitudes(2, reps=1): RY layer, CX entangler, RY layer
    # (cos/sin of the trainable angles are precomputed on the host -> SMEM scalars)
    st = _ry_cs(st, 0, qcs_ref[0], qcs_ref[1])
    st = _ry_cs(st, 1, qcs_ref[2], qcs_ref[3])
    st = _cx01(st)
    st = _ry_cs(st, 0, qcs_ref[4], qcs_ref[5])
    st = _ry_cs(st, 1, qcs_ref[6], qcs_ref[7])

    r0, i0, r1, i1, r2q, i2q, r3, i3 = st
    ev = (r0 * r0 + i0 * i0) - (r1 * r1 + i1 * i1) \
         - (r2q * r2q + i2q * i2q) + (r3 * r3 + i3 * i3)       # <Z⊗Z>, (1, TB)

    # head Linear(1,1); forward(): cat((y, 1-y), -1)
    y = ev * lin3_ref[0] + lin3_ref[1]
    o_ref[0:1, :] = y
    o_ref[1:2, :] = 1.0 - y


# ---------------------------------------------------------------------------
# pallas_call wrapper: batch is the (parallel) grid axis, weights stay resident.
# ---------------------------------------------------------------------------
def _fused_call(x_t, pk):
    pb = x_t.shape[1]                       # padded batch (multiple of TILE_B)
    nsteps = pb // TILE_B
    return pl.pallas_call(
        hybrid_qnn_kernel,
        out_shape=jax.ShapeDtypeStruct((2, pb), jnp.float32),
        grid=(nsteps,),
        in_specs=[
            pl.BlockSpec((784, TILE_B), lambda i: (0, i)),    # images (only B-scaled input)
            pl.BlockSpec((1152, 784), lambda i: (0, 0)),      # conv1 Toeplitz (phase-stacked)
            pl.BlockSpec((288, 1), lambda i: (0, 0)),         # conv1 bias column
            pl.BlockSpec((1024, 288), lambda i: (0, 0)),      # conv2 Toeplitz (phase-stacked)
            pl.BlockSpec((256, 1), lambda i: (0, 0)),         # conv2 bias column
            pl.BlockSpec((64, 256), lambda i: (0, 0)),        # fc1 (columns permuted)
            pl.BlockSpec((64, 1), lambda i: (0, 0)),          # fc1 bias column
            pl.BlockSpec((2, 64), lambda i: (0, 0)),          # fc2
            pl.BlockSpec((2, 1), lambda i: (0, 0)),           # fc2 bias column
            pl.BlockSpec(memory_space=pltpu.MemorySpace.SMEM),  # cos/sin of RealAmplitudes
            pl.BlockSpec(memory_space=pltpu.MemorySpace.SMEM),  # fc3 (w, b) scalars
        ],
        out_specs=pl.BlockSpec((2, TILE_B), lambda i: (0, i)),
        compiler_params=pltpu.CompilerParams(
            dimension_semantics=("parallel",),       # shard batch tiles across TCs (v7x)
            vmem_limit_bytes=32 * 1024 * 1024),
    )(x_t, pk["t1"], pk["b1"], pk["t2"], pk["b2"], pk["w3"], pk["b3"],
      pk["w4"], pk["b4"], pk["qcs"], pk["lin3"])


@jax.jit
def hybrid_qnn_forward(x_nchw, pk):
    b = x_nchw.shape[0]
    x = x_nchw[:, 0].reshape(b, 28 * 28).astype(jnp.float32)   # Cin == 1
    x_t = x.T                                                  # (784, B): batch -> lanes
    pb = ((b + TILE_B - 1) // TILE_B) * TILE_B
    x_t = jnp.pad(x_t, ((0, 0), (0, pb - b)))
    out_t = _fused_call(x_t, pk)                               # (2, PB)
    return out_t[:, :b].T                                      # (B, 2)


# ---------------------------------------------------------------------------
# Parameters (torch layout) + one-time packing into the kernel's layouts.
# ---------------------------------------------------------------------------
def init_params(key):
    ks = jax.random.split(key, 11)
    p = {}
    p["conv1_w"] = 0.2 * jax.random.normal(ks[0], (2, 1, 5, 5), jnp.float32)
    p["conv1_b"] = 0.1 * jax.random.normal(ks[1], (2,), jnp.float32)
    p["conv2_w"] = 0.2 * jax.random.normal(ks[2], (16, 2, 5, 5), jnp.float32)
    p["conv2_b"] = 0.1 * jax.random.normal(ks[3], (16,), jnp.float32)
    p["fc1_w"] = 0.1 * jax.random.normal(ks[4], (64, 256), jnp.float32)   # (out, in)
    p["fc1_b"] = 0.1 * jax.random.normal(ks[5], (64,), jnp.float32)
    p["fc2_w"] = 0.3 * jax.random.normal(ks[6], (2, 64), jnp.float32)     # Linear(64, 2)
    p["fc2_b"] = 0.1 * jax.random.normal(ks[7], (2,), jnp.float32)
    p["theta"] = jax.random.uniform(ks[8], (4,), jnp.float32, -1.0, 1.0)  # RealAmplitudes
    p["fc3_w"] = 0.5 * jax.random.normal(ks[9], (1, 1), jnp.float32)      # Linear(1, 1)
    p["fc3_b"] = 0.1 * jax.random.normal(ks[10], (1,), jnp.float32)
    return p


def pack_params(p):
    """One-time re-layout of torch-format parameters into the kernel's matmul layouts."""
    w1 = np.asarray(p["conv1_w"], np.float32)
    b1 = np.asarray(p["conv1_b"], np.float32)
    w2 = np.asarray(p["conv2_w"], np.float32)
    b2 = np.asarray(p["conv2_b"], np.float32)

    # conv1 Toeplitz: pre-pool output (Y,X) with Y=2*pu+p1y, X=2*pv+p1x
    # output row = (p1y*2+p1x)*288 + (pu*12+pv)*2 + c1 ; input col = (Y+i)*28 + (X+j)
    Y, X = np.meshgrid(np.arange(24), np.arange(24), indexing="ij")
    rows1 = ((Y % 2) * 2 + (X % 2)) * 288 + ((Y // 2) * 12 + (X // 2)) * 2
    t1 = np.zeros((1152, 784), np.float32)
    for c1 in range(2):
        for i in range(5):
            for j in range(5):
                t1[rows1 + c1, (Y + i) * 28 + (X + j)] = w1[c1, 0, i, j]
    b1_col = np.tile(b1, 144).reshape(288, 1)

    # conv2 Toeplitz on the pooled 12x12x2 map (rows (pu*12+pv)*2 + c1):
    # pre-pool output (h,w) with h=2*gh+p2y, w=2*gw+p2x
    # output row = (p2y*2+p2x)*256 + (gh*4+gw)*16 + c2 ; input col = ((h+i)*12+(w+j))*2 + c1
    H, W = np.meshgrid(np.arange(8), np.arange(8), indexing="ij")
    rows2 = ((H % 2) * 2 + (W % 2)) * 256 + ((H // 2) * 4 + (W // 2)) * 16
    t2 = np.zeros((1024, 288), np.float32)
    for c2 in range(16):
        for c1 in range(2):
            for i in range(5):
                for j in range(5):
                    t2[rows2 + c2, ((H + i) * 12 + (W + j)) * 2 + c1] = w2[c2, c1, i, j]
    b2_col = np.tile(b2, 16).reshape(256, 1)

    # fc1 columns re-ordered from torch NCHW flatten index (c2*16 + s) to (s*16 + c2)
    fc1_w = np.asarray(p["fc1_w"], np.float32)
    w3 = fc1_w.reshape(64, 16, 16).transpose(0, 2, 1).reshape(64, 256)
    b3_col = np.asarray(p["fc1_b"], np.float32).reshape(64, 1)
    w4 = np.asarray(p["fc2_w"], np.float32)              # (2, 64), used as-is (feature-major)
    b4_col = np.asarray(p["fc2_b"], np.float32).reshape(2, 1)

    th = np.asarray(p["theta"], np.float32)
    qcs = np.array([np.cos(th[0] / 2), np.sin(th[0] / 2), np.cos(th[1] / 2), np.sin(th[1] / 2),
                    np.cos(th[2] / 2), np.sin(th[2] / 2), np.cos(th[3] / 2), np.sin(th[3] / 2)],
                   np.float32)
    lin3 = np.array([float(np.asarray(p["fc3_w"]).reshape(())),
                     float(np.asarray(p["fc3_b"]).reshape(()))], np.float32)

    raw = {"t1": t1, "b1": b1_col, "t2": t2, "b2": b2_col, "w3": w3, "b3": b3_col,
           "w4": w4, "b4": b4_col, "qcs": qcs, "lin3": lin3}
    return {k: jnp.asarray(v) for k, v in raw.items()}


# ---------------------------------------------------------------------------
# Pure-JAX reference (validates the Toeplitz / pooling-phase / permutation plumbing).
# ---------------------------------------------------------------------------
def _ref_conv(x, w, b):   # x: (B, Cin, H, W), w: (Cout, Cin, 5, 5)
    ho, wo = x.shape[2] - 4, x.shape[3] - 4
    out = None
    for i in range(5):
        for j in range(5):
            patch = x[:, :, i:i + ho, j:j + wo]
            term = jnp.einsum("bchw,oc->bohw", patch, w[:, :, i, j])
            out = term if out is None else out + term
    return out + b[None, :, None, None]


def reference_forward(x_nchw, p):
    x = x_nchw.astype(jnp.float32)
    a = jnp.maximum(_ref_conv(x, p["conv1_w"], p["conv1_b"]), 0.0)          # (B,2,24,24)
    a = jnp.max(a.reshape(a.shape[0], 2, 12, 2, 12, 2), axis=(3, 5))        # (B,2,12,12)
    a = jnp.maximum(_ref_conv(a, p["conv2_w"], p["conv2_b"]), 0.0)          # (B,16,8,8)
    a = jnp.max(a.reshape(a.shape[0], 16, 4, 2, 4, 2), axis=(3, 5))         # (B,16,4,4)
    flat = a.reshape(a.shape[0], 256)
    hid = jnp.maximum(flat @ p["fc1_w"].T + p["fc1_b"], 0.0)
    f = hid @ p["fc2_w"].T + p["fc2_b"]                                     # (B,2)
    x0, x1 = f[:, 0:1], f[:, 1:2]
    one, zero = jnp.ones_like(x0), jnp.zeros_like(x0)
    st = (one, zero, zero, zero, zero, zero, zero, zero)
    for _ in range(2):
        st = _hadamard(st, 0)
        st = _hadamard(st, 1)
        st = _phase(st, 0, 2.0 * x0)
        st = _phase(st, 1, 2.0 * x1)
        st = _cx01(st)
        st = _phase(st, 1, 2.0 * (math.pi - x0) * (math.pi - x1))
        st = _cx01(st)
    th = p["theta"]
    st = _ry_cs(st, 0, jnp.cos(th[0] / 2), jnp.sin(th[0] / 2))
    st = _ry_cs(st, 1, jnp.cos(th[1] / 2), jnp.sin(th[1] / 2))
    st = _cx01(st)
    st = _ry_cs(st, 0, jnp.cos(th[2] / 2), jnp.sin(th[2] / 2))
    st = _ry_cs(st, 1, jnp.cos(th[3] / 2), jnp.sin(th[3] / 2))
    r0, i0, r1, i1, r2, i2, r3, i3 = st
    ev = (r0 * r0 + i0 * i0) - (r1 * r1 + i1 * i1) - (r2 * r2 + i2 * i2) + (r3 * r3 + i3 * i3)
    y = ev * p["fc3_w"][0, 0] + p["fc3_b"][0]
    return jnp.concatenate([y, 1.0 - y], axis=-1)


if __name__ == "__main__":
    key = jax.random.PRNGKey(0)
    pkey, xkey = jax.random.split(key)
    params = init_params(pkey)
    packed = pack_params(params)
    x = jax.random.normal(xkey, (2, 1, 28, 28), jnp.float32)

    out = hybrid_qnn_forward(x, packed)
    out = jax.block_until_ready(out)

    assert out.shape == (2, 2)
    assert bool(jnp.all(jnp.isfinite(out)))
    # forward returns cat((y, 1-y), -1) -> rows sum to 1
    assert bool(jnp.allclose(out.sum(-1), 1.0, atol=1e-5))
    # layout/permutation plumbing check against a pure-JAX reference (loose tol for MXU numerics)
    ref = reference_forward(x, params)
    assert bool(jnp.allclose(out, ref, atol=5e-2, rtol=5e-2))
    print("KERNEL_OK")
</pallas_src>

<mosaic_0001>
module attributes {stable_mosaic.version = 11 : i64} {
  func.func @hybrid_qnn_kernel(%arg0: i32, %arg1: memref<784x128xf32, #tpu.memory_space<vmem>>, %arg2: memref<1152x784xf32, #tpu.memory_space<vmem>>, %arg3: memref<288x1xf32, #tpu.memory_space<vmem>>, %arg4: memref<1024x288xf32, #tpu.memory_space<vmem>>, %arg5: memref<256x1xf32, #tpu.memory_space<vmem>>, %arg6: memref<64x256xf32, #tpu.memory_space<vmem>>, %arg7: memref<64x1xf32, #tpu.memory_space<vmem>>, %arg8: memref<2x64xf32, #tpu.memory_space<vmem>>, %arg9: memref<2x1xf32, #tpu.memory_space<vmem>>, %arg10: memref<8xf32, #tpu.memory_space<smem>>, %arg11: memref<2xf32, #tpu.memory_space<smem>>, %arg12: memref<2x128xf32, #tpu.memory_space<vmem>>) attributes {dimension_semantics = [#tpu.dimension_semantics<parallel>], iteration_bounds = array<i64: 1>, scalar_prefetch = 0 : i64, scratch_operands = 0 : i64, tpu.core_type = #tpu.core_type<tc>, window_params = [{transform_indices = @transform_0, window_bounds = array<i64: 784, 128>}, {pipeline_mode = #tpu.pipeline_mode<synchronous>, transform_indices = @transform_1, window_bounds = array<i64: 1152, 784>}, {pipeline_mode = #tpu.pipeline_mode<synchronous>, transform_indices = @transform_2, window_bounds = array<i64: 288, 1>}, {pipeline_mode = #tpu.pipeline_mode<synchronous>, transform_indices = @transform_3, window_bounds = array<i64: 1024, 288>}, {pipeline_mode = #tpu.pipeline_mode<synchronous>, transform_indices = @transform_4, window_bounds = array<i64: 256, 1>}, {pipeline_mode = #tpu.pipeline_mode<synchronous>, transform_indices = @transform_5, window_bounds = array<i64: 64, 256>}, {pipeline_mode = #tpu.pipeline_mode<synchronous>, transform_indices = @transform_6, window_bounds = array<i64: 64, 1>}, {pipeline_mode = #tpu.pipeline_mode<synchronous>, transform_indices = @transform_7, window_bounds = array<i64: 2, 64>}, {pipeline_mode = #tpu.pipeline_mode<synchronous>, transform_indices = @transform_8, window_bounds = array<i64: 2, 1>}, {transform_indices = @transform_9, window_bounds = array<i64: 8>}, {transform_indices = @transform_10, window_bounds = array<i64: 2>}, {transform_indices = @transform_11, window_bounds = array<i64: 2, 128>}]} {
    %c0 = arith.constant 0 : index
    %c0_0 = arith.constant 0 : index
    %0 = vector.load %arg2[%c0, %c0_0] : memref<1152x784xf32, #tpu.memory_space<vmem>>, vector<1152x784xf32>
    %c0_1 = arith.constant 0 : index
    %c0_2 = arith.constant 0 : index
    %1 = vector.load %arg1[%c0_1, %c0_2] : memref<784x128xf32, #tpu.memory_space<vmem>>, vector<784x128xf32>
    %cst = arith.constant dense<0.000000e+00> : vector<1152x128xf32>
    %2 = tpu.matmul %0, %1, %cst {dimension_numbers = #tpu.dot_dimension_numbers<[1], [0], [0], [1], [0, 0, 1, 1], [], []>} : vector<1152x784xf32>, vector<784x128xf32>, vector<1152x128xf32> -> vector<1152x128xf32>
    %3 = vector.extract_strided_slice %2 {offsets = [0, 0], sizes = [288, 128], strides = [1, 1]} : vector<1152x128xf32> to vector<288x128xf32>
    %4 = vector.extract_strided_slice %2 {offsets = [288, 0], sizes = [288, 128], strides = [1, 1]} : vector<1152x128xf32> to vector<288x128xf32>
    %5 = arith.maximumf %3, %4 : vector<288x128xf32>
    %6 = vector.extract_strided_slice %2 {offsets = [576, 0], sizes = [288, 128], strides = [1, 1]} : vector<1152x128xf32> to vector<288x128xf32>
    %7 = vector.extract_strided_slice %2 {offsets = [864, 0], sizes = [288, 128], strides = [1, 1]} : vector<1152x128xf32> to vector<288x128xf32>
    %8 = arith.maximumf %6, %7 : vector<288x128xf32>
    %9 = arith.maximumf %5, %8 : vector<288x128xf32>
    %c0_3 = arith.constant 0 : index
    %c0_4 = arith.constant 0 : index
    %10 = vector.load %arg3[%c0_3, %c0_4] : memref<288x1xf32, #tpu.memory_space<vmem>>, vector<288x1xf32>
    %11 = vector.broadcast %10 : vector<288x1xf32> to vector<288x128xf32>
    %12 = arith.addf %9, %11 : vector<288x128xf32>
    %cst_5 = arith.constant 0.000000e+00 : f32
    %13 = vector.broadcast %cst_5 : f32 to vector<288x128xf32>
    %14 = arith.maximumf %12, %13 : vector<288x128xf32>
    %c0_6 = arith.constant 0 : index
    %c0_7 = arith.constant 0 : index
    %15 = vector.load %arg4[%c0_6, %c0_7] : memref<1024x288xf32, #tpu.memory_space<vmem>>, vector<1024x288xf32>
    %cst_8 = arith.constant dense<0.000000e+00> : vector<1024x128xf32>
    %16 = tpu.matmul %15, %14, %cst_8 {dimension_numbers = #tpu.dot_dimension_numbers<[1], [0], [0], [1], [0, 0, 1, 1], [], []>} : vector<1024x288xf32>, vector<288x128xf32>, vector<1024x128xf32> -> vector<1024x128xf32>
    %17 = vector.extract_strided_slice %16 {offsets = [0, 0], sizes = [256, 128], strides = [1, 1]} : vector<1024x128xf32> to vector<256x128xf32>
    %18 = vector.extract_strided_slice %16 {offsets = [256, 0], sizes = [256, 128], strides = [1, 1]} : vector<1024x128xf32> to vector<256x128xf32>
    %19 = arith.maximumf %17, %18 : vector<256x128xf32>
    %20 = vector.extract_strided_slice %16 {offsets = [512, 0], sizes = [256, 128], strides = [1, 1]} : vector<1024x128xf32> to vector<256x128xf32>
    %21 = vector.extract_strided_slice %16 {offsets = [768, 0], sizes = [256, 128], strides = [1, 1]} : vector<1024x128xf32> to vector<256x128xf32>
    %22 = arith.maximumf %20, %21 : vector<256x128xf32>
    %23 = arith.maximumf %19, %22 : vector<256x128xf32>
    %c0_9 = arith.constant 0 : index
    %c0_10 = arith.constant 0 : index
    %24 = vector.load %arg5[%c0_9, %c0_10] : memref<256x1xf32, #tpu.memory_space<vmem>>, vector<256x1xf32>
    %25 = vector.broadcast %24 : vector<256x1xf32> to vector<256x128xf32>
    %26 = arith.addf %23, %25 : vector<256x128xf32>
    %cst_11 = arith.constant 0.000000e+00 : f32
    %27 = vector.broadcast %cst_11 : f32 to vector<256x128xf32>
    %28 = arith.maximumf %26, %27 : vector<256x128xf32>
    %c0_12 = arith.constant 0 : index
    %c0_13 = arith.constant 0 : index
    %29 = vector.load %arg6[%c0_12, %c0_13] : memref<64x256xf32, #tpu.memory_space<vmem>>, vector<64x256xf32>
    %cst_14 = arith.constant dense<0.000000e+00> : vector<64x128xf32>
    %30 = tpu.matmul %29, %28, %cst_14 {dimension_numbers = #tpu.dot_dimension_numbers<[1], [0], [0], [1], [0, 0, 1, 1], [], []>} : vector<64x256xf32>, vector<256x128xf32>, vector<64x128xf32> -> vector<64x128xf32>
    %c0_15 = arith.constant 0 : index
    %c0_16 = arith.constant 0 : index
    %31 = vector.load %arg7[%c0_15, %c0_16] : memref<64x1xf32, #tpu.memory_space<vmem>>, vector<64x1xf32>
    %32 = vector.broadcast %31 : vector<64x1xf32> to vector<64x128xf32>
    %33 = arith.addf %30, %32 : vector<64x128xf32>
    %cst_17 = arith.constant 0.000000e+00 : f32
    %34 = vector.broadcast %cst_17 : f32 to vector<64x128xf32>
    %35 = arith.maximumf %33, %34 : vector<64x128xf32>
    %c0_18 = arith.constant 0 : index
    %c0_19 = arith.constant 0 : index
    %36 = vector.load %arg8[%c0_18, %c0_19] : memref<2x64xf32, #tpu.memory_space<vmem>>, vector<2x64xf32>
    %cst_20 = arith.constant dense<0.000000e+00> : vector<2x128xf32>
    %37 = tpu.matmul %36, %35, %cst_20 {dimension_numbers = #tpu.dot_dimension_numbers<[1], [0], [0], [1], [0, 0, 1, 1], [], []>} : vector<2x64xf32>, vector<64x128xf32>, vector<2x128xf32> -> vector<2x128xf32>
    %c0_21 = arith.constant 0 : index
    %c0_22 = arith.constant 0 : index
    %38 = vector.load %arg9[%c0_21, %c0_22] : memref<2x1xf32, #tpu.memory_space<vmem>>, vector<2x1xf32>
    %39 = vector.broadcast %38 : vector<2x1xf32> to vector<2x128xf32>
    %40 = arith.addf %37, %39 : vector<2x128xf32>
    %41 = vector.extract_strided_slice %40 {offsets = [0, 0], sizes = [1, 128], strides = [1, 1]} : vector<2x128xf32> to vector<1x128xf32>
    %42 = vector.extract_strided_slice %40 {offsets = [1, 0], sizes = [1, 128], strides = [1, 1]} : vector<2x128xf32> to vector<1x128xf32>
    %cst_23 = arith.constant 1.000000e+00 : f32
    %43 = vector.broadcast %cst_23 : f32 to vector<1x128xf32>
    %cst_24 = arith.constant 0.000000e+00 : f32
    %44 = vector.broadcast %cst_24 : f32 to vector<1x128xf32>
    %45 = arith.addf %43, %44 : vector<1x128xf32>
    %cst_25 = arith.constant 0.707106769 : f32
    %46 = vector.broadcast %cst_25 : f32 to vector<1x128xf32>
    %47 = arith.mulf %46, %45 : vector<1x128xf32>
    %48 = arith.addf %44, %44 : vector<1x128xf32>
    %cst_26 = arith.constant 0.707106769 : f32
    %49 = vector.broadcast %cst_26 : f32 to vector<1x128xf32>
    %50 = arith.mulf %49, %48 : vector<1x128xf32>
    %51 = arith.subf %43, %44 : vector<1x128xf32>
    %cst_27 = arith.constant 0.707106769 : f32
    %52 = vector.broadcast %cst_27 : f32 to vector<1x128xf32>
    %53 = arith.mulf %52, %51 : vector<1x128xf32>
    %54 = arith.subf %44, %44 : vector<1x128xf32>
    %cst_28 = arith.constant 0.707106769 : f32
    %55 = vector.broadcast %cst_28 : f32 to vector<1x128xf32>
    %56 = arith.mulf %55, %54 : vector<1x128xf32>
    %57 = arith.addf %44, %44 : vector<1x128xf32>
    %cst_29 = arith.constant 0.707106769 : f32
    %58 = vector.broadcast %cst_29 : f32 to vector<1x128xf32>
    %59 = arith.mulf %58, %57 : vector<1x128xf32>
    %60 = arith.addf %44, %44 : vector<1x128xf32>
    %cst_30 = arith.constant 0.707106769 : f32
    %61 = vector.broadcast %cst_30 : f32 to vector<1x128xf32>
    %62 = arith.mulf %61, %60 : vector<1x128xf32>
    %63 = arith.subf %44, %44 : vector<1x128xf32>
    %cst_31 = arith.constant 0.707106769 : f32
    %64 = vector.broadcast %cst_31 : f32 to vector<1x128xf32>
    %65 = arith.mulf %64, %63 : vector<1x128xf32>
    %66 = arith.subf %44, %44 : vector<1x128xf32>
    %cst_32 = arith.constant 0.707106769 : f32
    %67 = vector.broadcast %cst_32 : f32 to vector<1x128xf32>
    %68 = arith.mulf %67, %66 : vector<1x128xf32>
    %69 = arith.addf %47, %59 : vector<1x128xf32>
    %cst_33 = arith.constant 0.707106769 : f32
    %70 = vector.broadcast %cst_33 : f32 to vector<1x128xf32>
    %71 = arith.mulf %70, %69 : vector<1x128xf32>
    %72 = arith.addf %50, %62 : vector<1x128xf32>
    %cst_34 = arith.constant 0.707106769 : f32
    %73 = vector.broadcast %cst_34 : f32 to vector<1x128xf32>
    %74 = arith.mulf %73, %72 : vector<1x128xf32>
    %75 = arith.addf %53, %65 : vector<1x128xf32>
    %cst_35 = arith.constant 0.707106769 : f32
    %76 = vector.broadcast %cst_35 : f32 to vector<1x128xf32>
    %77 = arith.mulf %76, %75 : vector<1x128xf32>
    %78 = arith.addf %56, %68 : vector<1x128xf32>
    %cst_36 = arith.constant 0.707106769 : f32
    %79 = vector.broadcast %cst_36 : f32 to vector<1x128xf32>
    %80 = arith.mulf %79, %78 : vector<1x128xf32>
    %81 = arith.subf %47, %59 : vector<1x128xf32>
    %cst_37 = arith.constant 0.707106769 : f32
    %82 = vector.broadcast %cst_37 : f32 to vector<1x128xf32>
    %83 = arith.mulf %82, %81 : vector<1x128xf32>
    %84 = arith.subf %50, %62 : vector<1x128xf32>
    %cst_38 = arith.constant 0.707106769 : f32
    %85 = vector.broadcast %cst_38 : f32 to vector<1x128xf32>
    %86 = arith.mulf %85, %84 : vector<1x128xf32>
    %87 = arith.subf %53, %65 : vector<1x128xf32>
    %cst_39 = arith.constant 0.707106769 : f32
    %88 = vector.broadcast %cst_39 : f32 to vector<1x128xf32>
    %89 = arith.mulf %88, %87 : vector<1x128xf32>
    %90 = arith.subf %56, %68 : vector<1x128xf32>
    %cst_40 = arith.constant 0.707106769 : f32
    %91 = vector.broadcast %cst_40 : f32 to vector<1x128xf32>
    %92 = arith.mulf %91, %90 : vector<1x128xf32>
    %cst_41 = arith.constant 2.000000e+00 : f32
    %93 = vector.broadcast %cst_41 : f32 to vector<1x128xf32>
    %94 = arith.mulf %93, %41 : vector<1x128xf32>
    %95 = math.cos %94 : vector<1x128xf32>
    %96 = math.sin %94 : vector<1x128xf32>
    %97 = arith.mulf %77, %95 : vector<1x128xf32>
    %98 = arith.mulf %80, %96 : vector<1x128xf32>
    %99 = arith.subf %97, %98 : vector<1x128xf32>
    %100 = arith.mulf %77, %96 : vector<1x128xf32>
    %101 = arith.mulf %80, %95 : vector<1x128xf32>
    %102 = arith.addf %100, %101 : vector<1x128xf32>
    %103 = arith.mulf %89, %95 : vector<1x128xf32>
    %104 = arith.mulf %92, %96 : vector<1x128xf32>
    %105 = arith.subf %103, %104 : vector<1x128xf32>
    %106 = arith.mulf %89, %96 : vector<1x128xf32>
    %107 = arith.mulf %92, %95 : vector<1x128xf32>
    %108 = arith.addf %106, %107 : vector<1x128xf32>
    %cst_42 = arith.constant 2.000000e+00 : f32
    %109 = vector.broadcast %cst_42 : f32 to vector<1x128xf32>
    %110 = arith.mulf %109, %42 : vector<1x128xf32>
    %111 = math.cos %110 : vector<1x128xf32>
    %112 = math.sin %110 : vector<1x128xf32>
    %113 = arith.mulf %83, %111 : vector<1x128xf32>
    %114 = arith.mulf %86, %112 : vector<1x128xf32>
    %115 = arith.subf %113, %114 : vector<1x128xf32>
    %116 = arith.mulf %83, %112 : vector<1x128xf32>
    %117 = arith.mulf %86, %111 : vector<1x128xf32>
    %118 = arith.addf %116, %117 : vector<1x128xf32>
    %119 = arith.mulf %105, %111 : vector<1x128xf32>
    %120 = arith.mulf %108, %112 : vector<1x128xf32>
    %121 = arith.subf %119, %120 : vector<1x128xf32>
    %122 = arith.mulf %105, %112 : vector<1x128xf32>
    %123 = arith.mulf %108, %111 : vector<1x128xf32>
    %124 = arith.addf %122, %123 : vector<1x128xf32>
    %cst_43 = arith.constant 3.14159274 : f32
    %125 = vector.broadcast %cst_43 : f32 to vector<1x128xf32>
    %126 = arith.subf %125, %41 : vector<1x128xf32>
    %cst_44 = arith.constant 2.000000e+00 : f32
    %127 = vector.broadcast %cst_44 : f32 to vector<1x128xf32>
    %128 = arith.mulf %127, %126 : vector<1x128xf32>
    %cst_45 = arith.constant 3.14159274 : f32
    %129 = vector.broadcast %cst_45 : f32 to vector<1x128xf32>
    %130 = arith.subf %129, %42 : vector<1x128xf32>
    %131 = arith.mulf %128, %130 : vector<1x128xf32>
    %132 = math.cos %131 : vector<1x128xf32>
    %133 = math.sin %131 : vector<1x128xf32>
    %134 = arith.mulf %115, %132 : vector<1x128xf32>
    %135 = arith.mulf %118, %133 : vector<1x128xf32>
    %136 = arith.subf %134, %135 : vector<1x128xf32>
    %137 = arith.mulf %115, %133 : vector<1x128xf32>
    %138 = arith.mulf %118, %132 : vector<1x128xf32>
    %139 = arith.addf %137, %138 : vector<1x128xf32>
    %140 = arith.mulf %99, %132 : vector<1x128xf32>
    %141 = arith.mulf %102, %133 : vector<1x128xf32>
    %142 = arith.subf %140, %141 : vector<1x128xf32>
    %143 = arith.mulf %99, %133 : vector<1x128xf32>
    %144 = arith.mulf %102, %132 : vector<1x128xf32>
    %145 = arith.addf %143, %144 : vector<1x128xf32>
    %146 = arith.addf %71, %142 : vector<1x128xf32>
    %cst_46 = arith.constant 0.707106769 : f32
    %147 = vector.broadcast %cst_46 : f32 to vector<1x128xf32>
    %148 = arith.mulf %147, %146 : vector<1x128xf32>
    %149 = arith.addf %74, %145 : vector<1x128xf32>
    %cst_47 = arith.constant 0.707106769 : f32
    %150 = vector.broadcast %cst_47 : f32 to vector<1x128xf32>
    %151 = arith.mulf %150, %149 : vector<1x128xf32>
    %152 = arith.subf %71, %142 : vector<1x128xf32>
    %cst_48 = arith.constant 0.707106769 : f32
    %153 = vector.broadcast %cst_48 : f32 to vector<1x128xf32>
    %154 = arith.mulf %153, %152 : vector<1x128xf32>
    %155 = arith.subf %74, %145 : vector<1x128xf32>
    %cst_49 = arith.constant 0.707106769 : f32
    %156 = vector.broadcast %cst_49 : f32 to vector<1x128xf32>
    %157 = arith.mulf %156, %155 : vector<1x128xf32>
    %158 = arith.addf %136, %121 : vector<1x128xf32>
    %cst_50 = arith.constant 0.707106769 : f32
    %159 = vector.broadcast %cst_50 : f32 to vector<1x128xf32>
    %160 = arith.mulf %159, %158 : vector<1x128xf32>
    %161 = arith.addf %139, %124 : vector<1x128xf32>
    %cst_51 = arith.constant 0.707106769 : f32
    %162 = vector.broadcast %cst_51 : f32 to vector<1x128xf32>
    %163 = arith.mulf %162, %161 : vector<1x128xf32>
    %164 = arith.subf %136, %121 : vector<1x128xf32>
    %cst_52 = arith.constant 0.707106769 : f32
    %165 = vector.broadcast %cst_52 : f32 to vector<1x128xf32>
    %166 = arith.mulf %165, %164 : vector<1x128xf32>
    %167 = arith.subf %139, %124 : vector<1x128xf32>
    %cst_53 = arith.constant 0.707106769 : f32
    %168 = vector.broadcast %cst_53 : f32 to vector<1x128xf32>
    %169 = arith.mulf %168, %167 : vector<1x128xf32>
    %170 = arith.addf %148, %160 : vector<1x128xf32>
    %cst_54 = arith.constant 0.707106769 : f32
    %171 = vector.broadcast %cst_54 : f32 to vector<1x128xf32>
    %172 = arith.mulf %171, %170 : vector<1x128xf32>
    %173 = arith.addf %151, %163 : vector<1x128xf32>
    %cst_55 = arith.constant 0.707106769 : f32
    %174 = vector.broadcast %cst_55 : f32 to vector<1x128xf32>
    %175 = arith.mulf %174, %173 : vector<1x128xf32>
    %176 = arith.addf %154, %166 : vector<1x128xf32>
    %cst_56 = arith.constant 0.707106769 : f32
    %177 = vector.broadcast %cst_56 : f32 to vector<1x128xf32>
    %178 = arith.mulf %177, %176 : vector<1x128xf32>
    %179 = arith.addf %157, %169 : vector<1x128xf32>
    %cst_57 = arith.constant 0.707106769 : f32
    %180 = vector.broadcast %cst_57 : f32 to vector<1x128xf32>
    %181 = arith.mulf %180, %179 : vector<1x128xf32>
    %182 = arith.subf %148, %160 : vector<1x128xf32>
    %cst_58 = arith.constant 0.707106769 : f32
    %183 = vector.broadcast %cst_58 : f32 to vector<1x128xf32>
    %184 = arith.mulf %183, %182 : vector<1x128xf32>
    %185 = arith.subf %151, %163 : vector<1x128xf32>
    %cst_59 = arith.constant 0.707106769 : f32
    %186 = vector.broadcast %cst_59 : f32 to vector<1x128xf32>
    %187 = arith.mulf %186, %185 : vector<1x128xf32>
    %188 = arith.subf %154, %166 : vector<1x128xf32>
    %cst_60 = arith.constant 0.707106769 : f32
    %189 = vector.broadcast %cst_60 : f32 to vector<1x128xf32>
    %190 = arith.mulf %189, %188 : vector<1x128xf32>
    %191 = arith.subf %157, %169 : vector<1x128xf32>
    %cst_61 = arith.constant 0.707106769 : f32
    %192 = vector.broadcast %cst_61 : f32 to vector<1x128xf32>
    %193 = arith.mulf %192, %191 : vector<1x128xf32>
    %cst_62 = arith.constant 2.000000e+00 : f32
    %194 = vector.broadcast %cst_62 : f32 to vector<1x128xf32>
    %195 = arith.mulf %194, %41 : vector<1x128xf32>
    %196 = math.cos %195 : vector<1x128xf32>
    %197 = math.sin %195 : vector<1x128xf32>
    %198 = arith.mulf %178, %196 : vector<1x128xf32>
    %199 = arith.mulf %181, %197 : vector<1x128xf32>
    %200 = arith.subf %198, %199 : vector<1x128xf32>
    %201 = arith.mulf %178, %197 : vector<1x128xf32>
    %202 = arith.mulf %181, %196 : vector<1x128xf32>
    %203 = arith.addf %201, %202 : vector<1x128xf32>
    %204 = arith.mulf %190, %196 : vector<1x128xf32>
    %205 = arith.mulf %193, %197 : vector<1x128xf32>
    %206 = arith.subf %204, %205 : vector<1x128xf32>
    %207 = arith.mulf %190, %197 : vector<1x128xf32>
    %208 = arith.mulf %193, %196 : vector<1x128xf32>
    %209 = arith.addf %207, %208 : vector<1x128xf32>
    %cst_63 = arith.constant 2.000000e+00 : f32
    %210 = vector.broadcast %cst_63 : f32 to vector<1x128xf32>
    %211 = arith.mulf %210, %42 : vector<1x128xf32>
    %212 = math.cos %211 : vector<1x128xf32>
    %213 = math.sin %211 : vector<1x128xf32>
    %214 = arith.mulf %184, %212 : vector<1x128xf32>
    %215 = arith.mulf %187, %213 : vector<1x128xf32>
    %216 = arith.subf %214, %215 : vector<1x128xf32>
    %217 = arith.mulf %184, %213 : vector<1x128xf32>
    %218 = arith.mulf %187, %212 : vector<1x128xf32>
    %219 = arith.addf %217, %218 : vector<1x128xf32>
    %220 = arith.mulf %206, %212 : vector<1x128xf32>
    %221 = arith.mulf %209, %213 : vector<1x128xf32>
    %222 = arith.subf %220, %221 : vector<1x128xf32>
    %223 = arith.mulf %206, %213 : vector<1x128xf32>
    %224 = arith.mulf %209, %212 : vector<1x128xf32>
    %225 = arith.addf %223, %224 : vector<1x128xf32>
    %cst_64 = arith.constant 3.14159274 : f32
    %226 = vector.broadcast %cst_64 : f32 to vector<1x128xf32>
    %227 = arith.subf %226, %41 : vector<1x128xf32>
    %cst_65 = arith.constant 2.000000e+00 : f32
    %228 = vector.broadcast %cst_65 : f32 to vector<1x128xf32>
    %229 = arith.mulf %228, %227 : vector<1x128xf32>
    %cst_66 = arith.constant 3.14159274 : f32
    %230 = vector.broadcast %cst_66 : f32 to vector<1x128xf32>
    %231 = arith.subf %230, %42 : vector<1x128xf32>
    %232 = arith.mulf %229, %231 : vector<1x128xf32>
    %233 = math.cos %232 : vector<1x128xf32>
    %234 = math.sin %232 : vector<1x128xf32>
    %235 = arith.mulf %216, %233 : vector<1x128xf32>
    %236 = arith.mulf %219, %234 : vector<1x128xf32>
    %237 = arith.subf %235, %236 : vector<1x128xf32>
    %238 = arith.mulf %216, %234 : vector<1x128xf32>
    %239 = arith.mulf %219, %233 : vector<1x128xf32>
    %240 = arith.addf %238, %239 : vector<1x128xf32>
    %241 = arith.mulf %200, %233 : vector<1x128xf32>
    %242 = arith.mulf %203, %234 : vector<1x128xf32>
    %243 = arith.subf %241, %242 : vector<1x128xf32>
    %244 = arith.mulf %200, %234 : vector<1x128xf32>
    %245 = arith.mulf %203, %233 : vector<1x128xf32>
    %246 = arith.addf %244, %245 : vector<1x128xf32>
    %c0_67 = arith.constant 0 : index
    %247 = memref.load %arg10[%c0_67] : memref<8xf32, #tpu.memory_space<smem>>
    %c1 = arith.constant 1 : index
    %248 = memref.load %arg10[%c1] : memref<8xf32, #tpu.memory_space<smem>>
    %249 = vector.broadcast %247 : f32 to vector<1x128xf32>
    %250 = arith.mulf %249, %172 : vector<1x128xf32>
    %251 = vector.broadcast %248 : f32 to vector<1x128xf32>
    %252 = arith.mulf %251, %243 : vector<1x128xf32>
    %253 = arith.subf %250, %252 : vector<1x128xf32>
    %254 = vector.broadcast %247 : f32 to vector<1x128xf32>
    %255 = arith.mulf %254, %175 : vector<1x128xf32>
    %256 = vector.broadcast %248 : f32 to vector<1x128xf32>
    %257 = arith.mulf %256, %246 : vector<1x128xf32>
    %258 = arith.subf %255, %257 : vector<1x128xf32>
    %259 = vector.broadcast %248 : f32 to vector<1x128xf32>
    %260 = arith.mulf %259, %172 : vector<1x128xf32>
    %261 = vector.broadcast %247 : f32 to vector<1x128xf32>
    %262 = arith.mulf %261, %243 : vector<1x128xf32>
    %263 = arith.addf %260, %262 : vector<1x128xf32>
    %264 = vector.broadcast %248 : f32 to vector<1x128xf32>
    %265 = arith.mulf %264, %175 : vector<1x128xf32>
    %266 = vector.broadcast %247 : f32 to vector<1x128xf32>
    %267 = arith.mulf %266, %246 : vector<1x128xf32>
    %268 = arith.addf %265, %267 : vector<1x128xf32>
    %269 = vector.broadcast %247 : f32 to vector<1x128xf32>
    %270 = arith.mulf %269, %237 : vector<1x128xf32>
    %271 = vector.broadcast %248 : f32 to vector<1x128xf32>
    %272 = arith.mulf %271, %222 : vector<1x128xf32>
    %273 = arith.subf %270, %272 : vector<1x128xf32>
    %274 = vector.broadcast %247 : f32 to vector<1x128xf32>
    %275 = arith.mulf %274, %240 : vector<1x128xf32>
    %276 = vector.broadcast %248 : f32 to vector<1x128xf32>
    %277 = arith.mulf %276, %225 : vector<1x128xf32>
    %278 = arith.subf %275, %277 : vector<1x128xf32>
    %279 = vector.broadcast %248 : f32 to vector<1x128xf32>
    %280 = arith.mulf %279, %237 : vector<1x128xf32>
    %281 = vector.broadcast %247 : f32 to vector<1x128xf32>
    %282 = arith.mulf %281, %222 : vector<1x128xf32>
    %283 = arith.addf %280, %282 : vector<1x128xf32>
    %284 = vector.broadcast %248 : f32 to vector<1x128xf32>
    %285 = arith.mulf %284, %240 : vector<1x128xf32>
    %286 = vector.broadcast %247 : f32 to vector<1x128xf32>
    %287 = arith.mulf %286, %225 : vector<1x128xf32>
    %288 = arith.addf %285, %287 : vector<1x128xf32>
    %c2 = arith.constant 2 : index
    %289 = memref.load %arg10[%c2] : memref<8xf32, #tpu.memory_space<smem>>
    %c3 = arith.constant 3 : index
    %290 = memref.load %arg10[%c3] : memref<8xf32, #tpu.memory_space<smem>>
    %291 = vector.broadcast %289 : f32 to vector<1x128xf32>
    %292 = arith.mulf %291, %253 : vector<1x128xf32>
    %293 = vector.broadcast %290 : f32 to vector<1x128xf32>
    %294 = arith.mulf %293, %273 : vector<1x128xf32>
    %295 = arith.subf %292, %294 : vector<1x128xf32>
    %296 = vector.broadcast %289 : f32 to vector<1x128xf32>
    %297 = arith.mulf %296, %258 : vector<1x128xf32>
    %298 = vector.broadcast %290 : f32 to vector<1x128xf32>
    %299 = arith.mulf %298, %278 : vector<1x128xf32>
    %300 = arith.subf %297, %299 : vector<1x128xf32>
    %301 = vector.broadcast %289 : f32 to vector<1x128xf32>
    %302 = arith.mulf %301, %263 : vector<1x128xf32>
    %303 = vector.broadcast %290 : f32 to vector<1x128xf32>
    %304 = arith.mulf %303, %283 : vector<1x128xf32>
    %305 = arith.subf %302, %304 : vector<1x128xf32>
    %306 = vector.broadcast %289 : f32 to vector<1x128xf32>
    %307 = arith.mulf %306, %268 : vector<1x128xf32>
    %308 = vector.broadcast %290 : f32 to vector<1x128xf32>
    %309 = arith.mulf %308, %288 : vector<1x128xf32>
    %310 = arith.subf %307, %309 : vector<1x128xf32>
    %311 = vector.broadcast %290 : f32 to vector<1x128xf32>
    %312 = arith.mulf %311, %253 : vector<1x128xf32>
    %313 = vector.broadcast %289 : f32 to vector<1x128xf32>
    %314 = arith.mulf %313, %273 : vector<1x128xf32>
    %315 = arith.addf %312, %314 : vector<1x128xf32>
    %316 = vector.broadcast %290 : f32 to vector<1x128xf32>
    %317 = arith.mulf %316, %258 : vector<1x128xf32>
    %318 = vector.broadcast %289 : f32 to vector<1x128xf32>
    %319 = arith.mulf %318, %278 : vector<1x128xf32>
    %320 = arith.addf %317, %319 : vector<1x128xf32>
    %321 = vector.broadcast %290 : f32 to vector<1x128xf32>
    %322 = arith.mulf %321, %263 : vector<1x128xf32>
    %323 = vector.broadcast %289 : f32 to vector<1x128xf32>
    %324 = arith.mulf %323, %283 : vector<1x128xf32>
    %325 = arith.addf %322, %324 : vector<1x128xf32>
    %326 = vector.broadcast %290 : f32 to vector<1x128xf32>
    %327 = arith.mulf %326, %268 : vector<1x128xf32>
    %328 = vector.broadcast %289 : f32 to vector<1x128xf32>
    %329 = arith.mulf %328, %288 : vector<1x128xf32>
    %330 = arith.addf %327, %329 : vector<1x128xf32>
    %c4 = arith.constant 4 : index
    %331 = memref.load %arg10[%c4] : memref<8xf32, #tpu.memory_space<smem>>
    %c5 = arith.constant 5 : index
    %332 = memref.load %arg10[%c5] : memref<8xf32, #tpu.memory_space<smem>>
    %333 = vector.broadcast %331 : f32 to vector<1x128xf32>
    %334 = arith.mulf %333, %295 : vector<1x128xf32>
    %335 = vector.broadcast %332 : f32 to vector<1x128xf32>
    %336 = arith.mulf %335, %325 : vector<1x128xf32>
    %337 = arith.subf %334, %336 : vector<1x128xf32>
    %338 = vector.broadcast %331 : f32 to vector<1x128xf32>
    %339 = arith.mulf %338, %300 : vector<1x128xf32>
    %340 = vector.broadcast %332 : f32 to vector<1x128xf32>
    %341 = arith.mulf %340, %330 : vector<1x128xf32>
    %342 = arith.subf %339, %341 : vector<1x128xf32>
    %343 = vector.broadcast %332 : f32 to vector<1x128xf32>
    %344 = arith.mulf %343, %295 : vector<1x128xf32>
    %345 = vector.broadcast %331 : f32 to vector<1x128xf32>
    %346 = arith.mulf %345, %325 : vector<1x128xf32>
    %347 = arith.addf %344, %346 : vector<1x128xf32>
    %348 = vector.broadcast %332 : f32 to vector<1x128xf32>
    %349 = arith.mulf %348, %300 : vector<1x128xf32>
    %350 = vector.broadcast %331 : f32 to vector<1x128xf32>
    %351 = arith.mulf %350, %330 : vector<1x128xf32>
    %352 = arith.addf %349, %351 : vector<1x128xf32>
    %353 = vector.broadcast %331 : f32 to vector<1x128xf32>
    %354 = arith.mulf %353, %315 : vector<1x128xf32>
    %355 = vector.broadcast %332 : f32 to vector<1x128xf32>
    %356 = arith.mulf %355, %305 : vector<1x128xf32>
    %357 = arith.subf %354, %356 : vector<1x128xf32>
    %358 = vector.broadcast %331 : f32 to vector<1x128xf32>
    %359 = arith.mulf %358, %320 : vector<1x128xf32>
    %360 = vector.broadcast %332 : f32 to vector<1x128xf32>
    %361 = arith.mulf %360, %310 : vector<1x128xf32>
    %362 = arith.subf %359, %361 : vector<1x128xf32>
    %363 = vector.broadcast %332 : f32 to vector<1x128xf32>
    %364 = arith.mulf %363, %315 : vector<1x128xf32>
    %365 = vector.broadcast %331 : f32 to vector<1x128xf32>
    %366 = arith.mulf %365, %305 : vector<1x128xf32>
    %367 = arith.addf %364, %366 : vector<1x128xf32>
    %368 = vector.broadcast %332 : f32 to vector<1x128xf32>
    %369 = arith.mulf %368, %320 : vector<1x128xf32>
    %370 = vector.broadcast %331 : f32 to vector<1x128xf32>
    %371 = arith.mulf %370, %310 : vector<1x128xf32>
    %372 = arith.addf %369, %371 : vector<1x128xf32>
    %c6 = arith.constant 6 : index
    %373 = memref.load %arg10[%c6] : memref<8xf32, #tpu.memory_space<smem>>
    %c7 = arith.constant 7 : index
    %374 = memref.load %arg10[%c7] : memref<8xf32, #tpu.memory_space<smem>>
    %375 = vector.broadcast %373 : f32 to vector<1x128xf32>
    %376 = arith.mulf %375, %337 : vector<1x128xf32>
    %377 = vector.broadcast %374 : f32 to vector<1x128xf32>
    %378 = arith.mulf %377, %357 : vector<1x128xf32>
    %379 = arith.subf %376, %378 : vector<1x128xf32>
    %380 = vector.broadcast %373 : f32 to vector<1x128xf32>
    %381 = arith.mulf %380, %342 : vector<1x128xf32>
    %382 = vector.broadcast %374 : f32 to vector<1x128xf32>
    %383 = arith.mulf %382, %362 : vector<1x128xf32>
    %384 = arith.subf %381, %383 : vector<1x128xf32>
    %385 = vector.broadcast %373 : f32 to vector<1x128xf32>
    %386 = arith.mulf %385, %347 : vector<1x128xf32>
    %387 = vector.broadcast %374 : f32 to vector<1x128xf32>
    %388 = arith.mulf %387, %367 : vector<1x128xf32>
    %389 = arith.subf %386, %388 : vector<1x128xf32>
    %390 = vector.broadcast %373 : f32 to vector<1x128xf32>
    %391 = arith.mulf %390, %352 : vector<1x128xf32>
    %392 = vector.broadcast %374 : f32 to vector<1x128xf32>
    %393 = arith.mulf %392, %372 : vector<1x128xf32>
    %394 = arith.subf %391, %393 : vector<1x128xf32>
    %395 = vector.broadcast %374 : f32 to vector<1x128xf32>
    %396 = arith.mulf %395, %337 : vector<1x128xf32>
    %397 = vector.broadcast %373 : f32 to vector<1x128xf32>
    %398 = arith.mulf %397, %357 : vector<1x128xf32>
    %399 = arith.addf %396, %398 : vector<1x128xf32>
    %400 = vector.broadcast %374 : f32 to vector<1x128xf32>
    %401 = arith.mulf %400, %342 : vector<1x128xf32>
    %402 = vector.broadcast %373 : f32 to vector<1x128xf32>
    %403 = arith.mulf %402, %362 : vector<1x128xf32>
    %404 = arith.addf %401, %403 : vector<1x128xf32>
    %405 = vector.broadcast %374 : f32 to vector<1x128xf32>
    %406 = arith.mulf %405, %347 : vector<1x128xf32>
    %407 = vector.broadcast %373 : f32 to vector<1x128xf32>
    %408 = arith.mulf %407, %367 : vector<1x128xf32>
    %409 = arith.addf %406, %408 : vector<1x128xf32>
    %410 = vector.broadcast %374 : f32 to vector<1x128xf32>
    %411 = arith.mulf %410, %352 : vector<1x128xf32>
    %412 = vector.broadcast %373 : f32 to vector<1x128xf32>
    %413 = arith.mulf %412, %372 : vector<1x128xf32>
    %414 = arith.addf %411, %413 : vector<1x128xf32>
    %415 = arith.mulf %379, %379 : vector<1x128xf32>
    %416 = arith.mulf %384, %384 : vector<1x128xf32>
    %417 = arith.addf %415, %416 : vector<1x128xf32>
    %418 = arith.mulf %389, %389 : vector<1x128xf32>
    %419 = arith.mulf %394, %394 : vector<1x128xf32>
    %420 = arith.addf %418, %419 : vector<1x128xf32>
    %421 = arith.subf %417, %420 : vector<1x128xf32>
    %422 = arith.mulf %399, %399 : vector<1x128xf32>
    %423 = arith.mulf %404, %404 : vector<1x128xf32>
    %424 = arith.addf %422, %423 : vector<1x128xf32>
    %425 = arith.subf %421, %424 : vector<1x128xf32>
    %426 = arith.mulf %409, %409 : vector<1x128xf32>
    %427 = arith.mulf %414, %414 : vector<1x128xf32>
    %428 = arith.addf %426, %427 : vector<1x128xf32>
    %429 = arith.addf %425, %428 : vector<1x128xf32>
    %c0_68 = arith.constant 0 : index
    %430 = memref.load %arg11[%c0_68] : memref<2xf32, #tpu.memory_space<smem>>
    %431 = vector.broadcast %430 : f32 to vector<1x128xf32>
    %432 = arith.mulf %429, %431 : vector<1x128xf32>
    %c1_69 = arith.constant 1 : index
    %433 = memref.load %arg11[%c1_69] : memref<2xf32, #tpu.memory_space<smem>>
    %434 = vector.broadcast %433 : f32 to vector<1x128xf32>
    %435 = arith.addf %432, %434 : vector<1x128xf32>
    %c0_70 = arith.constant 0 : index
    %c0_71 = arith.constant 0 : index
    %436 = vector.load %arg12[%c0_70, %c0_71] : memref<2x128xf32, #tpu.memory_space<vmem>>, vector<1x128xf32>
    tpu.vector_store %arg12[%c0_70, %c0_71], %435 {strides = array<i32>} : memref<2x128xf32, #tpu.memory_space<vmem>>, vector<1x128xf32>,
    %cst_72 = arith.constant 1.000000e+00 : f32
    %437 = vector.broadcast %cst_72 : f32 to vector<1x128xf32>
    %438 = arith.subf %437, %435 : vector<1x128xf32>
    %c1_73 = arith.constant 1 : index
    %c0_74 = arith.constant 0 : index
    %439 = vector.load %arg12[%c1_73, %c0_74] : memref<2x128xf32, #tpu.memory_space<vmem>>, vector<1x128xf32>
    tpu.vector_store %arg12[%c1_73, %c0_74], %438 {strides = array<i32>} : memref<2x128xf32, #tpu.memory_space<vmem>>, vector<1x128xf32>,
    return
  }
  func.func @transform_0(%arg0: i32) -> (i32, i32) {
    %c0_i32 = arith.constant 0 : i32
    %c0_i32_0 = arith.constant 0 : i32
    return %c0_i32, %arg0 : i32, i32
  }
  func.func @transform_1(%arg0: i32) -> (i32, i32) {
    %c0_i32 = arith.constant 0 : i32
    %c0_i32_0 = arith.constant 0 : i32
    %c0_i32_1 = arith.constant 0 : i32
    return %c0_i32, %c0_i32_0 : i32, i32
  }
  func.func @transform_2(%arg0: i32) -> (i32, i32) {
    %c0_i32 = arith.constant 0 : i32
    %c0_i32_0 = arith.constant 0 : i32
    %c0_i32_1 = arith.constant 0 : i32
    return %c0_i32, %c0_i32_0 : i32, i32
  }
  func.func @transform_3(%arg0: i32) -> (i32, i32) {
    %c0_i32 = arith.constant 0 : i32
    %c0_i32_0 = arith.constant 0 : i32
    %c0_i32_1 = arith.constant 0 : i32
    return %c0_i32, %c0_i32_0 : i32, i32
  }
  func.func @transform_4(%arg0: i32) -> (i32, i32) {
    %c0_i32 = arith.constant 0 : i32
    %c0_i32_0 = arith.constant 0 : i32
    %c0_i32_1 = arith.constant 0 : i32
    return %c0_i32, %c0_i32_0 : i32, i32
  }
  func.func @transform_5(%arg0: i32) -> (i32, i32) {
    %c0_i32 = arith.constant 0 : i32
    %c0_i32_0 = arith.constant 0 : i32
    %c0_i32_1 = arith.constant 0 : i32
    return %c0_i32, %c0_i32_0 : i32, i32
  }
  func.func @transform_6(%arg0: i32) -> (i32, i32) {
    %c0_i32 = arith.constant 0 : i32
    %c0_i32_0 = arith.constant 0 : i32
    %c0_i32_1 = arith.constant 0 : i32
    return %c0_i32, %c0_i32_0 : i32, i32
  }
  func.func @transform_7(%arg0: i32) -> (i32, i32) {
    %c0_i32 = arith.constant 0 : i32
    %c0_i32_0 = arith.constant 0 : i32
    %c0_i32_1 = arith.constant 0 : i32
    return %c0_i32, %c0_i32_0 : i32, i32
  }
  func.func @transform_8(%arg0: i32) -> (i32, i32) {
    %c0_i32 = arith.constant 0 : i32
    %c0_i32_0 = arith.constant 0 : i32
    %c0_i32_1 = arith.constant 0 : i32
    return %c0_i32, %c0_i32_0 : i32, i32
  }
  func.func @transform_9(%arg0: i32) -> i32 {
    %c0_i32 = arith.constant 0 : i32
    %c0_i32_0 = arith.constant 0 : i32
    return %c0_i32 : i32
  }
  func.func @transform_10(%arg0: i32) -> i32 {
    %c0_i32 = arith.constant 0 : i32
    %c0_i32_0 = arith.constant 0 : i32
    return %c0_i32 : i32
  }
  func.func @transform_11(%arg0: i32) -> (i32, i32) {
    %c0_i32 = arith.constant 0 : i32
    %c0_i32_0 = arith.constant 0 : i32
    return %c0_i32, %arg0 : i32, i32
  }
}

</mosaic_0001>

<bundles_post_ra>
// kernel: squeeze.1
= control target key start
LH: loop header
LB: loop body
LE: loop exit
PB: predicated region body
PF: predicated region fallthrough
CT: control target
= control target key end

     0   :  { %vm5_vm0 = vcmask 1041409   ;;  %vm21_vm1 = vcmask 31744   ;;  %vm65_vm2 = vcmask 97280   ;;  %vm43_vm3 = vcmask 64512   ;;  %s514_s24 = smov 124   ;;  %s515_s6 = smov 116   ;;  %s822_s0 = inlined_call_operand.vmem [shape: f32[2,28,28], index: 0, kind: input, shape index: {}]   ;;  %s823_s1 = inlined_call_operand.vmem [shape: f32[2,784], index: 1, kind: output, shape index: {}]  }
   0x1   :  { %v415_v0 = vld [vmem:[%s822_s0 + $0x9] sm:$0x1]   ;;  %v423_v6 = vld [vmem:[%s822_s0 + $0x1b] sm:$0x1]   ;;  %v419_v12 = vld [vmem:[%s822_s0 + $0x12] sm:$0x1]  }
   0x2   :  { %v416_v1 = vld [vmem:[%s822_s0 + $0x28] sm:$0x2]   ;;  %v424_v7 = vld [vmem:[%s822_s0 + $0x3a] sm:$0x2]   ;;  %v420_v14 = vld [vmem:[%s822_s0 + $0x31] sm:$0x2]  }
   0x3   :  { %v14_v2 = vsel %vm5_vm0, %v416_v1, %v415_v0  ;;  %v417_v3 = vld [vmem:[%s822_s0 + $0x9] sm:$0x1]   ;;  %v425_v8 = vld [vmem:[%s822_s0 + $0x1b] sm:$0x1]   ;;  %v58_v10 = vsel %vm5_vm0, %v424_v7, %v423_v6  ;;  %v421_v15 = vld [vmem:[%s822_s0 + $0x12] sm:$0x1]   ;;  %v36_v18 = vsel %vm5_vm0, %v420_v14, %v419_v12 }
   0x4   :  { %v418_v4 = vld [vmem:[%s822_s0 + $0x28] sm:$0x2]   ;;  %v426_v11 = vld [vmem:[%s822_s0 + $0x3a] sm:$0x2]   ;;  %v422_v16 = vld [vmem:[%s822_s0 + $0x31] sm:$0x2]  }
   0x5   :  { %v20_v5 = vsel %vm5_vm0, %v418_v4, %v417_v3  ;;  %v64_v13 = vsel %vm5_vm0, %v426_v11, %v425_v8  ;;  %v42_v19 = vsel %vm5_vm0, %v422_v16, %v421_v15  ;;  %vm69_vm4 = vcmask 130048   ;;  %v427_v20 = vld [vmem:[%s822_s0 + $0x4] sm:$0x1]   ;;  %v431_v27 = vld [vmem:[%s822_s0 + $0xd] sm:$0x1]   ;;  %s516_s17 = smov 120  }
   0x6   :  { %v22_v9 = vsel %vm21_vm1, %v20_v5, %v14_v2  ;;  %v66_v17 = vsel %vm65_vm2, %v64_v13, %v58_v10  ;;  %v428_v21 = vld [vmem:[%s822_s0 + $0x23] sm:$0x2]   ;;  %v44_v22 = vsel %vm43_vm3, %v42_v19, %v36_v18  ;;  %vm47_vm5 = vcmask 162816   ;;  %v432_v28 = vld [vmem:[%s822_s0 + $0x2c] sm:$0x2]   ;;  %s517_s28 = smov 112  }
   0x7   :  { %23 = vrot.lane.b32.xlu0 %v22_v9, %s514_s24  ;;  %67 = vrot.lane.b32.xlu1 %v66_v17, %s515_s6  ;;  %v80_v23 = vsel %vm5_vm0, %v428_v21, %v427_v20  ;;  %v429_v24 = vld [vmem:[%s822_s0 + $0x4] sm:$0x1]   ;;  %v433_v29 = vld [vmem:[%s822_s0 + $0xd] sm:$0x1]   ;;  %v101_v31 = vsel %vm5_vm0, %v432_v28, %v431_v27  ;;  %vm25_vm6 = vcmask 195584   ;;  %s518_s4 = smov 108  }
   0x8   :  { %v430_v25 = vld [vmem:[%s822_s0 + $0x23] sm:$0x2]   ;;  %v434_v32 = vld [vmem:[%s822_s0 + $0x2c] sm:$0x2]   ;;  %v435_v33 = vld [vmem:[%s822_s0 + $0x16] sm:$0x1]  }
   0x9   :  { %v86_v26 = vsel %vm5_vm0, %v430_v25, %v429_v24  ;;  %v107_v34 = vsel %vm5_vm0, %v434_v32, %v433_v29  ;;  %v436_v35 = vld [vmem:[%s822_s0 + $0x35] sm:$0x2]   ;;  %v439_v41 = vld [vmem:[%s822_s0 + $0x8] sm:$0x1]   ;;  %v441_v44 = vld [vmem:[%s822_s0 + $0x11] sm:$0x1]  }
   0xa   :  { %v88_v30 = vsel %vm69_vm4, %v86_v26, %v80_v23  ;;  %v437_v36 = vld [vmem:[%s822_s0 + $0x16] sm:$0x1]   ;;  %v109_v38 = vsel %vm47_vm5, %v107_v34, %v101_v31  ;;  %v123_v39 = vsel %vm5_vm0, %v436_v35, %v435_v33  ;;  %v440_v42 = vld [vmem:[%s822_s0 + $0x27] sm:$0x2]   ;;  %v442_v45 = vld [vmem:[%s822_s0 + $0x30] sm:$0x2]  }
   0xb   :  { %45 = vrot.lane.b32.xlu0 %v44_v22, %s516_s17  ;;  %v438_v37 = vld [vmem:[%s822_s0 + $0x35] sm:$0x2]   ;;  %89 = vrot.lane.b32.xlu1 %v88_v30, %s517_s28  ;;  %v145_v46 = vsel %vm5_vm0, %v440_v42, %v439_v41  ;;  %s519_s9 = smov 104   ;;  %v443_v47 = vld [vmem:[%s822_s0 + $0x1a] sm:$0x1]   ;;  %v156_v49 = vsel %vm5_vm0, %v442_v45, %v441_v44  ;;  %s520_s14 = smov 96  }
   0xc   :  { %v129_v40 = vsel %vm5_vm0, %v438_v37, %v437_v36  ;;  %v444_v48 = vld [vmem:[%s822_s0 + $0x39] sm:$0x2]   ;;  %v445_v50 = vld [vmem:[%s822_s0 + $0x3] sm:$0x1]   ;;  %s521_s19 = smov 92   ;;  %s522_s24 = smov 88  }
   0xd   :  { %v131_v43 = vsel %vm25_vm6, %v129_v40, %v123_v39  ;;  %v446_v51 = vld [vmem:[%s822_s0 + $0x22] sm:$0x2]   ;;  %v167_v52 = vsel %vm5_vm0, %v444_v48, %v443_v47  ;;  %v447_v53 = vld [vmem:[%s822_s0 + $0xc] sm:$0x1]   ;;  %v449_v56 = vld [vmem:[%s822_s0 + $0x15] sm:$0x1]  }
   0xe   :  { %v448_v54 = vld [vmem:[%s822_s0 + $0x2b] sm:$0x2]   ;;  %v178_v55 = vsel %vm5_vm0, %v446_v51, %v445_v50  ;;  %v450_v57 = vld [vmem:[%s822_s0 + $0x34] sm:$0x2]   ;;  %s523_s29 = smov 84   ;;  %s524_s5 = smov 80  }
   0xf   :  { %110 = vrot.lane.b32.xlu0 %v109_v38, %s518_s4  ;;  %132 = vrot.lane.b32.xlu1 %v131_v43, %s519_s9  ;;  %v188_v58 = vsel %vm5_vm0, %v448_v54, %v447_v53  ;;  %v451_v59 = vld [vmem:[%s822_s0 + $0x7] sm:$0x1]   ;;  %v199_v61 = vsel %vm5_vm0, %v450_v57, %v449_v56  ;;  %v453_v62 = vld [vmem:[%s822_s0 + $0x10] sm:$0x1]   ;;  %s525_s10 = smov 76   ;;  %s526_s17 = smov 68  }
  0x10   :  { %v452_v60 = vld [vmem:[%s822_s0 + $0x26] sm:$0x2]   ;;  %v454_v63 = vld [vmem:[%s822_s0 + $0x2f] sm:$0x2]   ;;  %v455_v1 = vld [vmem:[%s822_s0 + $0x19] sm:$0x1]  }
  0x11   :  { %v210_v0 = vsel %vm5_vm0, %v452_v60, %v451_v59  ;;  %v456_v2 = vld [vmem:[%s822_s0 + $0x38] sm:$0x2]   ;;  %v221_v3 = vsel %vm5_vm0, %v454_v63, %v453_v62  ;;  %v457_v4 = vld [vmem:[%s822_s0 + $0x2] sm:$0x1]   ;;  %vm7_vm7 = vcmask 228352   ;;  %s531_s15 = smov 48  }
  0x12   :  { %v458_v5 = vld [vmem:[%s822_s0 + $0x21] sm:$0x2]   ;;  %v2_v6 = vld [vmem:[%s822_s0] sm:$0x1]   ;;  %v232_v7 = vsel %vm5_vm0, %v456_v2, %v455_v1  ;;  %v459_v9 = vld [vmem:[%s822_s0 + $0xb] sm:$0x1]  }
  0x13   :  { %146 = vrot.lane.b32.xlu0 %v145_v46, %s520_s14  ;;  %157 = vrot.lane.b32.xlu1 %v156_v49, %s521_s19  ;;  %v414_v8 = vld [vmem:[%s822_s0 + $0x1f] sm:$0x2]   ;;  %v460_v10 = vld [vmem:[%s822_s0 + $0x2a] sm:$0x2]   ;;  %v243_v12 = vsel %vm5_vm0, %v458_v5, %v457_v4  ;;  %s532_s20 = smov 40   ;;  %s533_s25 = smov 36  }
  0x14   :  { %v6_v11 = vsel %vm5_vm0, %v414_v8, %v2_v6  ;;  %v461_v13 = vld [vmem:[%s822_s0 + $0x14] sm:$0x1]   ;;  %v253_v15 = vsel %vm5_vm0, %v460_v10, %v459_v9  ;;  %v463_v16 = vld [vmem:[%s822_s0 + $0x6] sm:$0x1]   ;;  %v465_v19 = vld [vmem:[%s822_s0 + $0xf] sm:$0x1]  }
  0x15   :  { %8 = vst.msk [vmem:[#allocation0] sm:$0x3] %vm7_vm7, %v6_v11   ;;  %v462_v14 = vld [vmem:[%s822_s0 + $0x33] sm:$0x2]   ;;  %v464_v17 = vld [vmem:[%s822_s0 + $0x25] sm:$0x2]  }
  0x16   :  { %v264_v18 = vsel %vm5_vm0, %v462_v14, %v461_v13  ;;  %v466_v20 = vld [vmem:[%s822_s0 + $0x2e] sm:$0x2]   ;;  %v275_v21 = vsel %vm5_vm0, %v464_v17, %v463_v16  ;;  %v467_v22 = vld [vmem:[%s822_s0 + $0x18] sm:$0x1]   ;;  %v469_v25 = vld [vmem:[%s822_s0 + $0x1] sm:$0x1]  }
  0x17   :  { %168 = vrot.lane.b32.xlu0 %v167_v52, %s522_s24  ;;  %179 = vrot.lane.b32.xlu1 %v178_v55, %s523_s29  ;;  %s527_s24 = smov 64   ;;  %s528_s29 = smov 60   ;;  %v468_v23 = vld [vmem:[%s822_s0 + $0x37] sm:$0x2]   ;;  %v286_v24 = vsel %vm5_vm0, %v466_v20, %v465_v19  ;;  %v470_v26 = vld [vmem:[%s822_s0 + $0x20] sm:$0x2]  }
  0x18   :  { %v297_v27 = vsel %vm5_vm0, %v468_v23, %v467_v22  ;;  %v471_v28 = vld [vmem:[%s822_s0 + $0xa] sm:$0x1]   ;;  %v308_v30 = vsel %vm5_vm0, %v470_v26, %v469_v25  ;;  %s534_s30 = smov 32   ;;  %v473_v31 = vld [vmem:[%s822_s0 + $0x13] sm:$0x1]   ;;  %s535_s6 = smov 28  }
  0x19   :  { %v472_v29 = vld [vmem:[%s822_s0 + $0x29] sm:$0x2]   ;;  %v474_v32 = vld [vmem:[%s822_s0 + $0x32] sm:$0x2]   ;;  %v475_v34 = vld [vmem:[%s822_s0 + $0x5] sm:$0x1]  }
  0x1a   :  { %v318_v33 = vsel %vm5_vm0, %v472_v29, %v471_v28  ;;  %v476_v35 = vld [vmem:[%s822_s0 + $0x24] sm:$0x2]   ;;  %v329_v36 = vsel %vm5_vm0, %v474_v32, %v473_v31  ;;  %s536_s11 = smov 24   ;;  %v477_v37 = vld [vmem:[%s822_s0 + $0xe] sm:$0x1]   ;;  %s537_s16 = smov 20  }
  0x1b   :  { %189 = vrot.lane.b32.xlu0 %v188_v58, %s524_s5  ;;  %200 = vrot.lane.b32.xlu1 %v199_v61, %s525_s10  ;;  %s529_s5 = smov 56   ;;  %s530_s10 = smov 52   ;;  %v478_v38 = vld [vmem:[%s822_s0 + $0x2d] sm:$0x2]   ;;  %v340_v39 = vsel %vm5_vm0, %v476_v35, %v475_v34  ;;  %v479_v40 = vld [vmem:[%s822_s0 + $0x17] sm:$0x1]  }
  0x1c   :  { %v480_v41 = vld [vmem:[%s822_s0 + $0x36] sm:$0x2]   ;;  %v351_v42 = vsel %vm5_vm0, %v478_v38, %v477_v37  ;;  %s538_s0 = smov 12   ;;  %s539_s21 = smov 8   ;;  %vm28_vm8 = vcmask 1048544   ;;  %vm72_vm9 = vcmask 1048480  }
  0x1d   :  { %v362_v43 = vsel %vm5_vm0, %v480_v41, %v479_v40  ;;  %s540_s22 = smov 4   ;;  %vm50_vm10 = vcmask 1048512   ;;  %vm94_vm11 = vcmask 1048448   ;;  %vm115_vm12 = vcmask 1048416  }
  0x1e   :  { %vm137_vm13 = vcmask 1048384   ;;  %vm148_vm14 = vcmask 1015552   ;;  %vm159_vm15 = vcmask 982752   ;;  %vm170_vm0 = vcmask 949952  }
  0x1f   :  { %211 = vrot.lane.b32.xlu0 %v210_v0, %s526_s17  ;;  %222 = vrot.lane.b32.xlu1 %v221_v3, %s527_s24  ;;  %vm246_vm7 = vcmask 687552  }
  0x23   :  { %233 = vrot.lane.b32.xlu0 %v232_v7, %s528_s29  ;;  %244 = vrot.lane.b32.xlu1 %v243_v12, %s529_s5 }
  0x27   :  { %254 = vrot.lane.b32.xlu0 %v253_v15, %s530_s10  ;;  %265 = vrot.lane.b32.xlu1 %v264_v18, %s531_s15 }
  0x2b   :  { %276 = vrot.lane.b32.xlu0 %v275_v21, %s532_s20  ;;  %287 = vrot.lane.b32.xlu1 %v286_v24, %s533_s25 }
  0x2f   :  { %298 = vrot.lane.b32.xlu0 %v297_v27, %s534_s30  ;;  %309 = vrot.lane.b32.xlu1 %v308_v30, %s535_s6 }
  0x33   :  { %319 = vrot.lane.b32.xlu0 %v318_v33, %s536_s11  ;;  %330 = vrot.lane.b32.xlu1 %v329_v36, %s537_s16 }
  0x37   :  { %341 = vrot.lane.b32.xlu0 %v340_v39, %s538_s0  ;;  %352 = vrot.lane.b32.xlu1 %v351_v42, %s539_s21 }
  0x3b   :  { %363 = vrot.lane.b32.xlu0 %v362_v43, %s540_s22 }
  0x79   :  { %v24_v44 = vpop.permute.xlu0 %23   ;;  %v68_v45 = vpop.permute.xlu1 %67  }
  0x7a   :  { %27 = vst.msk [vmem:[#allocation0 + $0x10] sm:$0x3] %vm25_vm6, %v24_v44   ;;  %vm235_vm6 = vcmask 720352  }
  0x7b   :  { %30 = vst.msk [vmem:[#allocation0 + $0x8] sm:$0x3] %vm28_vm8, %v24_v44   ;;  %vm256_vm8 = vcmask 654752  }
  0x7c   :  { %71 = vst.msk [vmem:[#allocation0 + $0x30] sm:$0x3] %vm69_vm4, %v68_v45   ;;  %vm213_vm4 = vcmask 785952  }
  0x7d   :  { %74 = vst.msk [vmem:[#allocation0 + $0x28] sm:$0x3] %vm72_vm9, %v68_v45   ;;  %v46_v46 = vpop.permute.xlu0 %45   ;;  %v90_v47 = vpop.permute.xlu1 %89   ;;  %vm267_vm9 = vcmask 621952  }
  0x7e   :  { %49 = vst.msk [vmem:[#allocation0 + $0x20] sm:$0x3] %vm47_vm5, %v46_v46   ;;  %vm224_vm5 = vcmask 753152  }
  0x7f   :  { %52 = vst.msk [vmem:[#allocation0 + $0x18] sm:$0x3] %vm50_vm10, %v46_v46   ;;  %vm278_vm10 = vcmask 556352  }
  0x80   :  { %93 = vst.msk [vmem:[#allocation0 + $0x8] sm:$0x3] %vm65_vm2, %v90_v47   ;;  %vm191_vm2 = vcmask 884352  }
  0x81   :  { %95 = vst.msk [vmem:[#allocation0] sm:$0x3] %vm94_vm11, %v90_v47   ;;  %v111_v48 = vpop.permute.xlu0 %110   ;;  %v133_v50 = vpop.permute.xlu1 %132   ;;  %vm289_vm11 = vcmask 523552  }
  0x82   :  { %114 = vst.msk [vmem:[#allocation0 + $0x18] sm:$0x3] %vm43_vm3, %v111_v48   ;;  %vm202_vm3 = vcmask 851552  }
  0x83   :  { %117 = vst.msk [vmem:[#allocation0 + $0x10] sm:$0x3] %vm115_vm12, %v111_v48   ;;  %v404_v49 = vld [vmem:[#allocation0 + $0x30] sm:$0x3]  ;;  %vm300_vm12 = vcmask 490752  }
  0x84   :  { %486 = vst [vmem:[%s823_s1 + $0xc] sm:$0x3] %v404_v49  ;;  %136 = vst.msk [vmem:[#allocation0 + $0x28] sm:$0x3] %vm21_vm1, %v133_v50   ;;  %vm181_vm1 = vcmask 917152  }
  0x85   :  { %139 = vst.msk [vmem:[#allocation0 + $0x20] sm:$0x3] %vm137_vm13, %v133_v50   ;;  %v147_v51 = vpop.permute.xlu0 %146   ;;  %v158_v52 = vpop.permute.xlu1 %157   ;;  %vm311_vm13 = vcmask 457952  }
  0x86   :  { %150 = vst.msk [vmem:[#allocation0 + $0x8] sm:$0x3] %vm148_vm14, %v147_v51   ;;  %vm321_vm14 = vcmask 425152  }
  0x87   :  { %161 = vst.msk [vmem:[#allocation0 + $0x18] sm:$0x3] %vm159_vm15, %v158_v52   ;;  %vm332_vm15 = vcmask 392352  }
  0x89   :  { %v169_v53 = vpop.permute.xlu0 %168   ;;  %v180_v54 = vpop.permute.xlu1 %179  }
  0x8a   :  { %172 = vst.msk [vmem:[#allocation0 + $0x28] sm:$0x3] %vm170_vm0, %v169_v53   ;;  %vm343_vm0 = vcmask 326752  }
  0x8b   :  { %182 = vst.msk [vmem:[#allocation0] sm:$0x3] %vm181_vm1, %v180_v54   ;;  %vm354_vm1 = vcmask 293952  }
  0x8d   :  { %v190_v55 = vpop.permute.xlu0 %189   ;;  %v201_v56 = vpop.permute.xlu1 %200  }
  0x8e   :  { %193 = vst.msk [vmem:[#allocation0 + $0x10] sm:$0x3] %vm191_vm2, %v190_v55   ;;  %vm365_vm2 = vcmask 261152  }
  0x8f   :  { %204 = vst.msk [vmem:[#allocation0 + $0x20] sm:$0x3] %vm202_vm3, %v201_v56  }
  0x91   :  { %v212_v57 = vpop.permute.xlu0 %211   ;;  %v223_v58 = vpop.permute.xlu1 %222  }
  0x92   :  { %215 = vst.msk [vmem:[#allocation0 + $0x8] sm:$0x3] %vm213_vm4, %v212_v57  }
  0x93   :  { %226 = vst.msk [vmem:[#allocation0 + $0x18] sm:$0x3] %vm224_vm5, %v223_v58  }
  0x95   :  { %v234_v59 = vpop.permute.xlu0 %233   ;;  %v245_v60 = vpop.permute.xlu1 %244  }
  0x96   :  { %237 = vst.msk [vmem:[#allocation0 + $0x28] sm:$0x3] %vm235_vm6, %v234_v59  }
  0x97   :  { %247 = vst.msk [vmem:[#allocation0] sm:$0x3] %vm246_vm7, %v245_v60  }
  0x99   :  { %v255_v61 = vpop.permute.xlu0 %254   ;;  %v266_v62 = vpop.permute.xlu1 %265  }
  0x9a   :  { %258 = vst.msk [vmem:[#allocation0 + $0x10] sm:$0x3] %vm256_vm8, %v255_v61  }
  0x9b   :  { %269 = vst.msk [vmem:[#allocation0 + $0x20] sm:$0x3] %vm267_vm9, %v266_v62  }
  0x9d   :  { %v277_v63 = vpop.permute.xlu0 %276   ;;  %v288_v0 = vpop.permute.xlu1 %287  }
  0x9e   :  { %280 = vst.msk [vmem:[#allocation0 + $0x8] sm:$0x3] %vm278_vm10, %v277_v63  }
  0x9f   :  { %291 = vst.msk [vmem:[#allocation0 + $0x18] sm:$0x3] %vm289_vm11, %v288_v0  }
  0xa1   :  { %v299_v1 = vpop.permute.xlu0 %298   ;;  %v310_v2 = vpop.permute.xlu1 %309  }
  0xa2   :  { %302 = vst.msk [vmem:[#allocation0 + $0x28] sm:$0x3] %vm300_vm12, %v299_v1  }
  0xa3   :  { %312 = vst.msk [vmem:[#allocation0] sm:$0x3] %vm311_vm13, %v310_v2  }
  0xa5   :  { %v320_v3 = vpop.permute.xlu0 %319   ;;  %v331_v4 = vpop.permute.xlu1 %330  }
  0xa6   :  { %323 = vst.msk [vmem:[#allocation0 + $0x10] sm:$0x3] %vm321_vm14, %v320_v3  }
  0xa7   :  { %334 = vst.msk [vmem:[#allocation0 + $0x20] sm:$0x3] %vm332_vm15, %v331_v4  }
  0xa9   :  { %v342_v5 = vpop.permute.xlu0 %341   ;;  %v353_v7 = vpop.permute.xlu1 %352  }
  0xaa   :  { %345 = vst.msk [vmem:[#allocation0 + $0x8] sm:$0x3] %vm343_vm0, %v342_v5   ;;  %v371_v6 = vld [vmem:[#allocation0] sm:$0x3] }
  0xab   :  { %373 = vst [vmem:[%s823_s1] sm:$0x3] %v371_v6  ;;  %356 = vst.msk [vmem:[#allocation0 + $0x18] sm:$0x3] %vm354_vm1, %v353_v7  }
  0xad   :  { %v380_v8 = vld [vmem:[#allocation0 + $0x10] sm:$0x3]  ;;  %v364_v9 = vpop.permute.xlu0 %363  }
  0xae   :  { %482 = vst [vmem:[%s823_s1 + $0x4] sm:$0x3] %v380_v8  ;;  %367 = vst.msk [vmem:[#allocation0 + $0x28] sm:$0x3] %vm365_vm2, %v364_v9   ;;  %v392_v10 = vld [vmem:[#allocation0 + $0x20] sm:$0x3] }
  0xaf   :  { %484 = vst [vmem:[%s823_s1 + $0x8] sm:$0x3] %v392_v10 }
  0xb1   :  { %v375_v11 = vld [vmem:[#allocation0 + $0x8] sm:$0x3] }
  0xb2   :  { %481 = vst [vmem:[%s823_s1 + $0x2] sm:$0x3] %v375_v11  ;;  %v386_v12 = vld [vmem:[#allocation0 + $0x18] sm:$0x3] }
  0xb3   :  { %483 = vst [vmem:[%s823_s1 + $0x6] sm:$0x3] %v386_v12 }
  0xb5   :  { %v398_v13 = vld [vmem:[#allocation0 + $0x28] sm:$0x3] }
  0xb6   :  { %485 = vst [vmem:[%s823_s1 + $0xa] sm:$0x3] %v398_v13 }

// kernel: hybrid_qnn_forward.1
= control target key start
LH: loop header
LB: loop body
LE: loop exit
PB: predicated region body
PF: predicated region fallthrough
CT: control target
= control target key end

     0   :  { %16 = vsyncpa [#allocation3], 0  ;;  %s17920_s0 = inlined_call_operand.vmem [shape: f32[784,128], index: 0, kind: input, shape index: {}]   ;;  %s17921_s1 = inlined_call_operand.vmem [shape: f32[1152,784], index: 1, kind: input, shape index: {}]   ;;  %s17922_s2 = inlined_call_operand.vmem [shape: f32[288,1], index: 2, kind: input, shape index: {}]   ;;  %s17923_s3 = inlined_call_operand.vmem [shape: f32[1024,288], index: 3, kind: input, shape index: {}]   ;;  %s17924_s4 = inlined_call_operand.vmem [shape: f32[256,1], index: 4, kind: input, shape index: {}]   ;;  %s17925_s5 = inlined_call_operand.vmem [shape: f32[64,256], index: 5, kind: input, shape index: {}]   ;;  %s17926_s6 = inlined_call_operand.vmem [shape: f32[64,1], index: 6, kind: input, shape index: {}]   ;;  %s17927_s7 = inlined_call_operand.vmem [shape: f32[2,64], index: 7, kind: input, shape index: {}]   ;;  %s17928_s8 = inlined_call_operand.vmem [shape: f32[2,1], index: 8, kind: input, shape index: {}]   ;;  %s17929_s9 = inlined_call_operand.vmem [shape: f32[8], index: 9, kind: input, shape index: {}]   ;;  %s17930_s10 = inlined_call_operand.vmem [shape: f32[2], index: 10, kind: input, shape index: {}]   ;;  %s17931_s11 = inlined_call_operand.vmem [shape: f32[2,128], index: 11, kind: output, shape index: {}]  }
   0x1   :  { %s42_s19 = sshll.u32 %s17929_s9, 4  ;;  %s43_s19 = int_to_ptr.vmem [resolvable:$true] %s42_s19 }
   0x2   :  { %17 = vsyncpa [#allocation5], 0  ;;  %s52_s22 = sshll.u32 %s17930_s10, 4  ;;  %s10482_s23 = scalar_lea.vmem %s43_s19, 16  ;;  %s53_s22 = int_to_ptr.vmem [resolvable:$true] %s52_s22 }
   0x3   :  { %p10483_p0 = scmp.ne.s32.totalorder %s43_s19, %s10482_s23  ;;  %p10487_p1 = scmp.lt.s32.totalorder %s43_s19, %s43_s19 }
   0x4   :  { %p10488_p2 = scmp.lt.s32.totalorder %s10482_s23, %s10482_s23 }
   0x6   :  { %p10489_p3 = por %p10488_p2, %p10487_p1 }
   0x8   :  { %p10490_p4 = pnand %p10489_p3, %p10483_p0 }
   0xa   :  { %10493 = shalt.err (!%p10490_p4)
}
   0xb   :  { %s10510_s24 = smov [#allocation2]   ;;  %s10494_s25 = scalar_lea.vmem %s53_s22, 16 }
   0xc   :  { %45 = dma.vmem_to_smem %s43_s19, 16, %s10510_s24, [#allocation3]  }
   0xd   :  { %p10495_p5 = scmp.ne.s32.totalorder %s53_s22, %s10494_s25  ;;  %p10499_p6 = scmp.lt.s32.totalorder %s53_s22, %s53_s22 }
   0xe   :  { %p10500_p7 = scmp.lt.s32.totalorder %s10494_s25, %s10494_s25 }
  0x10   :  { %p10501_p8 = por %p10500_p7, %p10499_p6 }
  0x12   :  { %p10502_p9 = pnand %p10501_p8, %p10495_p5 }
  0x14   :  { %10505 = shalt.err (!%p10502_p9)
}
  0x15   :  { %s10511_s9 = smov [#allocation4]  }
  0x16   :  { %55 = dma.vmem_to_smem %s53_s22, 16, %s10511_s9, [#allocation5]  }
  0x17   :  { %10506 = dma.done.wait [#allocation3], 16  }
  0x18   :  { %10507 = vsyncadd [#allocation3], 4294967280 }
  0x19   :  { %10508 = dma.done.wait [#allocation5], 16  }
  0x1a   :  { %10509 = vsyncadd [#allocation5], 4294967280 }
  0x1b   :  { %62 = sfence }
  0x1c   :  { %v1071_v0 = vld [vmem:[%s17920_s0] sm:$0xff]  ;;  %v1072_v1 = vld [vmem:[%s17920_s0 + $0x8] sm:$0xff]  ;;  %v1073_v2 = vld [vmem:[%s17920_s0 + $0x10] sm:$0xff]  ;;  %v17932_v3 = vmov 0.0|0.0   ;;  %vm1169_vm0 = vcmask 130048   ;;  %vm5522_vm1 = vcmask 261120  }
  0x1d   :  { %9691 = vmatprep.subr.bf16.mxu0 %v17932_v3  ;;  %v9692_v4 = vpack.c.bf16 %v1072_v1, %v1071_v0  ;;  %v1074_v5 = vld [vmem:[%s17920_s0 + $0x18] sm:$0xff]  ;;  %9939 = vmatprep.subr.bf16.mxu1 %v17932_v3  ;;  %v1075_v7 = vld [vmem:[%s17920_s0 + $0x20] sm:$0xff]  ;;  %v1076_v8 = vld [vmem:[%s17920_s0 + $0x28] sm:$0xff]  ;;  %vm10514_vm2 = vmmov 0   ;;  %vm7853_vm3 = vcmask 523264   ;;  %s8901_s17 = sld [smem:[#allocation2 + $0x1]] }
  0x1e   :  { %v9695_v6 = vpack.c.bf16 %v1074_v5, %v1073_v2  ;;  %v9698_v9 = vpack.c.bf16 %v1076_v8, %v1075_v7  ;;  %v1077_v10 = vld [vmem:[%s17920_s0 + $0x30] sm:$0xff]  ;;  %v1078_v11 = vld [vmem:[%s17920_s0 + $0x38] sm:$0xff]  ;;  %v64_v12 = vld [vmem:[%s17921_s1 + $0x8] sm:$0xff]  ;;  %s8903_s18 = sld [smem:[#allocation2 + $0x3]]  ;;  %s17806_s19 = sld [smem:[#allocation2 + $0x6]] }
  0x1f   :  { %9693 = vmatpush1.bf16.msra.mxu0 %v9692_v4  ;;  %9955 = vmatpush1.bf16.msra.mxu1 %v9692_v4  ;;  %v9701_v13 = vpack.c.bf16 %v1078_v11, %v1077_v10  ;;  %v1079_v14 = vld [vmem:[%s17920_s0 + $0x40] sm:$0xff]  ;;  %v1080_v15 = vld [vmem:[%s17920_s0 + $0x48] sm:$0xff]  ;;  %v1081_v17 = vld [vmem:[%s17920_s0 + $0x50] sm:$0xff]  ;;  %s17810_s20 = sld [smem:[#allocation2 + $0x7]]  ;;  %s8597_s21 = sld [smem:[#allocation4]] }
  0x20   :  { %9694 = vmatprep.subr.bf16.mxu0 %v17932_v3  ;;  %9940 = vmatprep.subr.bf16.mxu1 %v17932_v3  ;;  %v9704_v16 = vpack.c.bf16 %v1080_v15, %v1079_v14  ;;  %v1082_v18 = vld [vmem:[%s17920_s0 + $0x58] sm:$0xff]  ;;  %v1083_v20 = vld [vmem:[%s17920_s0 + $0x60] sm:$0xff]  ;;  %v1084_v21 = vld [vmem:[%s17920_s0 + $0x68] sm:$0xff]  ;;  %s8908_s22 = sld [smem:[#allocation4 + $0x1]] }
  0x21   :  { %1666 = vmatprep.mubr.f32.mxu0 %v64_v12  ;;  %v9707_v19 = vpack.c.bf16 %v1082_v18, %v1081_v17  ;;  %v9710_v22 = vpack.c.bf16 %v1084_v21, %v1083_v20  ;;  %v1085_v23 = vld [vmem:[%s17920_s0 + $0x70] sm:$0xff]  ;;  %v1086_v24 = vld [vmem:[%s17920_s0 + $0x78] sm:$0xff]  ;;  %v1087_v26 = vld [vmem:[%s17920_s0 + $0x80] sm:$0xff] }
  0x22   :  { %v9713_v25 = vpack.c.bf16 %v1086_v24, %v1085_v23  ;;  %v1088_v27 = vld [vmem:[%s17920_s0 + $0x88] sm:$0xff]  ;;  %v1089_v29 = vld [vmem:[%s17920_s0 + $0x90] sm:$0xff]  ;;  %v1090_v30 = vld [vmem:[%s17920_s0 + $0x98] sm:$0xff] }
  0x23   :  { %9696 = vmatpush1.bf16.msra.mxu0 %v9695_v6  ;;  %9956 = vmatpush1.bf16.msra.mxu1 %v9695_v6  ;;  %v9716_v28 = vpack.c.bf16 %v1088_v27, %v1087_v26  ;;  %v9719_v31 = vpack.c.bf16 %v1090_v30, %v1089_v29  ;;  %v1091_v32 = vld [vmem:[%s17920_s0 + $0xa0] sm:$0xff]  ;;  %v1092_v33 = vld [vmem:[%s17920_s0 + $0xa8] sm:$0xff]  ;;  %v1093_v35 = vld [vmem:[%s17920_s0 + $0xb0] sm:$0xff] }
  0x24   :  { %9697 = vmatprep.subr.bf16.mxu0 %v17932_v3  ;;  %9941 = vmatprep.subr.bf16.mxu1 %v17932_v3  ;;  %v9722_v34 = vpack.c.bf16 %v1092_v33, %v1091_v32  ;;  %v1094_v36 = vld [vmem:[%s17920_s0 + $0xb8] sm:$0xff]  ;;  %v1095_v38 = vld [vmem:[%s17920_s0 + $0xc0] sm:$0xff]  ;;  %v1096_v39 = vld [vmem:[%s17920_s0 + $0xc8] sm:$0xff] }
  0x25   :  { %v9725_v37 = vpack.c.bf16 %v1094_v36, %v1093_v35  ;;  %v9728_v40 = vpack.c.bf16 %v1096_v39, %v1095_v38  ;;  %v1097_v41 = vld [vmem:[%s17920_s0 + $0xd0] sm:$0xff]  ;;  %v1098_v42 = vld [vmem:[%s17920_s0 + $0xd8] sm:$0xff]  ;;  %v1099_v44 = vld [vmem:[%s17920_s0 + $0xe0] sm:$0xff] }
  0x26   :  { %v9731_v43 = vpack.c.bf16 %v1098_v42, %v1097_v41  ;;  %v1100_v45 = vld [vmem:[%s17920_s0 + $0xe8] sm:$0xff]  ;;  %v1101_v47 = vld [vmem:[%s17920_s0 + $0xf0] sm:$0xff]  ;;  %v1102_v48 = vld [vmem:[%s17920_s0 + $0xf8] sm:$0xff] }
  0x27   :  { %9699 = vmatpush1.bf16.msra.mxu0 %v9698_v9  ;;  %9957 = vmatpush1.bf16.msra.mxu1 %v9698_v9  ;;  %v9734_v46 = vpack.c.bf16 %v1100_v45, %v1099_v44  ;;  %v9737_v49 = vpack.c.bf16 %v1102_v48, %v1101_v47  ;;  %v63_v50 = vld [vmem:[%s17921_s1] sm:$0xff]  ;;  %v70_v52 = vld [vmem:[%s17921_s1 + $0x38] sm:$0xff]  ;;  %v77_v54 = vld [vmem:[%s17921_s1 + $0x70] sm:$0xff] }
  0x28   :  { %9700 = vmatprep.subr.bf16.mxu0 %v17932_v3  ;;  %9942 = vmatprep.subr.bf16.mxu1 %v17932_v3  ;;  %v71_v51 = vld [vmem:[%s17921_s1 + $0x40] sm:$0xff]  ;;  %v78_v53 = vld [vmem:[%s17921_s1 + $0x78] sm:$0xff]  ;;  %v85_v55 = vld [vmem:[%s17921_s1 + $0xb0] sm:$0xff] }
  0x29   :  { %v84_v56 = vld [vmem:[%s17921_s1 + $0xa8] sm:$0xff]  ;;  %v91_v58 = vld [vmem:[%s17921_s1 + $0xe0] sm:$0xff]  ;;  %v98_v60 = vld [vmem:[%s17921_s1 + $0x118] sm:$0xff] }
  0x2a   :  { %v92_v57 = vld [vmem:[%s17921_s1 + $0xe8] sm:$0xff]  ;;  %v99_v59 = vld [vmem:[%s17921_s1 + $0x120] sm:$0xff]  ;;  %v106_v61 = vld [vmem:[%s17921_s1 + $0x158] sm:$0xff] }
  0x2b   :  { %9702 = vmatpush1.bf16.msra.mxu0 %v9701_v13  ;;  %9958 = vmatpush1.bf16.msra.mxu1 %v9701_v13  ;;  %v105_v62 = vld [vmem:[%s17921_s1 + $0x150] sm:$0xff]  ;;  %v112_v0 = vld [vmem:[%s17921_s1 + $0x188] sm:$0xff]  ;;  %v119_v2 = vld [vmem:[%s17921_s1 + $0x1c0] sm:$0xff] }
  0x2c   :  { %9703 = vmatprep.subr.bf16.mxu0 %v17932_v3  ;;  %9943 = vmatprep.subr.bf16.mxu1 %v17932_v3  ;;  %v113_v63 = vld [vmem:[%s17921_s1 + $0x190] sm:$0xff]  ;;  %v120_v1 = vld [vmem:[%s17921_s1 + $0x1c8] sm:$0xff]  ;;  %v127_v4 = vld [vmem:[%s17921_s1 + $0x200] sm:$0xff] }
  0x2d   :  { %v126_v5 = vld [vmem:[%s17921_s1 + $0x1f8] sm:$0xff]  ;;  %v133_v7 = vld [vmem:[%s17921_s1 + $0x230] sm:$0xff]  ;;  %v140_v9 = vld [vmem:[%s17921_s1 + $0x268] sm:$0xff] }
  0x2e   :  { %v134_v6 = vld [vmem:[%s17921_s1 + $0x238] sm:$0xff]  ;;  %v141_v8 = vld [vmem:[%s17921_s1 + $0x270] sm:$0xff]  ;;  %v148_v10 = vld [vmem:[%s17921_s1 + $0x2a8] sm:$0xff] }
  0x2f   :  { %9705 = vmatpush1.bf16.msra.mxu0 %v9704_v16  ;;  %9959 = vmatpush1.bf16.msra.mxu1 %v9704_v16  ;;  %v147_v11 = vld [vmem:[%s17921_s1 + $0x2a0] sm:$0xff]  ;;  %v154_v13 = vld [vmem:[%s17921_s1 + $0x2d8] sm:$0xff]  ;;  %v161_v15 = vld [vmem:[%s17921_s1 + $0x310] sm:$0xff] }
  0x30   :  { %9706 = vmatprep.subr.bf16.mxu0 %v17932_v3  ;;  %9944 = vmatprep.subr.bf16.mxu1 %v17932_v3  ;;  %v155_v12 = vld [vmem:[%s17921_s1 + $0x2e0] sm:$0xff]  ;;  %v162_v14 = vld [vmem:[%s17921_s1 + $0x318] sm:$0xff]  ;;  %v169_v16 = vld [vmem:[%s17921_s1 + $0x350] sm:$0xff] }
  0x31   :  { %v168_v17 = vld [vmem:[%s17921_s1 + $0x348] sm:$0xff]  ;;  %v183_v20 = vld [vmem:[%s17921_s1 + $0x3c0] sm:$0xff]  ;;  %v182_v21 = vld [vmem:[%s17921_s1 + $0x3b8] sm:$0xff] }
  0x32   :  { %v176_v18 = vld [vmem:[%s17921_s1 + $0x388] sm:$0xff]  ;;  %v1103_v23 = vld [vmem:[%s17920_s0 + $0x100] sm:$0xff]  ;;  %v189_v26 = vld [vmem:[%s17921_s1 + $0x3f0] sm:$0xff] }
  0x33   :  { %9708 = vmatpush1.bf16.msra.mxu0 %v9707_v19  ;;  %9960 = vmatpush1.bf16.msra.mxu1 %v9707_v19  ;;  %v175_v19 = vld [vmem:[%s17921_s1 + $0x380] sm:$0xff]  ;;  %v1104_v24 = vld [vmem:[%s17920_s0 + $0x108] sm:$0xff]  ;;  %v197_v27 = vld [vmem:[%s17921_s1 + $0x430] sm:$0xff] }
  0x34   :  { %9709 = vmatprep.subr.bf16.mxu0 %v17932_v3  ;;  %9945 = vmatprep.subr.bf16.mxu1 %v17932_v3  ;;  %v1106_v29 = vld [vmem:[%s17920_s0 + $0x118] sm:$0xff]  ;;  %v204_v32 = vld [vmem:[%s17921_s1 + $0x468] sm:$0xff]  ;;  %v1107_v33 = vld [vmem:[%s17920_s0 + $0x120] sm:$0xff] }
  0x35   :  { %v203_v36 = vld [vmem:[%s17921_s1 + $0x460] sm:$0xff]  ;;  %v1109_v38 = vld [vmem:[%s17920_s0 + $0x130] sm:$0xff]  ;;  %v1110_v39 = vld [vmem:[%s17920_s0 + $0x138] sm:$0xff] }
  0x36   :  { %v210_v41 = vld [vmem:[%s17921_s1 + $0x498] sm:$0xff]  ;;  %v1112_v44 = vld [vmem:[%s17920_s0 + $0x148] sm:$0xff]  ;;  %v225_v47 = vld [vmem:[%s17921_s1 + $0x510] sm:$0xff] }
  0x37   :  { %9711 = vmatpush1.bf16.msra.mxu0 %v9710_v22  ;;  %9961 = vmatpush1.bf16.msra.mxu1 %v9710_v22  ;;  %v190_v22 = vld [vmem:[%s17921_s1 + $0x3f8] sm:$0xff]  ;;  %v1113_v48 = vld [vmem:[%s17920_s0 + $0x150] sm:$0xff] }
  0x38   :  { %9712 = vmatprep.subr.bf16.mxu0 %v17932_v3  ;;  %9946 = vmatprep.subr.bf16.mxu1 %v17932_v3  ;;  %v218_v42 = vld [vmem:[%s17921_s1 + $0x4d8] sm:$0xff] }
  0x3b   :  { %9714 = vmatpush1.bf16.msra.mxu0 %v9713_v25  ;;  %9962 = vmatpush1.bf16.msra.mxu1 %v9713_v25  ;;  %v9740_v25 = vpack.c.bf16 %v1104_v24, %v1103_v23  ;;  %v273_v23 = vld [vmem:[%s17921_s1 + $0x690] sm:$0xff] }
  0x3c   :  { %9715 = vmatprep.subr.bf16.mxu0 %v17932_v3  ;;  %9947 = vmatprep.subr.bf16.mxu1 %v17932_v3  ;;  %v281_v24 = vld [vmem:[%s17921_s1 + $0x6d0] sm:$0xff] }
  0x3f   :  { %9717 = vmatpush1.bf16.msra.mxu0 %v9716_v28  ;;  %9963 = vmatpush1.bf16.msra.mxu1 %v9716_v28  ;;  %v1105_v28 = vld [vmem:[%s17920_s0 + $0x110] sm:$0xff] }
  0x40   :  { %9718 = vmatprep.subr.bf16.mxu0 %v17932_v3  ;;  %9948 = vmatprep.subr.bf16.mxu1 %v17932_v3  ;;  %v9743_v30 = vpack.c.bf16 %v1106_v29, %v1105_v28  ;;  %v280_v28 = vld [vmem:[%s17921_s1 + $0x6c8] sm:$0xff] }
  0x41   :  { %v288_v29 = vld [vmem:[%s17921_s1 + $0x708] sm:$0xff] }
  0x43   :  { %9720 = vmatpush1.bf16.msra.mxu0 %v9719_v31  ;;  %9964 = vmatpush1.bf16.msra.mxu1 %v9719_v31  ;;  %v196_v31 = vld [vmem:[%s17921_s1 + $0x428] sm:$0xff] }
  0x44   :  { %9721 = vmatprep.subr.bf16.mxu0 %v17932_v3  ;;  %9949 = vmatprep.subr.bf16.mxu1 %v17932_v3 }
  0x47   :  { %9723 = vmatpush1.bf16.msra.mxu0 %v9722_v34  ;;  %9965 = vmatpush1.bf16.msra.mxu1 %v9722_v34  ;;  %v1108_v34 = vld [vmem:[%s17920_s0 + $0x128] sm:$0xff] }
  0x48   :  { %9724 = vmatprep.subr.bf16.mxu0 %v17932_v3  ;;  %9950 = vmatprep.subr.bf16.mxu1 %v17932_v3  ;;  %v9746_v35 = vpack.c.bf16 %v1108_v34, %v1107_v33  ;;  %v287_v33 = vld [vmem:[%s17921_s1 + $0x700] sm:$0xff] }
  0x49   :  { %v295_v34 = vld [vmem:[%s17921_s1 + $0x740] sm:$0xff] }
  0x4b   :  { %9726 = vmatpush1.bf16.msra.mxu0 %v9725_v37  ;;  %9966 = vmatpush1.bf16.msra.mxu1 %v9725_v37  ;;  %v211_v37 = vld [vmem:[%s17921_s1 + $0x4a0] sm:$0xff] }
  0x4c   :  { %9727 = vmatprep.subr.bf16.mxu0 %v17932_v3  ;;  %9951 = vmatprep.subr.bf16.mxu1 %v17932_v3 }
  0x4f   :  { %9729 = vmatpush1.bf16.msra.mxu0 %v9728_v40  ;;  %9967 = vmatpush1.bf16.msra.mxu1 %v9728_v40  ;;  %v9749_v40 = vpack.c.bf16 %v1110_v39, %v1109_v38  ;;  %v294_v38 = vld [vmem:[%s17921_s1 + $0x738] sm:$0xff] }
  0x50   :  { %9730 = vmatprep.subr.bf16.mxu0 %v17932_v3  ;;  %9952 = vmatprep.subr.bf16.mxu1 %v17932_v3  ;;  %v302_v39 = vld [vmem:[%s17921_s1 + $0x778] sm:$0xff] }
  0x53   :  { %9732 = vmatpush1.bf16.msra.mxu0 %v9731_v43  ;;  %9968 = vmatpush1.bf16.msra.mxu1 %v9731_v43  ;;  %v1111_v43 = vld [vmem:[%s17920_s0 + $0x140] sm:$0xff] }
  0x54   :  { %9733 = vmatprep.subr.bf16.mxu0 %v17932_v3  ;;  %9953 = vmatprep.subr.bf16.mxu1 %v17932_v3  ;;  %v9752_v45 = vpack.c.bf16 %v1112_v44, %v1111_v43  ;;  %v316_v43 = vld [vmem:[%s17921_s1 + $0x7e8] sm:$0xff]  ;;  %v315_v44 = vld [vmem:[%s17921_s1 + $0x7e0] sm:$0xff] }
  0x57   :  { %9735 = vmatpush1.bf16.msra.mxu0 %v9734_v46  ;;  %9969 = vmatpush1.bf16.msra.mxu1 %v9734_v46  ;;  %v217_v46 = vld [vmem:[%s17921_s1 + $0x4d0] sm:$0xff] }
  0x58   :  { %9736 = vmatprep.subr.bf16.mxu0 %v17932_v3  ;;  %9954 = vmatprep.subr.bf16.mxu1 %v17932_v3 }
  0x5b   :  { %9738 = vmatpush1.bf16.msra.mxu0 %v9737_v49  ;;  %9970 = vmatpush1.bf16.msra.mxu1 %v9737_v49  ;;  %v1114_v49 = vld [vmem:[%s17920_s0 + $0x158] sm:$0xff] }
  0x5c   :  { %9739 = vmatprep.subr.bf16.mxu0 %v17932_v3 }
  0x5e   :  { %1667 = vmatmul.mubr.f32.vlgmr.msra.gmra.mrb[0].mxu0 %v63_v50  ;;  %v9755_v50 = vpack.c.bf16 %v1114_v49, %v1113_v48  ;;  %v329_v48 = vld [vmem:[%s17921_s1 + $0x850] sm:$0xff] }
  0x5f   :  { %1671 = vmatprep.mubr.f32.mxu0 %v71_v51  ;;  %9741 = vmatpush1.bf16.msra.mxu0 %v9740_v25  ;;  %v224_v51 = vld [vmem:[%s17921_s1 + $0x508] sm:$0xff]  ;;  %v1129_v25 = vld [vmem:[%s17920_s0 + $0x1d0] sm:$0xff] }
  0x60   :  { %9742 = vmatprep.subr.bf16.mxu0 %v17932_v3  ;;  %v337_v49 = vld [vmem:[%s17921_s1 + $0x890] sm:$0xff] }
  0x62   :  { %1672 = vmatmul.mubr.f32.gmra.mrb[2].mxu0 %v70_v52  ;;  %v232_v52 = vld [vmem:[%s17921_s1 + $0x548] sm:$0xff] }
  0x63   :  { %1676 = vmatprep.mubr.f32.mxu0 %v78_v53  ;;  %9744 = vmatpush1.bf16.msra.mxu0 %v9743_v30  ;;  %v1115_v53 = vld [vmem:[%s17920_s0 + $0x160] sm:$0xff] }
  0x64   :  { %9745 = vmatprep.subr.bf16.mxu0 %v17932_v3  ;;  %v1131_v30 = vld [vmem:[%s17920_s0 + $0x1e0] sm:$0xff] }
  0x66   :  { %1677 = vmatmul.mubr.f32.gmra.mrb[4].mxu0 %v77_v54  ;;  %v1116_v54 = vld [vmem:[%s17920_s0 + $0x168] sm:$0xff] }
  0x67   :  { %1681 = vmatprep.mubr.f32.mxu0 %v85_v55  ;;  %9747 = vmatpush1.bf16.msra.mxu0 %v9746_v35  ;;  %v9758_v55 = vpack.c.bf16 %v1116_v54, %v1115_v53  ;;  %v1133_v35 = vld [vmem:[%s17920_s0 + $0x1f0] sm:$0xff]  ;;  %v351_v53 = vld [vmem:[%s17921_s1 + $0x900] sm:$0xff]  ;;  %v350_v54 = vld [vmem:[%s17921_s1 + $0x8f8] sm:$0xff] }
  0x68   :  { %9748 = vmatprep.subr.bf16.mxu0 %v17932_v3 }
  0x6a   :  { %1682 = vmatmul.mubr.f32.gmra.mrb[6].mxu0 %v84_v56  ;;  %v231_v56 = vld [vmem:[%s17921_s1 + $0x540] sm:$0xff] }
  0x6b   :  { %1686 = vmatprep.mubr.f32.mxu0 %v92_v57  ;;  %9750 = vmatpush1.bf16.msra.mxu0 %v9749_v40  ;;  %v239_v57 = vld [vmem:[%s17921_s1 + $0x580] sm:$0xff]  ;;  %v301_v40 = vld [vmem:[%s17921_s1 + $0x770] sm:$0xff] }
  0x6c   :  { %9751 = vmatprep.subr.bf16.mxu0 %v17932_v3 }
  0x6e   :  { %1687 = vmatmul.mubr.f32.gmra.mrb[8].mxu0 %v91_v58  ;;  %v1117_v58 = vld [vmem:[%s17920_s0 + $0x170] sm:$0xff] }
  0x6f   :  { %1691 = vmatprep.mubr.f32.mxu0 %v99_v59  ;;  %9753 = vmatpush1.bf16.msra.mxu0 %v9752_v45  ;;  %v1118_v59 = vld [vmem:[%s17920_s0 + $0x178] sm:$0xff]  ;;  %v323_v45 = vld [vmem:[%s17921_s1 + $0x820] sm:$0xff] }
  0x70   :  { %9754 = vmatprep.subr.bf16.mxu0 %v17932_v3 }
  0x72   :  { %1692 = vmatmul.mubr.f32.gmra.mrb[10].mxu0 %v98_v60  ;;  %v9761_v60 = vpack.c.bf16 %v1118_v59, %v1117_v58  ;;  %v364_v58 = vld [vmem:[%s17921_s1 + $0x968] sm:$0xff] }
  0x73   :  { %1696 = vmatprep.mubr.f32.mxu0 %v106_v61  ;;  %9756 = vmatpush1.bf16.msra.mxu0 %v9755_v50  ;;  %v238_v61 = vld [vmem:[%s17921_s1 + $0x578] sm:$0xff]  ;;  %v336_v50 = vld [vmem:[%s17921_s1 + $0x888] sm:$0xff] }
  0x74   :  { %9757 = vmatprep.subr.bf16.mxu0 %v17932_v3  ;;  %v372_v59 = vld [vmem:[%s17921_s1 + $0x9a8] sm:$0xff] }
  0x76   :  { %1697 = vmatmul.mubr.f32.gmra.mrb[12].mxu0 %v105_v62  ;;  %v246_v62 = vld [vmem:[%s17921_s1 + $0x5b8] sm:$0xff] }
  0x77   :  { %1701 = vmatprep.mubr.f32.mxu0 %v113_v63  ;;  %9759 = vmatpush1.bf16.msra.mxu0 %v9758_v55  ;;  %v1119_v63 = vld [vmem:[%s17920_s0 + $0x180] sm:$0xff]  ;;  %v358_v55 = vld [vmem:[%s17921_s1 + $0x938] sm:$0xff] }
  0x78   :  { %9760 = vmatprep.subr.bf16.mxu0 %v17932_v3 }
  0x7a   :  { %1702 = vmatmul.mubr.f32.gmra.mrb[14].mxu0 %v112_v0  ;;  %v1120_v0 = vld [vmem:[%s17920_s0 + $0x188] sm:$0xff] }
  0x7b   :  { %1706 = vmatprep.mubr.f32.mxu0 %v120_v1  ;;  %9762 = vmatpush1.bf16.msra.mxu0 %v9761_v60  ;;  %v9764_v1 = vpack.c.bf16 %v1120_v0, %v1119_v63  ;;  %v371_v60 = vld [vmem:[%s17921_s1 + $0x9a0] sm:$0xff]  ;;  %v386_v63 = vld [vmem:[%s17921_s1 + $0xa18] sm:$0xff]  ;;  %v385_v0 = vld [vmem:[%s17921_s1 + $0xa10] sm:$0xff] }
  0x7c   :  { %9763 = vmatprep.subr.bf16.mxu0 %v17932_v3 }
  0x7e   :  { %1707 = vmatmul.mubr.f32.gmra.mrb[16].mxu0 %v119_v2  ;;  %v245_v2 = vld [vmem:[%s17921_s1 + $0x5b0] sm:$0xff] }
  0x7f   :  { %1711 = vmatprep.mubr.f32.mxu0 %v127_v4  ;;  %9765 = vmatpush1.bf16.msra.mxu0 %v9764_v1  ;;  %v253_v4 = vld [vmem:[%s17921_s1 + $0x5f0] sm:$0xff] }
  0x80   :  { %9766 = vmatprep.subr.bf16.mxu0 %v17932_v3  ;;  %v393_v1 = vld [vmem:[%s17921_s1 + $0xa50] sm:$0xff] }
  0x82   :  { %1712 = vmatmul.mubr.f32.gmra.mrb[18].mxu0 %v126_v5  ;;  %v1121_v5 = vld [vmem:[%s17920_s0 + $0x190] sm:$0xff] }
  0x83   :  { %1716 = vmatprep.mubr.f32.mxu0 %v134_v6  ;;  %v1122_v6 = vld [vmem:[%s17920_s0 + $0x198] sm:$0xff] }
  0x86   :  { %1717 = vmatmul.mubr.f32.gmra.mrb[20].mxu0 %v133_v7  ;;  %v9767_v7 = vpack.c.bf16 %v1122_v6, %v1121_v5  ;;  %v399_v5 = vld [vmem:[%s17921_s1 + $0xa80] sm:$0xff] }
  0x87   :  { %1721 = vmatprep.mubr.f32.mxu0 %v141_v8  ;;  %v252_v8 = vld [vmem:[%s17921_s1 + $0x5e8] sm:$0xff]  ;;  %v407_v6 = vld [vmem:[%s17921_s1 + $0xac0] sm:$0xff] }
  0x88   :  { %9768 = vmatpush1.bf16.msra.mxu0 %v9767_v7  ;;  %v406_v7 = vld [vmem:[%s17921_s1 + $0xab8] sm:$0xff] }
  0x89   :  { %9769 = vmatprep.subr.bf16.mxu0 %v17932_v3 }
  0x8a   :  { %1722 = vmatmul.mubr.f32.gmra.mrb[22].mxu0 %v140_v9  ;;  %v260_v9 = vld [vmem:[%s17921_s1 + $0x628] sm:$0xff] }
  0x8b   :  { %1726 = vmatprep.mubr.f32.mxu0 %v148_v10  ;;  %v1123_v10 = vld [vmem:[%s17920_s0 + $0x1a0] sm:$0xff] }
  0x8e   :  { %1727 = vmatmul.mubr.f32.gmra.mrb[24].mxu0 %v147_v11  ;;  %v1124_v11 = vld [vmem:[%s17920_s0 + $0x1a8] sm:$0xff] }
  0x8f   :  { %1731 = vmatprep.mubr.f32.mxu0 %v155_v12  ;;  %v9770_v12 = vpack.c.bf16 %v1124_v11, %v1123_v10  ;;  %v421_v10 = vld [vmem:[%s17921_s1 + $0xb30] sm:$0xff]  ;;  %v420_v11 = vld [vmem:[%s17921_s1 + $0xb28] sm:$0xff] }
  0x91   :  { %9771 = vmatpush1.bf16.msra.mxu0 %v9770_v12  ;;  %v428_v12 = vld [vmem:[%s17921_s1 + $0xb68] sm:$0xff] }
  0x92   :  { %1732 = vmatmul.mubr.f32.gmra.mrb[26].mxu0 %v154_v13  ;;  %v259_v13 = vld [vmem:[%s17921_s1 + $0x620] sm:$0xff]  ;;  %9772 = vmatprep.subr.bf16.mxu0 %v17932_v3 }
  0x93   :  { %1736 = vmatprep.mubr.f32.mxu0 %v162_v14  ;;  %v267_v14 = vld [vmem:[%s17921_s1 + $0x660] sm:$0xff] }
  0x96   :  { %1737 = vmatmul.mubr.f32.gmra.mrb[28].mxu0 %v161_v15  ;;  %v1125_v15 = vld [vmem:[%s17920_s0 + $0x1b0] sm:$0xff] }
  0x97   :  { %1741 = vmatprep.mubr.f32.mxu0 %v169_v16  ;;  %v1126_v16 = vld [vmem:[%s17920_s0 + $0x1b8] sm:$0xff] }
  0x9a   :  { %1742 = vmatmul.mubr.f32.gmra.mrb[30].mxu0 %v168_v17  ;;  %v9773_v17 = vpack.c.bf16 %v1126_v16, %v1125_v15  ;;  %v434_v15 = vld [vmem:[%s17921_s1 + $0xb98] sm:$0xff] }
  0x9b   :  { %1746 = vmatprep.mubr.f32.mxu0 %v176_v18  ;;  %v266_v18 = vld [vmem:[%s17921_s1 + $0x658] sm:$0xff] }
  0x9c   :  { %9774 = vmatpush1.bf16.msra.mxu0 %v9773_v17  ;;  %v442_v16 = vld [vmem:[%s17921_s1 + $0xbd8] sm:$0xff]  ;;  %v441_v17 = vld [vmem:[%s17921_s1 + $0xbd0] sm:$0xff] }
  0x9d   :  { %9775 = vmatprep.subr.bf16.mxu0 %v17932_v3 }
  0x9e   :  { %1747 = vmatmul.mubr.f32.gmra.mrb[32].mxu0 %v175_v19  ;;  %v274_v19 = vld [vmem:[%s17921_s1 + $0x698] sm:$0xff] }
  0x9f   :  { %1751 = vmatprep.mubr.f32.mxu0 %v183_v20  ;;  %v1127_v20 = vld [vmem:[%s17920_s0 + $0x1c0] sm:$0xff] }
  0xa2   :  { %1752 = vmatmul.mubr.f32.gmra.mrb[34].mxu0 %v182_v21  ;;  %v1128_v21 = vld [vmem:[%s17920_s0 + $0x1c8] sm:$0xff] }
  0xa3   :  { %1756 = vmatprep.mubr.f32.mxu0 %v190_v22  ;;  %v9776_v22 = vpack.c.bf16 %v1128_v21, %v1127_v20  ;;  %v456_v20 = vld [vmem:[%s17921_s1 + $0xc48] sm:$0xff]  ;;  %v455_v21 = vld [vmem:[%s17921_s1 + $0xc40] sm:$0xff] }
  0xa5   :  { %9777 = vmatpush1.bf16.msra.mxu0 %v9776_v22  ;;  %v463_v22 = vld [vmem:[%s17921_s1 + $0xc80] sm:$0xff] }
  0xa6   :  { %1757 = vmatmul.mubr.f32.gmra.mrb[36].mxu0 %v189_v26  ;;  %9778 = vmatprep.subr.bf16.mxu0 %v17932_v3  ;;  %v1130_v26 = vld [vmem:[%s17920_s0 + $0x1d8] sm:$0xff] }
  0xa7   :  { %1761 = vmatprep.mubr.f32.mxu0 %v197_v27  ;;  %v9779_v27 = vpack.c.bf16 %v1130_v26, %v1129_v25  ;;  %v469_v25 = vld [vmem:[%s17921_s1 + $0xcb0] sm:$0xff] }
  0xa8   :  { %v477_v26 = vld [vmem:[%s17921_s1 + $0xcf0] sm:$0xff] }
  0xa9   :  { %9780 = vmatpush1.bf16.msra.mxu0 %v9779_v27  ;;  %v476_v27 = vld [vmem:[%s17921_s1 + $0xce8] sm:$0xff] }
  0xaa   :  { %1762 = vmatmul.mubr.f32.gmra.mrb[38].mxu0 %v196_v31  ;;  %9781 = vmatprep.subr.bf16.mxu0 %v17932_v3  ;;  %v1132_v31 = vld [vmem:[%s17920_s0 + $0x1e8] sm:$0xff] }
  0xab   :  { %1766 = vmatprep.mubr.f32.mxu0 %v204_v32  ;;  %v9782_v32 = vpack.c.bf16 %v1132_v31, %v1131_v30  ;;  %v491_v30 = vld [vmem:[%s17921_s1 + $0xd60] sm:$0xff]  ;;  %v490_v31 = vld [vmem:[%s17921_s1 + $0xd58] sm:$0xff] }
  0xad   :  { %9783 = vmatpush1.bf16.msra.mxu0 %v9782_v32  ;;  %v498_v32 = vld [vmem:[%s17921_s1 + $0xd98] sm:$0xff] }
  0xae   :  { %1767 = vmatmul.mubr.f32.gmra.mrb[40].mxu0 %v203_v36  ;;  %9784 = vmatprep.subr.bf16.mxu0 %v17932_v3  ;;  %v1134_v36 = vld [vmem:[%s17920_s0 + $0x1f8] sm:$0xff] }
  0xaf   :  { %1771 = vmatprep.mubr.f32.mxu0 %v211_v37  ;;  %v9785_v37 = vpack.c.bf16 %v1134_v36, %v1133_v35  ;;  %v504_v35 = vld [vmem:[%s17921_s1 + $0xdc8] sm:$0xff] }
  0xb0   :  { %v512_v36 = vld [vmem:[%s17921_s1 + $0xe08] sm:$0xff] }
  0xb1   :  { %9786 = vmatpush1.bf16.msra.mxu0 %v9785_v37  ;;  %v511_v37 = vld [vmem:[%s17921_s1 + $0xe00] sm:$0xff] }
  0xb2   :  { %1772 = vmatmul.mubr.f32.gmra.mrb[42].mxu0 %v210_v41  ;;  %9787 = vmatprep.subr.bf16.mxu0 %v17932_v3  ;;  %v309_v41 = vld [vmem:[%s17921_s1 + $0x7b0] sm:$0xff] }
  0xb3   :  { %1776 = vmatprep.mubr.f32.mxu0 %v218_v42  ;;  %v308_v42 = vld [vmem:[%s17921_s1 + $0x7a8] sm:$0xff] }
  0xb6   :  { %1777 = vmatmul.mubr.f32.gmra.mrb[44].mxu0 %v217_v46  ;;  %v322_v46 = vld [vmem:[%s17921_s1 + $0x818] sm:$0xff] }
  0xb7   :  { %1781 = vmatprep.mubr.f32.mxu0 %v225_v47  ;;  %v330_v47 = vld [vmem:[%s17921_s1 + $0x858] sm:$0xff] }
  0xba   :  { %1782 = vmatmul.mubr.f32.gmra.mrb[46].mxu0 %v224_v51  ;;  %v344_v51 = vld [vmem:[%s17921_s1 + $0x8c8] sm:$0xff] }
  0xbb   :  { %1786 = vmatprep.mubr.f32.mxu0 %v232_v52  ;;  %v343_v52 = vld [vmem:[%s17921_s1 + $0x8c0] sm:$0xff] }
  0xbe   :  { %1787 = vmatmul.mubr.f32.gmra.mrb[48].mxu0 %v231_v56  ;;  %v357_v56 = vld [vmem:[%s17921_s1 + $0x930] sm:$0xff] }
  0xbf   :  { %1791 = vmatprep.mubr.f32.mxu0 %v239_v57  ;;  %v365_v57 = vld [vmem:[%s17921_s1 + $0x970] sm:$0xff] }
  0xc2   :  { %1792 = vmatmul.mubr.f32.gmra.mrb[50].mxu0 %v238_v61  ;;  %v379_v61 = vld [vmem:[%s17921_s1 + $0x9e0] sm:$0xff] }
  0xc3   :  { %1796 = vmatprep.mubr.f32.mxu0 %v246_v62  ;;  %v378_v62 = vld [vmem:[%s17921_s1 + $0x9d8] sm:$0xff] }
  0xc6   :  { %1797 = vmatmul.mubr.f32.gmra.mrb[52].mxu0 %v245_v2  ;;  %v392_v2 = vld [vmem:[%s17921_s1 + $0xa48] sm:$0xff] }
  0xc7   :  { %1801 = vmatprep.mubr.f32.mxu0 %v253_v4  ;;  %v400_v4 = vld [vmem:[%s17921_s1 + $0xa88] sm:$0xff] }
  0xca   :  { %1802 = vmatmul.mubr.f32.gmra.mrb[54].mxu0 %v252_v8  ;;  %v414_v8 = vld [vmem:[%s17921_s1 + $0xaf8] sm:$0xff] }
  0xcb   :  { %1806 = vmatprep.mubr.f32.mxu0 %v260_v9  ;;  %v413_v9 = vld [vmem:[%s17921_s1 + $0xaf0] sm:$0xff] }
  0xce   :  { %1807 = vmatmul.mubr.f32.gmra.mrb[56].mxu0 %v259_v13  ;;  %v427_v13 = vld [vmem:[%s17921_s1 + $0xb60] sm:$0xff] }
  0xcf   :  { %1811 = vmatprep.mubr.f32.mxu0 %v267_v14  ;;  %v435_v14 = vld [vmem:[%s17921_s1 + $0xba0] sm:$0xff] }
  0xd2   :  { %1812 = vmatmul.mubr.f32.gmra.mrb[58].mxu0 %v266_v18  ;;  %v449_v18 = vld [vmem:[%s17921_s1 + $0xc10] sm:$0xff] }
  0xd3   :  { %1816 = vmatprep.mubr.f32.mxu0 %v274_v19  ;;  %v448_v19 = vld [vmem:[%s17921_s1 + $0xc08] sm:$0xff] }
  0xd6   :  { %1817 = vmatmul.mubr.f32.gmra.mrb[60].mxu0 %v273_v23  ;;  %v462_v23 = vld [vmem:[%s17921_s1 + $0xc78] sm:$0xff] }
  0xd7   :  { %1821 = vmatprep.mubr.f32.mxu0 %v281_v24  ;;  %v470_v24 = vld [vmem:[%s17921_s1 + $0xcb8] sm:$0xff] }
  0xda   :  { %1822 = vmatmul.mubr.f32.gmra.mrb[62].mxu0 %v280_v28  ;;  %v484_v28 = vld [vmem:[%s17921_s1 + $0xd28] sm:$0xff] }
  0xdb   :  { %1826 = vmatprep.mubr.f32.mxu0 %v288_v29  ;;  %v483_v29 = vld [vmem:[%s17921_s1 + $0xd20] sm:$0xff] }
  0xde   :  { %1827 = vmatmul.mubr.f32.gmra.mrb[64].mxu0 %v287_v33  ;;  %v497_v33 = vld [vmem:[%s17921_s1 + $0xd90] sm:$0xff] }
  0xdf   :  { %1831 = vmatprep.mubr.f32.mxu0 %v295_v34  ;;  %v505_v34 = vld [vmem:[%s17921_s1 + $0xdd0] sm:$0xff] }
  0xe2   :  { %1832 = vmatmul.mubr.f32.gmra.mrb[66].mxu0 %v294_v38  ;;  %v66_v38 = vld [vmem:[%s17921_s1 + $0x18] sm:$0xff] }
  0xe3   :  { %1836 = vmatprep.mubr.f32.mxu0 %v302_v39  ;;  %v65_v39 = vld [vmem:[%s17921_s1 + $0x10] sm:$0xff] }
  0xe6   :  { %1837 = vmatmul.mubr.f32.gmra.mrb[68].mxu0 %v301_v40  ;;  %v73_v40 = vld [vmem:[%s17921_s1 + $0x50] sm:$0xff] }
  0xe7   :  { %1841 = vmatprep.mubr.f32.mxu0 %v309_v41  ;;  %v72_v41 = vld [vmem:[%s17921_s1 + $0x48] sm:$0xff] }
  0xea   :  { %1842 = vmatmul.mubr.f32.gmra.mrb[70].mxu0 %v308_v42  ;;  %v80_v42 = vld [vmem:[%s17921_s1 + $0x88] sm:$0xff] }
  0xeb   :  { %1846 = vmatprep.mubr.f32.mxu0 %v316_v43  ;;  %v79_v43 = vld [vmem:[%s17921_s1 + $0x80] sm:$0xff] }
  0xee   :  { %1847 = vmatmul.mubr.f32.gmra.mrb[72].mxu0 %v315_v44  ;;  %v87_v44 = vld [vmem:[%s17921_s1 + $0xc0] sm:$0xff] }
  0xef   :  { %1851 = vmatprep.mubr.f32.mxu0 %v323_v45  ;;  %v86_v45 = vld [vmem:[%s17921_s1 + $0xb8] sm:$0xff] }
  0xf2   :  { %1852 = vmatmul.mubr.f32.gmra.mrb[74].mxu0 %v322_v46  ;;  %v94_v46 = vld [vmem:[%s17921_s1 + $0xf8] sm:$0xff] }
  0xf3   :  { %1856 = vmatprep.mubr.f32.mxu0 %v330_v47  ;;  %v93_v47 = vld [vmem:[%s17921_s1 + $0xf0] sm:$0xff] }
  0xf6   :  { %1857 = vmatmul.mubr.f32.gmra.mrb[76].mxu0 %v329_v48  ;;  %v101_v48 = vld [vmem:[%s17921_s1 + $0x130] sm:$0xff] }
  0xf7   :  { %1861 = vmatprep.mubr.f32.mxu0 %v337_v49  ;;  %v100_v49 = vld [vmem:[%s17921_s1 + $0x128] sm:$0xff] }
  0xfa   :  { %1862 = vmatmul.mubr.f32.gmra.mrb[78].mxu0 %v336_v50  ;;  %v108_v50 = vld [vmem:[%s17921_s1 + $0x168] sm:$0xff] }
  0xfb   :  { %1866 = vmatprep.mubr.f32.mxu0 %v344_v51  ;;  %v107_v51 = vld [vmem:[%s17921_s1 + $0x160] sm:$0xff] }
  0xfe   :  { %1867 = vmatmul.mubr.f32.gmra.mrb[80].mxu0 %v343_v52  ;;  %v115_v52 = vld [vmem:[%s17921_s1 + $0x1a0] sm:$0xff] }
  0xff   :  { %1871 = vmatprep.mubr.f32.mxu0 %v351_v53  ;;  %v114_v53 = vld [vmem:[%s17921_s1 + $0x198] sm:$0xff] }
 0x102   :  { %1872 = vmatmul.mubr.f32.gmra.mrb[82].mxu0 %v350_v54  ;;  %v122_v54 = vld [vmem:[%s17921_s1 + $0x1d8] sm:$0xff] }
 0x103   :  { %1876 = vmatprep.mubr.f32.mxu0 %v358_v55  ;;  %v121_v55 = vld [vmem:[%s17921_s1 + $0x1d0] sm:$0xff] }
 0x106   :  { %1877 = vmatmul.mubr.f32.gmra.mrb[84].mxu0 %v357_v56  ;;  %v129_v56 = vld [vmem:[%s17921_s1 + $0x210] sm:$0xff] }
 0x107   :  { %1881 = vmatprep.mubr.f32.mxu0 %v365_v57  ;;  %v128_v57 = vld [vmem:[%s17921_s1 + $0x208] sm:$0xff] }
 0x10a   :  { %1882 = vmatmul.mubr.f32.gmra.mrb[86].mxu0 %v364_v58  ;;  %v136_v58 = vld [vmem:[%s17921_s1 + $0x248] sm:$0xff] }
 0x10b   :  { %1886 = vmatprep.mubr.f32.mxu0 %v372_v59  ;;  %v135_v59 = vld [vmem:[%s17921_s1 + $0x240] sm:$0xff] }
 0x10e   :  { %1887 = vmatmul.mubr.f32.gmra.mrb[88].mxu0 %v371_v60  ;;  %v143_v60 = vld [vmem:[%s17921_s1 + $0x280] sm:$0xff] }
 0x10f   :  { %1891 = vmatprep.mubr.f32.mxu0 %v379_v61  ;;  %v142_v61 = vld [vmem:[%s17921_s1 + $0x278] sm:$0xff] }
 0x112   :  { %1892 = vmatmul.mubr.f32.gmra.mrb[90].mxu0 %v378_v62  ;;  %v150_v62 = vld [vmem:[%s17921_s1 + $0x2b8] sm:$0xff] }
 0x113   :  { %1896 = vmatprep.mubr.f32.mxu0 %v386_v63  ;;  %v149_v63 = vld [vmem:[%s17921_s1 + $0x2b0] sm:$0xff] }
 0x116   :  { %1897 = vmatmul.mubr.f32.gmra.mrb[92].mxu0 %v385_v0  ;;  %v157_v0 = vld [vmem:[%s17921_s1 + $0x2f0] sm:$0xff] }
 0x117   :  { %1901 = vmatprep.mubr.f32.mxu0 %v393_v1  ;;  %v156_v1 = vld [vmem:[%s17921_s1 + $0x2e8] sm:$0xff] }
 0x11a   :  { %1902 = vmatmul.mubr.f32.gmra.mrb[94].mxu0 %v392_v2  ;;  %v164_v2 = vld [vmem:[%s17921_s1 + $0x328] sm:$0xff] }
 0x11b   :  { %1906 = vmatprep.mubr.f32.mxu0 %v400_v4  ;;  %v163_v4 = vld [vmem:[%s17921_s1 + $0x320] sm:$0xff] }
 0x11e   :  { %1907 = vmatmul.mubr.f32.gmra.mrb[96].mxu0 %v399_v5  ;;  %v171_v5 = vld [vmem:[%s17921_s1 + $0x360] sm:$0xff] }
 0x11f   :  { %1911 = vmatprep.mubr.f32.mxu0 %v407_v6  ;;  %v170_v6 = vld [vmem:[%s17921_s1 + $0x358] sm:$0xff] }
 0x122   :  { %1912 = vmatmul.mubr.f32.gmra.mrb[98].mxu0 %v406_v7  ;;  %v178_v7 = vld [vmem:[%s17921_s1 + $0x398] sm:$0xff] }
 0x123   :  { %1916 = vmatprep.mubr.f32.mxu0 %v414_v8  ;;  %v177_v8 = vld [vmem:[%s17921_s1 + $0x390] sm:$0xff] }
 0x126   :  { %1917 = vmatmul.mubr.f32.gmra.mrb[100].mxu0 %v413_v9  ;;  %v185_v9 = vld [vmem:[%s17921_s1 + $0x3d0] sm:$0xff] }
 0x127   :  { %1921 = vmatprep.mubr.f32.mxu0 %v421_v10  ;;  %v184_v10 = vld [vmem:[%s17921_s1 + $0x3c8] sm:$0xff] }
 0x12a   :  { %1922 = vmatmul.mubr.f32.gmra.mrb[102].mxu0 %v420_v11  ;;  %v192_v11 = vld [vmem:[%s17921_s1 + $0x408] sm:$0xff] }
 0x12b   :  { %1926 = vmatprep.mubr.f32.mxu0 %v428_v12  ;;  %v191_v12 = vld [vmem:[%s17921_s1 + $0x400] sm:$0xff] }
 0x12e   :  { %1927 = vmatmul.mubr.f32.gmra.mrb[104].mxu0 %v427_v13  ;;  %v199_v13 = vld [vmem:[%s17921_s1 + $0x440] sm:$0xff] }
 0x12f   :  { %1931 = vmatprep.mubr.f32.mxu0 %v435_v14  ;;  %v198_v14 = vld [vmem:[%s17921_s1 + $0x438] sm:$0xff] }
 0x132   :  { %1932 = vmatmul.mubr.f32.gmra.mrb[106].mxu0 %v434_v15  ;;  %v206_v15 = vld [vmem:[%s17921_s1 + $0x478] sm:$0xff] }
 0x133   :  { %1936 = vmatprep.mubr.f32.mxu0 %v442_v16  ;;  %v205_v16 = vld [vmem:[%s17921_s1 + $0x470] sm:$0xff] }
 0x136   :  { %1937 = vmatmul.mubr.f32.gmra.mrb[108].mxu0 %v441_v17  ;;  %v213_v17 = vld [vmem:[%s17921_s1 + $0x4b0] sm:$0xff] }
 0x137   :  { %1941 = vmatprep.mubr.f32.mxu0 %v449_v18  ;;  %v212_v18 = vld [vmem:[%s17921_s1 + $0x4a8] sm:$0xff] }
 0x13a   :  { %1942 = vmatmul.mubr.f32.gmra.mrb[110].mxu0 %v448_v19  ;;  %v220_v19 = vld [vmem:[%s17921_s1 + $0x4e8] sm:$0xff] }
 0x13b   :  { %1946 = vmatprep.mubr.f32.mxu0 %v456_v20  ;;  %v219_v20 = vld [vmem:[%s17921_s1 + $0x4e0] sm:$0xff] }
 0x13e   :  { %1947 = vmatmul.mubr.f32.gmra.mrb[112].mxu0 %v455_v21  ;;  %v227_v21 = vld [vmem:[%s17921_s1 + $0x520] sm:$0xff] }
 0x13f   :  { %1951 = vmatprep.mubr.f32.mxu0 %v463_v22  ;;  %v226_v22 = vld [vmem:[%s17921_s1 + $0x518] sm:$0xff] }
 0x142   :  { %1952 = vmatmul.mubr.f32.gmra.mrb[114].mxu0 %v462_v23  ;;  %v234_v23 = vld [vmem:[%s17921_s1 + $0x558] sm:$0xff] }
 0x143   :  { %1956 = vmatprep.mubr.f32.mxu0 %v470_v24  ;;  %v233_v24 = vld [vmem:[%s17921_s1 + $0x550] sm:$0xff] }
 0x146   :  { %1957 = vmatmul.mubr.f32.gmra.mrb[116].mxu0 %v469_v25  ;;  %v241_v25 = vld [vmem:[%s17921_s1 + $0x590] sm:$0xff] }
 0x147   :  { %1961 = vmatprep.mubr.f32.mxu0 %v477_v26  ;;  %v1135_v26 = vld [vmem:[%s17920_s0 + $0x200] sm:$0xff] }
 0x14a   :  { %1962 = vmatmul.mubr.f32.gmra.mrb[118].mxu0 %v476_v27  ;;  %v1136_v27 = vld [vmem:[%s17920_s0 + $0x208] sm:$0xff] }
 0x14b   :  { %1966 = vmatprep.mubr.f32.mxu0 %v484_v28  ;;  %v240_v28 = vld [vmem:[%s17921_s1 + $0x588] sm:$0xff] }
 0x14e   :  { %1967 = vmatmul.mubr.f32.gmra.mrb[120].mxu0 %v483_v29  ;;  %v9788_v29 = vpack.c.bf16 %v1136_v27, %v1135_v26  ;;  %v1140_v26 = vld [vmem:[%s17920_s0 + $0x228] sm:$0xff]  ;;  %v589_v27 = vld [vmem:[%s17921_s1 + $0x1070] sm:$0xff] }
 0x14f   :  { %1971 = vmatprep.mubr.f32.mxu0 %v491_v30  ;;  %v248_v30 = vld [vmem:[%s17921_s1 + $0x5c8] sm:$0xff] }
 0x152   :  { %1972 = vmatmul.mubr.f32.gmra.mrb[122].mxu0 %v490_v31  ;;  %v247_v31 = vld [vmem:[%s17921_s1 + $0x5c0] sm:$0xff] }
 0x153   :  { %1976 = vmatprep.mubr.f32.mxu0 %v498_v32  ;;  %v255_v32 = vld [vmem:[%s17921_s1 + $0x600] sm:$0xff] }
 0x156   :  { %1977 = vmatmul.mubr.f32.gmra.mrb[124].mxu0 %v497_v33  ;;  %v254_v33 = vld [vmem:[%s17921_s1 + $0x5f8] sm:$0xff] }
 0x157   :  { %1981 = vmatprep.mubr.f32.mxu0 %v505_v34  ;;  %v262_v34 = vld [vmem:[%s17921_s1 + $0x638] sm:$0xff] }
 0x15a   :  { %1982 = vmatmul.mubr.f32.gmra.mrb[126].mxu0 %v504_v35  ;;  %v261_v35 = vld [vmem:[%s17921_s1 + $0x630] sm:$0xff] }
 0x15b   :  { %1986 = vmatprep.mubr.f32.mxu0 %v512_v36  ;;  %v269_v36 = vld [vmem:[%s17921_s1 + $0x670] sm:$0xff] }
 0x15e   :  { %1987 = vmatmul.mubr.f32.gmra.mrb[128].mxu0 %v511_v37  ;;  %v268_v37 = vld [vmem:[%s17921_s1 + $0x668] sm:$0xff] }
 0x15f   :  { %2451 = vmatprep.mubr.f32.mxu0 %v66_v38  ;;  %v276_v38 = vld [vmem:[%s17921_s1 + $0x6a8] sm:$0xff] }
 0x162   :  { %2452 = vmatmul.mubr.f32.vlgmr.msra.gmra.mrb[0].mxu0 %v65_v39  ;;  %v275_v39 = vld [vmem:[%s17921_s1 + $0x6a0] sm:$0xff] }
 0x163   :  { %2456 = vmatprep.mubr.f32.mxu0 %v73_v40  ;;  %9789 = vmatpush1.bf16.msra.mxu0 %v9788_v29  ;;  %v283_v40 = vld [vmem:[%s17921_s1 + $0x6e0] sm:$0xff] }
 0x164   :  { %9790 = vmatprep.subr.bf16.mxu0 %v17932_v3 }
 0x166   :  { %2457 = vmatmul.mubr.f32.gmra.mrb[2].mxu0 %v72_v41  ;;  %v282_v41 = vld [vmem:[%s17921_s1 + $0x6d8] sm:$0xff] }
 0x167   :  { %2461 = vmatprep.mubr.f32.mxu0 %v80_v42  ;;  %v290_v42 = vld [vmem:[%s17921_s1 + $0x718] sm:$0xff] }
 0x16a   :  { %2462 = vmatmul.mubr.f32.gmra.mrb[4].mxu0 %v79_v43  ;;  %v289_v43 = vld [vmem:[%s17921_s1 + $0x710] sm:$0xff] }
 0x16b   :  { %2466 = vmatprep.mubr.f32.mxu0 %v87_v44  ;;  %v297_v44 = vld [vmem:[%s17921_s1 + $0x750] sm:$0xff] }
 0x16e   :  { %2467 = vmatmul.mubr.f32.gmra.mrb[6].mxu0 %v86_v45  ;;  %v519_v45 = vld [vmem:[%s17921_s1 + $0xe40] sm:$0xff] }
 0x16f   :  { %2471 = vmatprep.mubr.f32.mxu0 %v94_v46  ;;  %v518_v46 = vld [vmem:[%s17921_s1 + $0xe38] sm:$0xff]  ;;  %1991 = vmatprep.mubr.f32.mxu1 %v519_v45  ;;  %v616_v45 = vld [vmem:[%s17921_s1 + $0x1148] sm:$0xff] }
 0x170   :  { %1992 = vmatmul.mubr.f32.vlgmr.msra.gmra.mrb[0].mxu1 %v518_v46  ;;  %v394_v46 = vld [vmem:[%s17921_s1 + $0xa58] sm:$0xff] }
 0x172   :  { %2472 = vmatmul.mubr.f32.gmra.mrb[8].mxu0 %v93_v47  ;;  %v296_v47 = vld [vmem:[%s17921_s1 + $0x748] sm:$0xff] }
 0x173   :  { %2476 = vmatprep.mubr.f32.mxu0 %v101_v48  ;;  %v304_v48 = vld [vmem:[%s17921_s1 + $0x788] sm:$0xff] }
 0x176   :  { %2477 = vmatmul.mubr.f32.gmra.mrb[10].mxu0 %v100_v49  ;;  %v1137_v49 = vld [vmem:[%s17920_s0 + $0x210] sm:$0xff] }
 0x177   :  { %2481 = vmatprep.mubr.f32.mxu0 %v108_v50  ;;  %v1138_v50 = vld [vmem:[%s17920_s0 + $0x218] sm:$0xff] }
 0x17a   :  { %2482 = vmatmul.mubr.f32.gmra.mrb[12].mxu0 %v107_v51  ;;  %v526_v51 = vld [vmem:[%s17921_s1 + $0xe78] sm:$0xff] }
 0x17b   :  { %2486 = vmatprep.mubr.f32.mxu0 %v115_v52  ;;  %v303_v52 = vld [vmem:[%s17921_s1 + $0x780] sm:$0xff]  ;;  %1996 = vmatprep.mubr.f32.mxu1 %v526_v51  ;;  %v409_v51 = vld [vmem:[%s17921_s1 + $0xad0] sm:$0xff] }
 0x17e   :  { %2487 = vmatmul.mubr.f32.gmra.mrb[14].mxu0 %v114_v53  ;;  %v9791_v53 = vpack.c.bf16 %v1138_v50, %v1137_v49  ;;  %v623_v49 = vld [vmem:[%s17921_s1 + $0x1180] sm:$0xff]  ;;  %v401_v50 = vld [vmem:[%s17921_s1 + $0xa90] sm:$0xff] }
 0x17f   :  { %2491 = vmatprep.mubr.f32.mxu0 %v122_v54  ;;  %v525_v54 = vld [vmem:[%s17921_s1 + $0xe70] sm:$0xff] }
 0x180   :  { %1997 = vmatmul.mubr.f32.gmra.mrb[2].mxu1 %v525_v54  ;;  %9792 = vmatpush1.bf16.msra.mxu0 %v9791_v53  ;;  %v630_v53 = vld [vmem:[%s17921_s1 + $0x11b8] sm:$0xff]  ;;  %v408_v54 = vld [vmem:[%s17921_s1 + $0xac8] sm:$0xff] }
 0x181   :  { %9793 = vmatprep.subr.bf16.mxu0 %v17932_v3 }
 0x182   :  { %2492 = vmatmul.mubr.f32.gmra.mrb[16].mxu0 %v121_v55  ;;  %v311_v55 = vld [vmem:[%s17921_s1 + $0x7c0] sm:$0xff] }
 0x183   :  { %2496 = vmatprep.mubr.f32.mxu0 %v129_v56  ;;  %v533_v56 = vld [vmem:[%s17921_s1 + $0xeb0] sm:$0xff] }
 0x184   :  { %2001 = vmatprep.mubr.f32.mxu1 %v533_v56  ;;  %v638_v56 = vld [vmem:[%s17921_s1 + $0x11f8] sm:$0xff] }
 0x186   :  { %2497 = vmatmul.mubr.f32.gmra.mrb[18].mxu0 %v128_v57  ;;  %v532_v57 = vld [vmem:[%s17921_s1 + $0xea8] sm:$0xff] }
 0x187   :  { %2501 = vmatprep.mubr.f32.mxu0 %v136_v58  ;;  %v310_v58 = vld [vmem:[%s17921_s1 + $0x7b8] sm:$0xff]  ;;  %2002 = vmatmul.mubr.f32.gmra.mrb[4].mxu1 %v532_v57  ;;  %v637_v57 = vld [vmem:[%s17921_s1 + $0x11f0] sm:$0xff] }
 0x18a   :  { %2502 = vmatmul.mubr.f32.gmra.mrb[20].mxu0 %v135_v59  ;;  %v318_v59 = vld [vmem:[%s17921_s1 + $0x7f8] sm:$0xff] }
 0x18b   :  { %2506 = vmatprep.mubr.f32.mxu0 %v143_v60  ;;  %v540_v60 = vld [vmem:[%s17921_s1 + $0xee8] sm:$0xff] }
 0x18c   :  { %2006 = vmatprep.mubr.f32.mxu1 %v540_v60  ;;  %v645_v60 = vld [vmem:[%s17921_s1 + $0x1230] sm:$0xff] }
 0x18e   :  { %2507 = vmatmul.mubr.f32.gmra.mrb[22].mxu0 %v142_v61  ;;  %v539_v61 = vld [vmem:[%s17921_s1 + $0xee0] sm:$0xff] }
 0x18f   :  { %2511 = vmatprep.mubr.f32.mxu0 %v150_v62  ;;  %v317_v62 = vld [vmem:[%s17921_s1 + $0x7f0] sm:$0xff]  ;;  %2007 = vmatmul.mubr.f32.gmra.mrb[6].mxu1 %v539_v61  ;;  %v644_v61 = vld [vmem:[%s17921_s1 + $0x1228] sm:$0xff] }
 0x192   :  { %2512 = vmatmul.mubr.f32.gmra.mrb[24].mxu0 %v149_v63  ;;  %v325_v63 = vld [vmem:[%s17921_s1 + $0x830] sm:$0xff] }
 0x193   :  { %2516 = vmatprep.mubr.f32.mxu0 %v157_v0  ;;  %v547_v0 = vld [vmem:[%s17921_s1 + $0xf20] sm:$0xff] }
 0x194   :  { %2011 = vmatprep.mubr.f32.mxu1 %v547_v0  ;;  %v1141_v0 = vld [vmem:[%s17920_s0 + $0x230] sm:$0xff] }
 0x196   :  { %2517 = vmatmul.mubr.f32.gmra.mrb[26].mxu0 %v156_v1  ;;  %v546_v1 = vld [vmem:[%s17921_s1 + $0xf18] sm:$0xff] }
 0x197   :  { %2521 = vmatprep.mubr.f32.mxu0 %v164_v2  ;;  %v324_v2 = vld [vmem:[%s17921_s1 + $0x828] sm:$0xff]  ;;  %2012 = vmatmul.mubr.f32.gmra.mrb[8].mxu1 %v546_v1  ;;  %v1142_v1 = vld [vmem:[%s17920_s0 + $0x238] sm:$0xff] }
 0x19a   :  { %2522 = vmatmul.mubr.f32.gmra.mrb[28].mxu0 %v163_v4  ;;  %v332_v4 = vld [vmem:[%s17921_s1 + $0x868] sm:$0xff] }
 0x19b   :  { %2526 = vmatprep.mubr.f32.mxu0 %v171_v5  ;;  %v554_v5 = vld [vmem:[%s17921_s1 + $0xf58] sm:$0xff] }
 0x19c   :  { %2016 = vmatprep.mubr.f32.mxu1 %v554_v5  ;;  %v9797_v5 = vpack.c.bf16 %v1142_v1, %v1141_v0  ;;  %v749_v0 = vld [vmem:[%s17921_s1 + $0x1570] sm:$0xff]  ;;  %v527_v1 = vld [vmem:[%s17921_s1 + $0xe80] sm:$0xff] }
 0x19e   :  { %2527 = vmatmul.mubr.f32.gmra.mrb[30].mxu0 %v170_v6  ;;  %v553_v6 = vld [vmem:[%s17921_s1 + $0xf50] sm:$0xff] }
 0x19f   :  { %2531 = vmatprep.mubr.f32.mxu0 %v178_v7  ;;  %v331_v7 = vld [vmem:[%s17921_s1 + $0x860] sm:$0xff]  ;;  %2017 = vmatmul.mubr.f32.gmra.mrb[10].mxu1 %v553_v6 }
 0x1a0   :  { %v651_v6 = vld [vmem:[%s17921_s1 + $0x1260] sm:$0xff] }
 0x1a2   :  { %2532 = vmatmul.mubr.f32.gmra.mrb[32].mxu0 %v177_v8  ;;  %v339_v8 = vld [vmem:[%s17921_s1 + $0x8a0] sm:$0xff] }
 0x1a3   :  { %2536 = vmatprep.mubr.f32.mxu0 %v185_v9  ;;  %v561_v9 = vld [vmem:[%s17921_s1 + $0xf90] sm:$0xff] }
 0x1a4   :  { %2021 = vmatprep.mubr.f32.mxu1 %v561_v9  ;;  %v658_v9 = vld [vmem:[%s17921_s1 + $0x1298] sm:$0xff] }
 0x1a6   :  { %2537 = vmatmul.mubr.f32.gmra.mrb[34].mxu0 %v184_v10  ;;  %v560_v10 = vld [vmem:[%s17921_s1 + $0xf88] sm:$0xff] }
 0x1a7   :  { %2541 = vmatprep.mubr.f32.mxu0 %v192_v11  ;;  %v338_v11 = vld [vmem:[%s17921_s1 + $0x898] sm:$0xff]  ;;  %2022 = vmatmul.mubr.f32.gmra.mrb[12].mxu1 %v560_v10  ;;  %v436_v10 = vld [vmem:[%s17921_s1 + $0xba8] sm:$0xff] }
 0x1aa   :  { %2542 = vmatmul.mubr.f32.gmra.mrb[36].mxu0 %v191_v12  ;;  %v346_v12 = vld [vmem:[%s17921_s1 + $0x8d8] sm:$0xff] }
 0x1ab   :  { %2546 = vmatprep.mubr.f32.mxu0 %v199_v13  ;;  %v568_v13 = vld [vmem:[%s17921_s1 + $0xfc8] sm:$0xff] }
 0x1ac   :  { %2026 = vmatprep.mubr.f32.mxu1 %v568_v13  ;;  %v665_v13 = vld [vmem:[%s17921_s1 + $0x12d0] sm:$0xff] }
 0x1ae   :  { %2547 = vmatmul.mubr.f32.gmra.mrb[38].mxu0 %v198_v14  ;;  %v567_v14 = vld [vmem:[%s17921_s1 + $0xfc0] sm:$0xff] }
 0x1af   :  { %2551 = vmatprep.mubr.f32.mxu0 %v206_v15  ;;  %v345_v15 = vld [vmem:[%s17921_s1 + $0x8d0] sm:$0xff]  ;;  %2027 = vmatmul.mubr.f32.gmra.mrb[14].mxu1 %v567_v14  ;;  %v443_v14 = vld [vmem:[%s17921_s1 + $0xbe0] sm:$0xff] }
 0x1b2   :  { %2552 = vmatmul.mubr.f32.gmra.mrb[40].mxu0 %v205_v16  ;;  %v353_v16 = vld [vmem:[%s17921_s1 + $0x910] sm:$0xff] }
 0x1b3   :  { %2556 = vmatprep.mubr.f32.mxu0 %v213_v17  ;;  %v575_v17 = vld [vmem:[%s17921_s1 + $0x1000] sm:$0xff] }
 0x1b4   :  { %2031 = vmatprep.mubr.f32.mxu1 %v575_v17  ;;  %v672_v17 = vld [vmem:[%s17921_s1 + $0x1308] sm:$0xff] }
 0x1b6   :  { %2557 = vmatmul.mubr.f32.gmra.mrb[42].mxu0 %v212_v18  ;;  %v574_v18 = vld [vmem:[%s17921_s1 + $0xff8] sm:$0xff] }
 0x1b7   :  { %2561 = vmatprep.mubr.f32.mxu0 %v220_v19  ;;  %v352_v19 = vld [vmem:[%s17921_s1 + $0x908] sm:$0xff]  ;;  %2032 = vmatmul.mubr.f32.gmra.mrb[16].mxu1 %v574_v18  ;;  %v450_v18 = vld [vmem:[%s17921_s1 + $0xc18] sm:$0xff] }
 0x1ba   :  { %2562 = vmatmul.mubr.f32.gmra.mrb[44].mxu0 %v219_v20  ;;  %v360_v20 = vld [vmem:[%s17921_s1 + $0x948] sm:$0xff] }
 0x1bb   :  { %2566 = vmatprep.mubr.f32.mxu0 %v227_v21  ;;  %v582_v21 = vld [vmem:[%s17921_s1 + $0x1038] sm:$0xff] }
 0x1bc   :  { %2036 = vmatprep.mubr.f32.mxu1 %v582_v21  ;;  %v679_v21 = vld [vmem:[%s17921_s1 + $0x1340] sm:$0xff] }
 0x1be   :  { %2567 = vmatmul.mubr.f32.gmra.mrb[46].mxu0 %v226_v22  ;;  %v581_v22 = vld [vmem:[%s17921_s1 + $0x1030] sm:$0xff] }
 0x1bf   :  { %2571 = vmatprep.mubr.f32.mxu0 %v234_v23  ;;  %v359_v23 = vld [vmem:[%s17921_s1 + $0x940] sm:$0xff]  ;;  %2037 = vmatmul.mubr.f32.gmra.mrb[18].mxu1 %v581_v22  ;;  %v457_v22 = vld [vmem:[%s17921_s1 + $0xc50] sm:$0xff] }
 0x1c0   :  { %2041 = vmatprep.mubr.f32.mxu1 %v589_v27  ;;  %v472_v27 = vld [vmem:[%s17921_s1 + $0xcc8] sm:$0xff] }
 0x1c2   :  { %2572 = vmatmul.mubr.f32.gmra.mrb[48].mxu0 %v233_v24  ;;  %v367_v24 = vld [vmem:[%s17921_s1 + $0x980] sm:$0xff] }
 0x1c3   :  { %2576 = vmatprep.mubr.f32.mxu0 %v241_v25  ;;  %v1139_v25 = vld [vmem:[%s17920_s0 + $0x220] sm:$0xff] }
 0x1c4   :  { %v9794_v29 = vpack.c.bf16 %v1140_v26, %v1139_v25  ;;  %v686_v25 = vld [vmem:[%s17921_s1 + $0x1378] sm:$0xff]  ;;  %v464_v26 = vld [vmem:[%s17921_s1 + $0xc88] sm:$0xff] }
 0x1c6   :  { %2577 = vmatmul.mubr.f32.gmra.mrb[50].mxu0 %v240_v28  ;;  %v366_v28 = vld [vmem:[%s17921_s1 + $0x978] sm:$0xff] }
 0x1c7   :  { %2581 = vmatprep.mubr.f32.mxu0 %v248_v30  ;;  %v588_v30 = vld [vmem:[%s17921_s1 + $0x1068] sm:$0xff]  ;;  %9795 = vmatpush1.bf16.msra.mxu0 %v9794_v29  ;;  %v693_v29 = vld [vmem:[%s17921_s1 + $0x13b0] sm:$0xff] }
 0x1c8   :  { %2042 = vmatmul.mubr.f32.gmra.mrb[20].mxu1 %v588_v30  ;;  %9796 = vmatprep.subr.bf16.mxu0 %v17932_v3  ;;  %v471_v30 = vld [vmem:[%s17921_s1 + $0xcc0] sm:$0xff] }
 0x1ca   :  { %2582 = vmatmul.mubr.f32.gmra.mrb[52].mxu0 %v247_v31  ;;  %v374_v31 = vld [vmem:[%s17921_s1 + $0x9b8] sm:$0xff] }
 0x1cb   :  { %2586 = vmatprep.mubr.f32.mxu0 %v255_v32  ;;  %v596_v32 = vld [vmem:[%s17921_s1 + $0x10a8] sm:$0xff]  ;;  %9798 = vmatpush1.bf16.msra.mxu0 %v9797_v5 }
 0x1cc   :  { %2046 = vmatprep.mubr.f32.mxu1 %v596_v32  ;;  %9799 = vmatprep.subr.bf16.mxu0 %v17932_v3  ;;  %v701_v32 = vld [vmem:[%s17921_s1 + $0x13f0] sm:$0xff]  ;;  %v756_v5 = vld [vmem:[%s17921_s1 + $0x15a8] sm:$0xff] }
 0x1ce   :  { %2587 = vmatmul.mubr.f32.gmra.mrb[54].mxu0 %v254_v33  ;;  %v595_v33 = vld [vmem:[%s17921_s1 + $0x10a0] sm:$0xff] }
 0x1cf   :  { %2591 = vmatprep.mubr.f32.mxu0 %v262_v34  ;;  %v373_v34 = vld [vmem:[%s17921_s1 + $0x9b0] sm:$0xff]  ;;  %2047 = vmatmul.mubr.f32.gmra.mrb[22].mxu1 %v595_v33  ;;  %v700_v33 = vld [vmem:[%s17921_s1 + $0x13e8] sm:$0xff] }
 0x1d2   :  { %2592 = vmatmul.mubr.f32.gmra.mrb[56].mxu0 %v261_v35  ;;  %v381_v35 = vld [vmem:[%s17921_s1 + $0x9f0] sm:$0xff] }
 0x1d3   :  { %2596 = vmatprep.mubr.f32.mxu0 %v269_v36  ;;  %v603_v36 = vld [vmem:[%s17921_s1 + $0x10e0] sm:$0xff] }
 0x1d4   :  { %2051 = vmatprep.mubr.f32.mxu1 %v603_v36  ;;  %v708_v36 = vld [vmem:[%s17921_s1 + $0x1428] sm:$0xff] }
 0x1d6   :  { %2597 = vmatmul.mubr.f32.gmra.mrb[58].mxu0 %v268_v37  ;;  %v602_v37 = vld [vmem:[%s17921_s1 + $0x10d8] sm:$0xff] }
 0x1d7   :  { %2601 = vmatprep.mubr.f32.mxu0 %v276_v38  ;;  %v380_v38 = vld [vmem:[%s17921_s1 + $0x9e8] sm:$0xff]  ;;  %2052 = vmatmul.mubr.f32.gmra.mrb[24].mxu1 %v602_v37  ;;  %v707_v37 = vld [vmem:[%s17921_s1 + $0x1420] sm:$0xff] }
 0x1da   :  { %2602 = vmatmul.mubr.f32.gmra.mrb[60].mxu0 %v275_v39  ;;  %v388_v39 = vld [vmem:[%s17921_s1 + $0xa28] sm:$0xff] }
 0x1db   :  { %2606 = vmatprep.mubr.f32.mxu0 %v283_v40  ;;  %v610_v40 = vld [vmem:[%s17921_s1 + $0x1118] sm:$0xff] }
 0x1dc   :  { %2056 = vmatprep.mubr.f32.mxu1 %v610_v40  ;;  %v1143_v40 = vld [vmem:[%s17920_s0 + $0x240] sm:$0xff] }
 0x1de   :  { %2607 = vmatmul.mubr.f32.gmra.mrb[62].mxu0 %v282_v41  ;;  %v609_v41 = vld [vmem:[%s17921_s1 + $0x1110] sm:$0xff] }
 0x1df   :  { %2611 = vmatprep.mubr.f32.mxu0 %v290_v42  ;;  %v387_v42 = vld [vmem:[%s17921_s1 + $0xa20] sm:$0xff]  ;;  %2057 = vmatmul.mubr.f32.gmra.mrb[26].mxu1 %v609_v41  ;;  %v1144_v41 = vld [vmem:[%s17920_s0 + $0x248] sm:$0xff] }
 0x1e2   :  { %2612 = vmatmul.mubr.f32.gmra.mrb[64].mxu0 %v289_v43  ;;  %v395_v43 = vld [vmem:[%s17921_s1 + $0xa60] sm:$0xff] }
 0x1e3   :  { %2616 = vmatprep.mubr.f32.mxu0 %v297_v44  ;;  %v617_v44 = vld [vmem:[%s17921_s1 + $0x1150] sm:$0xff] }
 0x1e4   :  { %2061 = vmatprep.mubr.f32.mxu1 %v617_v44  ;;  %v9800_v44 = vpack.c.bf16 %v1144_v41, %v1143_v40  ;;  %v812_v40 = vld [vmem:[%s17921_s1 + $0x1768] sm:$0xff]  ;;  %v590_v41 = vld [vmem:[%s17921_s1 + $0x1078] sm:$0xff] }
 0x1e5   :  { %2062 = vmatmul.mubr.f32.gmra.mrb[28].mxu1 %v616_v45  ;;  %v714_v45 = vld [vmem:[%s17921_s1 + $0x1458] sm:$0xff] }
 0x1e6   :  { %2617 = vmatmul.mubr.f32.gmra.mrb[66].mxu0 %v296_v47  ;;  %v402_v47 = vld [vmem:[%s17921_s1 + $0xa98] sm:$0xff] }
 0x1e7   :  { %2621 = vmatprep.mubr.f32.mxu0 %v304_v48  ;;  %v624_v48 = vld [vmem:[%s17921_s1 + $0x1188] sm:$0xff]  ;;  %9801 = vmatpush1.bf16.msra.mxu0 %v9800_v44  ;;  %v819_v44 = vld [vmem:[%s17921_s1 + $0x17a0] sm:$0xff] }
 0x1e8   :  { %2066 = vmatprep.mubr.f32.mxu1 %v624_v48  ;;  %v721_v48 = vld [vmem:[%s17921_s1 + $0x1490] sm:$0xff]  ;;  %9802 = vmatprep.subr.bf16.mxu0 %v17932_v3 }
 0x1e9   :  { %2067 = vmatmul.mubr.f32.gmra.mrb[30].mxu1 %v623_v49  ;;  %v499_v49 = vld [vmem:[%s17921_s1 + $0xda0] sm:$0xff] }
 0x1ea   :  { %2622 = vmatmul.mubr.f32.gmra.mrb[68].mxu0 %v303_v52  ;;  %v631_v52 = vld [vmem:[%s17921_s1 + $0x11c0] sm:$0xff] }
 0x1eb   :  { %2626 = vmatprep.mubr.f32.mxu0 %v311_v55  ;;  %2071 = vmatprep.mubr.f32.mxu1 %v631_v52  ;;  %v416_v55 = vld [vmem:[%s17921_s1 + $0xb08] sm:$0xff] }
 0x1ec   :  { %v728_v52 = vld [vmem:[%s17921_s1 + $0x14c8] sm:$0xff] }
 0x1ed   :  { %2072 = vmatmul.mubr.f32.gmra.mrb[32].mxu1 %v630_v53  ;;  %v506_v53 = vld [vmem:[%s17921_s1 + $0xdd8] sm:$0xff] }
 0x1ee   :  { %2627 = vmatmul.mubr.f32.gmra.mrb[70].mxu0 %v310_v58  ;;  %v415_v58 = vld [vmem:[%s17921_s1 + $0xb00] sm:$0xff]  ;;  %2076 = vmatprep.mubr.f32.mxu1 %v638_v56 }
 0x1ef   :  { %2631 = vmatprep.mubr.f32.mxu0 %v318_v59  ;;  %v423_v59 = vld [vmem:[%s17921_s1 + $0xb40] sm:$0xff] }
 0x1f0   :  { %v735_v56 = vld [vmem:[%s17921_s1 + $0x1500] sm:$0xff] }
 0x1f1   :  { %2077 = vmatmul.mubr.f32.gmra.mrb[34].mxu1 %v637_v57  ;;  %v513_v57 = vld [vmem:[%s17921_s1 + $0xe10] sm:$0xff] }
 0x1f2   :  { %2632 = vmatmul.mubr.f32.gmra.mrb[72].mxu0 %v317_v62  ;;  %v422_v62 = vld [vmem:[%s17921_s1 + $0xb38] sm:$0xff]  ;;  %2081 = vmatprep.mubr.f32.mxu1 %v645_v60 }
 0x1f3   :  { %2636 = vmatprep.mubr.f32.mxu0 %v325_v63  ;;  %v430_v63 = vld [vmem:[%s17921_s1 + $0xb78] sm:$0xff] }
 0x1f4   :  { %v742_v60 = vld [vmem:[%s17921_s1 + $0x1538] sm:$0xff] }
 0x1f5   :  { %2082 = vmatmul.mubr.f32.gmra.mrb[36].mxu1 %v644_v61  ;;  %v520_v61 = vld [vmem:[%s17921_s1 + $0xe48] sm:$0xff] }
 0x1f6   :  { %2637 = vmatmul.mubr.f32.gmra.mrb[74].mxu0 %v324_v2  ;;  %v652_v2 = vld [vmem:[%s17921_s1 + $0x1268] sm:$0xff] }
 0x1f7   :  { %2641 = vmatprep.mubr.f32.mxu0 %v332_v4  ;;  %v429_v4 = vld [vmem:[%s17921_s1 + $0xb70] sm:$0xff]  ;;  %2086 = vmatprep.mubr.f32.mxu1 %v652_v2  ;;  %v535_v2 = vld [vmem:[%s17921_s1 + $0xec0] sm:$0xff] }
 0x1f9   :  { %2087 = vmatmul.mubr.f32.gmra.mrb[38].mxu1 %v651_v6  ;;  %v534_v6 = vld [vmem:[%s17921_s1 + $0xeb8] sm:$0xff] }
 0x1fa   :  { %2642 = vmatmul.mubr.f32.gmra.mrb[76].mxu0 %v331_v7  ;;  %v437_v7 = vld [vmem:[%s17921_s1 + $0xbb0] sm:$0xff] }
 0x1fb   :  { %2646 = vmatprep.mubr.f32.mxu0 %v339_v8  ;;  %v659_v8 = vld [vmem:[%s17921_s1 + $0x12a0] sm:$0xff] }
 0x1fc   :  { %2091 = vmatprep.mubr.f32.mxu1 %v659_v8  ;;  %v764_v8 = vld [vmem:[%s17921_s1 + $0x15e8] sm:$0xff] }
 0x1fd   :  { %2092 = vmatmul.mubr.f32.gmra.mrb[40].mxu1 %v658_v9  ;;  %v763_v9 = vld [vmem:[%s17921_s1 + $0x15e0] sm:$0xff] }
 0x1fe   :  { %2647 = vmatmul.mubr.f32.gmra.mrb[78].mxu0 %v338_v11  ;;  %v444_v11 = vld [vmem:[%s17921_s1 + $0xbe8] sm:$0xff] }
 0x1ff   :  { %2651 = vmatprep.mubr.f32.mxu0 %v346_v12  ;;  %v666_v12 = vld [vmem:[%s17921_s1 + $0x12d8] sm:$0xff] }
 0x200   :  { %2096 = vmatprep.mubr.f32.mxu1 %v666_v12  ;;  %v771_v12 = vld [vmem:[%s17921_s1 + $0x1620] sm:$0xff] }
 0x201   :  { %2097 = vmatmul.mubr.f32.gmra.mrb[42].mxu1 %v665_v13  ;;  %v770_v13 = vld [vmem:[%s17921_s1 + $0x1618] sm:$0xff] }
 0x202   :  { %2652 = vmatmul.mubr.f32.gmra.mrb[80].mxu0 %v345_v15  ;;  %v451_v15 = vld [vmem:[%s17921_s1 + $0xc20] sm:$0xff] }
 0x203   :  { %2656 = vmatprep.mubr.f32.mxu0 %v353_v16  ;;  %v673_v16 = vld [vmem:[%s17921_s1 + $0x1310] sm:$0xff] }
 0x204   :  { %2101 = vmatprep.mubr.f32.mxu1 %v673_v16  ;;  %v1145_v16 = vld [vmem:[%s17920_s0 + $0x250] sm:$0xff] }
 0x205   :  { %2102 = vmatmul.mubr.f32.gmra.mrb[44].mxu1 %v672_v17  ;;  %v1146_v17 = vld [vmem:[%s17920_s0 + $0x258] sm:$0xff] }
 0x206   :  { %2657 = vmatmul.mubr.f32.gmra.mrb[82].mxu0 %v352_v19  ;;  %v458_v19 = vld [vmem:[%s17921_s1 + $0xc58] sm:$0xff] }
 0x207   :  { %2661 = vmatprep.mubr.f32.mxu0 %v360_v20  ;;  %v680_v20 = vld [vmem:[%s17921_s1 + $0x1348] sm:$0xff] }
 0x208   :  { %2106 = vmatprep.mubr.f32.mxu1 %v680_v20  ;;  %v9803_v20 = vpack.c.bf16 %v1146_v17, %v1145_v16  ;;  %v875_v16 = vld [vmem:[%s17921_s1 + $0x1960] sm:$0xff]  ;;  %v653_v17 = vld [vmem:[%s17921_s1 + $0x1270] sm:$0xff] }
 0x209   :  { %2107 = vmatmul.mubr.f32.gmra.mrb[46].mxu1 %v679_v21  ;;  %v777_v21 = vld [vmem:[%s17921_s1 + $0x1650] sm:$0xff] }
 0x20a   :  { %2662 = vmatmul.mubr.f32.gmra.mrb[84].mxu0 %v359_v23  ;;  %v465_v23 = vld [vmem:[%s17921_s1 + $0xc90] sm:$0xff] }
 0x20b   :  { %2666 = vmatprep.mubr.f32.mxu0 %v367_v24  ;;  %v687_v24 = vld [vmem:[%s17921_s1 + $0x1380] sm:$0xff]  ;;  %9804 = vmatpush1.bf16.msra.mxu0 %v9803_v20  ;;  %v882_v20 = vld [vmem:[%s17921_s1 + $0x1998] sm:$0xff] }
 0x20c   :  { %2111 = vmatprep.mubr.f32.mxu1 %v687_v24  ;;  %v784_v24 = vld [vmem:[%s17921_s1 + $0x1688] sm:$0xff]  ;;  %9805 = vmatprep.subr.bf16.mxu0 %v17932_v3 }
 0x20d   :  { %2112 = vmatmul.mubr.f32.gmra.mrb[48].mxu1 %v686_v25  ;;  %v562_v25 = vld [vmem:[%s17921_s1 + $0xf98] sm:$0xff] }
 0x20e   :  { %2667 = vmatmul.mubr.f32.gmra.mrb[86].mxu0 %v366_v28  ;;  %v694_v28 = vld [vmem:[%s17921_s1 + $0x13b8] sm:$0xff] }
 0x20f   :  { %2671 = vmatprep.mubr.f32.mxu0 %v374_v31  ;;  %2116 = vmatprep.mubr.f32.mxu1 %v694_v28  ;;  %v479_v31 = vld [vmem:[%s17921_s1 + $0xd00] sm:$0xff] }
 0x210   :  { %v791_v28 = vld [vmem:[%s17921_s1 + $0x16c0] sm:$0xff] }
 0x211   :  { %2117 = vmatmul.mubr.f32.gmra.mrb[50].mxu1 %v693_v29  ;;  %v569_v29 = vld [vmem:[%s17921_s1 + $0xfd0] sm:$0xff] }
 0x212   :  { %2672 = vmatmul.mubr.f32.gmra.mrb[88].mxu0 %v373_v34  ;;  %v478_v34 = vld [vmem:[%s17921_s1 + $0xcf8] sm:$0xff]  ;;  %2121 = vmatprep.mubr.f32.mxu1 %v701_v32 }
 0x213   :  { %2676 = vmatprep.mubr.f32.mxu0 %v381_v35  ;;  %v486_v35 = vld [vmem:[%s17921_s1 + $0xd38] sm:$0xff] }
 0x214   :  { %v798_v32 = vld [vmem:[%s17921_s1 + $0x16f8] sm:$0xff] }
 0x215   :  { %2122 = vmatmul.mubr.f32.gmra.mrb[52].mxu1 %v700_v33  ;;  %v576_v33 = vld [vmem:[%s17921_s1 + $0x1008] sm:$0xff] }
 0x216   :  { %2677 = vmatmul.mubr.f32.gmra.mrb[90].mxu0 %v380_v38  ;;  %v485_v38 = vld [vmem:[%s17921_s1 + $0xd30] sm:$0xff]  ;;  %2126 = vmatprep.mubr.f32.mxu1 %v708_v36 }
 0x217   :  { %2681 = vmatprep.mubr.f32.mxu0 %v388_v39  ;;  %v493_v39 = vld [vmem:[%s17921_s1 + $0xd70] sm:$0xff] }
 0x218   :  { %v805_v36 = vld [vmem:[%s17921_s1 + $0x1730] sm:$0xff] }
 0x219   :  { %2127 = vmatmul.mubr.f32.gmra.mrb[54].mxu1 %v707_v37  ;;  %v583_v37 = vld [vmem:[%s17921_s1 + $0x1040] sm:$0xff] }
 0x21a   :  { %2682 = vmatmul.mubr.f32.gmra.mrb[92].mxu0 %v387_v42  ;;  %v715_v42 = vld [vmem:[%s17921_s1 + $0x1460] sm:$0xff] }
 0x21b   :  { %2686 = vmatprep.mubr.f32.mxu0 %v395_v43  ;;  %v492_v43 = vld [vmem:[%s17921_s1 + $0xd68] sm:$0xff]  ;;  %2131 = vmatprep.mubr.f32.mxu1 %v715_v42  ;;  %v598_v42 = vld [vmem:[%s17921_s1 + $0x10b8] sm:$0xff] }
 0x21d   :  { %2132 = vmatmul.mubr.f32.gmra.mrb[56].mxu1 %v714_v45  ;;  %v597_v45 = vld [vmem:[%s17921_s1 + $0x10b0] sm:$0xff] }
 0x21e   :  { %2687 = vmatmul.mubr.f32.gmra.mrb[94].mxu0 %v394_v46  ;;  %v500_v46 = vld [vmem:[%s17921_s1 + $0xda8] sm:$0xff] }
 0x21f   :  { %2691 = vmatprep.mubr.f32.mxu0 %v402_v47  ;;  %v722_v47 = vld [vmem:[%s17921_s1 + $0x1498] sm:$0xff] }
 0x220   :  { %2136 = vmatprep.mubr.f32.mxu1 %v722_v47  ;;  %v827_v47 = vld [vmem:[%s17921_s1 + $0x17e0] sm:$0xff] }
 0x221   :  { %2137 = vmatmul.mubr.f32.gmra.mrb[58].mxu1 %v721_v48  ;;  %v826_v48 = vld [vmem:[%s17921_s1 + $0x17d8] sm:$0xff] }
 0x222   :  { %2692 = vmatmul.mubr.f32.gmra.mrb[96].mxu0 %v401_v50  ;;  %v507_v50 = vld [vmem:[%s17921_s1 + $0xde0] sm:$0xff] }
 0x223   :  { %2696 = vmatprep.mubr.f32.mxu0 %v409_v51  ;;  %v729_v51 = vld [vmem:[%s17921_s1 + $0x14d0] sm:$0xff] }
 0x224   :  { %2141 = vmatprep.mubr.f32.mxu1 %v729_v51  ;;  %v834_v51 = vld [vmem:[%s17921_s1 + $0x1818] sm:$0xff] }
 0x225   :  { %2142 = vmatmul.mubr.f32.gmra.mrb[60].mxu1 %v728_v52  ;;  %v833_v52 = vld [vmem:[%s17921_s1 + $0x1810] sm:$0xff] }
 0x226   :  { %2697 = vmatmul.mubr.f32.gmra.mrb[98].mxu0 %v408_v54  ;;  %v514_v54 = vld [vmem:[%s17921_s1 + $0xe18] sm:$0xff] }
 0x227   :  { %2701 = vmatprep.mubr.f32.mxu0 %v416_v55  ;;  %v736_v55 = vld [vmem:[%s17921_s1 + $0x1508] sm:$0xff] }
 0x228   :  { %2146 = vmatprep.mubr.f32.mxu1 %v736_v55  ;;  %v1147_v55 = vld [vmem:[%s17920_s0 + $0x260] sm:$0xff] }
 0x229   :  { %2147 = vmatmul.mubr.f32.gmra.mrb[62].mxu1 %v735_v56  ;;  %v1148_v56 = vld [vmem:[%s17920_s0 + $0x268] sm:$0xff] }
 0x22a   :  { %2702 = vmatmul.mubr.f32.gmra.mrb[100].mxu0 %v415_v58  ;;  %v521_v58 = vld [vmem:[%s17921_s1 + $0xe50] sm:$0xff] }
 0x22b   :  { %2706 = vmatprep.mubr.f32.mxu0 %v423_v59  ;;  %v743_v59 = vld [vmem:[%s17921_s1 + $0x1540] sm:$0xff] }
 0x22c   :  { %2151 = vmatprep.mubr.f32.mxu1 %v743_v59  ;;  %v9806_v59 = vpack.c.bf16 %v1148_v56, %v1147_v55  ;;  %v709_v55 = vld [vmem:[%s17921_s1 + $0x1430] sm:$0xff] }
 0x22d   :  { %2152 = vmatmul.mubr.f32.gmra.mrb[64].mxu1 %v742_v60  ;;  %v840_v60 = vld [vmem:[%s17921_s1 + $0x1848] sm:$0xff] }
 0x22e   :  { %2707 = vmatmul.mubr.f32.gmra.mrb[102].mxu0 %v422_v62  ;;  %v528_v62 = vld [vmem:[%s17921_s1 + $0xe88] sm:$0xff] }
 0x22f   :  { %2711 = vmatprep.mubr.f32.mxu0 %v430_v63  ;;  %v750_v63 = vld [vmem:[%s17921_s1 + $0x1578] sm:$0xff]  ;;  %9807 = vmatpush1.bf16.msra.mxu0 %v9806_v59 }
 0x230   :  { %2156 = vmatprep.mubr.f32.mxu1 %v750_v63  ;;  %v847_v63 = vld [vmem:[%s17921_s1 + $0x1880] sm:$0xff]  ;;  %9808 = vmatprep.subr.bf16.mxu0 %v17932_v3 }
 0x231   :  { %2157 = vmatmul.mubr.f32.gmra.mrb[66].mxu1 %v749_v0  ;;  %v625_v0 = vld [vmem:[%s17921_s1 + $0x1190] sm:$0xff] }
 0x232   :  { %2712 = vmatmul.mubr.f32.gmra.mrb[104].mxu0 %v429_v4  ;;  %v757_v4 = vld [vmem:[%s17921_s1 + $0x15b0] sm:$0xff] }
 0x233   :  { %2716 = vmatprep.mubr.f32.mxu0 %v437_v7  ;;  %2161 = vmatprep.mubr.f32.mxu1 %v757_v4  ;;  %v542_v7 = vld [vmem:[%s17921_s1 + $0xef8] sm:$0xff] }
 0x234   :  { %v854_v4 = vld [vmem:[%s17921_s1 + $0x18b8] sm:$0xff] }
 0x235   :  { %2162 = vmatmul.mubr.f32.gmra.mrb[68].mxu1 %v756_v5  ;;  %v632_v5 = vld [vmem:[%s17921_s1 + $0x11c8] sm:$0xff] }
 0x236   :  { %2717 = vmatmul.mubr.f32.gmra.mrb[106].mxu0 %v436_v10  ;;  %v541_v10 = vld [vmem:[%s17921_s1 + $0xef0] sm:$0xff]  ;;  %2166 = vmatprep.mubr.f32.mxu1 %v764_v8 }
 0x237   :  { %2721 = vmatprep.mubr.f32.mxu0 %v444_v11  ;;  %v549_v11 = vld [vmem:[%s17921_s1 + $0xf30] sm:$0xff] }
 0x238   :  { %v861_v8 = vld [vmem:[%s17921_s1 + $0x18f0] sm:$0xff] }
 0x239   :  { %2167 = vmatmul.mubr.f32.gmra.mrb[70].mxu1 %v763_v9  ;;  %v639_v9 = vld [vmem:[%s17921_s1 + $0x1200] sm:$0xff] }
 0x23a   :  { %2722 = vmatmul.mubr.f32.gmra.mrb[108].mxu0 %v443_v14  ;;  %v548_v14 = vld [vmem:[%s17921_s1 + $0xf28] sm:$0xff]  ;;  %2171 = vmatprep.mubr.f32.mxu1 %v771_v12 }
 0x23b   :  { %2726 = vmatprep.mubr.f32.mxu0 %v451_v15  ;;  %v556_v15 = vld [vmem:[%s17921_s1 + $0xf68] sm:$0xff] }
 0x23c   :  { %v868_v12 = vld [vmem:[%s17921_s1 + $0x1928] sm:$0xff] }
 0x23d   :  { %2172 = vmatmul.mubr.f32.gmra.mrb[72].mxu1 %v770_v13  ;;  %v646_v13 = vld [vmem:[%s17921_s1 + $0x1238] sm:$0xff] }
 0x23e   :  { %2727 = vmatmul.mubr.f32.gmra.mrb[110].mxu0 %v450_v18  ;;  %v778_v18 = vld [vmem:[%s17921_s1 + $0x1658] sm:$0xff] }
 0x23f   :  { %2731 = vmatprep.mubr.f32.mxu0 %v458_v19  ;;  %v555_v19 = vld [vmem:[%s17921_s1 + $0xf60] sm:$0xff]  ;;  %2176 = vmatprep.mubr.f32.mxu1 %v778_v18  ;;  %v661_v18 = vld [vmem:[%s17921_s1 + $0x12b0] sm:$0xff] }
 0x241   :  { %2177 = vmatmul.mubr.f32.gmra.mrb[74].mxu1 %v777_v21  ;;  %v660_v21 = vld [vmem:[%s17921_s1 + $0x12a8] sm:$0xff] }
 0x242   :  { %2732 = vmatmul.mubr.f32.gmra.mrb[112].mxu0 %v457_v22  ;;  %v563_v22 = vld [vmem:[%s17921_s1 + $0xfa0] sm:$0xff] }
 0x243   :  { %2736 = vmatprep.mubr.f32.mxu0 %v465_v23  ;;  %v785_v23 = vld [vmem:[%s17921_s1 + $0x1690] sm:$0xff] }
 0x244   :  { %2181 = vmatprep.mubr.f32.mxu1 %v785_v23  ;;  %v890_v23 = vld [vmem:[%s17921_s1 + $0x19d8] sm:$0xff] }
 0x245   :  { %2182 = vmatmul.mubr.f32.gmra.mrb[76].mxu1 %v784_v24  ;;  %v889_v24 = vld [vmem:[%s17921_s1 + $0x19d0] sm:$0xff] }
 0x246   :  { %2737 = vmatmul.mubr.f32.gmra.mrb[114].mxu0 %v464_v26  ;;  %v570_v26 = vld [vmem:[%s17921_s1 + $0xfd8] sm:$0xff] }
 0x247   :  { %2741 = vmatprep.mubr.f32.mxu0 %v472_v27  ;;  %v792_v27 = vld [vmem:[%s17921_s1 + $0x16c8] sm:$0xff] }
 0x248   :  { %2186 = vmatprep.mubr.f32.mxu1 %v792_v27  ;;  %v897_v27 = vld [vmem:[%s17921_s1 + $0x1a10] sm:$0xff] }
 0x249   :  { %2187 = vmatmul.mubr.f32.gmra.mrb[78].mxu1 %v791_v28  ;;  %v896_v28 = vld [vmem:[%s17921_s1 + $0x1a08] sm:$0xff] }
 0x24a   :  { %2742 = vmatmul.mubr.f32.gmra.mrb[116].mxu0 %v471_v30  ;;  %v577_v30 = vld [vmem:[%s17921_s1 + $0x1010] sm:$0xff] }
 0x24b   :  { %2746 = vmatprep.mubr.f32.mxu0 %v479_v31  ;;  %v799_v31 = vld [vmem:[%s17921_s1 + $0x1700] sm:$0xff] }
 0x24c   :  { %2191 = vmatprep.mubr.f32.mxu1 %v799_v31  ;;  %v1149_v31 = vld [vmem:[%s17920_s0 + $0x270] sm:$0xff] }
 0x24d   :  { %2192 = vmatmul.mubr.f32.gmra.mrb[80].mxu1 %v798_v32  ;;  %v1150_v32 = vld [vmem:[%s17920_s0 + $0x278] sm:$0xff] }
 0x24e   :  { %2747 = vmatmul.mubr.f32.gmra.mrb[118].mxu0 %v478_v34  ;;  %v584_v34 = vld [vmem:[%s17921_s1 + $0x1048] sm:$0xff] }
 0x24f   :  { %2751 = vmatprep.mubr.f32.mxu0 %v486_v35  ;;  %v806_v35 = vld [vmem:[%s17921_s1 + $0x1738] sm:$0xff] }
 0x250   :  { %2196 = vmatprep.mubr.f32.mxu1 %v806_v35  ;;  %v9809_v35 = vpack.c.bf16 %v1150_v32, %v1149_v31  ;;  %v967_v31 = vld [vmem:[%s17921_s1 + $0x1c40] sm:$0xff]  ;;  %v744_v32 = vld [vmem:[%s17921_s1 + $0x1548] sm:$0xff] }
 0x251   :  { %2197 = vmatmul.mubr.f32.gmra.mrb[82].mxu1 %v805_v36  ;;  %v903_v36 = vld [vmem:[%s17921_s1 + $0x1a40] sm:$0xff] }
 0x252   :  { %2752 = vmatmul.mubr.f32.gmra.mrb[120].mxu0 %v485_v38  ;;  %v591_v38 = vld [vmem:[%s17921_s1 + $0x1080] sm:$0xff] }
 0x253   :  { %2756 = vmatprep.mubr.f32.mxu0 %v493_v39  ;;  %v813_v39 = vld [vmem:[%s17921_s1 + $0x1770] sm:$0xff]  ;;  %9810 = vmatpush1.bf16.msra.mxu0 %v9809_v35  ;;  %v966_v35 = vld [vmem:[%s17921_s1 + $0x1c38] sm:$0xff] }
 0x254   :  { %2201 = vmatprep.mubr.f32.mxu1 %v813_v39  ;;  %v910_v39 = vld [vmem:[%s17921_s1 + $0x1a78] sm:$0xff]  ;;  %9811 = vmatprep.subr.bf16.mxu0 %v17932_v3 }
 0x255   :  { %2202 = vmatmul.mubr.f32.gmra.mrb[84].mxu1 %v812_v40  ;;  %v688_v40 = vld [vmem:[%s17921_s1 + $0x1388] sm:$0xff] }
 0x256   :  { %2757 = vmatmul.mubr.f32.gmra.mrb[122].mxu0 %v492_v43  ;;  %v820_v43 = vld [vmem:[%s17921_s1 + $0x17a8] sm:$0xff] }
 0x257   :  { %2761 = vmatprep.mubr.f32.mxu0 %v500_v46  ;;  %2206 = vmatprep.mubr.f32.mxu1 %v820_v43  ;;  %v605_v46 = vld [vmem:[%s17921_s1 + $0x10f0] sm:$0xff] }
 0x258   :  { %v917_v43 = vld [vmem:[%s17921_s1 + $0x1ab0] sm:$0xff] }
 0x259   :  { %2207 = vmatmul.mubr.f32.gmra.mrb[86].mxu1 %v819_v44  ;;  %v695_v44 = vld [vmem:[%s17921_s1 + $0x13c0] sm:$0xff] }
 0x25a   :  { %2762 = vmatmul.mubr.f32.gmra.mrb[124].mxu0 %v499_v49  ;;  %v604_v49 = vld [vmem:[%s17921_s1 + $0x10e8] sm:$0xff]  ;;  %2211 = vmatprep.mubr.f32.mxu1 %v827_v47  ;;  %v12175_v47 = vpop.f32.mrb[0].mxu1 }
 0x25b   :  { %2766 = vmatprep.mubr.f32.mxu0 %v507_v50  ;;  %v612_v50 = vld [vmem:[%s17921_s1 + $0x1128] sm:$0xff]  ;;  %18038 = vst [vmem:[#allocation8_spill] sm:$0xff] %v12175_v47 }
 0x25d   :  { %2212 = vmatmul.mubr.f32.gmra.mrb[88].mxu1 %v826_v48  ;;  %v924_v48 = vld [vmem:[%s17921_s1 + $0x1ae8] sm:$0xff] }
 0x25e   :  { %2767 = vmatmul.mubr.f32.gmra.mrb[126].mxu0 %v506_v53  ;;  %v611_v53 = vld [vmem:[%s17921_s1 + $0x1120] sm:$0xff]  ;;  %2216 = vmatprep.mubr.f32.mxu1 %v834_v51  ;;  %v710_v51 = vld [vmem:[%s17921_s1 + $0x1438] sm:$0xff] }
 0x25f   :  { %2771 = vmatprep.mubr.f32.mxu0 %v514_v54  ;;  %v619_v54 = vld [vmem:[%s17921_s1 + $0x1160] sm:$0xff] }
 0x261   :  { %2217 = vmatmul.mubr.f32.gmra.mrb[90].mxu1 %v833_v52 }
 0x262   :  { %2772 = vmatmul.mubr.f32.gmra.mrb[128].mxu0 %v513_v57  ;;  %v841_v57 = vld [vmem:[%s17921_s1 + $0x1850] sm:$0xff] }
 0x263   :  { %2776 = vmatprep.mubr.f32.mxu0 %v521_v58  ;;  %v618_v58 = vld [vmem:[%s17921_s1 + $0x1158] sm:$0xff]  ;;  %2221 = vmatprep.mubr.f32.mxu1 %v841_v57  ;;  %v717_v57 = vld [vmem:[%s17921_s1 + $0x1470] sm:$0xff] }
 0x265   :  { %2222 = vmatmul.mubr.f32.gmra.mrb[92].mxu1 %v840_v60 }
 0x266   :  { %2777 = vmatmul.mubr.f32.gmra.mrb[130].mxu0 %v520_v61  ;;  %v626_v61 = vld [vmem:[%s17921_s1 + $0x1198] sm:$0xff] }
 0x267   :  { %2781 = vmatprep.mubr.f32.mxu0 %v528_v62  ;;  %v848_v62 = vld [vmem:[%s17921_s1 + $0x1888] sm:$0xff] }
 0x268   :  { %2226 = vmatprep.mubr.f32.mxu1 %v848_v62  ;;  %v938_v62 = vld [vmem:[%s17921_s1 + $0x1b58] sm:$0xff] }
 0x269   :  { %2227 = vmatmul.mubr.f32.gmra.mrb[94].mxu1 %v847_v63  ;;  %v716_v63 = vld [vmem:[%s17921_s1 + $0x1468] sm:$0xff] }
 0x26a   :  { %2782 = vmatmul.mubr.f32.gmra.mrb[132].mxu0 %v527_v1  ;;  %v633_v1 = vld [vmem:[%s17921_s1 + $0x11d0] sm:$0xff] }
 0x26b   :  { %2786 = vmatprep.mubr.f32.mxu0 %v535_v2  ;;  %v855_v2 = vld [vmem:[%s17921_s1 + $0x18c0] sm:$0xff] }
 0x26c   :  { %2231 = vmatprep.mubr.f32.mxu1 %v855_v2 }
 0x26d   :  { %2232 = vmatmul.mubr.f32.gmra.mrb[96].mxu1 %v854_v4 }
 0x26e   :  { %2787 = vmatmul.mubr.f32.gmra.mrb[134].mxu0 %v534_v6  ;;  %v640_v6 = vld [vmem:[%s17921_s1 + $0x1208] sm:$0xff] }
 0x26f   :  { %2791 = vmatprep.mubr.f32.mxu0 %v542_v7  ;;  %v862_v7 = vld [vmem:[%s17921_s1 + $0x18f8] sm:$0xff] }
 0x270   :  { %2236 = vmatprep.mubr.f32.mxu1 %v862_v7  ;;  %v945_v7 = vld [vmem:[%s17921_s1 + $0x1b90] sm:$0xff] }
 0x271   :  { %2237 = vmatmul.mubr.f32.gmra.mrb[98].mxu1 %v861_v8  ;;  %v723_v8 = vld [vmem:[%s17921_s1 + $0x14a0] sm:$0xff] }
 0x272   :  { %2792 = vmatmul.mubr.f32.gmra.mrb[136].mxu0 %v541_v10  ;;  %v647_v10 = vld [vmem:[%s17921_s1 + $0x1240] sm:$0xff] }
 0x273   :  { %2796 = vmatprep.mubr.f32.mxu0 %v549_v11  ;;  %v869_v11 = vld [vmem:[%s17921_s1 + $0x1930] sm:$0xff] }
 0x274   :  { %2241 = vmatprep.mubr.f32.mxu1 %v869_v11 }
 0x275   :  { %2242 = vmatmul.mubr.f32.gmra.mrb[100].mxu1 %v868_v12 }
 0x276   :  { %2797 = vmatmul.mubr.f32.gmra.mrb[138].mxu0 %v548_v14  ;;  %v654_v14 = vld [vmem:[%s17921_s1 + $0x1278] sm:$0xff] }
 0x277   :  { %2801 = vmatprep.mubr.f32.mxu0 %v556_v15  ;;  %v876_v15 = vld [vmem:[%s17921_s1 + $0x1968] sm:$0xff] }
 0x278   :  { %2246 = vmatprep.mubr.f32.mxu1 %v876_v15  ;;  %v952_v15 = vld [vmem:[%s17921_s1 + $0x1bc8] sm:$0xff] }
 0x279   :  { %2247 = vmatmul.mubr.f32.gmra.mrb[102].mxu1 %v875_v16  ;;  %v730_v16 = vld [vmem:[%s17921_s1 + $0x14d8] sm:$0xff] }
 0x27a   :  { %2802 = vmatmul.mubr.f32.gmra.mrb[140].mxu0 %v555_v19  ;;  %v883_v19 = vld [vmem:[%s17921_s1 + $0x19a0] sm:$0xff] }
 0x27b   :  { %2806 = vmatprep.mubr.f32.mxu0 %v563_v22  ;;  %2251 = vmatprep.mubr.f32.mxu1 %v883_v19  ;;  %v668_v22 = vld [vmem:[%s17921_s1 + $0x12e8] sm:$0xff] }
 0x27d   :  { %2252 = vmatmul.mubr.f32.gmra.mrb[104].mxu1 %v882_v20 }
 0x27e   :  { %2807 = vmatmul.mubr.f32.gmra.mrb[142].mxu0 %v562_v25  ;;  %v667_v25 = vld [vmem:[%s17921_s1 + $0x12e0] sm:$0xff]  ;;  %2256 = vmatprep.mubr.f32.mxu1 %v890_v23 }
 0x27f   :  { %2811 = vmatprep.mubr.f32.mxu0 %v570_v26  ;;  %v675_v26 = vld [vmem:[%s17921_s1 + $0x1320] sm:$0xff] }
 0x280   :  { %v959_v23 = vld [vmem:[%s17921_s1 + $0x1c00] sm:$0xff] }
 0x281   :  { %2257 = vmatmul.mubr.f32.gmra.mrb[106].mxu1 %v889_v24  ;;  %v737_v24 = vld [vmem:[%s17921_s1 + $0x1510] sm:$0xff] }
 0x282   :  { %2812 = vmatmul.mubr.f32.gmra.mrb[144].mxu0 %v569_v29  ;;  %v674_v29 = vld [vmem:[%s17921_s1 + $0x1318] sm:$0xff]  ;;  %2261 = vmatprep.mubr.f32.mxu1 %v897_v27 }
 0x283   :  { %2816 = vmatprep.mubr.f32.mxu0 %v577_v30  ;;  %v682_v30 = vld [vmem:[%s17921_s1 + $0x1358] sm:$0xff] }
 0x285   :  { %2262 = vmatmul.mubr.f32.gmra.mrb[108].mxu1 %v896_v28 }
 0x286   :  { %2817 = vmatmul.mubr.f32.gmra.mrb[146].mxu0 %v576_v33  ;;  %v904_v33 = vld [vmem:[%s17921_s1 + $0x1a48] sm:$0xff] }
 0x287   :  { %2821 = vmatprep.mubr.f32.mxu0 %v584_v34  ;;  %v681_v34 = vld [vmem:[%s17921_s1 + $0x1350] sm:$0xff]  ;;  %2266 = vmatprep.mubr.f32.mxu1 %v904_v33 }
 0x289   :  { %2267 = vmatmul.mubr.f32.gmra.mrb[110].mxu1 %v903_v36  ;;  %v752_v36 = vld [vmem:[%s17921_s1 + $0x1588] sm:$0xff] }
 0x28a   :  { %2822 = vmatmul.mubr.f32.gmra.mrb[148].mxu0 %v583_v37  ;;  %v689_v37 = vld [vmem:[%s17921_s1 + $0x1390] sm:$0xff] }
 0x28b   :  { %2826 = vmatprep.mubr.f32.mxu0 %v591_v38  ;;  %v911_v38 = vld [vmem:[%s17921_s1 + $0x1a80] sm:$0xff] }
 0x28c   :  { %2271 = vmatprep.mubr.f32.mxu1 %v911_v38  ;;  %v974_v38 = vld [vmem:[%s17921_s1 + $0x1c78] sm:$0xff] }
 0x28d   :  { %2272 = vmatmul.mubr.f32.gmra.mrb[112].mxu1 %v910_v39  ;;  %v973_v39 = vld [vmem:[%s17921_s1 + $0x1c70] sm:$0xff] }
 0x28e   :  { %2827 = vmatmul.mubr.f32.gmra.mrb[150].mxu0 %v590_v41  ;;  %v696_v41 = vld [vmem:[%s17921_s1 + $0x13c8] sm:$0xff] }
 0x28f   :  { %2831 = vmatprep.mubr.f32.mxu0 %v598_v42  ;;  %v918_v42 = vld [vmem:[%s17921_s1 + $0x1ab8] sm:$0xff] }
 0x290   :  { %2276 = vmatprep.mubr.f32.mxu1 %v918_v42  ;;  %v759_v42 = vld [vmem:[%s17921_s1 + $0x15c0] sm:$0xff] }
 0x291   :  { %2277 = vmatmul.mubr.f32.gmra.mrb[114].mxu1 %v917_v43 }
 0x292   :  { %2832 = vmatmul.mubr.f32.gmra.mrb[152].mxu0 %v597_v45  ;;  %v703_v45 = vld [vmem:[%s17921_s1 + $0x1400] sm:$0xff] }
 0x293   :  { %2836 = vmatprep.mubr.f32.mxu0 %v605_v46  ;;  %v925_v46 = vld [vmem:[%s17921_s1 + $0x1af0] sm:$0xff] }
 0x294   :  { %2281 = vmatprep.mubr.f32.mxu1 %v925_v46  ;;  %v758_v46 = vld [vmem:[%s17921_s1 + $0x15b8] sm:$0xff] }
 0x295   :  { %2282 = vmatmul.mubr.f32.gmra.mrb[116].mxu1 %v924_v48 }
 0x296   :  { %2837 = vmatmul.mubr.f32.gmra.mrb[154].mxu0 %v604_v49  ;;  %v702_v49 = vld [vmem:[%s17921_s1 + $0x13f8] sm:$0xff] }
 0x297   :  { %2841 = vmatprep.mubr.f32.mxu0 %v612_v50  ;;  %v1995_v50 = vpop.f32.mrb[1].mxu1 }
 0x298   :  { %v12186_v52 = vpop.f32.mrb[2].mxu1 }
 0x299   :  { %18039 = vst [vmem:[#allocation9_spill] sm:$0xff] %v12186_v52  ;;  %v2000_v56 = vpop.f32.mrb[3].mxu1  ;;  %v811_v52 = vld [vmem:[%s17921_s1 + $0x1760] sm:$0xff] }
 0x29a   :  { %2842 = vmatmul.mubr.f32.gmra.mrb[156].mxu0 %v611_v53  ;;  %v932_v53 = vld [vmem:[%s17921_s1 + $0x1b28] sm:$0xff]  ;;  %v773_v56 = vld [vmem:[%s17921_s1 + $0x1630] sm:$0xff] }
 0x29b   :  { %2846 = vmatprep.mubr.f32.mxu0 %v619_v54  ;;  %v931_v54 = vld [vmem:[%s17921_s1 + $0x1b20] sm:$0xff]  ;;  %2286 = vmatprep.mubr.f32.mxu1 %v932_v53 }
 0x29c   :  { %2287 = vmatmul.mubr.f32.gmra.mrb[118].mxu1 %v931_v54  ;;  %v987_v53 = vld [vmem:[%s17921_s1 + $0x1ce0] sm:$0xff]  ;;  %v765_v54 = vld [vmem:[%s17921_s1 + $0x15f0] sm:$0xff] }
 0x29e   :  { %2847 = vmatmul.mubr.f32.gmra.mrb[158].mxu0 %v618_v58  ;;  %v12200_v58 = vpop.f32.mrb[4].mxu1 }
 0x29f   :  { %2851 = vmatprep.mubr.f32.mxu0 %v626_v61  ;;  %18040 = vst [vmem:[#allocation10_spill] sm:$0xff] %v12200_v58  ;;  %v2005_v59 = vpop.f32.mrb[5].mxu1  ;;  %v939_v61 = vld [vmem:[%s17921_s1 + $0x1b60] sm:$0xff] }
 0x2a0   :  { %v12202_v60 = vpop.f32.mrb[6].mxu1  ;;  %2291 = vmatprep.mubr.f32.mxu1 %v939_v61  ;;  %v995_v59 = vld [vmem:[%s17921_s1 + $0x1d20] sm:$0xff]  ;;  %v994_v61 = vld [vmem:[%s17921_s1 + $0x1d18] sm:$0xff] }
 0x2a1   :  { %18041 = vst [vmem:[#allocation11_spill] sm:$0xff] %v12202_v60  ;;  %2292 = vmatmul.mubr.f32.gmra.mrb[120].mxu1 %v938_v62  ;;  %v772_v62 = vld [vmem:[%s17921_s1 + $0x1628] sm:$0xff]  ;;  %v797_v60 = vld [vmem:[%s17921_s1 + $0x16f0] sm:$0xff] }
 0x2a2   :  { %2852 = vmatmul.mubr.f32.gmra.mrb[160].mxu0 %v625_v0  ;;  %v2010_v0 = vpop.f32.mrb[7].mxu1 }
 0x2a3   :  { %2856 = vmatprep.mubr.f32.mxu0 %v633_v1  ;;  %v724_v1 = vld [vmem:[%s17921_s1 + $0x14a8] sm:$0xff]  ;;  %v12216_v2 = vpop.f32.mrb[8].mxu1 }
 0x2a4   :  { %18042 = vst [vmem:[#allocation12_spill] sm:$0xff] %v12216_v2  ;;  %v2015_v4 = vpop.f32.mrb[9].mxu1  ;;  %v780_v0 = vld [vmem:[%s17921_s1 + $0x1668] sm:$0xff] }
 0x2a5   :  { %v1002_v4 = vld [vmem:[%s17921_s1 + $0x1d58] sm:$0xff] }
 0x2a6   :  { %2857 = vmatmul.mubr.f32.gmra.mrb[162].mxu0 %v632_v5  ;;  %v12218_v5 = vpop.f32.mrb[10].mxu1 }
 0x2a7   :  { %2861 = vmatprep.mubr.f32.mxu0 %v640_v6  ;;  %18043 = vst [vmem:[#allocation13_spill] sm:$0xff] %v12218_v5  ;;  %v946_v6 = vld [vmem:[%s17921_s1 + $0x1b98] sm:$0xff]  ;;  %v783_v5 = vld [vmem:[%s17921_s1 + $0x1680] sm:$0xff] }
 0x2a8   :  { %2296 = vmatprep.mubr.f32.mxu1 %v946_v6  ;;  %v1001_v6 = vld [vmem:[%s17921_s1 + $0x1d50] sm:$0xff] }
 0x2a9   :  { %2297 = vmatmul.mubr.f32.gmra.mrb[122].mxu1 %v945_v7  ;;  %v779_v7 = vld [vmem:[%s17921_s1 + $0x1660] sm:$0xff] }
 0x2aa   :  { %2862 = vmatmul.mubr.f32.gmra.mrb[164].mxu0 %v639_v9  ;;  %v2020_v9 = vpop.f32.mrb[11].mxu1 }
 0x2ab   :  { %2866 = vmatprep.mubr.f32.mxu0 %v647_v10  ;;  %v731_v10 = vld [vmem:[%s17921_s1 + $0x14e0] sm:$0xff]  ;;  %v12232_v11 = vpop.f32.mrb[12].mxu1 }
 0x2ac   :  { %18044 = vst [vmem:[#allocation14_spill] sm:$0xff] %v12232_v11  ;;  %v2025_v12 = vpop.f32.mrb[13].mxu1  ;;  %v787_v9 = vld [vmem:[%s17921_s1 + $0x16a0] sm:$0xff] }
 0x2ad   :  { %v1009_v12 = vld [vmem:[%s17921_s1 + $0x1d90] sm:$0xff] }
 0x2ae   :  { %2867 = vmatmul.mubr.f32.gmra.mrb[166].mxu0 %v646_v13  ;;  %v12234_v13 = vpop.f32.mrb[14].mxu1 }
 0x2af   :  { %2871 = vmatprep.mubr.f32.mxu0 %v654_v14  ;;  %18045 = vst [vmem:[#allocation15_spill] sm:$0xff] %v12234_v13  ;;  %v953_v14 = vld [vmem:[%s17921_s1 + $0x1bd0] sm:$0xff] }
 0x2b0   :  { %2301 = vmatprep.mubr.f32.mxu1 %v953_v14  ;;  %v1008_v14 = vld [vmem:[%s17921_s1 + $0x1d88] sm:$0xff]  ;;  %v769_v13 = vld [vmem:[%s17921_s1 + $0x1610] sm:$0xff] }
 0x2b1   :  { %2302 = vmatmul.mubr.f32.gmra.mrb[124].mxu1 %v952_v15  ;;  %v786_v15 = vld [vmem:[%s17921_s1 + $0x1698] sm:$0xff] }
 0x2b2   :  { %2872 = vmatmul.mubr.f32.gmra.mrb[168].mxu0 %v653_v17  ;;  %v2030_v17 = vpop.f32.mrb[15].mxu1 }
 0x2b3   :  { %2876 = vmatprep.mubr.f32.mxu0 %v661_v18  ;;  %v738_v18 = vld [vmem:[%s17921_s1 + $0x1518] sm:$0xff]  ;;  %v12248_v19 = vpop.f32.mrb[16].mxu1 }
 0x2b4   :  { %18046 = vst [vmem:[#allocation16_spill] sm:$0xff] %v12248_v19  ;;  %v2035_v20 = vpop.f32.mrb[17].mxu1  ;;  %v794_v17 = vld [vmem:[%s17921_s1 + $0x16d8] sm:$0xff] }
 0x2b5   :  { %v1016_v20 = vld [vmem:[%s17921_s1 + $0x1dc8] sm:$0xff] }
 0x2b6   :  { %2877 = vmatmul.mubr.f32.gmra.mrb[170].mxu0 %v660_v21  ;;  %v12250_v21 = vpop.f32.mrb[18].mxu1 }
 0x2b7   :  { %2881 = vmatprep.mubr.f32.mxu0 %v668_v22  ;;  %18047 = vst [vmem:[#allocation17_spill] sm:$0xff] %v12250_v21  ;;  %v960_v22 = vld [vmem:[%s17921_s1 + $0x1c08] sm:$0xff]  ;;  %v755_v21 = vld [vmem:[%s17921_s1 + $0x15a0] sm:$0xff] }
 0x2b8   :  { %2306 = vmatprep.mubr.f32.mxu1 %v960_v22  ;;  %v1015_v22 = vld [vmem:[%s17921_s1 + $0x1dc0] sm:$0xff] }
 0x2b9   :  { %2307 = vmatmul.mubr.f32.gmra.mrb[126].mxu1 %v959_v23  ;;  %v793_v23 = vld [vmem:[%s17921_s1 + $0x16d0] sm:$0xff] }
 0x2ba   :  { %2882 = vmatmul.mubr.f32.gmra.mrb[172].mxu0 %v667_v25  ;;  %v2040_v25 = vpop.f32.mrb[19].mxu1  ;;  %2311 = vmatprep.mubr.f32.mxu1 %v967_v31 }
 0x2bb   :  { %2886 = vmatprep.mubr.f32.mxu0 %v675_v26  ;;  %v745_v26 = vld [vmem:[%s17921_s1 + $0x1550] sm:$0xff]  ;;  %v12264_v27 = vpop.f32.mrb[20].mxu1 }
 0x2bc   :  { %v2045_v28 = vpop.f32.mrb[21].mxu1  ;;  %v801_v25 = vld [vmem:[%s17921_s1 + $0x1710] sm:$0xff] }
 0x2bd   :  { %2312 = vmatmul.mubr.f32.gmra.mrb[128].mxu1 %v966_v35  ;;  %v1023_v28 = vld [vmem:[%s17921_s1 + $0x1e00] sm:$0xff]  ;;  %v1154_v35 = vld [vmem:[%s17920_s0 + $0x298] sm:$0xff] }
 0x2be   :  { %2887 = vmatmul.mubr.f32.gmra.mrb[174].mxu0 %v674_v29  ;;  %v1151_v29 = vld [vmem:[%s17920_s0 + $0x280] sm:$0xff]  ;;  %2316 = vmatprep.mubr.f32.mxu1 %v974_v38  ;;  %v1030_v38 = vld [vmem:[%s17921_s1 + $0x1e38] sm:$0xff] }
 0x2bf   :  { %2891 = vmatprep.mubr.f32.mxu0 %v682_v30  ;;  %v1152_v30 = vld [vmem:[%s17920_s0 + $0x288] sm:$0xff] }
 0x2c0   :  { %v9812_v33 = vpack.c.bf16 %v1152_v30, %v1151_v29  ;;  %v1022_v29 = vld [vmem:[%s17921_s1 + $0x1df8] sm:$0xff]  ;;  %v800_v30 = vld [vmem:[%s17921_s1 + $0x1708] sm:$0xff] }
 0x2c1   :  { %2317 = vmatmul.mubr.f32.gmra.mrb[130].mxu1 %v973_v39  ;;  %v1029_v39 = vld [vmem:[%s17921_s1 + $0x1e30] sm:$0xff] }
 0x2c2   :  { %2892 = vmatmul.mubr.f32.gmra.mrb[176].mxu0 %v681_v34  ;;  %v12278_v34 = vpop.f32.mrb[22].mxu1 }
 0x2c3   :  { %2896 = vmatprep.mubr.f32.mxu0 %v689_v37  ;;  %v2050_v37 = vpop.f32.mrb[23].mxu1  ;;  %9813 = vmatpush1.bf16.msra.mxu0 %v9812_v33  ;;  %v1153_v33 = vld [vmem:[%s17920_s0 + $0x290] sm:$0xff] }
 0x2c4   :  { %9814 = vmatprep.subr.bf16.mxu0 %v17932_v3  ;;  %v9815_v37 = vpack.c.bf16 %v1154_v35, %v1153_v33  ;;  %v843_v35 = vld [vmem:[%s17921_s1 + $0x1860] sm:$0xff] }
 0x2c6   :  { %2897 = vmatmul.mubr.f32.gmra.mrb[178].mxu0 %v688_v40  ;;  %v751_v40 = vld [vmem:[%s17921_s1 + $0x1580] sm:$0xff] }
 0x2c7   :  { %2901 = vmatprep.mubr.f32.mxu0 %v696_v41  ;;  %v12296_v41 = vpop.f32.mrb[24].mxu1  ;;  %9816 = vmatpush1.bf16.msra.mxu0 %v9815_v37  ;;  %v1164_v37 = vld [vmem:[%s17920_s0 + $0x2e8] sm:$0xff] }
 0x2c8   :  { %v2055_v43 = vpop.f32.mrb[25].mxu1  ;;  %9817 = vmatprep.subr.bf16.mxu0 %v17932_v3 }
 0x2c9   :  { %v12310_v48 = vpop.f32.mrb[26].mxu1  ;;  %v815_v43 = vld [vmem:[%s17921_s1 + $0x1780] sm:$0xff] }
 0x2ca   :  { %2902 = vmatmul.mubr.f32.gmra.mrb[180].mxu0 %v695_v44  ;;  %v981_v44 = vld [vmem:[%s17921_s1 + $0x1cb0] sm:$0xff]  ;;  %v2060_v50 = vpop.f32.mrb[27].mxu1 }
 0x2cb   :  { %2906 = vmatprep.mubr.f32.mxu0 %v703_v45  ;;  %v980_v45 = vld [vmem:[%s17921_s1 + $0x1ca8] sm:$0xff]  ;;  %2321 = vmatprep.mubr.f32.mxu1 %v981_v44  ;;  %v1155_v44 = vld [vmem:[%s17920_s0 + $0x2a0] sm:$0xff]  ;;  %v1037_v50 = vld [vmem:[%s17921_s1 + $0x1e70] sm:$0xff] }
 0x2cc   :  { %2322 = vmatmul.mubr.f32.gmra.mrb[132].mxu1 %v980_v45  ;;  %v1156_v45 = vld [vmem:[%s17920_s0 + $0x2a8] sm:$0xff] }
 0x2ce   :  { %2907 = vmatmul.mubr.f32.gmra.mrb[182].mxu0 %v702_v49  ;;  %v766_v49 = vld [vmem:[%s17921_s1 + $0x15f8] sm:$0xff] }
 0x2cf   :  { %2911 = vmatprep.mubr.f32.mxu0 %v710_v51  ;;  %v988_v51 = vld [vmem:[%s17921_s1 + $0x1ce8] sm:$0xff] }
 0x2d0   :  { %2326 = vmatprep.mubr.f32.mxu1 %v988_v51  ;;  %v1036_v51 = vld [vmem:[%s17921_s1 + $0x1e68] sm:$0xff] }
 0x2d1   :  { %2327 = vmatmul.mubr.f32.gmra.mrb[134].mxu1 %v987_v53  ;;  %v814_v53 = vld [vmem:[%s17921_s1 + $0x1778] sm:$0xff] }
 0x2d2   :  { %2912 = vmatmul.mubr.f32.gmra.mrb[184].mxu0 %v709_v55  ;;  %v12324_v55 = vpop.f32.mrb[28].mxu1  ;;  %2331 = vmatprep.mubr.f32.mxu1 %v995_v59  ;;  %v1158_v59 = vld [vmem:[%s17920_s0 + $0x2b8] sm:$0xff] }
 0x2d3   :  { %2916 = vmatprep.mubr.f32.mxu0 %v717_v57  ;;  %v2065_v57 = vpop.f32.mrb[29].mxu1 }
 0x2d4   :  { %v1157_v57 = vld [vmem:[%s17920_s0 + $0x2b0] sm:$0xff] }
 0x2d5   :  { %2332 = vmatmul.mubr.f32.gmra.mrb[136].mxu1 %v994_v61 }
 0x2d6   :  { %2917 = vmatmul.mubr.f32.gmra.mrb[186].mxu0 %v716_v63  ;;  %v12338_v63 = vpop.f32.mrb[30].mxu1  ;;  %2336 = vmatprep.mubr.f32.mxu1 %v1002_v4  ;;  %v821_v4 = vld [vmem:[%s17921_s1 + $0x17b0] sm:$0xff] }
 0x2d7   :  { %2921 = vmatprep.mubr.f32.mxu0 %v724_v1  ;;  %v2070_v1 = vpop.f32.mrb[31].mxu1 }
 0x2d8   :  { %v1043_v1 = vld [vmem:[%s17921_s1 + $0x1ea0] sm:$0xff] }
 0x2d9   :  { %2337 = vmatmul.mubr.f32.gmra.mrb[138].mxu1 %v1001_v6 }
 0x2da   :  { %2922 = vmatmul.mubr.f32.gmra.mrb[188].mxu0 %v723_v8  ;;  %v12352_v8 = vpop.f32.mrb[32].mxu1  ;;  %2341 = vmatprep.mubr.f32.mxu1 %v1009_v12 }
 0x2db   :  { %2926 = vmatprep.mubr.f32.mxu0 %v731_v10  ;;  %v2075_v10 = vpop.f32.mrb[33].mxu1 }
 0x2dc   :  { %v1160_v10 = vld [vmem:[%s17920_s0 + $0x2c8] sm:$0xff] }
 0x2dd   :  { %2342 = vmatmul.mubr.f32.gmra.mrb[140].mxu1 %v1008_v14 }
 0x2de   :  { %2927 = vmatmul.mubr.f32.gmra.mrb[190].mxu0 %v730_v16  ;;  %v12366_v16 = vpop.f32.mrb[34].mxu1  ;;  %2346 = vmatprep.mubr.f32.mxu1 %v1016_v20 }
 0x2df   :  { %2931 = vmatprep.mubr.f32.mxu0 %v738_v18  ;;  %v2080_v18 = vpop.f32.mrb[35].mxu1 }
 0x2e0   :  { %v828_v18 = vld [vmem:[%s17921_s1 + $0x17e8] sm:$0xff] }
 0x2e1   :  { %2347 = vmatmul.mubr.f32.gmra.mrb[142].mxu1 %v1015_v22  ;;  %v836_v22 = vld [vmem:[%s17921_s1 + $0x1828] sm:$0xff] }
 0x2e2   :  { %2932 = vmatmul.mubr.f32.gmra.mrb[192].mxu0 %v737_v24  ;;  %v12380_v24 = vpop.f32.mrb[36].mxu1  ;;  %2351 = vmatprep.mubr.f32.mxu1 %v1023_v28 }
 0x2e3   :  { %2936 = vmatprep.mubr.f32.mxu0 %v745_v26  ;;  %v2085_v26 = vpop.f32.mrb[37].mxu1 }
 0x2e4   :  { %v12394_v31 = vpop.f32.mrb[38].mxu1 }
 0x2e5   :  { %2352 = vmatmul.mubr.f32.gmra.mrb[144].mxu1 %v1022_v29  ;;  %v1058_v29 = vld [vmem:[%s17921_s1 + $0x1f18] sm:$0xff] }
 0x2e6   :  { %2937 = vmatmul.mubr.f32.gmra.mrb[194].mxu0 %v744_v32  ;;  %v808_v32 = vld [vmem:[%s17921_s1 + $0x1748] sm:$0xff]  ;;  %2356 = vmatprep.mubr.f32.mxu1 %v1030_v38 }
 0x2e7   :  { %2941 = vmatprep.mubr.f32.mxu0 %v752_v36  ;;  %v2090_v36 = vpop.f32.mrb[39].mxu1 }
 0x2e8   :  { %v1163_v36 = vld [vmem:[%s17920_s0 + $0x2e0] sm:$0xff] }
 0x2e9   :  { %2357 = vmatmul.mubr.f32.gmra.mrb[146].mxu1 %v1029_v39  ;;  %v9830_v39 = vpack.c.bf16 %v1164_v37, %v1163_v36  ;;  %v898_v36 = vld [vmem:[%s17921_s1 + $0x1a18] sm:$0xff] }
 0x2ea   :  { %2942 = vmatmul.mubr.f32.gmra.mrb[196].mxu0 %v751_v40  ;;  %v807_v40 = vld [vmem:[%s17921_s1 + $0x1740] sm:$0xff]  ;;  %2361 = vmatprep.mubr.f32.mxu1 %v1037_v50  ;;  %v850_v50 = vld [vmem:[%s17921_s1 + $0x1898] sm:$0xff] }
 0x2eb   :  { %2946 = vmatprep.mubr.f32.mxu0 %v759_v42  ;;  %v12414_v42 = vpop.f32.mrb[40].mxu1  ;;  %v906_v37 = vld [vmem:[%s17921_s1 + $0x1a58] sm:$0xff] }
 0x2ed   :  { %2362 = vmatmul.mubr.f32.gmra.mrb[148].mxu1 %v1036_v51 }
 0x2ee   :  { %2947 = vmatmul.mubr.f32.gmra.mrb[198].mxu0 %v758_v46  ;;  %v2095_v46 = vpop.f32.mrb[41].mxu1 }
 0x2ef   :  { %2951 = vmatprep.mubr.f32.mxu0 %v766_v49  ;;  %v9818_v49 = vpack.c.bf16 %v1156_v45, %v1155_v44  ;;  %v1167_v44 = vld [vmem:[%s17920_s0 + $0x300] sm:$0xff]  ;;  %v842_v45 = vld [vmem:[%s17921_s1 + $0x1858] sm:$0xff] }
 0x2f1   :  { %9819 = vmatpush1.bf16.msra.mxu0 %v9818_v49  ;;  %v1168_v49 = vld [vmem:[%s17920_s0 + $0x308] sm:$0xff] }
 0x2f2   :  { %2952 = vmatmul.mubr.f32.gmra.mrb[200].mxu0 %v765_v54  ;;  %v12435_v54 = vpop.f32.mrb[42].mxu1  ;;  %9820 = vmatprep.subr.bf16.mxu0 %v17932_v3  ;;  %v9835_v51 = vpack.c.bf16 %v1168_v49, %v1167_v44  ;;  %v912_v44 = vld [vmem:[%s17921_s1 + $0x1a88] sm:$0xff]  ;;  %v139_v49 = vld [vmem:[%s17921_s1 + $0x260] sm:$0xff] }
 0x2f3   :  { %2956 = vmatprep.mubr.f32.mxu0 %v773_v56  ;;  %v822_v56 = vld [vmem:[%s17921_s1 + $0x17b8] sm:$0xff]  ;;  %v2100_v61 = vpop.f32.mrb[43].mxu1 }
 0x2f4   :  { %v12456_v6 = vpop.f32.mrb[44].mxu1  ;;  %9836 = vmatprep.subr.bf16.mxu1 %v9835_v51  ;;  %v69_v61 = vld [vmem:[%s17921_s1 + $0x30] sm:$0xff] }
 0x2f5   :  { %v2105_v12 = vpop.f32.mrb[45].mxu1  ;;  %9838 = vmatpush3.bf16.msra.mxu1 %v9835_v51  ;;  %v146_v51 = vld [vmem:[%s17921_s1 + $0x298] sm:$0xff] }
 0x2f6   :  { %2957 = vmatmul.mubr.f32.gmra.mrb[202].mxu0 %v772_v62  ;;  %v9821_v62 = vpack.c.bf16 %v1158_v59, %v1157_v57  ;;  %v12477_v20 = vpop.f32.mrb[46].mxu1  ;;  %9839 = vmatprep.subr.bf16.mxu1 %v17932_v3  ;;  %v90_v12 = vld [vmem:[%s17921_s1 + $0xd8] sm:$0xff] }
 0x2f7   :  { %2961 = vmatprep.mubr.f32.mxu0 %v780_v0  ;;  %v1044_v0 = vld [vmem:[%s17921_s1 + $0x1ea8] sm:$0xff]  ;;  %v2110_v26 = vpop.f32.mrb[47].mxu1 }
 0x2f8   :  { %9822 = vmatpush1.bf16.msra.mxu0 %v9821_v62  ;;  %2366 = vmatprep.mubr.f32.mxu1 %v1044_v0  ;;  %v12498_v33 = vpop.f32.mrb[48].mxu1  ;;  %v849_v62 = vld [vmem:[%s17921_s1 + $0x1890] sm:$0xff]  ;;  %v76_v0 = vld [vmem:[%s17921_s1 + $0x68] sm:$0xff] }
 0x2f9   :  { %9823 = vmatprep.subr.bf16.mxu0 %v17932_v3  ;;  %2367 = vmatmul.mubr.f32.gmra.mrb[150].mxu1 %v1043_v1  ;;  %v2115_v38 = vpop.f32.mrb[49].mxu1  ;;  %v857_v1 = vld [vmem:[%s17921_s1 + $0x18d0] sm:$0xff]  ;;  %v884_v26 = vld [vmem:[%s17921_s1 + $0x19a8] sm:$0xff] }
 0x2fa   :  { %2962 = vmatmul.mubr.f32.gmra.mrb[204].mxu0 %v779_v7  ;;  %v829_v7 = vld [vmem:[%s17921_s1 + $0x17f0] sm:$0xff]  ;;  %v12522_v46 = vpop.f32.mrb[50].mxu1 }
 0x2fb   :  { %2966 = vmatprep.mubr.f32.mxu0 %v787_v9  ;;  %v1159_v9 = vld [vmem:[%s17920_s0 + $0x2c0] sm:$0xff]  ;;  %v2120_v57 = vpop.f32.mrb[51].mxu1  ;;  %v125_v38 = vld [vmem:[%s17921_s1 + $0x1f0] sm:$0xff] }
 0x2fc   :  { %v9824_v14 = vpack.c.bf16 %v1160_v10, %v1159_v9  ;;  %v83_v9 = vld [vmem:[%s17921_s1 + $0xa0] sm:$0xff]  ;;  %v934_v57 = vld [vmem:[%s17921_s1 + $0x1b38] sm:$0xff] }
 0x2fd   :  { %v863_v10 = vld [vmem:[%s17921_s1 + $0x1900] sm:$0xff] }
 0x2fe   :  { %2967 = vmatmul.mubr.f32.gmra.mrb[206].mxu0 %v786_v15  ;;  %v1051_v15 = vld [vmem:[%s17921_s1 + $0x1ee0] sm:$0xff] }
 0x2ff   :  { %2971 = vmatprep.mubr.f32.mxu0 %v794_v17  ;;  %v1050_v17 = vld [vmem:[%s17921_s1 + $0x1ed8] sm:$0xff]  ;;  %9825 = vmatpush1.bf16.msra.mxu0 %v9824_v14  ;;  %v871_v14 = vld [vmem:[%s17921_s1 + $0x1940] sm:$0xff] }
 0x300   :  { %2371 = vmatprep.mubr.f32.mxu1 %v1051_v15  ;;  %9826 = vmatprep.subr.bf16.mxu0 %v17932_v3  ;;  %v870_v15 = vld [vmem:[%s17921_s1 + $0x1938] sm:$0xff] }
 0x301   :  { %2372 = vmatmul.mubr.f32.gmra.mrb[152].mxu1 %v1050_v17  ;;  %v878_v17 = vld [vmem:[%s17921_s1 + $0x1978] sm:$0xff] }
 0x302   :  { %2972 = vmatmul.mubr.f32.gmra.mrb[208].mxu0 %v793_v23  ;;  %v1161_v23 = vld [vmem:[%s17920_s0 + $0x2d0] sm:$0xff]  ;;  %2376 = vmatprep.mubr.f32.mxu1 %v1058_v29  ;;  %v111_v29 = vld [vmem:[%s17921_s1 + $0x180] sm:$0xff] }
 0x303   :  { %2976 = vmatprep.mubr.f32.mxu0 %v801_v25  ;;  %v1162_v25 = vld [vmem:[%s17920_s0 + $0x2d8] sm:$0xff] }
 0x304   :  { %v9827_v28 = vpack.c.bf16 %v1162_v25, %v1161_v23  ;;  %v104_v23 = vld [vmem:[%s17921_s1 + $0x148] sm:$0xff]  ;;  %v885_v25 = vld [vmem:[%s17921_s1 + $0x19b0] sm:$0xff] }
 0x306   :  { %2977 = vmatmul.mubr.f32.gmra.mrb[210].mxu0 %v800_v30  ;;  %v1057_v30 = vld [vmem:[%s17921_s1 + $0x1f10] sm:$0xff] }
 0x307   :  { %2981 = vmatprep.mubr.f32.mxu0 %v808_v32  ;;  %v835_v32 = vld [vmem:[%s17921_s1 + $0x1820] sm:$0xff]  ;;  %9828 = vmatpush1.bf16.msra.mxu0 %v9827_v28  ;;  %v892_v28 = vld [vmem:[%s17921_s1 + $0x19e8] sm:$0xff] }
 0x308   :  { %9829 = vmatprep.subr.bf16.mxu0 %v17932_v3  ;;  %2377 = vmatmul.mubr.f32.gmra.mrb[154].mxu1 %v1057_v30  ;;  %v891_v30 = vld [vmem:[%s17921_s1 + $0x19e0] sm:$0xff] }
 0x30a   :  { %2982 = vmatmul.mubr.f32.gmra.mrb[212].mxu0 %v807_v40  ;;  %v1065_v40 = vld [vmem:[%s17921_s1 + $0x1f50] sm:$0xff] }
 0x30b   :  { %2986 = vmatprep.mubr.f32.mxu0 %v815_v43  ;;  %v1064_v43 = vld [vmem:[%s17921_s1 + $0x1f48] sm:$0xff]  ;;  %9831 = vmatpush1.bf16.msra.mxu0 %v9830_v39  ;;  %v905_v39 = vld [vmem:[%s17921_s1 + $0x1a50] sm:$0xff] }
 0x30c   :  { %2381 = vmatprep.mubr.f32.mxu1 %v1065_v40  ;;  %9832 = vmatprep.subr.bf16.mxu0 %v17932_v3  ;;  %v132_v40 = vld [vmem:[%s17921_s1 + $0x228] sm:$0xff] }
 0x30d   :  { %2382 = vmatmul.mubr.f32.gmra.mrb[156].mxu1 %v1064_v43  ;;  %v913_v43 = vld [vmem:[%s17921_s1 + $0x1a90] sm:$0xff] }
 0x30e   :  { %2987 = vmatmul.mubr.f32.gmra.mrb[214].mxu0 %v814_v53  ;;  %v1165_v53 = vld [vmem:[%s17920_s0 + $0x2f0] sm:$0xff]  ;;  %9256 = vmatprep.mubr.msk.f32.mxu1 %vm1169_vm0, %v69_v61 }
 0x30f   :  { %2991 = vmatprep.mubr.f32.mxu0 %v822_v56  ;;  %v1166_v56 = vld [vmem:[%s17920_s0 + $0x2f8] sm:$0xff]  ;;  %v933_v61 = vld [vmem:[%s17921_s1 + $0x1b30] sm:$0xff] }
 0x310   :  { %v9833_v59 = vpack.c.bf16 %v1166_v56, %v1165_v53  ;;  %v927_v53 = vld [vmem:[%s17921_s1 + $0x1b00] sm:$0xff]  ;;  %v926_v56 = vld [vmem:[%s17921_s1 + $0x1af8] sm:$0xff] }
 0x311   :  { %9257 = vmatmul.mubr.msk.f32.vlgmr.msra.gmra.mrb[158].mxu1 %vm1169_vm0, %v76_v0  ;;  %v941_v0 = vld [vmem:[%s17921_s1 + $0x1b70] sm:$0xff] }
 0x312   :  { %2992 = vmatmul.mubr.f32.gmra.mrb[216].mxu0 %v821_v4  ;;  %v856_v4 = vld [vmem:[%s17921_s1 + $0x18c8] sm:$0xff]  ;;  %9259 = vmatprep.mubr.msk.f32.mxu1 %vm1169_vm0, %v83_v9  ;;  %v947_v9 = vld [vmem:[%s17921_s1 + $0x1ba0] sm:$0xff] }
 0x313   :  { %2996 = vmatprep.mubr.f32.mxu0 %v829_v7  ;;  %9834 = vmatpush1.bf16.msra.mxu0 %v9833_v59  ;;  %v864_v7 = vld [vmem:[%s17921_s1 + $0x1908] sm:$0xff]  ;;  %v153_v59 = vld [vmem:[%s17921_s1 + $0x2d0] sm:$0xff] }
 0x315   :  { %9260 = vmatmul.mubr.msk.f32.gmra.mrb[160].mxu1 %vm1169_vm0, %v90_v12  ;;  %v955_v12 = vld [vmem:[%s17921_s1 + $0x1be0] sm:$0xff] }
 0x316   :  { %2997 = vmatmul.mubr.f32.gmra.mrb[218].mxu0 %v828_v18  ;;  %v97_v18 = vld [vmem:[%s17921_s1 + $0x110] sm:$0xff] }
 0x317   :  { %3001 = vmatprep.mubr.f32.mxu0 %v836_v22  ;;  %v877_v22 = vld [vmem:[%s17921_s1 + $0x1970] sm:$0xff]  ;;  %9262 = vmatprep.mubr.msk.f32.mxu1 %vm1169_vm0, %v97_v18 }
 0x318   :  { %v961_v18 = vld [vmem:[%s17921_s1 + $0x1c10] sm:$0xff] }
 0x319   :  { %9263 = vmatmul.mubr.msk.f32.gmra.mrb[162].mxu1 %vm1169_vm0, %v104_v23  ;;  %v969_v23 = vld [vmem:[%s17921_s1 + $0x1c50] sm:$0xff] }
 0x31a   :  { %3002 = vmatmul.mubr.f32.gmra.mrb[220].mxu0 %v835_v32  ;;  %9265 = vmatprep.mubr.msk.f32.mxu1 %vm1169_vm0, %v111_v29  ;;  %v118_v32 = vld [vmem:[%s17921_s1 + $0x1b8] sm:$0xff]  ;;  %v968_v29 = vld [vmem:[%s17921_s1 + $0x1c48] sm:$0xff] }
 0x31b   :  { %3006 = vmatprep.mubr.f32.mxu0 %v843_v35  ;;  %v899_v35 = vld [vmem:[%s17921_s1 + $0x1a20] sm:$0xff] }
 0x31d   :  { %9266 = vmatmul.mubr.msk.f32.gmra.mrb[164].mxu1 %vm1169_vm0, %v118_v32 }
 0x31e   :  { %3007 = vmatmul.mubr.f32.gmra.mrb[222].mxu0 %v842_v45  ;;  %9268 = vmatprep.mubr.msk.f32.mxu1 %vm1169_vm0, %v125_v38  ;;  %v920_v45 = vld [vmem:[%s17921_s1 + $0x1ac8] sm:$0xff]  ;;  %v202_v38 = vld [vmem:[%s17921_s1 + $0x458] sm:$0xff] }
 0x31f   :  { %3011 = vmatprep.mubr.f32.mxu0 %v850_v50  ;;  %v919_v50 = vld [vmem:[%s17921_s1 + $0x1ac0] sm:$0xff] }
 0x321   :  { %9269 = vmatmul.mubr.msk.f32.gmra.mrb[166].mxu1 %vm1169_vm0, %v132_v40 }
 0x322   :  { %3012 = vmatmul.mubr.f32.gmra.mrb[224].mxu0 %v849_v62  ;;  %9271 = vmatprep.mubr.msk.f32.mxu1 %vm1169_vm0, %v139_v49  ;;  %v160_v62 = vld [vmem:[%s17921_s1 + $0x308] sm:$0xff] }
 0x323   :  { %3016 = vmatprep.mubr.f32.mxu0 %v857_v1  ;;  %v940_v1 = vld [vmem:[%s17921_s1 + $0x1b68] sm:$0xff] }
 0x325   :  { %9272 = vmatmul.mubr.msk.f32.gmra.mrb[168].mxu1 %vm1169_vm0, %v146_v51  ;;  %v209_v51 = vld [vmem:[%s17921_s1 + $0x490] sm:$0xff] }
 0x326   :  { %3017 = vmatmul.mubr.f32.gmra.mrb[226].mxu0 %v856_v4  ;;  %9274 = vmatprep.mubr.msk.f32.mxu1 %vm1169_vm0, %v153_v59  ;;  %v948_v4 = vld [vmem:[%s17921_s1 + $0x1ba8] sm:$0xff] }
 0x327   :  { %3021 = vmatprep.mubr.f32.mxu0 %v864_v7  ;;  %v167_v7 = vld [vmem:[%s17921_s1 + $0x340] sm:$0xff] }
 0x329   :  { %9275 = vmatmul.mubr.msk.f32.gmra.mrb[170].mxu1 %vm1169_vm0, %v160_v62  ;;  %v996_v62 = vld [vmem:[%s17921_s1 + $0x1d28] sm:$0xff] }
 0x32a   :  { %3022 = vmatmul.mubr.f32.gmra.mrb[228].mxu0 %v863_v10  ;;  %9277 = vmatprep.mubr.msk.f32.mxu1 %vm1169_vm0, %v167_v7  ;;  %v174_v10 = vld [vmem:[%s17921_s1 + $0x378] sm:$0xff]  ;;  %v223_v7 = vld [vmem:[%s17921_s1 + $0x500] sm:$0xff] }
 0x32b   :  { %3026 = vmatprep.mubr.f32.mxu0 %v871_v14  ;;  %v954_v14 = vld [vmem:[%s17921_s1 + $0x1bd8] sm:$0xff] }
 0x32d   :  { %9278 = vmatmul.mubr.msk.f32.gmra.mrb[172].mxu1 %vm1169_vm0, %v174_v10  ;;  %v230_v10 = vld [vmem:[%s17921_s1 + $0x538] sm:$0xff] }
 0x32e   :  { %3027 = vmatmul.mubr.f32.gmra.mrb[230].mxu0 %v870_v15  ;;  %v962_v15 = vld [vmem:[%s17921_s1 + $0x1c18] sm:$0xff] }
 0x32f   :  { %3031 = vmatprep.mubr.f32.mxu0 %v878_v17  ;;  %v181_v17 = vld [vmem:[%s17921_s1 + $0x3b0] sm:$0xff] }
 0x330   :  { %9280 = vmatprep.mubr.msk.f32.mxu1 %vm1169_vm0, %v181_v17  ;;  %v1010_v17 = vld [vmem:[%s17921_s1 + $0x1d98] sm:$0xff] }
 0x332   :  { %3032 = vmatmul.mubr.f32.gmra.mrb[232].mxu0 %v877_v22  ;;  %v188_v22 = vld [vmem:[%s17921_s1 + $0x3e8] sm:$0xff] }
 0x333   :  { %3036 = vmatprep.mubr.f32.mxu0 %v885_v25  ;;  %9281 = vmatmul.mubr.msk.f32.gmra.mrb[174].mxu1 %vm1169_vm0, %v188_v22 }
 0x336   :  { %3037 = vmatmul.mubr.f32.gmra.mrb[234].mxu0 %v884_v26 }
 0x337   :  { %3041 = vmatprep.mubr.f32.mxu0 %v892_v28 }
 0x33a   :  { %3042 = vmatmul.mubr.f32.gmra.mrb[236].mxu0 %v891_v30  ;;  %v976_v30 = vld [vmem:[%s17921_s1 + $0x1c88] sm:$0xff] }
 0x33b   :  { %3046 = vmatprep.mubr.f32.mxu0 %v899_v35 }
 0x33e   :  { %3047 = vmatmul.mubr.f32.gmra.mrb[238].mxu0 %v898_v36  ;;  %v195_v36 = vld [vmem:[%s17921_s1 + $0x420] sm:$0xff] }
 0x33f   :  { %3051 = vmatprep.mubr.f32.mxu0 %v906_v37  ;;  %9283 = vmatprep.mubr.msk.f32.mxu1 %vm1169_vm0, %v195_v36  ;;  %v1024_v36 = vld [vmem:[%s17921_s1 + $0x1e08] sm:$0xff] }
 0x340   :  { %9284 = vmatmul.mubr.msk.f32.gmra.mrb[176].mxu1 %vm1169_vm0, %v202_v38 }
 0x341   :  { %9286 = vmatprep.mubr.msk.f32.mxu1 %vm1169_vm0, %v209_v51 }
 0x342   :  { %3052 = vmatmul.mubr.f32.gmra.mrb[240].mxu0 %v905_v39  ;;  %v983_v39 = vld [vmem:[%s17921_s1 + $0x1cc0] sm:$0xff] }
 0x343   :  { %3056 = vmatprep.mubr.f32.mxu0 %v913_v43 }
 0x346   :  { %3057 = vmatmul.mubr.f32.gmra.mrb[242].mxu0 %v912_v44  ;;  %v982_v44 = vld [vmem:[%s17921_s1 + $0x1cb8] sm:$0xff] }
 0x347   :  { %3061 = vmatprep.mubr.f32.mxu0 %v920_v45  ;;  %v990_v45 = vld [vmem:[%s17921_s1 + $0x1cf8] sm:$0xff] }
 0x34a   :  { %3062 = vmatmul.mubr.f32.gmra.mrb[244].mxu0 %v919_v50 }
 0x34b   :  { %3066 = vmatprep.mubr.f32.mxu0 %v927_v53 }
 0x34e   :  { %3067 = vmatmul.mubr.f32.gmra.mrb[246].mxu0 %v926_v56  ;;  %v216_v56 = vld [vmem:[%s17921_s1 + $0x4c8] sm:$0xff] }
 0x34f   :  { %3071 = vmatprep.mubr.f32.mxu0 %v934_v57  ;;  %v997_v57 = vld [vmem:[%s17921_s1 + $0x1d30] sm:$0xff]  ;;  %9287 = vmatmul.mubr.msk.f32.gmra.mrb[178].mxu1 %vm1169_vm0, %v216_v56 }
 0x350   :  { %9289 = vmatprep.mubr.msk.f32.mxu1 %vm1169_vm0, %v223_v7 }
 0x352   :  { %3072 = vmatmul.mubr.f32.gmra.mrb[248].mxu0 %v933_v61 }
 0x353   :  { %3076 = vmatprep.mubr.f32.mxu0 %v941_v0  ;;  %v1004_v0 = vld [vmem:[%s17921_s1 + $0x1d68] sm:$0xff]  ;;  %9290 = vmatmul.mubr.msk.f32.gmra.mrb[180].mxu1 %vm1169_vm0, %v230_v10  ;;  %v1045_v10 = vld [vmem:[%s17921_s1 + $0x1eb0] sm:$0xff] }
 0x356   :  { %3077 = vmatmul.mubr.f32.gmra.mrb[250].mxu0 %v940_v1 }
 0x357   :  { %3081 = vmatprep.mubr.f32.mxu0 %v948_v4 }
 0x35a   :  { %3082 = vmatmul.mubr.f32.gmra.mrb[252].mxu0 %v947_v9 }
 0x35b   :  { %3086 = vmatprep.mubr.f32.mxu0 %v955_v12  ;;  %v1011_v12 = vld [vmem:[%s17921_s1 + $0x1da0] sm:$0xff] }
 0x35e   :  { %3087 = vmatmul.mubr.f32.gmra.mrb[254].mxu0 %v954_v14 }
 0x35f   :  { %3091 = vmatprep.mubr.f32.mxu0 %v962_v15 }
 0x361   :  { %v2828_v25 = vpop.f32.mrb[150].mxu0 }
 0x362   :  { %v2830_v26 = vpop.f32.mrb[151].mxu0  ;;  %3092 = vmatmul.mubr.f32.gmra.mrb[150].mxu0 %v961_v18  ;;  %v12713_v28 = vadd.f32 %v2828_v25, %v12264_v27  ;;  %v975_v27 = vld [vmem:[%s17921_s1 + $0x1c80] sm:$0xff]  ;;  %v1018_v18 = vld [vmem:[%s17921_s1 + $0x1dd8] sm:$0xff]  ;;  %v237_v25 = vld [vmem:[%s17921_s1 + $0x570] sm:$0xff] }
 0x363   :  { %3096 = vmatprep.mubr.f32.mxu0 %v969_v23  ;;  %9292 = vmatprep.mubr.msk.f32.mxu1 %vm1169_vm0, %v237_v25 }
 0x364   :  { %18048 = vst [vmem:[#allocation18_spill] sm:$0xff] %v12713_v28 }
 0x365   :  { %v2833_v32 = vpop.f32.mrb[152].mxu0 }
 0x366   :  { %v2835_v35 = vpop.f32.mrb[153].mxu0  ;;  %3097 = vmatmul.mubr.f32.gmra.mrb[152].mxu0 %v968_v29  ;;  %v12725_v37 = vadd.f32 %v2833_v32, %v12278_v34  ;;  %v244_v29 = vld [vmem:[%s17921_s1 + $0x5a8] sm:$0xff] }
 0x367   :  { %3101 = vmatprep.mubr.f32.mxu0 %v976_v30  ;;  %v1025_v30 = vld [vmem:[%s17921_s1 + $0x1e10] sm:$0xff]  ;;  %9293 = vmatmul.mubr.msk.f32.gmra.mrb[182].mxu1 %vm1169_vm0, %v244_v29 }
 0x368   :  { %18049 = vst [vmem:[#allocation19_spill] sm:$0xff] %v12725_v37  ;;  %v741_v37 = vld [vmem:[%s17921_s1 + $0x1530] sm:$0xff] }
 0x369   :  { %v2838_v40 = vpop.f32.mrb[154].mxu0 }
 0x36a   :  { %v2840_v34 = vpop.f32.mrb[155].mxu0  ;;  %3102 = vmatmul.mubr.f32.gmra.mrb[154].mxu0 %v975_v27  ;;  %v12739_v43 = vadd.f32 %v2838_v40, %v12296_v41  ;;  %v989_v41 = vld [vmem:[%s17921_s1 + $0x1cf0] sm:$0xff]  ;;  %v1032_v27 = vld [vmem:[%s17921_s1 + $0x1e48] sm:$0xff]  ;;  %v251_v40 = vld [vmem:[%s17921_s1 + $0x5e0] sm:$0xff] }
 0x36b   :  { %3106 = vmatprep.mubr.f32.mxu0 %v983_v39  ;;  %9295 = vmatprep.mubr.msk.f32.mxu1 %vm1169_vm0, %v251_v40  ;;  %v1059_v40 = vld [vmem:[%s17921_s1 + $0x1f20] sm:$0xff] }
 0x36c   :  { %18050 = vst [vmem:[#allocation20_spill] sm:$0xff] %v12739_v43 }
 0x36d   :  { %v2843_v49 = vpop.f32.mrb[156].mxu0 }
 0x36e   :  { %v2845_v50 = vpop.f32.mrb[157].mxu0  ;;  %3107 = vmatmul.mubr.f32.gmra.mrb[156].mxu0 %v982_v44  ;;  %v12751_v53 = vadd.f32 %v2843_v49, %v12310_v48  ;;  %v258_v44 = vld [vmem:[%s17921_s1 + $0x618] sm:$0xff]  ;;  %v1039_v49 = vld [vmem:[%s17921_s1 + $0x1e80] sm:$0xff] }
 0x36f   :  { %3111 = vmatprep.mubr.f32.mxu0 %v990_v45  ;;  %v12838_v45 = vpop.f32.mrb[52].mxu1  ;;  %9296 = vmatmul.mubr.msk.f32.gmra.mrb[184].mxu1 %vm1169_vm0, %v258_v44  ;;  %v286_v44 = vld [vmem:[%s17921_s1 + $0x6f8] sm:$0xff] }
 0x370   :  { %18051 = vst [vmem:[#allocation21_spill] sm:$0xff] %v12751_v53  ;;  %18058 = vst [vmem:[#allocation28_spill] sm:$0xff] %v12838_v45  ;;  %v727_v53 = vld [vmem:[%s17921_s1 + $0x14c0] sm:$0xff] }
 0x371   :  { %v2848_v59 = vpop.f32.mrb[158].mxu0 }
 0x372   :  { %v2850_v48 = vpop.f32.mrb[159].mxu0  ;;  %3112 = vmatmul.mubr.f32.gmra.mrb[158].mxu0 %v989_v41  ;;  %v12765_v61 = vadd.f32 %v2848_v59, %v12324_v55  ;;  %v1003_v55 = vld [vmem:[%s17921_s1 + $0x1d60] sm:$0xff] }
 0x373   :  { %3116 = vmatprep.mubr.f32.mxu0 %v997_v57  ;;  %v1038_v57 = vld [vmem:[%s17921_s1 + $0x1e78] sm:$0xff] }
 0x374   :  { %18052 = vst [vmem:[#allocation22_spill] sm:$0xff] %v12765_v61  ;;  %v1046_v48 = vld [vmem:[%s17921_s1 + $0x1eb8] sm:$0xff] }
 0x375   :  { %v2853_v1 = vpop.f32.mrb[160].mxu0 }
 0x376   :  { %v2855_v4 = vpop.f32.mrb[161].mxu0  ;;  %3117 = vmatmul.mubr.f32.gmra.mrb[160].mxu0 %v996_v62  ;;  %v12777_v9 = vadd.f32 %v2853_v1, %v12338_v63 }
 0x377   :  { %3121 = vmatprep.mubr.f32.mxu0 %v1004_v0 }
 0x378   :  { %18053 = vst [vmem:[#allocation23_spill] sm:$0xff] %v12777_v9  ;;  %v713_v9 = vld [vmem:[%s17921_s1 + $0x1450] sm:$0xff] }
 0x379   :  { %v2858_v14 = vpop.f32.mrb[162].mxu0 }
 0x37a   :  { %v2860_v63 = vpop.f32.mrb[163].mxu0  ;;  %3122 = vmatmul.mubr.f32.gmra.mrb[162].mxu0 %v1003_v55  ;;  %v12791_v15 = vadd.f32 %v2858_v14, %v12352_v8  ;;  %v1017_v8 = vld [vmem:[%s17921_s1 + $0x1dd0] sm:$0xff]  ;;  %v272_v14 = vld [vmem:[%s17921_s1 + $0x688] sm:$0xff] }
 0x37b   :  { %3126 = vmatprep.mubr.f32.mxu0 %v1011_v12  ;;  %v1053_v63 = vld [vmem:[%s17921_s1 + $0x1ef0] sm:$0xff] }
 0x37c   :  { %18054 = vst [vmem:[#allocation24_spill] sm:$0xff] %v12791_v15 }
 0x37d   :  { %v2863_v22 = vpop.f32.mrb[164].mxu0 }
 0x37e   :  { %v2865_v23 = vpop.f32.mrb[165].mxu0  ;;  %3127 = vmatmul.mubr.f32.gmra.mrb[164].mxu0 %v1010_v17  ;;  %v12803_v26 = vadd.f32 %v2863_v22, %v12366_v16 }
 0x37f   :  { %3131 = vmatprep.mubr.f32.mxu0 %v1018_v18 }
 0x380   :  { %18055 = vst [vmem:[#allocation25_spill] sm:$0xff] %v12803_v26  ;;  %v699_v26 = vld [vmem:[%s17921_s1 + $0x13e0] sm:$0xff] }
 0x381   :  { %v2868_v32 = vpop.f32.mrb[166].mxu0 }
 0x382   :  { %v2870_v16 = vpop.f32.mrb[167].mxu0  ;;  %3132 = vmatmul.mubr.f32.gmra.mrb[166].mxu0 %v1017_v8  ;;  %v12817_v35 = vadd.f32 %v2868_v32, %v12380_v24  ;;  %v1031_v24 = vld [vmem:[%s17921_s1 + $0x1e40] sm:$0xff]  ;;  %v1052_v8 = vld [vmem:[%s17921_s1 + $0x1ee8] sm:$0xff] }
 0x383   :  { %3136 = vmatprep.mubr.f32.mxu0 %v1025_v30  ;;  %v1060_v30 = vld [vmem:[%s17921_s1 + $0x1f28] sm:$0xff] }
 0x384   :  { %18056 = vst [vmem:[#allocation26_spill] sm:$0xff] %v12817_v35 }
 0x385   :  { %v2873_v38 = vpop.f32.mrb[168].mxu0 }
 0x386   :  { %v2875_v39 = vpop.f32.mrb[169].mxu0  ;;  %3137 = vmatmul.mubr.f32.gmra.mrb[168].mxu0 %v1024_v36  ;;  %v12829_v34 = vadd.f32 %v2873_v38, %v12394_v31  ;;  %v2125_v31 = vpop.f32.mrb[53].mxu1 }
 0x387   :  { %3141 = vmatprep.mubr.f32.mxu0 %v1032_v27  ;;  %v12844_v41 = vpop.f32.mrb[54].mxu1 }
 0x388   :  { %18057 = vst [vmem:[#allocation27_spill] sm:$0xff] %v12829_v34  ;;  %18059 = vst [vmem:[#allocation29_spill] sm:$0xff] %v12844_v41  ;;  %v2130_v59 = vpop.f32.mrb[55].mxu1  ;;  %v432_v41 = vld [vmem:[%s17921_s1 + $0xb88] sm:$0xff]  ;;  %v685_v34 = vld [vmem:[%s17921_s1 + $0x1370] sm:$0xff] }
 0x389   :  { %v2878_v50 = vpop.f32.mrb[170].mxu0  ;;  %v12855_v62 = vpop.f32.mrb[56].mxu1 }
 0x38a   :  { %v2880_v51 = vpop.f32.mrb[171].mxu0  ;;  %3142 = vmatmul.mubr.f32.gmra.mrb[170].mxu0 %v1031_v24  ;;  %v12847_v56 = vadd.f32 %v2878_v50, %v12414_v42  ;;  %18061 = vst [vmem:[#allocation31_spill] sm:$0xff] %v12855_v62  ;;  %v2135_v1 = vpop.f32.mrb[57].mxu1  ;;  %v265_v42 = vld [vmem:[%s17921_s1 + $0x650] sm:$0xff] }
 0x38b   :  { %3146 = vmatprep.mubr.f32.mxu0 %v1039_v49  ;;  %v12857_v7 = vpop.f32.mrb[58].mxu1  ;;  %9298 = vmatprep.mubr.msk.f32.mxu1 %vm1169_vm0, %v265_v42  ;;  %v1067_v49 = vld [vmem:[%s17921_s1 + $0x1f60] sm:$0xff]  ;;  %v68_v1 = vld [vmem:[%s17921_s1 + $0x28] sm:$0xff] }
 0x38c   :  { %18060 = vst [vmem:[#allocation30_spill] sm:$0xff] %v12847_v56  ;;  %18062 = vst [vmem:[#allocation32_spill] sm:$0xff] %v12857_v7  ;;  %v2140_v12 = vpop.f32.mrb[59].mxu1  ;;  %9299 = vmatmul.mubr.msk.f32.gmra.mrb[186].mxu1 %vm1169_vm0, %v272_v14  ;;  %v418_v7 = vld [vmem:[%s17921_s1 + $0xb18] sm:$0xff] }
 0x38d   :  { %v2883_v0 = vpop.f32.mrb[172].mxu0 }
 0x38e   :  { %v2885_v4 = vpop.f32.mrb[173].mxu0  ;;  %3147 = vmatmul.mubr.f32.gmra.mrb[172].mxu0 %v1038_v57  ;;  %v12863_v55 = vadd.f32 %v2883_v0, %v12435_v54  ;;  %v12876_v54 = vpop.f32.mrb[60].mxu1 }
 0x38f   :  { %3151 = vmatprep.mubr.f32.mxu0 %v1046_v48  ;;  %18064 = vst [vmem:[#allocation34_spill] sm:$0xff] %v12876_v54  ;;  %v2145_v18 = vpop.f32.mrb[61].mxu1  ;;  %v1066_v48 = vld [vmem:[%s17921_s1 + $0x1f58] sm:$0xff] }
 0x390   :  { %18063 = vst [vmem:[#allocation33_spill] sm:$0xff] %v12863_v55  ;;  %v12878_v23 = vpop.f32.mrb[62].mxu1  ;;  %v671_v55 = vld [vmem:[%s17921_s1 + $0x1300] sm:$0xff] }
 0x391   :  { %v2888_v17 = vpop.f32.mrb[174].mxu0  ;;  %18065 = vst [vmem:[#allocation35_spill] sm:$0xff] %v12878_v23  ;;  %v2150_v29 = vpop.f32.mrb[63].mxu1  ;;  %v404_v23 = vld [vmem:[%s17921_s1 + $0xaa8] sm:$0xff] }
 0x392   :  { %v2890_v22 = vpop.f32.mrb[175].mxu0  ;;  %3152 = vmatmul.mubr.f32.gmra.mrb[174].mxu0 %v1045_v10  ;;  %v12881_v25 = vadd.f32 %v2888_v17, %v12456_v6  ;;  %v12889_v32 = vpop.f32.mrb[64].mxu1  ;;  %v279_v6 = vld [vmem:[%s17921_s1 + $0x6c0] sm:$0xff] }
 0x393   :  { %3156 = vmatprep.mubr.f32.mxu0 %v1053_v63  ;;  %18067 = vst [vmem:[#allocation37_spill] sm:$0xff] %v12889_v32  ;;  %v2155_v36 = vpop.f32.mrb[65].mxu1  ;;  %9301 = vmatprep.mubr.msk.f32.mxu1 %vm1169_vm0, %v279_v6  ;;  %v67_v17 = vld [vmem:[%s17921_s1 + $0x20] sm:$0xff]  ;;  %v300_v22 = vld [vmem:[%s17921_s1 + $0x768] sm:$0xff] }
 0x394   :  { %18066 = vst [vmem:[#allocation36_spill] sm:$0xff] %v12881_v25  ;;  %v12891_v38 = vpop.f32.mrb[66].mxu1  ;;  %9302 = vmatmul.mubr.msk.f32.gmra.mrb[188].mxu1 %vm1169_vm0, %v286_v44  ;;  %v307_v44 = vld [vmem:[%s17921_s1 + $0x7a0] sm:$0xff] }
 0x395   :  { %v2893_v16 = vpop.f32.mrb[176].mxu0  ;;  %18068 = vst [vmem:[#allocation38_spill] sm:$0xff] %v12891_v38  ;;  %v2160_v24 = vpop.f32.mrb[67].mxu1  ;;  %v390_v38 = vld [vmem:[%s17921_s1 + $0xa38] sm:$0xff] }
 0x396   :  { %v2895_v27 = vpop.f32.mrb[177].mxu0  ;;  %3157 = vmatmul.mubr.f32.gmra.mrb[176].mxu0 %v1052_v8  ;;  %v12897_v39 = vadd.f32 %v2893_v16, %v12477_v20  ;;  %v12910_v20 = vpop.f32.mrb[68].mxu1  ;;  %v75_v8 = vld [vmem:[%s17921_s1 + $0x60] sm:$0xff]  ;;  %v74_v16 = vld [vmem:[%s17921_s1 + $0x58] sm:$0xff] }
 0x397   :  { %3161 = vmatprep.mubr.f32.mxu0 %v1060_v30  ;;  %18070 = vst [vmem:[#allocation40_spill] sm:$0xff] %v12910_v20  ;;  %v2165_v50 = vpop.f32.mrb[69].mxu1  ;;  %v82_v27 = vld [vmem:[%s17921_s1 + $0x98] sm:$0xff] }
 0x398   :  { %18069 = vst [vmem:[#allocation39_spill] sm:$0xff] %v12897_v39  ;;  %v12912_v57 = vpop.f32.mrb[70].mxu1  ;;  %v314_v50 = vld [vmem:[%s17921_s1 + $0x7d8] sm:$0xff] }
 0x399   :  { %v2898_v31 = vpop.f32.mrb[178].mxu0  ;;  %18071 = vst [vmem:[#allocation41_spill] sm:$0xff] %v12912_v57  ;;  %v2170_v0 = vpop.f32.mrb[71].mxu1  ;;  %v376_v57 = vld [vmem:[%s17921_s1 + $0x9c8] sm:$0xff] }
 0x39a   :  { %v2900_v51 = vpop.f32.mrb[179].mxu0  ;;  %3162 = vmatmul.mubr.f32.gmra.mrb[178].mxu0 %v1059_v40  ;;  %v12915_v59 = vadd.f32 %v2898_v31, %v12498_v33  ;;  %v12923_v4 = vpop.f32.mrb[72].mxu1  ;;  %v293_v33 = vld [vmem:[%s17921_s1 + $0x730] sm:$0xff] }
 0x39b   :  { %3166 = vmatprep.mubr.f32.mxu0 %v1067_v49  ;;  %18073 = vst [vmem:[#allocation43_spill] sm:$0xff] %v12923_v4  ;;  %v2175_v10 = vpop.f32.mrb[73].mxu1  ;;  %9304 = vmatprep.mubr.msk.f32.mxu1 %vm1169_vm0, %v293_v33  ;;  %v81_v49 = vld [vmem:[%s17921_s1 + $0x90] sm:$0xff] }
 0x39c   :  { %18072 = vst [vmem:[#allocation42_spill] sm:$0xff] %v12915_v59  ;;  %v12925_v14 = vpop.f32.mrb[74].mxu1  ;;  %9305 = vmatmul.mubr.msk.f32.gmra.mrb[190].mxu1 %vm1169_vm0, %v300_v22  ;;  %v89_v51 = vld [vmem:[%s17921_s1 + $0xd0] sm:$0xff] }
 0x39d   :  { %v2903_v42 = vpop.f32.mrb[180].mxu0  ;;  %18074 = vst [vmem:[#allocation44_spill] sm:$0xff] %v12925_v14  ;;  %v2180_v18 = vpop.f32.mrb[75].mxu1  ;;  %9307 = vmatprep.mubr.msk.f32.mxu1 %vm1169_vm0, %v307_v44  ;;  %v321_v22 = vld [vmem:[%s17921_s1 + $0x810] sm:$0xff]  ;;  %v362_v14 = vld [vmem:[%s17921_s1 + $0x958] sm:$0xff] }
 0x39e   :  { %v2905_v12 = vpop.f32.mrb[181].mxu0  ;;  %3167 = vmatmul.mubr.f32.gmra.mrb[180].mxu0 %v1066_v48  ;;  %v12931_v63 = vadd.f32 %v2903_v42, %v12522_v46  ;;  %v12944_v46 = vpop.f32.mrb[76].mxu1  ;;  %v88_v42 = vld [vmem:[%s17921_s1 + $0xc8] sm:$0xff] }
 0x39f   :  { %3236 = vmatprep.mubr.f32.mxu0 %v68_v1  ;;  %18076 = vst [vmem:[#allocation46_spill] sm:$0xff] %v12944_v46  ;;  %v2185_v29 = vpop.f32.mrb[77].mxu1  ;;  %v96_v12 = vld [vmem:[%s17921_s1 + $0x108] sm:$0xff] }
 0x3a0   :  { %18075 = vst [vmem:[#allocation45_spill] sm:$0xff] %v12931_v63  ;;  %v12946_v30 = vpop.f32.mrb[78].mxu1  ;;  %9308 = vmatmul.mubr.msk.f32.gmra.mrb[192].mxu1 %vm1169_vm0, %v314_v50  ;;  %v110_v50 = vld [vmem:[%s17921_s1 + $0x178] sm:$0xff] }
 0x3a1   :  { %18077 = vst [vmem:[#allocation47_spill] sm:$0xff] %v12946_v30  ;;  %v2190_v36 = vpop.f32.mrb[79].mxu1  ;;  %9310 = vmatprep.mubr.msk.f32.mxu1 %vm1169_vm0, %v321_v22  ;;  %v342_v22 = vld [vmem:[%s17921_s1 + $0x8b8] sm:$0xff]  ;;  %v348_v30 = vld [vmem:[%s17921_s1 + $0x8e8] sm:$0xff] }
 0x3a2   :  { %3237 = vmatmul.mubr.f32.vlgmr.msra.gmra.mrb[0].mxu0 %v67_v17  ;;  %v12954_v6 = vpop.f32.mrb[80].mxu1  ;;  %v103_v36 = vld [vmem:[%s17921_s1 + $0x140] sm:$0xff]  ;;  %v446_v63 = vld [vmem:[%s17921_s1 + $0xbf8] sm:$0xff] }
 0x3a3   :  { %3241 = vmatprep.mubr.f32.mxu0 %v75_v8  ;;  %18078 = vst [vmem:[#allocation48_spill] sm:$0xff] %v12954_v6  ;;  %v2195_v40 = vpop.f32.mrb[81].mxu1  ;;  %v95_v8 = vld [vmem:[%s17921_s1 + $0x100] sm:$0xff] }
 0x3a4   :  { %v12956_v24 = vpop.f32.mrb[82].mxu1 }
 0x3a5   :  { %18079 = vst [vmem:[#allocation49_spill] sm:$0xff] %v12956_v24  ;;  %v2200_v31 = vpop.f32.mrb[83].mxu1  ;;  %v334_v24 = vld [vmem:[%s17921_s1 + $0x878] sm:$0xff] }
 0x3a6   :  { %3242 = vmatmul.mubr.f32.gmra.mrb[2].mxu0 %v74_v16  ;;  %v12972_v48 = vpop.f32.mrb[84].mxu1  ;;  %v328_v16 = vld [vmem:[%s17921_s1 + $0x848] sm:$0xff] }
 0x3a7   :  { %3246 = vmatprep.mubr.f32.mxu0 %v82_v27  ;;  %18080 = vst [vmem:[#allocation50_spill] sm:$0xff] %v12972_v48  ;;  %v2205_v0 = vpop.f32.mrb[85].mxu1  ;;  %9311 = vmatmul.mubr.msk.f32.gmra.mrb[194].mxu1 %vm1169_vm0, %v328_v16 }
 0x3a8   :  { %v12974_v1 = vpop.f32.mrb[86].mxu1 }
 0x3a9   :  { %18081 = vst [vmem:[#allocation51_spill] sm:$0xff] %v12974_v1  ;;  %v2210_v10 = vpop.f32.mrb[87].mxu1  ;;  %v320_v1 = vld [vmem:[%s17921_s1 + $0x808] sm:$0xff] }
 0x3aa   :  { %3247 = vmatmul.mubr.f32.gmra.mrb[4].mxu0 %v81_v49  ;;  %v12982_v33 = vpop.f32.mrb[88].mxu1  ;;  %v102_v49 = vld [vmem:[%s17921_s1 + $0x138] sm:$0xff]  ;;  %v335_v10 = vld [vmem:[%s17921_s1 + $0x880] sm:$0xff] }
 0x3ab   :  { %3251 = vmatprep.mubr.f32.mxu0 %v89_v51  ;;  %18082 = vst [vmem:[#allocation52_spill] sm:$0xff] %v12982_v33  ;;  %v2215_v17 = vpop.f32.mrb[89].mxu1  ;;  %9313 = vmatprep.mubr.msk.f32.mxu1 %vm1169_vm0, %v335_v10 }
 0x3ac   :  { %v12984_v18 = vpop.f32.mrb[90].mxu1  ;;  %9314 = vmatmul.mubr.msk.f32.gmra.mrb[196].mxu1 %vm1169_vm0, %v342_v22 }
 0x3ad   :  { %18083 = vst [vmem:[#allocation53_spill] sm:$0xff] %v12984_v18  ;;  %v2220_v29 = vpop.f32.mrb[91].mxu1 }
 0x3ae   :  { %3252 = vmatmul.mubr.f32.gmra.mrb[6].mxu0 %v88_v42  ;;  %v13000_v27 = vpop.f32.mrb[92].mxu1 }
 0x3af   :  { %3256 = vmatprep.mubr.f32.mxu0 %v96_v12  ;;  %18084 = vst [vmem:[#allocation54_spill] sm:$0xff] %v13000_v27  ;;  %v2225_v40 = vpop.f32.mrb[93].mxu1  ;;  %v109_v12 = vld [vmem:[%s17921_s1 + $0x170] sm:$0xff] }
 0x3b0   :  { %v13002_v44 = vpop.f32.mrb[94].mxu1  ;;  %v116_v40 = vld [vmem:[%s17921_s1 + $0x1a8] sm:$0xff]  ;;  %v517_v27 = vld [vmem:[%s17921_s1 + $0xe30] sm:$0xff] }
 0x3b1   :  { %18085 = vst [vmem:[#allocation55_spill] sm:$0xff] %v13002_v44  ;;  %v2230_v31 = vpop.f32.mrb[95].mxu1 }
 0x3b2   :  { %3257 = vmatmul.mubr.f32.gmra.mrb[8].mxu0 %v95_v8  ;;  %v13010_v51 = vpop.f32.mrb[96].mxu1  ;;  %v117_v8 = vld [vmem:[%s17921_s1 + $0x1b0] sm:$0xff]  ;;  %v124_v31 = vld [vmem:[%s17921_s1 + $0x1e8] sm:$0xff] }
 0x3b3   :  { %3261 = vmatprep.mubr.f32.mxu0 %v103_v36  ;;  %18086 = vst [vmem:[#allocation56_spill] sm:$0xff] %v13010_v51  ;;  %v2235_v0 = vpop.f32.mrb[97].mxu1  ;;  %v503_v51 = vld [vmem:[%s17921_s1 + $0xdc0] sm:$0xff] }
 0x3b4   :  { %v13012_v42 = vpop.f32.mrb[98].mxu1 }
 0x3b5   :  { %18087 = vst [vmem:[#allocation57_spill] sm:$0xff] %v13012_v42  ;;  %v2240_v17 = vpop.f32.mrb[99].mxu1 }
 0x3b6   :  { %3262 = vmatmul.mubr.f32.gmra.mrb[10].mxu0 %v102_v49  ;;  %v13028_v29 = vpop.f32.mrb[100].mxu1  ;;  %v123_v17 = vld [vmem:[%s17921_s1 + $0x1e0] sm:$0xff] }
 0x3b7   :  { %3266 = vmatprep.mubr.f32.mxu0 %v110_v50  ;;  %18088 = vst [vmem:[#allocation58_spill] sm:$0xff] %v13028_v29  ;;  %v2245_v16 = vpop.f32.mrb[101].mxu1  ;;  %v489_v29 = vld [vmem:[%s17921_s1 + $0xd50] sm:$0xff] }
 0x3b8   :  { %v13030_v36 = vpop.f32.mrb[102].mxu1  ;;  %v131_v16 = vld [vmem:[%s17921_s1 + $0x220] sm:$0xff] }
 0x3b9   :  { %18089 = vst [vmem:[#allocation59_spill] sm:$0xff] %v13030_v36  ;;  %v2250_v49 = vpop.f32.mrb[103].mxu1 }
 0x3ba   :  { %3267 = vmatmul.mubr.f32.gmra.mrb[12].mxu0 %v109_v12  ;;  %v13038_v50 = vpop.f32.mrb[104].mxu1  ;;  %v349_v12 = vld [vmem:[%s17921_s1 + $0x8f0] sm:$0xff] }
 0x3bb   :  { %3271 = vmatprep.mubr.f32.mxu0 %v117_v8  ;;  %18090 = vst [vmem:[#allocation60_spill] sm:$0xff] %v13038_v50  ;;  %v2255_v0 = vpop.f32.mrb[105].mxu1  ;;  %9316 = vmatprep.mubr.msk.f32.mxu1 %vm1169_vm0, %v349_v12  ;;  %v356_v8 = vld [vmem:[%s17921_s1 + $0x928] sm:$0xff]  ;;  %v475_v50 = vld [vmem:[%s17921_s1 + $0xce0] sm:$0xff] }
 0x3bc   :  { %v13040_v10 = vpop.f32.mrb[106].mxu1  ;;  %9317 = vmatmul.mubr.msk.f32.gmra.mrb[198].mxu1 %vm1169_vm0, %v356_v8  ;;  %v130_v0 = vld [vmem:[%s17921_s1 + $0x218] sm:$0xff] }
 0x3bd   :  { %18091 = vst [vmem:[#allocation61_spill] sm:$0xff] %v13040_v10  ;;  %v2260_v22 = vpop.f32.mrb[107].mxu1 }
 0x3be   :  { %3272 = vmatmul.mubr.f32.gmra.mrb[14].mxu0 %v116_v40  ;;  %v13056_v40 = vpop.f32.mrb[108].mxu1  ;;  %v138_v22 = vld [vmem:[%s17921_s1 + $0x258] sm:$0xff] }
 0x3bf   :  { %3276 = vmatprep.mubr.f32.mxu0 %v124_v31  ;;  %18092 = vst [vmem:[#allocation62_spill] sm:$0xff] %v13056_v40  ;;  %v2265_v49 = vpop.f32.mrb[109].mxu1 }
 0x3c0   :  { %v13058_v31 = vpop.f32.mrb[110].mxu1 }
 0x3c1   :  { %18093 = vst [vmem:[#allocation63_spill] sm:$0xff] %v13058_v31  ;;  %v2270_v12 = vpop.f32.mrb[111].mxu1 }
 0x3c2   :  { %3277 = vmatmul.mubr.f32.gmra.mrb[16].mxu0 %v123_v17  ;;  %v13066_v3 = vpop.f32.mrb[112].mxu1  ;;  %v363_v17 = vld [vmem:[%s17921_s1 + $0x960] sm:$0xff]  ;;  %v370_v12 = vld [vmem:[%s17921_s1 + $0x998] sm:$0xff] }
 0x3c3   :  { %3281 = vmatprep.mubr.f32.mxu0 %v131_v16  ;;  %18094 = vst [vmem:[#allocation64_spill] sm:$0xff] %v13066_v3  ;;  %v2275_v10 = vpop.f32.mrb[113].mxu1  ;;  %v137_v16 = vld [vmem:[%s17921_s1 + $0x250] sm:$0xff]  ;;  %9319 = vmatprep.mubr.msk.f32.mxu1 %vm1169_vm0, %v363_v17  ;;  %v144_v17 = vld [vmem:[%s17921_s1 + $0x288] sm:$0xff] }
 0x3c4   :  { %v13068_v8 = vpop.f32.mrb[114].mxu1  ;;  %v145_v10 = vld [vmem:[%s17921_s1 + $0x290] sm:$0xff]  ;;  %9320 = vmatmul.mubr.msk.f32.gmra.mrb[200].mxu1 %vm1169_vm0, %v370_v12  ;;  %v152_v3 = vld [vmem:[%s17921_s1 + $0x2c8] sm:$0xff] }
 0x3c5   :  { %18095 = vst [vmem:[#allocation65_spill] sm:$0xff] %v13068_v8  ;;  %v2280_v49 = vpop.f32.mrb[115].mxu1 }
 0x3c6   :  { %3282 = vmatmul.mubr.f32.gmra.mrb[18].mxu0 %v130_v0  ;;  %v13084_v0 = vpop.f32.mrb[116].mxu1 }
 0x3c7   :  { %3286 = vmatprep.mubr.f32.mxu0 %v138_v22  ;;  %18096 = vst [vmem:[#allocation66_spill] sm:$0xff] %v13084_v0  ;;  %v2285_v22 = vpop.f32.mrb[117].mxu1 }
 0x3c8   :  { %v13086_v8 = vpop.f32.mrb[118].mxu1 }
 0x3c9   :  { %18097 = vst [vmem:[#allocation67_spill] sm:$0xff] %v13086_v8  ;;  %v2290_v49 = vpop.f32.mrb[119].mxu1 }
 0x3ca   :  { %3287 = vmatmul.mubr.f32.gmra.mrb[20].mxu0 %v137_v16  ;;  %v13094_v31 = vpop.f32.mrb[120].mxu1  ;;  %v377_v16 = vld [vmem:[%s17921_s1 + $0x9d0] sm:$0xff]  ;;  %v384_v49 = vld [vmem:[%s17921_s1 + $0xa08] sm:$0xff] }
 0x3cb   :  { %3291 = vmatprep.mubr.f32.mxu0 %v145_v10  ;;  %18098 = vst [vmem:[#allocation68_spill] sm:$0xff] %v13094_v31  ;;  %v2295_v40 = vpop.f32.mrb[121].mxu1  ;;  %v151_v10 = vld [vmem:[%s17921_s1 + $0x2c0] sm:$0xff]  ;;  %9322 = vmatprep.mubr.msk.f32.mxu1 %vm1169_vm0, %v377_v16  ;;  %v158_v16 = vld [vmem:[%s17921_s1 + $0x2f8] sm:$0xff] }
 0x3cc   :  { %v13096_v12 = vpop.f32.mrb[122].mxu1  ;;  %v159_v40 = vld [vmem:[%s17921_s1 + $0x300] sm:$0xff]  ;;  %9323 = vmatmul.mubr.msk.f32.gmra.mrb[202].mxu1 %vm1169_vm0, %v384_v49  ;;  %v166_v31 = vld [vmem:[%s17921_s1 + $0x338] sm:$0xff] }
 0x3cd   :  { %18099 = vst [vmem:[#allocation69_spill] sm:$0xff] %v13096_v12  ;;  %v2300_v22 = vpop.f32.mrb[123].mxu1 }
 0x3ce   :  { %3292 = vmatmul.mubr.f32.gmra.mrb[22].mxu0 %v144_v17  ;;  %v13112_v17 = vpop.f32.mrb[124].mxu1 }
 0x3cf   :  { %3296 = vmatprep.mubr.f32.mxu0 %v152_v3  ;;  %18100 = vst [vmem:[#allocation70_spill] sm:$0xff] %v13112_v17  ;;  %v2305_v3 = vpop.f32.mrb[125].mxu1 }
 0x3d0   :  { %v13114_v12 = vpop.f32.mrb[126].mxu1 }
 0x3d1   :  { %18101 = vst [vmem:[#allocation71_spill] sm:$0xff] %v13114_v12  ;;  %v2310_v22 = vpop.f32.mrb[127].mxu1 }
 0x3d2   :  { %3297 = vmatmul.mubr.f32.gmra.mrb[24].mxu0 %v151_v10  ;;  %v13122_v8 = vpop.f32.mrb[128].mxu1  ;;  %v391_v10 = vld [vmem:[%s17921_s1 + $0xa40] sm:$0xff]  ;;  %v398_v22 = vld [vmem:[%s17921_s1 + $0xa78] sm:$0xff] }
 0x3d3   :  { %3301 = vmatprep.mubr.f32.mxu0 %v159_v40  ;;  %18102 = vst [vmem:[#allocation72_spill] sm:$0xff] %v13122_v8  ;;  %v2315_v0 = vpop.f32.mrb[129].mxu1  ;;  %v165_v40 = vld [vmem:[%s17921_s1 + $0x330] sm:$0xff]  ;;  %9325 = vmatprep.mubr.msk.f32.mxu1 %vm1169_vm0, %v391_v10  ;;  %v172_v10 = vld [vmem:[%s17921_s1 + $0x368] sm:$0xff] }
 0x3d4   :  { %v13124_v49 = vpop.f32.mrb[130].mxu1  ;;  %v173_v0 = vld [vmem:[%s17921_s1 + $0x370] sm:$0xff]  ;;  %9326 = vmatmul.mubr.msk.f32.gmra.mrb[204].mxu1 %vm1169_vm0, %v398_v22  ;;  %v180_v8 = vld [vmem:[%s17921_s1 + $0x3a8] sm:$0xff] }
 0x3d5   :  { %18103 = vst [vmem:[#allocation73_spill] sm:$0xff] %v13124_v49  ;;  %v2320_v3 = vpop.f32.mrb[131].mxu1 }
 0x3d6   :  { %3302 = vmatmul.mubr.f32.gmra.mrb[26].mxu0 %v158_v16  ;;  %v13140_v16 = vpop.f32.mrb[132].mxu1 }
 0x3d7   :  { %3306 = vmatprep.mubr.f32.mxu0 %v166_v31  ;;  %18104 = vst [vmem:[#allocation74_spill] sm:$0xff] %v13140_v16  ;;  %v2325_v31 = vpop.f32.mrb[133].mxu1 }
 0x3d8   :  { %v13142_v49 = vpop.f32.mrb[134].mxu1 }
 0x3d9   :  { %18105 = vst [vmem:[#allocation75_spill] sm:$0xff] %v13142_v49  ;;  %v2330_v3 = vpop.f32.mrb[135].mxu1 }
 0x3da   :  { %3307 = vmatmul.mubr.f32.gmra.mrb[28].mxu0 %v165_v40  ;;  %v13150_v12 = vpop.f32.mrb[136].mxu1  ;;  %v405_v40 = vld [vmem:[%s17921_s1 + $0xab0] sm:$0xff]  ;;  %v412_v3 = vld [vmem:[%s17921_s1 + $0xae8] sm:$0xff] }
 0x3db   :  { %3311 = vmatprep.mubr.f32.mxu0 %v173_v0  ;;  %18106 = vst [vmem:[#allocation76_spill] sm:$0xff] %v13150_v12  ;;  %v2335_v17 = vpop.f32.mrb[137].mxu1  ;;  %v179_v0 = vld [vmem:[%s17921_s1 + $0x3a0] sm:$0xff]  ;;  %9328 = vmatprep.mubr.msk.f32.mxu1 %vm1169_vm0, %v405_v40  ;;  %v186_v40 = vld [vmem:[%s17921_s1 + $0x3d8] sm:$0xff] }
 0x3dc   :  { %v13152_v22 = vpop.f32.mrb[138].mxu1  ;;  %v187_v17 = vld [vmem:[%s17921_s1 + $0x3e0] sm:$0xff]  ;;  %9329 = vmatmul.mubr.msk.f32.gmra.mrb[206].mxu1 %vm1169_vm0, %v412_v3  ;;  %v194_v12 = vld [vmem:[%s17921_s1 + $0x418] sm:$0xff] }
 0x3dd   :  { %18107 = vst [vmem:[#allocation77_spill] sm:$0xff] %v13152_v22  ;;  %v2340_v31 = vpop.f32.mrb[139].mxu1 }
 0x3de   :  { %3312 = vmatmul.mubr.f32.gmra.mrb[30].mxu0 %v172_v10  ;;  %v13168_v10 = vpop.f32.mrb[140].mxu1 }
 0x3df   :  { %3316 = vmatprep.mubr.f32.mxu0 %v180_v8  ;;  %18108 = vst [vmem:[#allocation78_spill] sm:$0xff] %v13168_v10  ;;  %v2345_v8 = vpop.f32.mrb[141].mxu1 }
 0x3e0   :  { %v13170_v22 = vpop.f32.mrb[142].mxu1 }
 0x3e1   :  { %18109 = vst [vmem:[#allocation79_spill] sm:$0xff] %v13170_v22  ;;  %v2350_v31 = vpop.f32.mrb[143].mxu1 }
 0x3e2   :  { %3317 = vmatmul.mubr.f32.gmra.mrb[32].mxu0 %v179_v0  ;;  %v13178_v49 = vpop.f32.mrb[144].mxu1  ;;  %v419_v0 = vld [vmem:[%s17921_s1 + $0xb20] sm:$0xff]  ;;  %v426_v31 = vld [vmem:[%s17921_s1 + $0xb58] sm:$0xff] }
 0x3e3   :  { %3321 = vmatprep.mubr.f32.mxu0 %v187_v17  ;;  %18110 = vst [vmem:[#allocation80_spill] sm:$0xff] %v13178_v49  ;;  %v2355_v16 = vpop.f32.mrb[145].mxu1  ;;  %v193_v17 = vld [vmem:[%s17921_s1 + $0x410] sm:$0xff]  ;;  %9331 = vmatprep.mubr.msk.f32.mxu1 %vm1169_vm0, %v419_v0  ;;  %v200_v0 = vld [vmem:[%s17921_s1 + $0x448] sm:$0xff] }
 0x3e4   :  { %v13180_v3 = vpop.f32.mrb[146].mxu1  ;;  %v201_v16 = vld [vmem:[%s17921_s1 + $0x450] sm:$0xff]  ;;  %9332 = vmatmul.mubr.msk.f32.gmra.mrb[208].mxu1 %vm1169_vm0, %v426_v31  ;;  %v208_v49 = vld [vmem:[%s17921_s1 + $0x488] sm:$0xff] }
 0x3e5   :  { %18111 = vst [vmem:[#allocation81_spill] sm:$0xff] %v13180_v3  ;;  %v2360_v8 = vpop.f32.mrb[147].mxu1 }
 0x3e6   :  { %3322 = vmatmul.mubr.f32.gmra.mrb[34].mxu0 %v186_v40  ;;  %v13196_v40 = vpop.f32.mrb[148].mxu1 }
 0x3e7   :  { %3326 = vmatprep.mubr.f32.mxu0 %v194_v12  ;;  %18112 = vst [vmem:[#allocation82_spill] sm:$0xff] %v13196_v40  ;;  %v2365_v12 = vpop.f32.mrb[149].mxu1 }
 0x3e8   :  { %v13198_v3 = vpop.f32.mrb[150].mxu1 }
 0x3e9   :  { %18113 = vst [vmem:[#allocation83_spill] sm:$0xff] %v13198_v3  ;;  %v2370_v8 = vpop.f32.mrb[151].mxu1  ;;  %v461_v3 = vld [vmem:[%s17921_s1 + $0xc70] sm:$0xff] }
 0x3ea   :  { %3327 = vmatmul.mubr.f32.gmra.mrb[36].mxu0 %v193_v17  ;;  %v13206_v22 = vpop.f32.mrb[152].mxu1  ;;  %v433_v17 = vld [vmem:[%s17921_s1 + $0xb90] sm:$0xff]  ;;  %v440_v8 = vld [vmem:[%s17921_s1 + $0xbc8] sm:$0xff] }
 0x3eb   :  { %3331 = vmatprep.mubr.f32.mxu0 %v201_v16  ;;  %18114 = vst [vmem:[#allocation84_spill] sm:$0xff] %v13206_v22  ;;  %v2375_v10 = vpop.f32.mrb[153].mxu1  ;;  %v207_v16 = vld [vmem:[%s17921_s1 + $0x480] sm:$0xff]  ;;  %9334 = vmatprep.mubr.msk.f32.mxu1 %vm1169_vm0, %v433_v17  ;;  %v214_v17 = vld [vmem:[%s17921_s1 + $0x4b8] sm:$0xff] }
 0x3ec   :  { %v13208_v31 = vpop.f32.mrb[154].mxu1  ;;  %v215_v10 = vld [vmem:[%s17921_s1 + $0x4c0] sm:$0xff]  ;;  %9335 = vmatmul.mubr.msk.f32.gmra.mrb[210].mxu1 %vm1169_vm0, %v440_v8 }
 0x3ed   :  { %18115 = vst [vmem:[#allocation85_spill] sm:$0xff] %v13208_v31  ;;  %v2380_v12 = vpop.f32.mrb[155].mxu1  ;;  %v447_v8 = vld [vmem:[%s17921_s1 + $0xc00] sm:$0xff] }
 0x3ee   :  { %3332 = vmatmul.mubr.f32.gmra.mrb[38].mxu0 %v200_v0  ;;  %v13224_v0 = vpop.f32.mrb[156].mxu1  ;;  %v222_v12 = vld [vmem:[%s17921_s1 + $0x4f8] sm:$0xff]  ;;  %9337 = vmatprep.mubr.msk.f32.mxu1 %vm1169_vm0, %v447_v8  ;;  %v236_v8 = vld [vmem:[%s17921_s1 + $0x568] sm:$0xff] }
 0x3ef   :  { %3336 = vmatprep.mubr.f32.mxu0 %v208_v49  ;;  %18116 = vst [vmem:[#allocation86_spill] sm:$0xff] %v13224_v0  ;;  %v2385_v49 = vpop.f32.mrb[157].mxu1 }
 0x3f0   :  { %v13232_v31 = vpop.f32.mrb[158].mxu1  ;;  %v454_v49 = vld [vmem:[%s17921_s1 + $0xc38] sm:$0xff] }
 0x3f1   :  { %v13234_v22 = vpop.f32.mrb[159].mxu1  ;;  %9338 = vmatmul.mubr.msk.f32.gmra.mrb[212].mxu1 %vm1169_vm0, %v454_v49  ;;  %v468_v49 = vld [vmem:[%s17921_s1 + $0xca8] sm:$0xff] }
 0x3f2   :  { %3337 = vmatmul.mubr.f32.gmra.mrb[40].mxu0 %v207_v16  ;;  %v221_v16 = vld [vmem:[%s17921_s1 + $0x4f0] sm:$0xff]  ;;  %9340 = vmatprep.mubr.msk.f32.mxu1 %vm1169_vm0, %v461_v3  ;;  %v250_v3 = vld [vmem:[%s17921_s1 + $0x5d8] sm:$0xff] }
 0x3f3   :  { %3341 = vmatprep.mubr.f32.mxu0 %v215_v10  ;;  %v229_v10 = vld [vmem:[%s17921_s1 + $0x530] sm:$0xff] }
 0x3f5   :  { %9341 = vmatmul.mubr.msk.f32.gmra.mrb[214].mxu1 %vm1169_vm0, %v468_v49  ;;  %v482_v49 = vld [vmem:[%s17921_s1 + $0xd18] sm:$0xff] }
 0x3f6   :  { %3342 = vmatmul.mubr.f32.gmra.mrb[42].mxu0 %v214_v17  ;;  %v228_v17 = vld [vmem:[%s17921_s1 + $0x528] sm:$0xff]  ;;  %9343 = vmatprep.mubr.msk.f32.mxu1 %vm1169_vm0, %v475_v50 }
 0x3f7   :  { %3346 = vmatprep.mubr.f32.mxu0 %v222_v12  ;;  %v13253_v12 = vpop.f32.mrb[160].mxu1  ;;  %v264_v50 = vld [vmem:[%s17921_s1 + $0x648] sm:$0xff] }
 0x3f8   :  { %v13258_v0 = vpop.f32.mrb[161].mxu1 }
 0x3f9   :  { %9344 = vmatmul.mubr.msk.f32.gmra.mrb[216].mxu1 %vm1169_vm0, %v482_v49  ;;  %v496_v49 = vld [vmem:[%s17921_s1 + $0xd88] sm:$0xff] }
 0x3fa   :  { %3347 = vmatmul.mubr.f32.gmra.mrb[44].mxu0 %v221_v16  ;;  %v235_v16 = vld [vmem:[%s17921_s1 + $0x560] sm:$0xff]  ;;  %9346 = vmatprep.mubr.msk.f32.mxu1 %vm1169_vm0, %v489_v29  ;;  %v278_v29 = vld [vmem:[%s17921_s1 + $0x6b8] sm:$0xff] }
 0x3fb   :  { %3351 = vmatprep.mubr.f32.mxu0 %v229_v10  ;;  %v243_v10 = vld [vmem:[%s17921_s1 + $0x5a0] sm:$0xff] }
 0x3fd   :  { %9347 = vmatmul.mubr.msk.f32.gmra.mrb[218].mxu1 %vm1169_vm0, %v496_v49  ;;  %v510_v49 = vld [vmem:[%s17921_s1 + $0xdf8] sm:$0xff] }
 0x3fe   :  { %3352 = vmatmul.mubr.f32.gmra.mrb[46].mxu0 %v228_v17  ;;  %v242_v17 = vld [vmem:[%s17921_s1 + $0x598] sm:$0xff]  ;;  %9349 = vmatprep.mubr.msk.f32.mxu1 %vm1169_vm0, %v503_v51  ;;  %v292_v51 = vld [vmem:[%s17921_s1 + $0x728] sm:$0xff] }
 0x3ff   :  { %3356 = vmatprep.mubr.f32.mxu0 %v236_v8  ;;  %v13277_v8 = vpop.f32.mrb[162].mxu1 }
 0x400   :  { %v13282_v40 = vpop.f32.mrb[163].mxu1 }
 0x401   :  { %9350 = vmatmul.mubr.msk.f32.gmra.mrb[220].mxu1 %vm1169_vm0, %v510_v49  ;;  %v524_v49 = vld [vmem:[%s17921_s1 + $0xe68] sm:$0xff] }
 0x402   :  { %3357 = vmatmul.mubr.f32.gmra.mrb[48].mxu0 %v235_v16  ;;  %v249_v16 = vld [vmem:[%s17921_s1 + $0x5d0] sm:$0xff]  ;;  %9352 = vmatprep.mubr.msk.f32.mxu1 %vm1169_vm0, %v517_v27  ;;  %v306_v27 = vld [vmem:[%s17921_s1 + $0x798] sm:$0xff] }
 0x403   :  { %3361 = vmatprep.mubr.f32.mxu0 %v243_v10  ;;  %v257_v10 = vld [vmem:[%s17921_s1 + $0x610] sm:$0xff] }
 0x405   :  { %9353 = vmatmul.mubr.msk.f32.gmra.mrb[222].mxu1 %vm1169_vm0, %v524_v49  ;;  %v305_v49 = vld [vmem:[%s17921_s1 + $0x790] sm:$0xff] }
 0x406   :  { %3362 = vmatmul.mubr.f32.gmra.mrb[50].mxu0 %v242_v17  ;;  %v256_v17 = vld [vmem:[%s17921_s1 + $0x608] sm:$0xff] }
 0x407   :  { %3366 = vmatprep.mubr.f32.mxu0 %v250_v3  ;;  %v13301_v3 = vpop.f32.mrb[164].mxu1 }
 0x408   :  { %v13306_v36 = vpop.f32.mrb[165].mxu1 }
 0x40a   :  { %3367 = vmatmul.mubr.f32.gmra.mrb[52].mxu0 %v249_v16  ;;  %v263_v16 = vld [vmem:[%s17921_s1 + $0x640] sm:$0xff] }
 0x40b   :  { %3371 = vmatprep.mubr.f32.mxu0 %v257_v10  ;;  %v271_v10 = vld [vmem:[%s17921_s1 + $0x680] sm:$0xff] }
 0x40e   :  { %3372 = vmatmul.mubr.f32.gmra.mrb[54].mxu0 %v256_v17  ;;  %v270_v17 = vld [vmem:[%s17921_s1 + $0x678] sm:$0xff] }
 0x40f   :  { %3376 = vmatprep.mubr.f32.mxu0 %v264_v50  ;;  %v13325_v50 = vpop.f32.mrb[166].mxu1 }
 0x410   :  { %v13330_v42 = vpop.f32.mrb[167].mxu1 }
 0x412   :  { %3377 = vmatmul.mubr.f32.gmra.mrb[56].mxu0 %v263_v16  ;;  %v277_v16 = vld [vmem:[%s17921_s1 + $0x6b0] sm:$0xff] }
 0x413   :  { %3381 = vmatprep.mubr.f32.mxu0 %v271_v10  ;;  %v285_v10 = vld [vmem:[%s17921_s1 + $0x6f0] sm:$0xff] }
 0x416   :  { %3382 = vmatmul.mubr.f32.gmra.mrb[58].mxu0 %v270_v17  ;;  %v284_v17 = vld [vmem:[%s17921_s1 + $0x6e8] sm:$0xff] }
 0x417   :  { %3386 = vmatprep.mubr.f32.mxu0 %v278_v29  ;;  %v13349_v29 = vpop.f32.mrb[168].mxu1 }
 0x418   :  { %v13354_v44 = vpop.f32.mrb[169].mxu1 }
 0x41a   :  { %3387 = vmatmul.mubr.f32.gmra.mrb[60].mxu0 %v277_v16  ;;  %v291_v16 = vld [vmem:[%s17921_s1 + $0x720] sm:$0xff] }
 0x41b   :  { %3391 = vmatprep.mubr.f32.mxu0 %v285_v10  ;;  %v299_v10 = vld [vmem:[%s17921_s1 + $0x760] sm:$0xff] }
 0x41e   :  { %3392 = vmatmul.mubr.f32.gmra.mrb[62].mxu0 %v284_v17  ;;  %v298_v17 = vld [vmem:[%s17921_s1 + $0x758] sm:$0xff] }
 0x41f   :  { %3396 = vmatprep.mubr.f32.mxu0 %v292_v51  ;;  %v13373_v51 = vpop.f32.mrb[170].mxu1 }
 0x420   :  { %v13378_v18 = vpop.f32.mrb[171].mxu1 }
 0x421   :  { %v13397_v33 = vpop.f32.mrb[172].mxu1 }
 0x422   :  { %3397 = vmatmul.mubr.f32.gmra.mrb[64].mxu0 %v291_v16  ;;  %v313_v16 = vld [vmem:[%s17921_s1 + $0x7d0] sm:$0xff] }
 0x423   :  { %3401 = vmatprep.mubr.f32.mxu0 %v299_v10  ;;  %v531_v10 = vld [vmem:[%s17921_s1 + $0xea0] sm:$0xff] }
 0x424   :  { %9355 = vmatprep.mubr.msk.f32.mxu1 %vm1169_vm0, %v531_v10  ;;  %v327_v10 = vld [vmem:[%s17921_s1 + $0x840] sm:$0xff] }
 0x426   :  { %3402 = vmatmul.mubr.f32.gmra.mrb[66].mxu0 %v298_v17  ;;  %v538_v17 = vld [vmem:[%s17921_s1 + $0xed8] sm:$0xff] }
 0x427   :  { %3406 = vmatprep.mubr.f32.mxu0 %v306_v27  ;;  %v312_v27 = vld [vmem:[%s17921_s1 + $0x7c8] sm:$0xff]  ;;  %9356 = vmatmul.mubr.msk.f32.gmra.mrb[224].mxu1 %vm1169_vm0, %v538_v17  ;;  %v545_v17 = vld [vmem:[%s17921_s1 + $0xf10] sm:$0xff] }
 0x428   :  { %9358 = vmatprep.mubr.msk.f32.mxu1 %vm1169_vm0, %v545_v17  ;;  %v341_v17 = vld [vmem:[%s17921_s1 + $0x8b0] sm:$0xff] }
 0x42a   :  { %3407 = vmatmul.mubr.f32.gmra.mrb[68].mxu0 %v305_v49  ;;  %v13402_v49 = vpop.f32.mrb[173].mxu1 }
 0x42b   :  { %3411 = vmatprep.mubr.f32.mxu0 %v313_v16  ;;  %v319_v16 = vld [vmem:[%s17921_s1 + $0x800] sm:$0xff]  ;;  %v13421_v48 = vpop.f32.mrb[174].mxu1 }
 0x42e   :  { %3412 = vmatmul.mubr.f32.gmra.mrb[70].mxu0 %v312_v27  ;;  %v552_v27 = vld [vmem:[%s17921_s1 + $0xf48] sm:$0xff] }
 0x42f   :  { %3416 = vmatprep.mubr.f32.mxu0 %v320_v1  ;;  %v326_v1 = vld [vmem:[%s17921_s1 + $0x838] sm:$0xff]  ;;  %9359 = vmatmul.mubr.msk.f32.gmra.mrb[226].mxu1 %vm1169_vm0, %v552_v27  ;;  %v559_v27 = vld [vmem:[%s17921_s1 + $0xf80] sm:$0xff] }
 0x430   :  { %9361 = vmatprep.mubr.msk.f32.mxu1 %vm1169_vm0, %v559_v27  ;;  %v355_v27 = vld [vmem:[%s17921_s1 + $0x920] sm:$0xff] }
 0x432   :  { %3417 = vmatmul.mubr.f32.gmra.mrb[72].mxu0 %v319_v16  ;;  %v13426_v16 = vpop.f32.mrb[175].mxu1 }
 0x433   :  { %3421 = vmatprep.mubr.f32.mxu0 %v327_v10  ;;  %v333_v10 = vld [vmem:[%s17921_s1 + $0x870] sm:$0xff]  ;;  %v13445_v6 = vpop.f32.mrb[176].mxu1 }
 0x436   :  { %3422 = vmatmul.mubr.f32.gmra.mrb[74].mxu0 %v326_v1  ;;  %v566_v1 = vld [vmem:[%s17921_s1 + $0xfb8] sm:$0xff] }
 0x437   :  { %3426 = vmatprep.mubr.f32.mxu0 %v334_v24  ;;  %v340_v24 = vld [vmem:[%s17921_s1 + $0x8a8] sm:$0xff]  ;;  %9362 = vmatmul.mubr.msk.f32.gmra.mrb[228].mxu1 %vm1169_vm0, %v566_v1  ;;  %v573_v1 = vld [vmem:[%s17921_s1 + $0xff0] sm:$0xff] }
 0x438   :  { %9364 = vmatprep.mubr.msk.f32.mxu1 %vm1169_vm0, %v573_v1  ;;  %v369_v1 = vld [vmem:[%s17921_s1 + $0x990] sm:$0xff] }
 0x43a   :  { %3427 = vmatmul.mubr.f32.gmra.mrb[76].mxu0 %v333_v10  ;;  %v13450_v10 = vpop.f32.mrb[177].mxu1 }
 0x43b   :  { %3431 = vmatprep.mubr.f32.mxu0 %v341_v17  ;;  %v347_v17 = vld [vmem:[%s17921_s1 + $0x8e0] sm:$0xff]  ;;  %v13469_v46 = vpop.f32.mrb[178].mxu1 }
 0x43e   :  { %3432 = vmatmul.mubr.f32.gmra.mrb[78].mxu0 %v340_v24  ;;  %v580_v24 = vld [vmem:[%s17921_s1 + $0x1028] sm:$0xff] }
 0x43f   :  { %3436 = vmatprep.mubr.f32.mxu0 %v348_v30  ;;  %v354_v30 = vld [vmem:[%s17921_s1 + $0x918] sm:$0xff]  ;;  %9365 = vmatmul.mubr.msk.f32.gmra.mrb[230].mxu1 %vm1169_vm0, %v580_v24  ;;  %v587_v24 = vld [vmem:[%s17921_s1 + $0x1060] sm:$0xff] }
 0x440   :  { %9367 = vmatprep.mubr.msk.f32.mxu1 %vm1169_vm0, %v587_v24  ;;  %v383_v24 = vld [vmem:[%s17921_s1 + $0xa00] sm:$0xff] }
 0x442   :  { %3437 = vmatmul.mubr.f32.gmra.mrb[80].mxu0 %v347_v17  ;;  %v13474_v17 = vpop.f32.mrb[179].mxu1 }
 0x443   :  { %3441 = vmatprep.mubr.f32.mxu0 %v355_v27  ;;  %v361_v27 = vld [vmem:[%s17921_s1 + $0x950] sm:$0xff]  ;;  %v13493_v4 = vpop.f32.mrb[180].mxu1 }
 0x446   :  { %3442 = vmatmul.mubr.f32.gmra.mrb[82].mxu0 %v354_v30  ;;  %v594_v30 = vld [vmem:[%s17921_s1 + $0x1098] sm:$0xff] }
 0x447   :  { %3446 = vmatprep.mubr.f32.mxu0 %v362_v14  ;;  %v368_v14 = vld [vmem:[%s17921_s1 + $0x988] sm:$0xff]  ;;  %9368 = vmatmul.mubr.msk.f32.gmra.mrb[232].mxu1 %vm1169_vm0, %v594_v30  ;;  %v601_v30 = vld [vmem:[%s17921_s1 + $0x10d0] sm:$0xff] }
 0x448   :  { %9370 = vmatprep.mubr.msk.f32.mxu1 %vm1169_vm0, %v601_v30  ;;  %v397_v30 = vld [vmem:[%s17921_s1 + $0xa70] sm:$0xff] }
 0x44a   :  { %3447 = vmatmul.mubr.f32.gmra.mrb[84].mxu0 %v361_v27  ;;  %v13498_v27 = vpop.f32.mrb[181].mxu1 }
 0x44b   :  { %3451 = vmatprep.mubr.f32.mxu0 %v369_v1  ;;  %v375_v1 = vld [vmem:[%s17921_s1 + $0x9c0] sm:$0xff]  ;;  %v13517_v20 = vpop.f32.mrb[182].mxu1 }
 0x44e   :  { %3452 = vmatmul.mubr.f32.gmra.mrb[86].mxu0 %v368_v14  ;;  %v608_v14 = vld [vmem:[%s17921_s1 + $0x1108] sm:$0xff] }
 0x44f   :  { %3456 = vmatprep.mubr.f32.mxu0 %v376_v57  ;;  %v382_v57 = vld [vmem:[%s17921_s1 + $0x9f8] sm:$0xff]  ;;  %9371 = vmatmul.mubr.msk.f32.gmra.mrb[234].mxu1 %vm1169_vm0, %v608_v14  ;;  %v615_v14 = vld [vmem:[%s17921_s1 + $0x1140] sm:$0xff] }
 0x450   :  { %9373 = vmatprep.mubr.msk.f32.mxu1 %vm1169_vm0, %v615_v14  ;;  %v411_v14 = vld [vmem:[%s17921_s1 + $0xae0] sm:$0xff] }
 0x452   :  { %3457 = vmatmul.mubr.f32.gmra.mrb[88].mxu0 %v375_v1  ;;  %v13522_v1 = vpop.f32.mrb[183].mxu1 }
 0x453   :  { %3461 = vmatprep.mubr.f32.mxu0 %v383_v24  ;;  %v389_v24 = vld [vmem:[%s17921_s1 + $0xa30] sm:$0xff]  ;;  %v13541_v32 = vpop.f32.mrb[184].mxu1 }
 0x456   :  { %3462 = vmatmul.mubr.f32.gmra.mrb[90].mxu0 %v382_v57  ;;  %v622_v57 = vld [vmem:[%s17921_s1 + $0x1178] sm:$0xff] }
 0x457   :  { %3466 = vmatprep.mubr.f32.mxu0 %v390_v38  ;;  %v396_v38 = vld [vmem:[%s17921_s1 + $0xa68] sm:$0xff]  ;;  %9374 = vmatmul.mubr.msk.f32.gmra.mrb[236].mxu1 %vm1169_vm0, %v622_v57  ;;  %v629_v57 = vld [vmem:[%s17921_s1 + $0x11b0] sm:$0xff] }
 0x458   :  { %9376 = vmatprep.mubr.msk.f32.mxu1 %vm1169_vm0, %v629_v57  ;;  %v425_v57 = vld [vmem:[%s17921_s1 + $0xb50] sm:$0xff] }
 0x45a   :  { %3467 = vmatmul.mubr.f32.gmra.mrb[92].mxu0 %v389_v24  ;;  %v13546_v24 = vpop.f32.mrb[185].mxu1 }
 0x45b   :  { %3471 = vmatprep.mubr.f32.mxu0 %v397_v30  ;;  %v403_v30 = vld [vmem:[%s17921_s1 + $0xaa0] sm:$0xff] }
 0x45e   :  { %3472 = vmatmul.mubr.f32.gmra.mrb[94].mxu0 %v396_v38  ;;  %v636_v38 = vld [vmem:[%s17921_s1 + $0x11e8] sm:$0xff] }
 0x45f   :  { %3476 = vmatprep.mubr.f32.mxu0 %v404_v23  ;;  %v410_v23 = vld [vmem:[%s17921_s1 + $0xad8] sm:$0xff]  ;;  %9377 = vmatmul.mubr.msk.f32.gmra.mrb[238].mxu1 %vm1169_vm0, %v636_v38  ;;  %v13565_v54 = vpop.f32.mrb[186].mxu1  ;;  %v643_v38 = vld [vmem:[%s17921_s1 + $0x1220] sm:$0xff] }
 0x460   :  { %9379 = vmatprep.mubr.msk.f32.mxu1 %vm1169_vm0, %v643_v38  ;;  %v439_v38 = vld [vmem:[%s17921_s1 + $0xbc0] sm:$0xff] }
 0x462   :  { %3477 = vmatmul.mubr.f32.gmra.mrb[96].mxu0 %v403_v30  ;;  %v13570_v30 = vpop.f32.mrb[187].mxu1 }
 0x463   :  { %3481 = vmatprep.mubr.f32.mxu0 %v411_v14  ;;  %v417_v14 = vld [vmem:[%s17921_s1 + $0xb10] sm:$0xff] }
 0x466   :  { %3482 = vmatmul.mubr.f32.gmra.mrb[98].mxu0 %v410_v23  ;;  %v650_v23 = vld [vmem:[%s17921_s1 + $0x1258] sm:$0xff] }
 0x467   :  { %3486 = vmatprep.mubr.f32.mxu0 %v418_v7  ;;  %v424_v7 = vld [vmem:[%s17921_s1 + $0xb48] sm:$0xff]  ;;  %9380 = vmatmul.mubr.msk.f32.gmra.mrb[240].mxu1 %vm1169_vm0, %v650_v23  ;;  %v13589_v62 = vpop.f32.mrb[188].mxu1  ;;  %v657_v23 = vld [vmem:[%s17921_s1 + $0x1290] sm:$0xff] }
 0x468   :  { %9382 = vmatprep.mubr.msk.f32.mxu1 %vm1169_vm0, %v657_v23 }
 0x46a   :  { %3487 = vmatmul.mubr.f32.gmra.mrb[100].mxu0 %v417_v14  ;;  %v13594_v14 = vpop.f32.mrb[189].mxu1 }
 0x46b   :  { %3491 = vmatprep.mubr.f32.mxu0 %v425_v57  ;;  %v431_v57 = vld [vmem:[%s17921_s1 + $0xb80] sm:$0xff] }
 0x46e   :  { %3492 = vmatmul.mubr.f32.gmra.mrb[102].mxu0 %v424_v7  ;;  %v664_v7 = vld [vmem:[%s17921_s1 + $0x12c8] sm:$0xff] }
 0x46f   :  { %3496 = vmatprep.mubr.f32.mxu0 %v432_v41  ;;  %v438_v41 = vld [vmem:[%s17921_s1 + $0xbb8] sm:$0xff]  ;;  %9383 = vmatmul.mubr.msk.f32.gmra.mrb[242].mxu1 %vm1169_vm0, %v664_v7  ;;  %v13613_v45 = vpop.f32.mrb[190].mxu1  ;;  %v453_v7 = vld [vmem:[%s17921_s1 + $0xc30] sm:$0xff] }
 0x470   :  { %v13618_v59 = vpop.f32.mrb[191].mxu1  ;;  %9385 = vmatprep.mubr.msk.f32.mxu1 %vm1169_vm0, %v671_v55 }
 0x472   :  { %3497 = vmatmul.mubr.f32.gmra.mrb[104].mxu0 %v431_v57 }
 0x473   :  { %3501 = vmatprep.mubr.f32.mxu0 %v439_v38  ;;  %v445_v38 = vld [vmem:[%s17921_s1 + $0xbf0] sm:$0xff] }
 0x475   :  { %v3238_v57 = vpop.f32.mrb[0].mxu0 }
 0x476   :  { %v13621_v23 = vadd.f32 %v13234_v22, %v3238_v57  ;;  %v3240_v39 = vpop.f32.mrb[1].mxu0  ;;  %3502 = vmatmul.mubr.f32.gmra.mrb[106].mxu0 %v438_v41  ;;  %v13643_v41 = vpop.f32.mrb[192].mxu1 }
 0x477   :  { %3506 = vmatprep.mubr.f32.mxu0 %v446_v63  ;;  %v678_v39 = vld [vmem:[%s17921_s1 + $0x1338] sm:$0xff]  ;;  %v452_v63 = vld [vmem:[%s17921_s1 + $0xc28] sm:$0xff]  ;;  %v13648_v57 = vpop.f32.mrb[193].mxu1 }
 0x478   :  { %9386 = vmatmul.mubr.msk.f32.gmra.mrb[244].mxu1 %vm1169_vm0, %v678_v39 }
 0x479   :  { %v3243_v25 = vpop.f32.mrb[2].mxu0  ;;  %9388 = vmatprep.mubr.msk.f32.mxu1 %vm1169_vm0, %v685_v34 }
 0x47a   :  { %v13633_v56 = vadd.f32 %v13232_v31, %v3243_v25  ;;  %v3245_v22 = vpop.f32.mrb[3].mxu0  ;;  %3507 = vmatmul.mubr.f32.gmra.mrb[108].mxu0 %v445_v38  ;;  %v460_v25 = vld [vmem:[%s17921_s1 + $0xc68] sm:$0xff] }
 0x47b   :  { %3511 = vmatprep.mubr.f32.mxu0 %v453_v7  ;;  %v459_v7 = vld [vmem:[%s17921_s1 + $0xc60] sm:$0xff] }
 0x47c   :  { %v467_v22 = vld [vmem:[%s17921_s1 + $0xca0] sm:$0xff] }
 0x47d   :  { %v3248_v31 = vpop.f32.mrb[4].mxu0 }
 0x47e   :  { %v13651_v55 = vadd.f32 %v13258_v0, %v3248_v31  ;;  %v3250_v38 = vpop.f32.mrb[5].mxu0  ;;  %3512 = vmatmul.mubr.f32.gmra.mrb[110].mxu0 %v452_v63  ;;  %v692_v63 = vld [vmem:[%s17921_s1 + $0x13a8] sm:$0xff]  ;;  %v13673_v31 = vpop.f32.mrb[194].mxu1 }
 0x47f   :  { %3516 = vmatprep.mubr.f32.mxu0 %v460_v25  ;;  %v466_v25 = vld [vmem:[%s17921_s1 + $0xc98] sm:$0xff]  ;;  %9389 = vmatmul.mubr.msk.f32.gmra.mrb[246].mxu1 %vm1169_vm0, %v692_v63 }
 0x480   :  { %9391 = vmatprep.mubr.msk.f32.mxu1 %vm1169_vm0, %v699_v26 }
 0x481   :  { %v3253_v39 = vpop.f32.mrb[6].mxu0 }
 0x482   :  { %v13663_v35 = vadd.f32 %v13253_v12, %v3253_v39  ;;  %v3255_v0 = vpop.f32.mrb[7].mxu0  ;;  %3517 = vmatmul.mubr.f32.gmra.mrb[112].mxu0 %v459_v7  ;;  %v474_v12 = vld [vmem:[%s17921_s1 + $0xcd8] sm:$0xff]  ;;  %v13678_v7 = vpop.f32.mrb[195].mxu1 }
 0x483   :  { %3521 = vmatprep.mubr.f32.mxu0 %v467_v22  ;;  %v473_v22 = vld [vmem:[%s17921_s1 + $0xcd0] sm:$0xff] }
 0x484   :  { %v481_v0 = vld [vmem:[%s17921_s1 + $0xd10] sm:$0xff] }
 0x485   :  { %v3258_v38 = vpop.f32.mrb[8].mxu0 }
 0x486   :  { %v13681_v34 = vadd.f32 %v13282_v40, %v3258_v38  ;;  %v3260_v39 = vpop.f32.mrb[9].mxu0  ;;  %3522 = vmatmul.mubr.f32.gmra.mrb[114].mxu0 %v466_v25  ;;  %v706_v25 = vld [vmem:[%s17921_s1 + $0x1418] sm:$0xff]  ;;  %v13706_v38 = vpop.f32.mrb[196].mxu1 }
 0x487   :  { %3526 = vmatprep.mubr.f32.mxu0 %v474_v12  ;;  %v480_v12 = vld [vmem:[%s17921_s1 + $0xd08] sm:$0xff]  ;;  %9392 = vmatmul.mubr.msk.f32.gmra.mrb[248].mxu1 %vm1169_vm0, %v706_v25 }
 0x488   :  { %9394 = vmatprep.mubr.msk.f32.mxu1 %vm1169_vm0, %v713_v9 }
 0x489   :  { %v3263_v63 = vpop.f32.mrb[10].mxu0 }
 0x48a   :  { %v13693_v15 = vadd.f32 %v13277_v8, %v3263_v63  ;;  %v3265_v40 = vpop.f32.mrb[11].mxu0  ;;  %3527 = vmatmul.mubr.f32.gmra.mrb[116].mxu0 %v473_v22  ;;  %v488_v8 = vld [vmem:[%s17921_s1 + $0xd48] sm:$0xff]  ;;  %v13708_v22 = vpop.f32.mrb[197].mxu1 }
 0x48b   :  { %3531 = vmatprep.mubr.f32.mxu0 %v481_v0  ;;  %v487_v0 = vld [vmem:[%s17921_s1 + $0xd40] sm:$0xff] }
 0x48c   :  { %v495_v40 = vld [vmem:[%s17921_s1 + $0xd80] sm:$0xff] }
 0x48d   :  { %v3268_v39 = vpop.f32.mrb[12].mxu0 }
 0x48e   :  { %v13711_v26 = vadd.f32 %v13306_v36, %v3268_v39  ;;  %v3270_v63 = vpop.f32.mrb[13].mxu0  ;;  %3532 = vmatmul.mubr.f32.gmra.mrb[118].mxu0 %v480_v12  ;;  %v720_v12 = vld [vmem:[%s17921_s1 + $0x1488] sm:$0xff] }
 0x48f   :  { %3536 = vmatprep.mubr.f32.mxu0 %v488_v8  ;;  %v494_v8 = vld [vmem:[%s17921_s1 + $0xd78] sm:$0xff]  ;;  %9395 = vmatmul.mubr.msk.f32.gmra.mrb[250].mxu1 %vm1169_vm0, %v720_v12  ;;  %v13736_v39 = vpop.f32.mrb[198].mxu1 }
 0x490   :  { %9397 = vmatprep.mubr.msk.f32.mxu1 %vm1169_vm0, %v727_v53 }
 0x491   :  { %v3273_v25 = vpop.f32.mrb[14].mxu0 }
 0x492   :  { %v13723_v61 = vadd.f32 %v13301_v3, %v3273_v25  ;;  %v3275_v36 = vpop.f32.mrb[15].mxu0  ;;  %3537 = vmatmul.mubr.f32.gmra.mrb[120].mxu0 %v487_v0  ;;  %v502_v3 = vld [vmem:[%s17921_s1 + $0xdb8] sm:$0xff]  ;;  %v13738_v0 = vpop.f32.mrb[199].mxu1 }
 0x493   :  { %3541 = vmatprep.mubr.f32.mxu0 %v495_v40  ;;  %v501_v40 = vld [vmem:[%s17921_s1 + $0xdb0] sm:$0xff] }
 0x494   :  { %v509_v36 = vld [vmem:[%s17921_s1 + $0xdf0] sm:$0xff] }
 0x495   :  { %v3278_v63 = vpop.f32.mrb[16].mxu0 }
 0x496   :  { %v13741_v9 = vadd.f32 %v13330_v42, %v3278_v63  ;;  %v3280_v25 = vpop.f32.mrb[17].mxu0  ;;  %3542 = vmatmul.mubr.f32.gmra.mrb[122].mxu0 %v494_v8  ;;  %v734_v8 = vld [vmem:[%s17921_s1 + $0x14f8] sm:$0xff] }
 0x497   :  { %3546 = vmatprep.mubr.f32.mxu0 %v502_v3  ;;  %v508_v3 = vld [vmem:[%s17921_s1 + $0xde8] sm:$0xff]  ;;  %9398 = vmatmul.mubr.msk.f32.gmra.mrb[252].mxu1 %vm1169_vm0, %v734_v8  ;;  %v13766_v63 = vpop.f32.mrb[200].mxu1 }
 0x498   :  { %9400 = vmatprep.mubr.msk.f32.mxu1 %vm1169_vm0, %v741_v37 }
 0x499   :  { %v3283_v12 = vpop.f32.mrb[18].mxu0 }
 0x49a   :  { %v13753_v43 = vadd.f32 %v13325_v50, %v3283_v12  ;;  %v3285_v42 = vpop.f32.mrb[19].mxu0  ;;  %3547 = vmatmul.mubr.f32.gmra.mrb[124].mxu0 %v501_v40  ;;  %v516_v50 = vld [vmem:[%s17921_s1 + $0xe28] sm:$0xff]  ;;  %v13768_v40 = vpop.f32.mrb[201].mxu1 }
 0x49b   :  { %3551 = vmatprep.mubr.f32.mxu0 %v509_v36  ;;  %v515_v36 = vld [vmem:[%s17921_s1 + $0xe20] sm:$0xff] }
 0x49c   :  { %18117 = vst [vmem:[#allocation87_spill] sm:$0xff] %v13753_v43  ;;  %v523_v42 = vld [vmem:[%s17921_s1 + $0xe60] sm:$0xff] }
 0x49d   :  { %v3288_v25 = vpop.f32.mrb[20].mxu0 }
 0x49e   :  { %v13771_v53 = vadd.f32 %v13354_v44, %v3288_v25  ;;  %v3290_v12 = vpop.f32.mrb[21].mxu0  ;;  %3552 = vmatmul.mubr.f32.gmra.mrb[126].mxu0 %v508_v3  ;;  %v748_v3 = vld [vmem:[%s17921_s1 + $0x1568] sm:$0xff] }
 0x49f   :  { %3556 = vmatprep.mubr.f32.mxu0 %v516_v50  ;;  %v522_v50 = vld [vmem:[%s17921_s1 + $0xe58] sm:$0xff]  ;;  %9401 = vmatmul.mubr.msk.f32.gmra.mrb[254].mxu1 %vm1169_vm0, %v748_v3  ;;  %v13796_v25 = vpop.f32.mrb[202].mxu1 }
 0x4a0   :  { %18118 = vst [vmem:[#allocation88_spill] sm:$0xff] %v13771_v53  ;;  %9403 = vmatprep.mubr.msk.f32.mxu1 %vm1169_vm0, %v755_v21 }
 0x4a1   :  { %v3293_v8 = vpop.f32.mrb[22].mxu0 }
 0x4a2   :  { %v13783_v28 = vadd.f32 %v13349_v29, %v3293_v8  ;;  %v3295_v44 = vpop.f32.mrb[23].mxu0  ;;  %3557 = vmatmul.mubr.f32.gmra.mrb[128].mxu0 %v515_v36  ;;  %v530_v29 = vld [vmem:[%s17921_s1 + $0xe98] sm:$0xff]  ;;  %v13798_v36 = vpop.f32.mrb[203].mxu1 }
 0x4a3   :  { %3561 = vmatprep.mubr.f32.mxu0 %v523_v42  ;;  %v529_v42 = vld [vmem:[%s17921_s1 + $0xe90] sm:$0xff] }
 0x4a4   :  { %18119 = vst [vmem:[#allocation89_spill] sm:$0xff] %v13783_v28  ;;  %v537_v44 = vld [vmem:[%s17921_s1 + $0xed0] sm:$0xff] }
 0x4a5   :  { %v3298_v12 = vpop.f32.mrb[24].mxu0 }
 0x4a6   :  { %v13801_v37 = vadd.f32 %v13378_v18, %v3298_v12  ;;  %v3300_v8 = vpop.f32.mrb[25].mxu0  ;;  %3562 = vmatmul.mubr.f32.gmra.mrb[130].mxu0 %v522_v50  ;;  %v762_v50 = vld [vmem:[%s17921_s1 + $0x15d8] sm:$0xff] }
 0x4a7   :  { %3566 = vmatprep.mubr.f32.mxu0 %v530_v29  ;;  %v536_v29 = vld [vmem:[%s17921_s1 + $0xec8] sm:$0xff]  ;;  %9404 = vmatmul.mubr.msk.f32.gmra.mrb[0].mxu1 %vm1169_vm0, %v762_v50  ;;  %v13826_v12 = vpop.f32.mrb[204].mxu1 }
 0x4a8   :  { %18120 = vst [vmem:[#allocation90_spill] sm:$0xff] %v13801_v37  ;;  %9406 = vmatprep.mubr.msk.f32.mxu1 %vm1169_vm0, %v769_v13 }
 0x4a9   :  { %v3303_v3 = vpop.f32.mrb[26].mxu0 }
 0x4aa   :  { %v13813_v19 = vadd.f32 %v13373_v51, %v3303_v3  ;;  %v3305_v18 = vpop.f32.mrb[27].mxu0  ;;  %3567 = vmatmul.mubr.f32.gmra.mrb[132].mxu0 %v529_v42  ;;  %v544_v51 = vld [vmem:[%s17921_s1 + $0xf08] sm:$0xff]  ;;  %v13828_v42 = vpop.f32.mrb[205].mxu1 }
 0x4ab   :  { %3571 = vmatprep.mubr.f32.mxu0 %v537_v44  ;;  %v543_v44 = vld [vmem:[%s17921_s1 + $0xf00] sm:$0xff] }
 0x4ac   :  { %18121 = vst [vmem:[#allocation91_spill] sm:$0xff] %v13813_v19  ;;  %v551_v18 = vld [vmem:[%s17921_s1 + $0xf40] sm:$0xff] }
 0x4ad   :  { %v3308_v8 = vpop.f32.mrb[28].mxu0 }
 0x4ae   :  { %v13831_v21 = vadd.f32 %v13402_v49, %v3308_v8  ;;  %v3310_v3 = vpop.f32.mrb[29].mxu0  ;;  %3572 = vmatmul.mubr.f32.gmra.mrb[134].mxu0 %v536_v29  ;;  %v776_v29 = vld [vmem:[%s17921_s1 + $0x1648] sm:$0xff] }
 0x4af   :  { %3576 = vmatprep.mubr.f32.mxu0 %v544_v51  ;;  %v550_v51 = vld [vmem:[%s17921_s1 + $0xf38] sm:$0xff]  ;;  %9407 = vmatmul.mubr.msk.f32.gmra.mrb[2].mxu1 %vm1169_vm0, %v776_v29  ;;  %v13856_v8 = vpop.f32.mrb[206].mxu1 }
 0x4b0   :  { %18122 = vst [vmem:[#allocation92_spill] sm:$0xff] %v13831_v21  ;;  %9409 = vmatprep.mubr.msk.f32.mxu1 %vm1169_vm0, %v783_v5 }
 0x4b1   :  { %v3313_v50 = vpop.f32.mrb[30].mxu0 }
 0x4b2   :  { %v13843_v11 = vadd.f32 %v13397_v33, %v3313_v50  ;;  %v3315_v49 = vpop.f32.mrb[31].mxu0  ;;  %3577 = vmatmul.mubr.f32.gmra.mrb[136].mxu0 %v543_v44  ;;  %v558_v33 = vld [vmem:[%s17921_s1 + $0xf78] sm:$0xff]  ;;  %v13858_v44 = vpop.f32.mrb[207].mxu1 }
 0x4b3   :  { %3581 = vmatprep.mubr.f32.mxu0 %v551_v18  ;;  %v557_v18 = vld [vmem:[%s17921_s1 + $0xf70] sm:$0xff] }
 0x4b4   :  { %18123 = vst [vmem:[#allocation93_spill] sm:$0xff] %v13843_v11  ;;  %v565_v49 = vld [vmem:[%s17921_s1 + $0xfb0] sm:$0xff] }
 0x4b5   :  { %v3318_v3 = vpop.f32.mrb[32].mxu0 }
 0x4b6   :  { %v13861_v13 = vadd.f32 %v13426_v16, %v3318_v3  ;;  %v3320_v50 = vpop.f32.mrb[33].mxu0  ;;  %3582 = vmatmul.mubr.f32.gmra.mrb[138].mxu0 %v550_v51  ;;  %v790_v51 = vld [vmem:[%s17921_s1 + $0x16b8] sm:$0xff] }
 0x4b7   :  { %3586 = vmatprep.mubr.f32.mxu0 %v558_v33  ;;  %v564_v33 = vld [vmem:[%s17921_s1 + $0xfa8] sm:$0xff]  ;;  %9410 = vmatmul.mubr.msk.f32.gmra.mrb[4].mxu1 %vm1169_vm0, %v790_v51  ;;  %v13886_v3 = vpop.f32.mrb[208].mxu1 }
 0x4b8   :  { %18124 = vst [vmem:[#allocation94_spill] sm:$0xff] %v13861_v13  ;;  %9412 = vmatprep.mubr.msk.f32.mxu1 %vm1169_vm0, %v797_v60  ;;  %v18187_v13 = vld [vmem:[#allocation9_spill] sm:$0xff] }
 0x4b9   :  { %v3323_v29 = vpop.f32.mrb[34].mxu0 }
 0x4ba   :  { %v13873_v2 = vadd.f32 %v13421_v48, %v3323_v29  ;;  %v3325_v16 = vpop.f32.mrb[35].mxu0  ;;  %3587 = vmatmul.mubr.f32.gmra.mrb[140].mxu0 %v557_v18  ;;  %v572_v48 = vld [vmem:[%s17921_s1 + $0xfe8] sm:$0xff]  ;;  %v13888_v18 = vpop.f32.mrb[209].mxu1 }
 0x4bb   :  { %3591 = vmatprep.mubr.f32.mxu0 %v565_v49  ;;  %v571_v49 = vld [vmem:[%s17921_s1 + $0xfe0] sm:$0xff] }
 0x4bc   :  { %18125 = vst [vmem:[#allocation95_spill] sm:$0xff] %v13873_v2  ;;  %v579_v16 = vld [vmem:[%s17921_s1 + $0x1020] sm:$0xff] }
 0x4bd   :  { %v3328_v50 = vpop.f32.mrb[36].mxu0 }
 0x4be   :  { %v13891_v5 = vadd.f32 %v13450_v10, %v3328_v50  ;;  %v3330_v29 = vpop.f32.mrb[37].mxu0  ;;  %3592 = vmatmul.mubr.f32.gmra.mrb[142].mxu0 %v564_v33  ;;  %v804_v33 = vld [vmem:[%s17921_s1 + $0x1728] sm:$0xff] }
 0x4bf   :  { %3596 = vmatprep.mubr.f32.mxu0 %v572_v48  ;;  %v578_v48 = vld [vmem:[%s17921_s1 + $0x1018] sm:$0xff]  ;;  %9413 = vmatmul.mubr.msk.f32.gmra.mrb[6].mxu1 %vm1169_vm0, %v804_v33  ;;  %v13916_v50 = vpop.f32.mrb[210].mxu1 }
 0x4c0   :  { %18126 = vst [vmem:[#allocation96_spill] sm:$0xff] %v13891_v5  ;;  %9415 = vmatprep.mubr.msk.f32.mxu1 %vm1169_vm0, %v811_v52  ;;  %v866_v5 = vld [vmem:[%s17921_s1 + $0x1918] sm:$0xff] }
 0x4c1   :  { %v3333_v51 = vpop.f32.mrb[38].mxu0 }
 0x4c2   :  { %v13903_v58 = vadd.f32 %v13445_v6, %v3333_v51  ;;  %v3335_v10 = vpop.f32.mrb[39].mxu0  ;;  %3597 = vmatmul.mubr.f32.gmra.mrb[144].mxu0 %v571_v49  ;;  %v586_v6 = vld [vmem:[%s17921_s1 + $0x1058] sm:$0xff]  ;;  %v13918_v49 = vpop.f32.mrb[211].mxu1 }
 0x4c3   :  { %3601 = vmatprep.mubr.f32.mxu0 %v579_v16  ;;  %v585_v16 = vld [vmem:[%s17921_s1 + $0x1050] sm:$0xff] }
 0x4c4   :  { %18127 = vst [vmem:[#allocation97_spill] sm:$0xff] %v13903_v58  ;;  %v593_v10 = vld [vmem:[%s17921_s1 + $0x1090] sm:$0xff]  ;;  %v1070_v58 = vld [vmem:[%s17921_s1 + $0x1f78] sm:$0xff] }
 0x4c5   :  { %v3338_v29 = vpop.f32.mrb[40].mxu0 }
 0x4c6   :  { %v13921_v60 = vadd.f32 %v13474_v17, %v3338_v29  ;;  %v3340_v51 = vpop.f32.mrb[41].mxu0  ;;  %3602 = vmatmul.mubr.f32.gmra.mrb[146].mxu0 %v578_v48  ;;  %v818_v48 = vld [vmem:[%s17921_s1 + $0x1798] sm:$0xff]  ;;  %v13946_v29 = vpop.f32.mrb[212].mxu1 }
 0x4c7   :  { %3606 = vmatprep.mubr.f32.mxu0 %v586_v6  ;;  %v592_v6 = vld [vmem:[%s17921_s1 + $0x1088] sm:$0xff]  ;;  %9416 = vmatmul.mubr.msk.f32.gmra.mrb[8].mxu1 %vm1169_vm0, %v818_v48 }
 0x4c8   :  { %18128 = vst [vmem:[#allocation98_spill] sm:$0xff] %v13921_v60  ;;  %v4850_v60 = vld [vmem:[%s17922_s2] sm:$0xff] }
 0x4c9   :  { %v3343_v33 = vpop.f32.mrb[42].mxu0 }
 0x4ca   :  { %v13933_v47 = vadd.f32 %v13469_v46, %v3343_v33  ;;  %v3345_v17 = vpop.f32.mrb[43].mxu0  ;;  %3607 = vmatmul.mubr.f32.gmra.mrb[148].mxu0 %v585_v16  ;;  %v600_v46 = vld [vmem:[%s17921_s1 + $0x10c8] sm:$0xff]  ;;  %v13948_v16 = vpop.f32.mrb[213].mxu1 }
 0x4cb   :  { %3611 = vmatprep.mubr.f32.mxu0 %v593_v10  ;;  %v599_v10 = vld [vmem:[%s17921_s1 + $0x10c0] sm:$0xff] }
 0x4cc   :  { %18129 = vst [vmem:[#allocation99_spill] sm:$0xff] %v13933_v47  ;;  %v607_v17 = vld [vmem:[%s17921_s1 + $0x1100] sm:$0xff]  ;;  %v10513_v47 = vmov 0  }
 0x4cd   :  { %v3348_v51 = vpop.f32.mrb[44].mxu0  ;;  %10472 = vset.pattern.permute.xlu0 %v10513_v47  ;;  %10473 = vset.pattern.permute.xlu1 %v10513_v47  ;;  %v614_v47 = vld [vmem:[%s17921_s1 + $0x1138] sm:$0xff] }
 0x4ce   :  { %v13951_v52 = vadd.f32 %v13498_v27, %v3348_v51  ;;  %v3350_v33 = vpop.f32.mrb[45].mxu0  ;;  %3612 = vmatmul.mubr.f32.gmra.mrb[0].mxu0 %v592_v6  ;;  %v825_v27 = vld [vmem:[%s17921_s1 + $0x17d0] sm:$0xff]  ;;  %4888 = vperm.xlu0 %10472, %v4850_v60   ;;  %v832_v51 = vld [vmem:[%s17921_s1 + $0x1808] sm:$0xff] }
 0x4cf   :  { %3616 = vmatprep.mubr.f32.mxu0 %v600_v46  ;;  %v606_v33 = vld [vmem:[%s17921_s1 + $0x10f8] sm:$0xff]  ;;  %9418 = vmatprep.mubr.msk.f32.mxu1 %vm1169_vm0, %v825_v27  ;;  %v613_v27 = vld [vmem:[%s17921_s1 + $0x1130] sm:$0xff] }
 0x4d0   :  { %18130 = vst [vmem:[#allocation100_spill] sm:$0xff] %v13951_v52  ;;  %9419 = vmatmul.mubr.msk.f32.gmra.mrb[10].mxu1 %vm1169_vm0, %v832_v51  ;;  %v621_v51 = vld [vmem:[%s17921_s1 + $0x1170] sm:$0xff] }
 0x4d1   :  { %v3353_v48 = vpop.f32.mrb[46].mxu0  ;;  %v4852_v52 = vld [vmem:[%s17922_s2 + $0x10] sm:$0xff] }
 0x4d2   :  { %v13966_v6 = vadd.f32 %v13493_v4, %v3353_v48  ;;  %v3355_v46 = vpop.f32.mrb[47].mxu0  ;;  %3617 = vmatmul.mubr.f32.gmra.mrb[2].mxu0 %v599_v10  ;;  %v13979_v4 = vpop.f32.mrb[214].mxu1  ;;  %4898 = vperm.xlu1 %10473, %v4852_v52  }
 0x4d3   :  { %3621 = vmatprep.mubr.f32.mxu0 %v607_v17  ;;  %v13981_v10 = vpop.f32.mrb[215].mxu1  ;;  %v4851_v17 = vld [vmem:[%s17922_s2 + $0x8] sm:$0xff] }
 0x4d4   :  { %18131 = vst [vmem:[#allocation101_spill] sm:$0xff] %v13966_v6  ;;  %4893 = vperm.xlu0 %10472, %v4851_v17   ;;  %v846_v17 = vld [vmem:[%s17921_s1 + $0x1878] sm:$0xff]  ;;  %v14017_v52 = vpop.f32.mrb[216].mxu1 }
 0x4d5   :  { %v3358_v60 = vpop.f32.mrb[48].mxu0  ;;  %18134 = vst [vmem:[#allocation104_spill] sm:$0xff] %v14017_v52  ;;  %v4855_v52 = vld [vmem:[%s17922_s2 + $0x28] sm:$0xff] }
 0x4d6   :  { %v13987_v48 = vadd.f32 %v13522_v1, %v3358_v60  ;;  %v3360_v46 = vpop.f32.mrb[49].mxu0  ;;  %3622 = vmatmul.mubr.f32.gmra.mrb[4].mxu0 %v606_v33  ;;  %v4854_v1 = vld [vmem:[%s17922_s2 + $0x20] sm:$0xff] }
 0x4d7   :  { %3626 = vmatprep.mubr.f32.mxu0 %v614_v47  ;;  %v839_v60 = vld [vmem:[%s17921_s1 + $0x1840] sm:$0xff]  ;;  %v620_v46 = vld [vmem:[%s17921_s1 + $0x1168] sm:$0xff] }
 0x4d8   :  { %18132 = vst [vmem:[#allocation102_spill] sm:$0xff] %v13987_v48  ;;  %4908 = vperm.xlu0 %10472, %v4854_v1   ;;  %9421 = vmatprep.mubr.msk.f32.mxu1 %vm1169_vm0, %v839_v60  ;;  %v4856_v1 = vld [vmem:[%s17922_s2 + $0x30] sm:$0xff]  ;;  %v627_v60 = vld [vmem:[%s17921_s1 + $0x11a0] sm:$0xff] }
 0x4d9   :  { %v3363_v6 = vpop.f32.mrb[50].mxu0  ;;  %9422 = vmatmul.mubr.msk.f32.gmra.mrb[12].mxu1 %vm1169_vm0, %v846_v17  ;;  %v635_v17 = vld [vmem:[%s17921_s1 + $0x11e0] sm:$0xff] }
 0x4da   :  { %v14002_v33 = vadd.f32 %v13517_v20, %v3363_v6  ;;  %v3365_v47 = vpop.f32.mrb[51].mxu0  ;;  %3627 = vmatmul.mubr.f32.gmra.mrb[6].mxu0 %v613_v27  ;;  %v628_v20 = vld [vmem:[%s17921_s1 + $0x11a8] sm:$0xff]  ;;  %v14020_v27 = vpop.f32.mrb[217].mxu1 }
 0x4db   :  { %3631 = vmatprep.mubr.f32.mxu0 %v621_v51  ;;  %v4853_v51 = vld [vmem:[%s17922_s2 + $0x18] sm:$0xff] }
 0x4dc   :  { %18133 = vst [vmem:[#allocation103_spill] sm:$0xff] %v14002_v33  ;;  %4903 = vperm.xlu1 %10473, %v4853_v51   ;;  %4918 = vperm.xlu0 %10472, %v4856_v1   ;;  %v634_v51 = vld [vmem:[%s17921_s1 + $0x11d8] sm:$0xff] }
 0x4dd   :  { %v3368_v6 = vpop.f32.mrb[52].mxu0 }
 0x4de   :  { %v14029_v47 = vadd.f32 %v13546_v24, %v3368_v6  ;;  %v3370_v33 = vpop.f32.mrb[53].mxu0  ;;  %3632 = vmatmul.mubr.f32.gmra.mrb[8].mxu0 %v620_v46  ;;  %v4858_v24 = vld [vmem:[%s17922_s2 + $0x40] sm:$0xff]  ;;  %v860_v6 = vld [vmem:[%s17921_s1 + $0x18e8] sm:$0xff] }
 0x4df   :  { %3636 = vmatprep.mubr.f32.mxu0 %v628_v20  ;;  %v853_v20 = vld [vmem:[%s17921_s1 + $0x18b0] sm:$0xff] }
 0x4e0   :  { %18135 = vst [vmem:[#allocation105_spill] sm:$0xff] %v14029_v47  ;;  %4913 = vperm.xlu1 %10473, %v4855_v52   ;;  %4928 = vperm.xlu0 %10472, %v4858_v24   ;;  %v4859_v47 = vld [vmem:[%s17922_s2 + $0x48] sm:$0xff] }
 0x4e1   :  { %v3373_v48 = vpop.f32.mrb[54].mxu0  ;;  %9424 = vmatprep.mubr.msk.f32.mxu1 %vm1169_vm0, %v853_v20  ;;  %v641_v20 = vld [vmem:[%s17921_s1 + $0x1210] sm:$0xff] }
 0x4e2   :  { %v14044_v33 = vadd.f32 %v13541_v32, %v3373_v48  ;;  %v3375_v46 = vpop.f32.mrb[55].mxu0  ;;  %3637 = vmatmul.mubr.f32.gmra.mrb[10].mxu0 %v627_v60  ;;  %v642_v32 = vld [vmem:[%s17921_s1 + $0x1218] sm:$0xff]  ;;  %v14059_v48 = vpop.f32.mrb[218].mxu1  ;;  %9425 = vmatmul.mubr.msk.f32.gmra.mrb[14].mxu1 %vm1169_vm0, %v860_v6  ;;  %v649_v6 = vld [vmem:[%s17921_s1 + $0x1250] sm:$0xff] }
 0x4e3   :  { %3641 = vmatprep.mubr.f32.mxu0 %v635_v17  ;;  %v14062_v1 = vpop.f32.mrb[219].mxu1  ;;  %v4857_v60 = vld [vmem:[%s17922_s2 + $0x38] sm:$0xff]  ;;  %v4860_v17 = vld [vmem:[%s17922_s2 + $0x50] sm:$0xff] }
 0x4e4   :  { %18136 = vst [vmem:[#allocation106_spill] sm:$0xff] %v14044_v33  ;;  %4923 = vperm.xlu1 %10473, %v4857_v60   ;;  %4938 = vperm.xlu0 %10472, %v4860_v17   ;;  %v874_v60 = vld [vmem:[%s17921_s1 + $0x1958] sm:$0xff]  ;;  %v648_v17 = vld [vmem:[%s17921_s1 + $0x1248] sm:$0xff] }
 0x4e5   :  { %v3378_v52 = vpop.f32.mrb[56].mxu0 }
 0x4e6   :  { %v14071_v24 = vadd.f32 %v13570_v30, %v3378_v52  ;;  %v3380_v46 = vpop.f32.mrb[57].mxu0  ;;  %3642 = vmatmul.mubr.f32.gmra.mrb[12].mxu0 %v634_v51  ;;  %v4862_v30 = vld [vmem:[%s17922_s2 + $0x60] sm:$0xff] }
 0x4e7   :  { %3646 = vmatprep.mubr.f32.mxu0 %v642_v32  ;;  %v867_v52 = vld [vmem:[%s17921_s1 + $0x1920] sm:$0xff] }
 0x4e8   :  { %18137 = vst [vmem:[#allocation107_spill] sm:$0xff] %v14071_v24  ;;  %4933 = vperm.xlu1 %10473, %v4859_v47   ;;  %4948 = vperm.xlu0 %10472, %v4862_v30   ;;  %v14101_v47 = vpop.f32.mrb[220].mxu1  ;;  %v4863_v24 = vld [vmem:[%s17922_s2 + $0x68] sm:$0xff] }
 0x4e9   :  { %v3383_v33 = vpop.f32.mrb[58].mxu0  ;;  %9427 = vmatprep.mubr.msk.f32.mxu1 %vm1169_vm0, %v867_v52  ;;  %v14104_v46 = vpop.f32.mrb[221].mxu1  ;;  %v655_v52 = vld [vmem:[%s17921_s1 + $0x1280] sm:$0xff] }
 0x4ea   :  { %v14086_v51 = vadd.f32 %v13565_v54, %v3383_v33  ;;  %v3385_v32 = vpop.f32.mrb[59].mxu0  ;;  %3647 = vmatmul.mubr.f32.gmra.mrb[14].mxu0 %v641_v20  ;;  %v656_v54 = vld [vmem:[%s17921_s1 + $0x1288] sm:$0xff]  ;;  %9428 = vmatmul.mubr.msk.f32.gmra.mrb[16].mxu1 %vm1169_vm0, %v874_v60  ;;  %v4861_v20 = vld [vmem:[%s17922_s2 + $0x58] sm:$0xff]  ;;  %v663_v60 = vld [vmem:[%s17921_s1 + $0x12c0] sm:$0xff] }
 0x4eb   :  { %3651 = vmatprep.mubr.f32.mxu0 %v649_v6  ;;  %v4864_v6 = vld [vmem:[%s17922_s2 + $0x70] sm:$0xff] }
 0x4ec   :  { %18138 = vst [vmem:[#allocation108_spill] sm:$0xff] %v14086_v51  ;;  %4943 = vperm.xlu1 %10473, %v4861_v20   ;;  %4958 = vperm.xlu0 %10472, %v4864_v6   ;;  %v888_v20 = vld [vmem:[%s17921_s1 + $0x19c8] sm:$0xff]  ;;  %v662_v6 = vld [vmem:[%s17921_s1 + $0x12b8] sm:$0xff] }
 0x4ed   :  { %v3388_v33 = vpop.f32.mrb[60].mxu0 }
 0x4ee   :  { %v14113_v30 = vadd.f32 %v13594_v14, %v3388_v33  ;;  %v3390_v32 = vpop.f32.mrb[61].mxu0  ;;  %3652 = vmatmul.mubr.f32.gmra.mrb[16].mxu0 %v648_v17  ;;  %v4866_v14 = vld [vmem:[%s17922_s2 + $0x80] sm:$0xff]  ;;  %v881_v33 = vld [vmem:[%s17921_s1 + $0x1990] sm:$0xff] }
 0x4ef   :  { %3656 = vmatprep.mubr.f32.mxu0 %v656_v54  ;;  %9430 = vmatprep.mubr.msk.f32.mxu1 %vm1169_vm0, %v881_v33  ;;  %v669_v33 = vld [vmem:[%s17921_s1 + $0x12f0] sm:$0xff] }
 0x4f0   :  { %18139 = vst [vmem:[#allocation109_spill] sm:$0xff] %v14113_v30  ;;  %4953 = vperm.xlu1 %10473, %v4863_v24   ;;  %4968 = vperm.xlu0 %10472, %v4866_v14   ;;  %v14143_v24 = vpop.f32.mrb[222].mxu1  ;;  %v4867_v30 = vld [vmem:[%s17922_s2 + $0x88] sm:$0xff] }
 0x4f1   :  { %v3393_v51 = vpop.f32.mrb[62].mxu0  ;;  %9431 = vmatmul.mubr.msk.f32.gmra.mrb[18].mxu1 %vm1169_vm0, %v888_v20  ;;  %v14146_v32 = vpop.f32.mrb[223].mxu1  ;;  %v677_v20 = vld [vmem:[%s17921_s1 + $0x1330] sm:$0xff] }
 0x4f2   :  { %v14128_v17 = vadd.f32 %v13589_v62, %v3393_v51  ;;  %v3395_v54 = vpop.f32.mrb[63].mxu0  ;;  %3657 = vmatmul.mubr.f32.gmra.mrb[18].mxu0 %v655_v52  ;;  %v670_v62 = vld [vmem:[%s17921_s1 + $0x12f8] sm:$0xff] }
 0x4f3   :  { %3661 = vmatprep.mubr.f32.mxu0 %v663_v60  ;;  %v4865_v52 = vld [vmem:[%s17922_s2 + $0x78] sm:$0xff]  ;;  %v4868_v60 = vld [vmem:[%s17922_s2 + $0x90] sm:$0xff] }
 0x4f4   :  { %18140 = vst [vmem:[#allocation110_spill] sm:$0xff] %v14128_v17  ;;  %4963 = vperm.xlu1 %10473, %v4865_v52   ;;  %4978 = vperm.xlu0 %10472, %v4868_v60   ;;  %v902_v52 = vld [vmem:[%s17921_s1 + $0x1a38] sm:$0xff]  ;;  %v676_v60 = vld [vmem:[%s17921_s1 + $0x1328] sm:$0xff] }
 0x4f5   :  { %v3398_v51 = vpop.f32.mrb[64].mxu0 }
 0x4f6   :  { %v14155_v14 = vadd.f32 %v13618_v59, %v3398_v51  ;;  %v3400_v54 = vpop.f32.mrb[65].mxu0  ;;  %3662 = vmatmul.mubr.f32.gmra.mrb[20].mxu0 %v662_v6  ;;  %v4870_v59 = vld [vmem:[%s17922_s2 + $0xa0] sm:$0xff] }
 0x4f7   :  { %3666 = vmatprep.mubr.f32.mxu0 %v670_v62  ;;  %v895_v51 = vld [vmem:[%s17921_s1 + $0x1a00] sm:$0xff]  ;;  %v4872_v54 = vld [vmem:[%s17922_s2 + $0xb0] sm:$0xff] }
 0x4f8   :  { %18141 = vst [vmem:[#allocation111_spill] sm:$0xff] %v14155_v14  ;;  %4973 = vperm.xlu1 %10473, %v4867_v30   ;;  %4988 = vperm.xlu0 %10472, %v4870_v59  }
 0x4f9   :  { %v3403_v17 = vpop.f32.mrb[66].mxu0  ;;  %9433 = vmatprep.mubr.msk.f32.mxu1 %vm1169_vm0, %v895_v51 }
 0x4fa   :  { %v14170_v6 = vadd.f32 %v13613_v45, %v3403_v17  ;;  %v3405_v62 = vpop.f32.mrb[67].mxu0  ;;  %3667 = vmatmul.mubr.f32.gmra.mrb[22].mxu0 %v669_v33  ;;  %v684_v45 = vld [vmem:[%s17921_s1 + $0x1368] sm:$0xff]  ;;  %9434 = vmatmul.mubr.msk.f32.gmra.mrb[20].mxu1 %vm1169_vm0, %v902_v52  ;;  %v4869_v17 = vld [vmem:[%s17922_s2 + $0x98] sm:$0xff]  ;;  %v14195_v59 = vpop.f32.mrb[224].mxu1  ;;  %v691_v52 = vld [vmem:[%s17921_s1 + $0x13a0] sm:$0xff] }
 0x4fb   :  { %3671 = vmatprep.mubr.f32.mxu0 %v677_v20  ;;  %v683_v62 = vld [vmem:[%s17921_s1 + $0x1360] sm:$0xff]  ;;  %v14200_v51 = vpop.f32.mrb[225].mxu1 }
 0x4fc   :  { %18142 = vst [vmem:[#allocation112_spill] sm:$0xff] %v14170_v6  ;;  %4983 = vperm.xlu1 %10473, %v4869_v17   ;;  %4998 = vperm.xlu0 %10472, %v4872_v54   ;;  %v909_v17 = vld [vmem:[%s17921_s1 + $0x1a70] sm:$0xff]  ;;  %v916_v54 = vld [vmem:[%s17921_s1 + $0x1aa8] sm:$0xff] }
 0x4fd   :  { %v3408_v30 = vpop.f32.mrb[68].mxu0  ;;  %9436 = vmatprep.mubr.msk.f32.mxu1 %vm1169_vm0, %v909_v17  ;;  %v697_v17 = vld [vmem:[%s17921_s1 + $0x13d0] sm:$0xff] }
 0x4fe   :  { %v14193_v33 = vadd.f32 %v13648_v57, %v3408_v30  ;;  %v3410_v20 = vpop.f32.mrb[69].mxu0  ;;  %3672 = vmatmul.mubr.f32.gmra.mrb[24].mxu0 %v676_v60  ;;  %v4871_v57 = vld [vmem:[%s17922_s2 + $0xa8] sm:$0xff]  ;;  %v4874_v60 = vld [vmem:[%s17922_s2 + $0xc0] sm:$0xff]  ;;  %9437 = vmatmul.mubr.msk.f32.gmra.mrb[22].mxu1 %vm1169_vm0, %v916_v54 }
 0x4ff   :  { %3676 = vmatprep.mubr.f32.mxu0 %v684_v45  ;;  %v690_v20 = vld [vmem:[%s17921_s1 + $0x1398] sm:$0xff] }
 0x500   :  { %18143 = vst [vmem:[#allocation113_spill] sm:$0xff] %v14193_v33  ;;  %4993 = vperm.xlu1 %10473, %v4871_v57   ;;  %5008 = vperm.xlu0 %10472, %v4874_v60  }
 0x501   :  { %v3413_v6 = vpop.f32.mrb[70].mxu0 }
 0x502   :  { %v14212_v45 = vadd.f32 %v13643_v41, %v3413_v6  ;;  %v3415_v30 = vpop.f32.mrb[71].mxu0  ;;  %3677 = vmatmul.mubr.f32.gmra.mrb[26].mxu0 %v683_v62  ;;  %v698_v41 = vld [vmem:[%s17921_s1 + $0x13d8] sm:$0xff] }
 0x503   :  { %3681 = vmatprep.mubr.f32.mxu0 %v691_v52  ;;  %v4873_v62 = vld [vmem:[%s17922_s2 + $0xb8] sm:$0xff]  ;;  %v4876_v52 = vld [vmem:[%s17922_s2 + $0xd0] sm:$0xff]  ;;  %v14237_v30 = vpop.f32.mrb[226].mxu1 }
 0x504   :  { %18144 = vst [vmem:[#allocation114_spill] sm:$0xff] %v14212_v45  ;;  %5003 = vperm.xlu1 %10473, %v4873_v62   ;;  %5018 = vperm.xlu0 %10472, %v4876_v52   ;;  %v14242_v54 = vpop.f32.mrb[227].mxu1  ;;  %v930_v45 = vld [vmem:[%s17921_s1 + $0x1b18] sm:$0xff] }
 0x505   :  { %v3418_v6 = vpop.f32.mrb[72].mxu0 }
 0x506   :  { %v14235_v57 = vadd.f32 %v13678_v7, %v3418_v6  ;;  %v3420_v60 = vpop.f32.mrb[73].mxu0  ;;  %3682 = vmatmul.mubr.f32.gmra.mrb[28].mxu0 %v690_v20  ;;  %v705_v7 = vld [vmem:[%s17921_s1 + $0x1410] sm:$0xff]  ;;  %v4875_v20 = vld [vmem:[%s17922_s2 + $0xc8] sm:$0xff] }
 0x507   :  { %3686 = vmatprep.mubr.f32.mxu0 %v698_v41  ;;  %v4878_v41 = vld [vmem:[%s17922_s2 + $0xe0] sm:$0xff] }
 0x508   :  { %18145 = vst [vmem:[#allocation115_spill] sm:$0xff] %v14235_v57  ;;  %5013 = vperm.xlu1 %10473, %v4875_v20   ;;  %v923_v60 = vld [vmem:[%s17921_s1 + $0x1ae0] sm:$0xff]  ;;  %v704_v57 = vld [vmem:[%s17921_s1 + $0x1408] sm:$0xff]  ;;  %5028 = vperm.xlu0 %10472, %v4878_v41   ;;  %v4880_v20 = vld [vmem:[%s17922_s2 + $0xf0] sm:$0xff] }
 0x509   :  { %v3423_v6 = vpop.f32.mrb[74].mxu0  ;;  %9439 = vmatprep.mubr.msk.f32.mxu1 %vm1169_vm0, %v923_v60 }
 0x50a   :  { %v14256_v62 = vadd.f32 %v13673_v31, %v3423_v6  ;;  %v3425_v52 = vpop.f32.mrb[75].mxu0  ;;  %3687 = vmatmul.mubr.f32.gmra.mrb[30].mxu0 %v697_v17  ;;  %v712_v17 = vld [vmem:[%s17921_s1 + $0x1448] sm:$0xff]  ;;  %9440 = vmatmul.mubr.msk.f32.gmra.mrb[24].mxu1 %vm1169_vm0, %v930_v45  ;;  %v14283_v31 = vpop.f32.mrb[228].mxu1  ;;  %v711_v45 = vld [vmem:[%s17921_s1 + $0x1440] sm:$0xff] }
 0x50b   :  { %3691 = vmatprep.mubr.f32.mxu0 %v705_v7  ;;  %v4877_v7 = vld [vmem:[%s17922_s2 + $0xd8] sm:$0xff]  ;;  %v14288_v60 = vpop.f32.mrb[229].mxu1 }
 0x50c   :  { %18146 = vst [vmem:[#allocation116_spill] sm:$0xff] %v14256_v62  ;;  %5023 = vperm.xlu1 %10473, %v4877_v7   ;;  %5038 = vperm.xlu0 %10472, %v4880_v20   ;;  %v944_v62 = vld [vmem:[%s17921_s1 + $0x1b88] sm:$0xff] }
 0x50d   :  { %v3428_v6 = vpop.f32.mrb[76].mxu0 }
 0x50e   :  { %v14281_v41 = vadd.f32 %v13708_v22, %v3428_v6  ;;  %v3430_v52 = vpop.f32.mrb[77].mxu0  ;;  %3692 = vmatmul.mubr.f32.gmra.mrb[182].mxu0 %v704_v57  ;;  %v719_v22 = vld [vmem:[%s17921_s1 + $0x1480] sm:$0xff]  ;;  %v4879_v57 = vld [vmem:[%s17922_s2 + $0xe8] sm:$0xff] }
 0x50f   :  { %3696 = vmatprep.mubr.f32.mxu0 %v712_v17  ;;  %v4882_v17 = vld [vmem:[%s17922_s2 + $0x100] sm:$0xff]  ;;  %v937_v52 = vld [vmem:[%s17921_s1 + $0x1b50] sm:$0xff] }
 0x510   :  { %18147 = vst [vmem:[#allocation117_spill] sm:$0xff] %v14281_v41  ;;  %5033 = vperm.xlu1 %10473, %v4879_v57   ;;  %v718_v41 = vld [vmem:[%s17921_s1 + $0x1478] sm:$0xff]  ;;  %5048 = vperm.xlu0 %10472, %v4882_v17   ;;  %v4884_v57 = vld [vmem:[%s17922_s2 + $0x110] sm:$0xff] }
 0x511   :  { %v3433_v6 = vpop.f32.mrb[78].mxu0  ;;  %9442 = vmatprep.mubr.msk.f32.mxu1 %vm1169_vm0, %v937_v52 }
 0x512   :  { %v14302_v7 = vadd.f32 %v13706_v38, %v3433_v6  ;;  %v3435_v20 = vpop.f32.mrb[79].mxu0  ;;  %3697 = vmatmul.mubr.f32.gmra.mrb[184].mxu0 %v711_v45  ;;  %v726_v45 = vld [vmem:[%s17921_s1 + $0x14b8] sm:$0xff]  ;;  %9443 = vmatmul.mubr.msk.f32.gmra.mrb[26].mxu1 %vm1169_vm0, %v944_v62  ;;  %v14329_v38 = vpop.f32.mrb[230].mxu1  ;;  %v725_v62 = vld [vmem:[%s17921_s1 + $0x14b0] sm:$0xff] }
 0x513   :  { %3701 = vmatprep.mubr.f32.mxu0 %v719_v22  ;;  %v4881_v22 = vld [vmem:[%s17922_s2 + $0xf8] sm:$0xff]  ;;  %v14334_v52 = vpop.f32.mrb[231].mxu1 }
 0x514   :  { %18148 = vst [vmem:[#allocation118_spill] sm:$0xff] %v14302_v7  ;;  %5043 = vperm.xlu1 %10473, %v4881_v22   ;;  %5058 = vperm.xlu0 %10472, %v4884_v57   ;;  %v958_v7 = vld [vmem:[%s17921_s1 + $0x1bf8] sm:$0xff] }
 0x515   :  { %v3438_v6 = vpop.f32.mrb[80].mxu0 }
 0x516   :  { %v14327_v17 = vadd.f32 %v13738_v0, %v3438_v6  ;;  %v3440_v20 = vpop.f32.mrb[81].mxu0  ;;  %3702 = vmatmul.mubr.f32.gmra.mrb[186].mxu0 %v718_v41  ;;  %v733_v0 = vld [vmem:[%s17921_s1 + $0x14f0] sm:$0xff]  ;;  %v4883_v41 = vld [vmem:[%s17922_s2 + $0x108] sm:$0xff] }
 0x517   :  { %3706 = vmatprep.mubr.f32.mxu0 %v726_v45  ;;  %v7429_v45 = vld [vmem:[%s17924_s4 + $0x80] sm:$0xff] }
 0x518   :  { %18149 = vst [vmem:[#allocation119_spill] sm:$0xff] %v14327_v17  ;;  %5053 = vperm.xlu1 %10473, %v4883_v41   ;;  %v951_v20 = vld [vmem:[%s17921_s1 + $0x1bc0] sm:$0xff]  ;;  %v732_v17 = vld [vmem:[%s17921_s1 + $0x14e8] sm:$0xff]  ;;  %7527 = vperm.xlu0 %10472, %v7429_v45  }
 0x519   :  { %v3443_v6 = vpop.f32.mrb[82].mxu0  ;;  %9445 = vmatprep.mubr.msk.f32.mxu1 %vm1169_vm0, %v951_v20  ;;  %v7413_v41 = vld [vmem:[%s17924_s4] sm:$0xff] }
 0x51a   :  { %v14348_v22 = vadd.f32 %v13736_v39, %v3443_v6  ;;  %v3445_v57 = vpop.f32.mrb[83].mxu0  ;;  %3707 = vmatmul.mubr.f32.gmra.mrb[188].mxu0 %v725_v62  ;;  %v740_v62 = vld [vmem:[%s17921_s1 + $0x1528] sm:$0xff]  ;;  %9446 = vmatmul.mubr.msk.f32.gmra.mrb[28].mxu1 %vm1169_vm0, %v958_v7  ;;  %v14375_v39 = vpop.f32.mrb[232].mxu1  ;;  %v739_v7 = vld [vmem:[%s17921_s1 + $0x1520] sm:$0xff] }
 0x51b   :  { %3711 = vmatprep.mubr.f32.mxu0 %v733_v0  ;;  %v4885_v0 = vld [vmem:[%s17922_s2 + $0x118] sm:$0xff]  ;;  %v14380_v20 = vpop.f32.mrb[233].mxu1  ;;  %s8905_s2 = sld [smem:[#allocation2 + $0x5]] }
 0x51c   :  { %18150 = vst [vmem:[#allocation120_spill] sm:$0xff] %v14348_v22  ;;  %5063 = vperm.xlu1 %10473, %v4885_v0   ;;  %7447 = vperm.xlu0 %10472, %v7413_v41   ;;  %v972_v22 = vld [vmem:[%s17921_s1 + $0x1c68] sm:$0xff] }
 0x51d   :  { %v3448_v6 = vpop.f32.mrb[84].mxu0 }
 0x51e   :  { %v14373_v45 = vadd.f32 %v13768_v40, %v3448_v6  ;;  %v3450_v57 = vpop.f32.mrb[85].mxu0  ;;  %3712 = vmatmul.mubr.f32.gmra.mrb[190].mxu0 %v732_v17  ;;  %v747_v40 = vld [vmem:[%s17921_s1 + $0x1560] sm:$0xff]  ;;  %v7430_v17 = vld [vmem:[%s17924_s4 + $0x88] sm:$0xff] }
 0x51f   :  { %3716 = vmatprep.mubr.f32.mxu0 %v740_v62  ;;  %v7431_v62 = vld [vmem:[%s17924_s4 + $0x90] sm:$0xff] }
 0x520   :  { %18151 = vst [vmem:[#allocation121_spill] sm:$0xff] %v14373_v45  ;;  %7532 = vperm.xlu1 %10473, %v7430_v17   ;;  %v965_v57 = vld [vmem:[%s17921_s1 + $0x1c30] sm:$0xff]  ;;  %v746_v45 = vld [vmem:[%s17921_s1 + $0x1558] sm:$0xff]  ;;  %7537 = vperm.xlu0 %10472, %v7431_v62  }
 0x521   :  { %v3453_v6 = vpop.f32.mrb[86].mxu0  ;;  %9448 = vmatprep.mubr.msk.f32.mxu1 %vm1169_vm0, %v965_v57  ;;  %v7415_v17 = vld [vmem:[%s17924_s4 + $0x10] sm:$0xff] }
 0x522   :  { %v14394_v0 = vadd.f32 %v13766_v63, %v3453_v6  ;;  %v3455_v41 = vpop.f32.mrb[87].mxu0  ;;  %3717 = vmatmul.mubr.f32.gmra.mrb[192].mxu0 %v739_v7  ;;  %v754_v7 = vld [vmem:[%s17921_s1 + $0x1598] sm:$0xff]  ;;  %9449 = vmatmul.mubr.msk.f32.gmra.mrb[30].mxu1 %vm1169_vm0, %v972_v22  ;;  %v14421_v63 = vpop.f32.mrb[234].mxu1  ;;  %v753_v22 = vld [vmem:[%s17921_s1 + $0x1590] sm:$0xff] }
 0x523   :  { %3721 = vmatprep.mubr.f32.mxu0 %v747_v40  ;;  %v7414_v40 = vld [vmem:[%s17924_s4 + $0x8] sm:$0xff]  ;;  %v14426_v57 = vpop.f32.mrb[235].mxu1 }
 0x524   :  { %18152 = vst [vmem:[#allocation122_spill] sm:$0xff] %v14394_v0  ;;  %7452 = vperm.xlu1 %10473, %v7414_v40   ;;  %7457 = vperm.xlu0 %10472, %v7415_v17   ;;  %v986_v0 = vld [vmem:[%s17921_s1 + $0x1cd8] sm:$0xff] }
 0x525   :  { %v3458_v6 = vpop.f32.mrb[88].mxu0 }
 0x526   :  { %v14419_v62 = vadd.f32 %v13798_v36, %v3458_v6  ;;  %v3460_v41 = vpop.f32.mrb[89].mxu0  ;;  %3722 = vmatmul.mubr.f32.gmra.mrb[194].mxu0 %v746_v45  ;;  %v761_v36 = vld [vmem:[%s17921_s1 + $0x15d0] sm:$0xff]  ;;  %v7432_v45 = vld [vmem:[%s17924_s4 + $0x98] sm:$0xff] }
 0x527   :  { %3726 = vmatprep.mubr.f32.mxu0 %v754_v7  ;;  %v7433_v7 = vld [vmem:[%s17924_s4 + $0xa0] sm:$0xff] }
 0x528   :  { %18153 = vst [vmem:[#allocation123_spill] sm:$0xff] %v14419_v62  ;;  %7542 = vperm.xlu1 %10473, %v7432_v45   ;;  %v979_v41 = vld [vmem:[%s17921_s1 + $0x1ca0] sm:$0xff]  ;;  %v760_v62 = vld [vmem:[%s17921_s1 + $0x15c8] sm:$0xff]  ;;  %7547 = vperm.xlu0 %10472, %v7433_v7  }
 0x529   :  { %v3463_v6 = vpop.f32.mrb[90].mxu0  ;;  %9451 = vmatprep.mubr.msk.f32.mxu1 %vm1169_vm0, %v979_v41  ;;  %v7417_v45 = vld [vmem:[%s17924_s4 + $0x20] sm:$0xff] }
 0x52a   :  { %v14440_v40 = vadd.f32 %v13796_v25, %v3463_v6  ;;  %v3465_v17 = vpop.f32.mrb[91].mxu0  ;;  %3727 = vmatmul.mubr.f32.gmra.mrb[196].mxu0 %v753_v22  ;;  %v768_v22 = vld [vmem:[%s17921_s1 + $0x1608] sm:$0xff]  ;;  %9452 = vmatmul.mubr.msk.f32.gmra.mrb[32].mxu1 %vm1169_vm0, %v986_v0  ;;  %v14467_v25 = vpop.f32.mrb[236].mxu1  ;;  %v767_v0 = vld [vmem:[%s17921_s1 + $0x1600] sm:$0xff] }
 0x52b   :  { %3731 = vmatprep.mubr.f32.mxu0 %v761_v36  ;;  %v7416_v36 = vld [vmem:[%s17924_s4 + $0x18] sm:$0xff]  ;;  %v14472_v41 = vpop.f32.mrb[237].mxu1 }
 0x52c   :  { %18154 = vst [vmem:[#allocation124_spill] sm:$0xff] %v14440_v40  ;;  %7462 = vperm.xlu1 %10473, %v7416_v36   ;;  %7467 = vperm.xlu0 %10472, %v7417_v45   ;;  %v1000_v40 = vld [vmem:[%s17921_s1 + $0x1d48] sm:$0xff] }
 0x52d   :  { %v3468_v6 = vpop.f32.mrb[92].mxu0 }
 0x52e   :  { %v14465_v7 = vadd.f32 %v13828_v42, %v3468_v6  ;;  %v3470_v17 = vpop.f32.mrb[93].mxu0  ;;  %3732 = vmatmul.mubr.f32.gmra.mrb[198].mxu0 %v760_v62  ;;  %v775_v42 = vld [vmem:[%s17921_s1 + $0x1640] sm:$0xff]  ;;  %v7434_v62 = vld [vmem:[%s17924_s4 + $0xa8] sm:$0xff] }
 0x52f   :  { %3736 = vmatprep.mubr.f32.mxu0 %v768_v22  ;;  %v7435_v22 = vld [vmem:[%s17924_s4 + $0xb0] sm:$0xff] }
 0x530   :  { %18155 = vst [vmem:[#allocation125_spill] sm:$0xff] %v14465_v7  ;;  %7552 = vperm.xlu1 %10473, %v7434_v62   ;;  %v993_v17 = vld [vmem:[%s17921_s1 + $0x1d10] sm:$0xff]  ;;  %v774_v7 = vld [vmem:[%s17921_s1 + $0x1638] sm:$0xff]  ;;  %7557 = vperm.xlu0 %10472, %v7435_v22  }
 0x531   :  { %v3473_v6 = vpop.f32.mrb[94].mxu0  ;;  %9454 = vmatprep.mubr.msk.f32.mxu1 %vm1169_vm0, %v993_v17  ;;  %v7419_v62 = vld [vmem:[%s17924_s4 + $0x30] sm:$0xff] }
 0x532   :  { %v14486_v36 = vadd.f32 %v13826_v12, %v3473_v6  ;;  %v3475_v45 = vpop.f32.mrb[95].mxu0  ;;  %3737 = vmatmul.mubr.f32.gmra.mrb[200].mxu0 %v767_v0  ;;  %v782_v0 = vld [vmem:[%s17921_s1 + $0x1678] sm:$0xff]  ;;  %9455 = vmatmul.mubr.msk.f32.gmra.mrb[34].mxu1 %vm1169_vm0, %v1000_v40  ;;  %v14513_v12 = vpop.f32.mrb[238].mxu1  ;;  %v781_v40 = vld [vmem:[%s17921_s1 + $0x1670] sm:$0xff] }
 0x533   :  { %3741 = vmatprep.mubr.f32.mxu0 %v775_v42  ;;  %v7418_v42 = vld [vmem:[%s17924_s4 + $0x28] sm:$0xff]  ;;  %v14518_v17 = vpop.f32.mrb[239].mxu1 }
 0x534   :  { %18156 = vst [vmem:[#allocation126_spill] sm:$0xff] %v14486_v36  ;;  %7472 = vperm.xlu1 %10473, %v7418_v42   ;;  %7477 = vperm.xlu0 %10472, %v7419_v62   ;;  %v1014_v36 = vld [vmem:[%s17921_s1 + $0x1db8] sm:$0xff] }
 0x535   :  { %v3478_v6 = vpop.f32.mrb[96].mxu0 }
 0x536   :  { %v14511_v22 = vadd.f32 %v13858_v44, %v3478_v6  ;;  %v3480_v45 = vpop.f32.mrb[97].mxu0  ;;  %3742 = vmatmul.mubr.f32.gmra.mrb[202].mxu0 %v774_v7  ;;  %v789_v44 = vld [vmem:[%s17921_s1 + $0x16b0] sm:$0xff]  ;;  %v7436_v7 = vld [vmem:[%s17924_s4 + $0xb8] sm:$0xff] }
 0x537   :  { %3746 = vmatprep.mubr.f32.mxu0 %v782_v0  ;;  %v7437_v0 = vld [vmem:[%s17924_s4 + $0xc0] sm:$0xff] }
 0x538   :  { %18157 = vst [vmem:[#allocation127_spill] sm:$0xff] %v14511_v22  ;;  %7562 = vperm.xlu1 %10473, %v7436_v7   ;;  %v1007_v45 = vld [vmem:[%s17921_s1 + $0x1d80] sm:$0xff]  ;;  %v788_v22 = vld [vmem:[%s17921_s1 + $0x16a8] sm:$0xff]  ;;  %7567 = vperm.xlu0 %10472, %v7437_v0  }
 0x539   :  { %v3483_v6 = vpop.f32.mrb[98].mxu0  ;;  %9457 = vmatprep.mubr.msk.f32.mxu1 %vm1169_vm0, %v1007_v45  ;;  %v7421_v7 = vld [vmem:[%s17924_s4 + $0x40] sm:$0xff] }
 0x53a   :  { %v14532_v42 = vadd.f32 %v13856_v8, %v3483_v6  ;;  %v3485_v62 = vpop.f32.mrb[99].mxu0  ;;  %3747 = vmatmul.mubr.f32.gmra.mrb[204].mxu0 %v781_v40  ;;  %v796_v40 = vld [vmem:[%s17921_s1 + $0x16e8] sm:$0xff]  ;;  %9458 = vmatmul.mubr.msk.f32.gmra.mrb[36].mxu1 %vm1169_vm0, %v1014_v36  ;;  %v14559_v8 = vpop.f32.mrb[240].mxu1  ;;  %v795_v36 = vld [vmem:[%s17921_s1 + $0x16e0] sm:$0xff] }
 0x53b   :  { %3751 = vmatprep.mubr.f32.mxu0 %v789_v44  ;;  %v7420_v44 = vld [vmem:[%s17924_s4 + $0x38] sm:$0xff]  ;;  %v14564_v45 = vpop.f32.mrb[241].mxu1 }
 0x53c   :  { %18158 = vst [vmem:[#allocation128_spill] sm:$0xff] %v14532_v42  ;;  %7482 = vperm.xlu1 %10473, %v7420_v44   ;;  %7487 = vperm.xlu0 %10472, %v7421_v7   ;;  %v1028_v42 = vld [vmem:[%s17921_s1 + $0x1e28] sm:$0xff] }
 0x53d   :  { %v3488_v6 = vpop.f32.mrb[100].mxu0 }
 0x53e   :  { %v14557_v0 = vadd.f32 %v13888_v18, %v3488_v6  ;;  %v3490_v62 = vpop.f32.mrb[101].mxu0  ;;  %3752 = vmatmul.mubr.f32.gmra.mrb[206].mxu0 %v788_v22  ;;  %v803_v18 = vld [vmem:[%s17921_s1 + $0x1720] sm:$0xff]  ;;  %v7438_v22 = vld [vmem:[%s17924_s4 + $0xc8] sm:$0xff] }
 0x53f   :  { %3756 = vmatprep.mubr.f32.mxu0 %v796_v40  ;;  %v7439_v40 = vld [vmem:[%s17924_s4 + $0xd0] sm:$0xff] }
 0x540   :  { %18159 = vst [vmem:[#allocation129_spill] sm:$0xff] %v14557_v0  ;;  %7572 = vperm.xlu1 %10473, %v7438_v22   ;;  %v1021_v62 = vld [vmem:[%s17921_s1 + $0x1df0] sm:$0xff]  ;;  %v802_v0 = vld [vmem:[%s17921_s1 + $0x1718] sm:$0xff]  ;;  %7577 = vperm.xlu0 %10472, %v7439_v40  }
 0x541   :  { %v3493_v6 = vpop.f32.mrb[102].mxu0  ;;  %9460 = vmatprep.mubr.msk.f32.mxu1 %vm1169_vm0, %v1021_v62  ;;  %v7423_v22 = vld [vmem:[%s17924_s4 + $0x50] sm:$0xff] }
 0x542   :  { %v14578_v44 = vadd.f32 %v13886_v3, %v3493_v6  ;;  %v3495_v7 = vpop.f32.mrb[103].mxu0  ;;  %3757 = vmatmul.mubr.f32.gmra.mrb[208].mxu0 %v795_v36  ;;  %v810_v36 = vld [vmem:[%s17921_s1 + $0x1758] sm:$0xff]  ;;  %9461 = vmatmul.mubr.msk.f32.gmra.mrb[38].mxu1 %vm1169_vm0, %v1028_v42  ;;  %v14605_v3 = vpop.f32.mrb[242].mxu1  ;;  %v809_v42 = vld [vmem:[%s17921_s1 + $0x1750] sm:$0xff] }
 0x543   :  { %3761 = vmatprep.mubr.f32.mxu0 %v803_v18  ;;  %v7422_v18 = vld [vmem:[%s17924_s4 + $0x48] sm:$0xff]  ;;  %v14610_v62 = vpop.f32.mrb[243].mxu1 }
 0x544   :  { %18160 = vst [vmem:[#allocation130_spill] sm:$0xff] %v14578_v44  ;;  %7492 = vperm.xlu1 %10473, %v7422_v18   ;;  %7497 = vperm.xlu0 %10472, %v7423_v22   ;;  %v1042_v44 = vld [vmem:[%s17921_s1 + $0x1e98] sm:$0xff] }
 0x545   :  { %v3498_v6 = vpop.f32.mrb[104].mxu0 }
 0x546   :  { %v14603_v40 = vadd.f32 %v13918_v49, %v3498_v6  ;;  %v3500_v7 = vpop.f32.mrb[105].mxu0  ;;  %3762 = vmatmul.mubr.f32.gmra.mrb[210].mxu0 %v802_v0  ;;  %v817_v49 = vld [vmem:[%s17921_s1 + $0x1790] sm:$0xff]  ;;  %v7440_v0 = vld [vmem:[%s17924_s4 + $0xd8] sm:$0xff] }
 0x547   :  { %3766 = vmatprep.mubr.f32.mxu0 %v810_v36  ;;  %v7441_v36 = vld [vmem:[%s17924_s4 + $0xe0] sm:$0xff] }
 0x548   :  { %18161 = vst [vmem:[#allocation131_spill] sm:$0xff] %v14603_v40  ;;  %7582 = vperm.xlu1 %10473, %v7440_v0   ;;  %v1035_v7 = vld [vmem:[%s17921_s1 + $0x1e60] sm:$0xff]  ;;  %v816_v40 = vld [vmem:[%s17921_s1 + $0x1788] sm:$0xff]  ;;  %7587 = vperm.xlu0 %10472, %v7441_v36  }
 0x549   :  { %v3503_v6 = vpop.f32.mrb[106].mxu0  ;;  %9463 = vmatprep.mubr.msk.f32.mxu1 %vm1169_vm0, %v1035_v7  ;;  %v7425_v0 = vld [vmem:[%s17924_s4 + $0x60] sm:$0xff] }
 0x54a   :  { %v14624_v18 = vadd.f32 %v13916_v50, %v3503_v6  ;;  %v3505_v22 = vpop.f32.mrb[107].mxu0  ;;  %3767 = vmatmul.mubr.f32.gmra.mrb[212].mxu0 %v809_v42  ;;  %v824_v42 = vld [vmem:[%s17921_s1 + $0x17c8] sm:$0xff]  ;;  %9464 = vmatmul.mubr.msk.f32.gmra.mrb[40].mxu1 %vm1169_vm0, %v1042_v44  ;;  %v823_v44 = vld [vmem:[%s17921_s1 + $0x17c0] sm:$0xff] }
 0x54b   :  { %3771 = vmatprep.mubr.f32.mxu0 %v817_v49  ;;  %v7424_v49 = vld [vmem:[%s17924_s4 + $0x58] sm:$0xff]  ;;  %v14651_v50 = vpop.f32.mrb[244].mxu1 }
 0x54c   :  { %18162 = vst [vmem:[#allocation132_spill] sm:$0xff] %v14624_v18  ;;  %7502 = vperm.xlu1 %10473, %v7424_v49   ;;  %7507 = vperm.xlu0 %10472, %v7425_v0   ;;  %v14656_v7 = vpop.f32.mrb[245].mxu1  ;;  %v1056_v18 = vld [vmem:[%s17921_s1 + $0x1f08] sm:$0xff] }
 0x54d   :  { %v3508_v6 = vpop.f32.mrb[108].mxu0 }
 0x54e   :  { %v14649_v36 = vadd.f32 %v13948_v16, %v3508_v6  ;;  %v3510_v22 = vpop.f32.mrb[109].mxu0  ;;  %3772 = vmatmul.mubr.f32.gmra.mrb[214].mxu0 %v816_v40  ;;  %v831_v16 = vld [vmem:[%s17921_s1 + $0x1800] sm:$0xff]  ;;  %v7442_v40 = vld [vmem:[%s17924_s4 + $0xe8] sm:$0xff] }
 0x54f   :  { %3776 = vmatprep.mubr.f32.mxu0 %v824_v42  ;;  %v7443_v42 = vld [vmem:[%s17924_s4 + $0xf0] sm:$0xff] }
 0x550   :  { %18163 = vst [vmem:[#allocation133_spill] sm:$0xff] %v14649_v36  ;;  %7592 = vperm.xlu1 %10473, %v7442_v40   ;;  %v1049_v22 = vld [vmem:[%s17921_s1 + $0x1ed0] sm:$0xff]  ;;  %v830_v36 = vld [vmem:[%s17921_s1 + $0x17f8] sm:$0xff]  ;;  %7597 = vperm.xlu0 %10472, %v7443_v42  }
 0x551   :  { %v3513_v6 = vpop.f32.mrb[110].mxu0  ;;  %9466 = vmatprep.mubr.msk.f32.mxu1 %vm1169_vm0, %v1049_v22  ;;  %v7427_v40 = vld [vmem:[%s17924_s4 + $0x70] sm:$0xff] }
 0x552   :  { %v14670_v49 = vadd.f32 %v13946_v29, %v3513_v6  ;;  %v3515_v0 = vpop.f32.mrb[111].mxu0  ;;  %3777 = vmatmul.mubr.f32.gmra.mrb[216].mxu0 %v823_v44  ;;  %v838_v44 = vld [vmem:[%s17921_s1 + $0x1838] sm:$0xff]  ;;  %9467 = vmatmul.mubr.msk.f32.gmra.mrb[42].mxu1 %vm1169_vm0, %v1056_v18  ;;  %v14697_v29 = vpop.f32.mrb[246].mxu1  ;;  %v837_v18 = vld [vmem:[%s17921_s1 + $0x1830] sm:$0xff] }
 0x553   :  { %3781 = vmatprep.mubr.f32.mxu0 %v831_v16  ;;  %v7426_v16 = vld [vmem:[%s17924_s4 + $0x68] sm:$0xff]  ;;  %v14702_v22 = vpop.f32.mrb[247].mxu1 }
 0x554   :  { %18164 = vst [vmem:[#allocation134_spill] sm:$0xff] %v14670_v49  ;;  %7512 = vperm.xlu1 %10473, %v7426_v16   ;;  %7517 = vperm.xlu0 %10472, %v7427_v40   ;;  %v859_v49 = vld [vmem:[%s17921_s1 + $0x18e0] sm:$0xff] }
 0x555   :  { %v3518_v6 = vpop.f32.mrb[112].mxu0 }
 0x556   :  { %v14695_v42 = vadd.f32 %v13981_v10, %v3518_v6  ;;  %v3520_v0 = vpop.f32.mrb[113].mxu0  ;;  %3782 = vmatmul.mubr.f32.gmra.mrb[218].mxu0 %v830_v36  ;;  %v845_v10 = vld [vmem:[%s17921_s1 + $0x1870] sm:$0xff]  ;;  %v7444_v36 = vld [vmem:[%s17924_s4 + $0xf8] sm:$0xff] }
 0x557   :  { %3786 = vmatprep.mubr.f32.mxu0 %v838_v44  ;;  %v7685_v44 = vld [vmem:[%s17926_s6] sm:$0xff] }
 0x558   :  { %18165 = vst [vmem:[#allocation135_spill] sm:$0xff] %v14695_v42  ;;  %7602 = vperm.xlu1 %10473, %v7444_v36   ;;  %v1063_v0 = vld [vmem:[%s17921_s1 + $0x1f40] sm:$0xff]  ;;  %v844_v42 = vld [vmem:[%s17921_s1 + $0x1868] sm:$0xff]  ;;  %7695 = vperm.xlu0 %10472, %v7685_v44   ;;  %v7687_v44 = vld [vmem:[%s17926_s6 + $0x10] sm:$0xff] }
 0x559   :  { %v3523_v6 = vpop.f32.mrb[114].mxu0  ;;  %9469 = vmatprep.mubr.msk.f32.mxu1 %vm1169_vm0, %v1063_v0  ;;  %v851_v0 = vld [vmem:[%s17921_s1 + $0x18a0] sm:$0xff] }
 0x55a   :  { %v14716_v16 = vadd.f32 %v13979_v4, %v3523_v6  ;;  %v3525_v40 = vpop.f32.mrb[115].mxu0  ;;  %3787 = vmatmul.mubr.f32.gmra.mrb[220].mxu0 %v837_v18  ;;  %v852_v18 = vld [vmem:[%s17921_s1 + $0x18a8] sm:$0xff]  ;;  %9470 = vmatmul.mubr.msk.f32.gmra.mrb[44].mxu1 %vm1169_vm0, %v1070_v58  ;;  %v14746_v58 = vpop.f32.mrb[248].mxu1  ;;  %v858_v4 = vld [vmem:[%s17921_s1 + $0x18d8] sm:$0xff] }
 0x55b   :  { %3791 = vmatprep.mubr.f32.mxu0 %v845_v10  ;;  %v7428_v10 = vld [vmem:[%s17924_s4 + $0x78] sm:$0xff]  ;;  %s8902_s4 = sld [smem:[#allocation2 + $0x2]] }
 0x55c   :  { %18167 = vst [vmem:[#allocation136_spill] sm:$0xff] %v14716_v16  ;;  %7522 = vperm.xlu1 %10473, %v7428_v10   ;;  %7705 = vperm.xlu0 %10472, %v7687_v44  }
 0x55d   :  { %v3528_v36 = vpop.f32.mrb[116].mxu0 }
 0x55e   :  { %v14741_v40 = vadd.f32 %v14020_v27, %v3528_v36  ;;  %v3530_v6 = vpop.f32.mrb[117].mxu0  ;;  %3792 = vmatmul.mubr.f32.gmra.mrb[222].mxu0 %v844_v42  ;;  %v14753_v27 = vpop.f32.mrb[249].mxu1  ;;  %v7686_v42 = vld [vmem:[%s17926_s6 + $0x8] sm:$0xff]  ;;  %v18171_v36 = vld [vmem:[#allocation104_spill] sm:$0xff] }
 0x55f   :  { %3796 = vmatprep.mubr.f32.mxu0 %v852_v18  ;;  %v7689_v18 = vld [vmem:[%s17926_s6 + $0x20] sm:$0xff] }
 0x560   :  { %18169 = vst [vmem:[#allocation137_spill] sm:$0xff] %v14741_v40  ;;  %7700 = vperm.xlu1 %10473, %v7686_v42   ;;  %7715 = vperm.xlu0 %10472, %v7689_v18   ;;  %v865_v18 = vld [vmem:[%s17921_s1 + $0x1910] sm:$0xff] }
 0x561   :  { %v3533_v6 = vpop.f32.mrb[118].mxu0 }
 0x562   :  { %v14762_v10 = vadd.f32 %v18171_v36, %v3533_v6  ;;  %v3535_v44 = vpop.f32.mrb[119].mxu0  ;;  %3797 = vmatmul.mubr.f32.gmra.mrb[224].mxu0 %v851_v0  ;;  %v7688_v6 = vld [vmem:[%s17926_s6 + $0x18] sm:$0xff]  ;;  %v14784_v36 = vpop.f32.mrb[250].mxu1 }
 0x563   :  { %3801 = vmatprep.mubr.f32.mxu0 %v859_v49  ;;  %v7691_v49 = vld [vmem:[%s17926_s6 + $0x30] sm:$0xff]  ;;  %v880_v44 = vld [vmem:[%s17921_s1 + $0x1988] sm:$0xff] }
 0x564   :  { %18172 = vst [vmem:[#allocation104_spill] sm:$0xff] %v14762_v10  ;;  %7710 = vperm.xlu1 %10473, %v7688_v6   ;;  %7725 = vperm.xlu0 %10472, %v7691_v49   ;;  %v873_v10 = vld [vmem:[%s17921_s1 + $0x1950] sm:$0xff] }
 0x565   :  { %v3538_v2 = vpop.f32.mrb[120].mxu0 }
 0x566   :  { %v14779_v0 = vadd.f32 %v14062_v1, %v3538_v2  ;;  %v3540_v42 = vpop.f32.mrb[121].mxu0  ;;  %3802 = vmatmul.mubr.f32.gmra.mrb[226].mxu0 %v858_v4  ;;  %v14791_v2 = vpop.f32.mrb[251].mxu1  ;;  %v7847_v4 = vld [vmem:[%s17928_s8] sm:$0x3]  ;;  %s8904_s8 = sld [smem:[#allocation2 + $0x4]] }
 0x567   :  { %3806 = vmatprep.mubr.f32.mxu0 %v866_v5  ;;  %v7690_v5 = vld [vmem:[%s17926_s6 + $0x28] sm:$0xff] }
 0x568   :  { %18174 = vst [vmem:[#allocation138_spill] sm:$0xff] %v14779_v0  ;;  %7720 = vperm.xlu1 %10473, %v7690_v5   ;;  %v872_v42 = vld [vmem:[%s17921_s1 + $0x1948] sm:$0xff]  ;;  %7850 = vperm.xlu0 %10472, %v7847_v4   ;;  %v887_v0 = vld [vmem:[%s17921_s1 + $0x19c0] sm:$0xff] }
 0x569   :  { %v3543_v1 = vpop.f32.mrb[122].mxu0 }
 0x56a   :  { %v14800_v6 = vadd.f32 %v14059_v48, %v3543_v1  ;;  %v3545_v49 = vpop.f32.mrb[123].mxu0  ;;  %3807 = vmatmul.mubr.f32.gmra.mrb[228].mxu0 %v865_v18  ;;  %v7692_v48 = vld [vmem:[%s17926_s6 + $0x38] sm:$0xff]  ;;  %v879_v1 = vld [vmem:[%s17921_s1 + $0x1980] sm:$0xff]  ;;  %v14819_v5 = vpop.f32.mrb[252].mxu1 }
 0x56b   :  { %3811 = vmatprep.mubr.f32.mxu0 %v873_v10  ;;  %v894_v49 = vld [vmem:[%s17921_s1 + $0x19f8] sm:$0xff] }
 0x56c   :  { %18176 = vst [vmem:[#allocation139_spill] sm:$0xff] %v14800_v6  ;;  %7730 = vperm.xlu1 %10473, %v7692_v48   ;;  %v14826_v6 = vpop.f32.mrb[253].mxu1 }
 0x56d   :  { %v3548_v40 = vpop.f32.mrb[124].mxu0 }
 0x56e   :  { %v14814_v18 = vadd.f32 %v14104_v46, %v3548_v40  ;;  %v3550_v10 = vpop.f32.mrb[125].mxu0  ;;  %3812 = vmatmul.mubr.f32.gmra.mrb[230].mxu0 %v872_v42  ;;  %v886_v42 = vld [vmem:[%s17921_s1 + $0x19b8] sm:$0xff] }
 0x56f   :  { %3816 = vmatprep.mubr.f32.mxu0 %v880_v44  ;;  %v901_v10 = vld [vmem:[%s17921_s1 + $0x1a30] sm:$0xff] }
 0x570   :  { %18178 = vst [vmem:[#allocation140_spill] sm:$0xff] %v14814_v18 }
 0x571   :  { %v3553_v46 = vpop.f32.mrb[126].mxu0 }
 0x572   :  { %v14829_v40 = vadd.f32 %v14101_v47, %v3553_v46  ;;  %v3555_v44 = vpop.f32.mrb[127].mxu0  ;;  %3817 = vmatmul.mubr.f32.gmra.mrb[232].mxu0 %v879_v1  ;;  %v14845_v1 = vpop.f32.mrb[254].mxu1 }
 0x573   :  { %3821 = vmatprep.mubr.f32.mxu0 %v887_v0  ;;  %v893_v0 = vld [vmem:[%s17921_s1 + $0x19f0] sm:$0xff]  ;;  %v908_v44 = vld [vmem:[%s17921_s1 + $0x1a68] sm:$0xff] }
 0x574   :  { %18180 = vst [vmem:[#allocation141_spill] sm:$0xff] %v14829_v40  ;;  %v14852_v40 = vpop.f32.mrb[255].mxu1 }
 0x575   :  { %v3558_v18 = vpop.f32.mrb[128].mxu0 }
 0x576   :  { %v14840_v4 = vadd.f32 %v14146_v32, %v3558_v18  ;;  %v3560_v47 = vpop.f32.mrb[129].mxu0  ;;  %3822 = vmatmul.mubr.f32.gmra.mrb[234].mxu0 %v886_v42  ;;  %v18184_v18 = vld [vmem:[#allocation8_spill] sm:$0xff] }
 0x577   :  { %3826 = vmatprep.mubr.f32.mxu0 %v894_v49  ;;  %v900_v49 = vld [vmem:[%s17921_s1 + $0x1a28] sm:$0xff] }
 0x578   :  { %18182 = vst [vmem:[#allocation142_spill] sm:$0xff] %v14840_v4 }
 0x579   :  { %v3563_v32 = vpop.f32.mrb[130].mxu0 }
 0x57a   :  { %v9971_v47 = vadd.f32 %v3563_v32, %v18184_v18  ;;  %v3565_v42 = vpop.f32.mrb[131].mxu0  ;;  %3827 = vmatmul.mubr.f32.gmra.mrb[236].mxu0 %v893_v0  ;;  %v14870_v0 = vpop.f32.mrb[0].mxu1 }
 0x57b   :  { %3831 = vmatprep.mubr.f32.mxu0 %v901_v10  ;;  %v907_v10 = vld [vmem:[%s17921_s1 + $0x1a60] sm:$0xff]  ;;  %v14878_v42 = vpop.f32.mrb[1].mxu1 }
 0x57c   :  { %v14859_v48 = vadd.f32 %v9971_v47, %v14143_v24  ;;  %v915_v47 = vld [vmem:[%s17921_s1 + $0x1aa0] sm:$0xff] }
 0x57d   :  { %v3568_v4 = vpop.f32.mrb[132].mxu0 }
 0x57e   :  { %18185 = vst [vmem:[#allocation8_spill] sm:$0xff] %v14859_v48  ;;  %v9972_v32 = vadd.f32 %v3568_v4, %v18187_v13  ;;  %v3570_v18 = vpop.f32.mrb[133].mxu0  ;;  %3832 = vmatmul.mubr.f32.gmra.mrb[238].mxu0 %v900_v49  ;;  %v922_v48 = vld [vmem:[%s17921_s1 + $0x1ad8] sm:$0xff] }
 0x57f   :  { %3836 = vmatprep.mubr.f32.mxu0 %v908_v44  ;;  %v18190_v44 = vld [vmem:[#allocation10_spill] sm:$0xff] }
 0x580   :  { %v14873_v24 = vadd.f32 %v9972_v32, %v14200_v51  ;;  %v914_v51 = vld [vmem:[%s17921_s1 + $0x1a98] sm:$0xff] }
 0x581   :  { %v3573_v16 = vpop.f32.mrb[134].mxu0 }
 0x582   :  { %18188 = vst [vmem:[#allocation9_spill] sm:$0xff] %v14873_v24  ;;  %v9973_v49 = vadd.f32 %v3573_v16, %v18190_v44  ;;  %v3575_v18 = vpop.f32.mrb[135].mxu0  ;;  %3837 = vmatmul.mubr.f32.gmra.mrb[240].mxu0 %v907_v10  ;;  %v18193_v24 = vld [vmem:[#allocation11_spill] sm:$0xff]  ;;  %v921_v10 = vld [vmem:[%s17921_s1 + $0x1ad0] sm:$0xff] }
 0x583   :  { %3841 = vmatprep.mubr.f32.mxu0 %v915_v47  ;;  %v14898_v47 = vpop.f32.mrb[2].mxu1 }
 0x584   :  { %v14887_v32 = vadd.f32 %v9973_v49, %v14195_v59  ;;  %v929_v49 = vld [vmem:[%s17921_s1 + $0x1b10] sm:$0xff]  ;;  %v14906_v18 = vpop.f32.mrb[3].mxu1 }
 0x585   :  { %v3578_v46 = vpop.f32.mrb[136].mxu0 }
 0x586   :  { %18191 = vst [vmem:[#allocation10_spill] sm:$0xff] %v14887_v32  ;;  %v9974_v16 = vadd.f32 %v3578_v46, %v18193_v24  ;;  %v3580_v44 = vpop.f32.mrb[137].mxu0  ;;  %3842 = vmatmul.mubr.f32.gmra.mrb[242].mxu0 %v914_v51 }
 0x587   :  { %3846 = vmatprep.mubr.f32.mxu0 %v922_v48  ;;  %v18195_v48 = vld [vmem:[#allocation12_spill] sm:$0xff]  ;;  %v936_v44 = vld [vmem:[%s17921_s1 + $0x1b48] sm:$0xff] }
 0x588   :  { %v14901_v59 = vadd.f32 %v9974_v16, %v14242_v54  ;;  %v928_v54 = vld [vmem:[%s17921_s1 + $0x1b08] sm:$0xff] }
 0x589   :  { %v3583_v4 = vpop.f32.mrb[138].mxu0 }
 0x58a   :  { %18194 = vst [vmem:[#allocation11_spill] sm:$0xff] %v14901_v59  ;;  %v9975_v24 = vadd.f32 %v3583_v4, %v18195_v48  ;;  %v3585_v51 = vpop.f32.mrb[139].mxu0  ;;  %3847 = vmatmul.mubr.f32.gmra.mrb[244].mxu0 %v921_v10  ;;  %v18198_v59 = vld [vmem:[#allocation13_spill] sm:$0xff]  ;;  %v935_v10 = vld [vmem:[%s17921_s1 + $0x1b40] sm:$0xff] }
 0x58b   :  { %3851 = vmatprep.mubr.f32.mxu0 %v929_v49  ;;  %v14926_v49 = vpop.f32.mrb[4].mxu1 }
 0x58c   :  { %v14915_v16 = vadd.f32 %v9975_v24, %v14237_v30  ;;  %v943_v24 = vld [vmem:[%s17921_s1 + $0x1b80] sm:$0xff]  ;;  %v14934_v51 = vpop.f32.mrb[5].mxu1 }
 0x58d   :  { %v3588_v32 = vpop.f32.mrb[140].mxu0 }
 0x58e   :  { %18196 = vst [vmem:[#allocation12_spill] sm:$0xff] %v14915_v16  ;;  %v9976_v4 = vadd.f32 %v3588_v32, %v18198_v59  ;;  %v3590_v48 = vpop.f32.mrb[141].mxu0  ;;  %3852 = vmatmul.mubr.f32.gmra.mrb[246].mxu0 %v928_v54  ;;  %v18200_v59 = vld [vmem:[#allocation14_spill] sm:$0xff] }
 0x58f   :  { %3856 = vmatprep.mubr.f32.mxu0 %v936_v44  ;;  %v950_v48 = vld [vmem:[%s17921_s1 + $0x1bb8] sm:$0xff] }
 0x590   :  { %v14929_v30 = vadd.f32 %v9976_v4, %v14288_v60  ;;  %v942_v60 = vld [vmem:[%s17921_s1 + $0x1b78] sm:$0xff] }
 0x591   :  { %v3593_v46 = vpop.f32.mrb[142].mxu0 }
 0x592   :  { %18199 = vst [vmem:[#allocation13_spill] sm:$0xff] %v14929_v30  ;;  %v9977_v54 = vadd.f32 %v3593_v46, %v18200_v59  ;;  %v3595_v44 = vpop.f32.mrb[143].mxu0  ;;  %3857 = vmatmul.mubr.f32.gmra.mrb[248].mxu0 %v935_v10  ;;  %v18203_v30 = vld [vmem:[#allocation15_spill] sm:$0xff]  ;;  %v949_v10 = vld [vmem:[%s17921_s1 + $0x1bb0] sm:$0xff] }
 0x593   :  { %3861 = vmatprep.mubr.f32.mxu0 %v943_v24  ;;  %v14954_v24 = vpop.f32.mrb[6].mxu1 }
 0x594   :  { %v14943_v4 = vadd.f32 %v9977_v54, %v14283_v31  ;;  %v957_v54 = vld [vmem:[%s17921_s1 + $0x1bf0] sm:$0xff]  ;;  %v14962_v44 = vpop.f32.mrb[7].mxu1 }
 0x595   :  { %v3598_v16 = vpop.f32.mrb[144].mxu0 }
 0x596   :  { %18201 = vst [vmem:[#allocation14_spill] sm:$0xff] %v14943_v4  ;;  %v9978_v46 = vadd.f32 %v3598_v16, %v18203_v30  ;;  %v3600_v59 = vpop.f32.mrb[145].mxu0  ;;  %3862 = vmatmul.mubr.f32.gmra.mrb[250].mxu0 %v942_v60  ;;  %v18204_v16 = vld [vmem:[#allocation16_spill] sm:$0xff]  ;;  %v18205_v4 = vld [vmem:[#allocation17_spill] sm:$0xff] }
 0x597   :  { %3866 = vmatprep.mubr.f32.mxu0 %v950_v48  ;;  %v956_v48 = vld [vmem:[%s17921_s1 + $0x1be8] sm:$0xff] }
 0x598   :  { %v14957_v31 = vadd.f32 %v9978_v46, %v14334_v52  ;;  %v964_v52 = vld [vmem:[%s17921_s1 + $0x1c28] sm:$0xff] }
 0x599   :  { %v3603_v32 = vpop.f32.mrb[146].mxu0 }
 0x59a   :  { %v9979_v30 = vadd.f32 %v3603_v32, %v18204_v16  ;;  %v3605_v60 = vpop.f32.mrb[147].mxu0  ;;  %3867 = vmatmul.mubr.f32.gmra.mrb[252].mxu0 %v949_v10  ;;  %v963_v32 = vld [vmem:[%s17921_s1 + $0x1c20] sm:$0xff]  ;;  %v14978_v10 = vpop.f32.mrb[8].mxu1 }
 0x59b   :  { %3871 = vmatprep.mubr.f32.mxu0 %v957_v54  ;;  %v14986_v16 = vpop.f32.mrb[9].mxu1 }
 0x59c   :  { %v14969_v59 = vadd.f32 %v9979_v30, %v14329_v38  ;;  %v971_v38 = vld [vmem:[%s17921_s1 + $0x1c60] sm:$0xff] }
 0x59d   :  { %v3608_v46 = vpop.f32.mrb[148].mxu0 }
 0x59e   :  { %v9980_v11 = vadd.f32 %v3608_v46, %v18205_v4  ;;  %v3610_v33 = vpop.f32.mrb[149].mxu0  ;;  %3872 = vmatmul.mubr.f32.gmra.mrb[254].mxu0 %v956_v48  ;;  %v18206_v4 = vld [vmem:[#allocation18_spill] sm:$0xff]  ;;  %v970_v48 = vld [vmem:[%s17921_s1 + $0x1c58] sm:$0xff] }
 0x59f   :  { %3876 = vmatprep.mubr.f32.mxu0 %v964_v52  ;;  %v18207_v46 = vld [vmem:[#allocation19_spill] sm:$0xff] }
 0x5a0   :  { %v14981_v54 = vadd.f32 %v9980_v11, %v14380_v20  ;;  %v978_v11 = vld [vmem:[%s17921_s1 + $0x1c98] sm:$0xff] }
 0x5a1   :  { %v3613_v30 = vpop.f32.mrb[0].mxu0 }
 0x5a2   :  { %v3614_v33 = vadd.f32 %v3613_v30, %v18206_v4  ;;  %v3615_v60 = vpop.f32.mrb[1].mxu0  ;;  %3877 = vmatmul.mubr.f32.gmra.mrb[150].mxu0 %v963_v32  ;;  %v977_v32 = vld [vmem:[%s17921_s1 + $0x1c90] sm:$0xff] }
 0x5a3   :  { %3881 = vmatprep.mubr.f32.mxu0 %v971_v38  ;;  %v15002_v38 = vpop.f32.mrb[10].mxu1  ;;  %v18208_v60 = vld [vmem:[#allocation20_spill] sm:$0xff] }
 0x5a4   :  { %v14993_v52 = vadd.f32 %v14375_v39, %v3614_v33  ;;  %v985_v39 = vld [vmem:[%s17921_s1 + $0x1cd0] sm:$0xff]  ;;  %v15010_v4 = vpop.f32.mrb[11].mxu1 }
 0x5a5   :  { %v3618_v20 = vpop.f32.mrb[2].mxu0 }
 0x5a6   :  { %v3619_v14 = vadd.f32 %v3618_v20, %v18207_v46  ;;  %v3620_v13 = vpop.f32.mrb[3].mxu0  ;;  %3882 = vmatmul.mubr.f32.gmra.mrb[152].mxu0 %v970_v48  ;;  %v18209_v46 = vld [vmem:[#allocation21_spill] sm:$0xff] }
 0x5a7   :  { %3886 = vmatprep.mubr.f32.mxu0 %v978_v11  ;;  %v984_v11 = vld [vmem:[%s17921_s1 + $0x1cc8] sm:$0xff] }
 0x5a8   :  { %v15005_v30 = vadd.f32 %v14426_v57, %v3619_v14  ;;  %v992_v14 = vld [vmem:[%s17921_s1 + $0x1d08] sm:$0xff] }
 0x5a9   :  { %v3623_v33 = vpop.f32.mrb[4].mxu0 }
 0x5aa   :  { %v3624_v13 = vadd.f32 %v3623_v33, %v18208_v60  ;;  %v3625_v48 = vpop.f32.mrb[5].mxu0  ;;  %3887 = vmatmul.mubr.f32.gmra.mrb[154].mxu0 %v977_v32  ;;  %v991_v32 = vld [vmem:[%s17921_s1 + $0x1d00] sm:$0xff] }
 0x5ab   :  { %3891 = vmatprep.mubr.f32.mxu0 %v985_v39  ;;  %v18210_v48 = vld [vmem:[#allocation22_spill] sm:$0xff] }
 0x5ac   :  { %v15017_v20 = vadd.f32 %v14421_v63, %v3624_v13  ;;  %v999_v63 = vld [vmem:[%s17921_s1 + $0x1d40] sm:$0xff]  ;;  %v15032_v33 = vpop.f32.mrb[12].mxu1 }
 0x5ad   :  { %v3628_v57 = vpop.f32.mrb[6].mxu0  ;;  %v15034_v13 = vpop.f32.mrb[13].mxu1 }
 0x5ae   :  { %v3629_v21 = vadd.f32 %v3628_v57, %v18209_v46  ;;  %v3630_v19 = vpop.f32.mrb[7].mxu0  ;;  %3892 = vmatmul.mubr.f32.gmra.mrb[156].mxu0 %v984_v11  ;;  %v18211_v46 = vld [vmem:[#allocation23_spill] sm:$0xff] }
 0x5af   :  { %3896 = vmatprep.mubr.f32.mxu0 %v992_v14  ;;  %v998_v14 = vld [vmem:[%s17921_s1 + $0x1d38] sm:$0xff] }
 0x5b0   :  { %v15027_v39 = vadd.f32 %v14472_v41, %v3629_v21  ;;  %v1006_v41 = vld [vmem:[%s17921_s1 + $0x1d78] sm:$0xff] }
 0x5b1   :  { %v3633_v60 = vpop.f32.mrb[8].mxu0 }
 0x5b2   :  { %v3634_v19 = vadd.f32 %v3633_v60, %v18210_v48  ;;  %v3635_v11 = vpop.f32.mrb[9].mxu0  ;;  %3897 = vmatmul.mubr.f32.gmra.mrb[158].mxu0 %v991_v32  ;;  %v1005_v32 = vld [vmem:[%s17921_s1 + $0x1d70] sm:$0xff] }
 0x5b3   :  { %3901 = vmatprep.mubr.f32.mxu0 %v999_v63  ;;  %v18212_v11 = vld [vmem:[#allocation24_spill] sm:$0xff] }
 0x5b4   :  { %v15041_v21 = vadd.f32 %v14467_v25, %v3634_v19  ;;  %v1013_v25 = vld [vmem:[%s17921_s1 + $0x1db0] sm:$0xff] }
 0x5b5   :  { %v3638_v57 = vpop.f32.mrb[10].mxu0  ;;  %v15056_v60 = vpop.f32.mrb[14].mxu1 }
 0x5b6   :  { %v3639_v37 = vadd.f32 %v3638_v57, %v18211_v46  ;;  %v3640_v28 = vpop.f32.mrb[11].mxu0  ;;  %3902 = vmatmul.mubr.f32.gmra.mrb[160].mxu0 %v998_v14  ;;  %v15058_v19 = vpop.f32.mrb[15].mxu1  ;;  %v18214_v46 = vld [vmem:[#allocation25_spill] sm:$0xff] }
 0x5b7   :  { %3906 = vmatprep.mubr.f32.mxu0 %v1006_v41  ;;  %v1012_v41 = vld [vmem:[%s17921_s1 + $0x1da8] sm:$0xff] }
 0x5b8   :  { %v15051_v63 = vadd.f32 %v14518_v17, %v3639_v37  ;;  %v1020_v17 = vld [vmem:[%s17921_s1 + $0x1de8] sm:$0xff] }
 0x5b9   :  { %v3643_v48 = vpop.f32.mrb[12].mxu0 }
 0x5ba   :  { %v3644_v28 = vadd.f32 %v3643_v48, %v18212_v11  ;;  %v3645_v14 = vpop.f32.mrb[13].mxu0  ;;  %3907 = vmatmul.mubr.f32.gmra.mrb[162].mxu0 %v1005_v32  ;;  %v1019_v32 = vld [vmem:[%s17921_s1 + $0x1de0] sm:$0xff] }
 0x5bb   :  { %3911 = vmatprep.mubr.f32.mxu0 %v1013_v25  ;;  %v18216_v14 = vld [vmem:[#allocation26_spill] sm:$0xff] }
 0x5bc   :  { %v15065_v37 = vadd.f32 %v14513_v12, %v3644_v28  ;;  %v1027_v12 = vld [vmem:[%s17921_s1 + $0x1e20] sm:$0xff] }
 0x5bd   :  { %v3648_v57 = vpop.f32.mrb[14].mxu0  ;;  %v15080_v48 = vpop.f32.mrb[16].mxu1 }
 0x5be   :  { %18213 = vst [vmem:[#allocation15_spill] sm:$0xff] %v15065_v37  ;;  %v3649_v53 = vadd.f32 %v3648_v57, %v18214_v46  ;;  %v3650_v43 = vpop.f32.mrb[15].mxu0  ;;  %3912 = vmatmul.mubr.f32.gmra.mrb[164].mxu0 %v1012_v41  ;;  %v15082_v28 = vpop.f32.mrb[17].mxu1  ;;  %v18218_v46 = vld [vmem:[#allocation27_spill] sm:$0xff] }
 0x5bf   :  { %3916 = vmatprep.mubr.f32.mxu0 %v1020_v17  ;;  %v1026_v17 = vld [vmem:[%s17921_s1 + $0x1e18] sm:$0xff] }
 0x5c0   :  { %v15075_v25 = vadd.f32 %v14564_v45, %v3649_v53  ;;  %v1034_v45 = vld [vmem:[%s17921_s1 + $0x1e58] sm:$0xff] }
 0x5c1   :  { %v3653_v11 = vpop.f32.mrb[16].mxu0 }
 0x5c2   :  { %18215 = vst [vmem:[#allocation16_spill] sm:$0xff] %v15075_v25  ;;  %v3654_v43 = vadd.f32 %v3653_v11, %v18216_v14  ;;  %v3655_v41 = vpop.f32.mrb[17].mxu0  ;;  %3917 = vmatmul.mubr.f32.gmra.mrb[166].mxu0 %v1019_v32  ;;  %v1033_v32 = vld [vmem:[%s17921_s1 + $0x1e50] sm:$0xff] }
 0x5c3   :  { %3921 = vmatprep.mubr.f32.mxu0 %v1027_v12  ;;  %v18220_v41 = vld [vmem:[#allocation30_spill] sm:$0xff] }
 0x5c4   :  { %v15089_v53 = vadd.f32 %v14559_v8, %v3654_v43  ;;  %v1041_v8 = vld [vmem:[%s17921_s1 + $0x1e90] sm:$0xff]  ;;  %v15104_v11 = vpop.f32.mrb[18].mxu1 }
 0x5c5   :  { %v3658_v57 = vpop.f32.mrb[18].mxu0  ;;  %v15106_v43 = vpop.f32.mrb[19].mxu1 }
 0x5c6   :  { %18217 = vst [vmem:[#allocation17_spill] sm:$0xff] %v15089_v53  ;;  %v3659_v25 = vadd.f32 %v3658_v57, %v18218_v46  ;;  %v3660_v37 = vpop.f32.mrb[19].mxu0  ;;  %3922 = vmatmul.mubr.f32.gmra.mrb[168].mxu0 %v1026_v17  ;;  %v18222_v46 = vld [vmem:[#allocation33_spill] sm:$0xff] }
 0x5c7   :  { %3926 = vmatprep.mubr.f32.mxu0 %v1034_v45  ;;  %v1040_v45 = vld [vmem:[%s17921_s1 + $0x1e88] sm:$0xff] }
 0x5c8   :  { %v15099_v12 = vadd.f32 %v14610_v62, %v3659_v25  ;;  %v1048_v25 = vld [vmem:[%s17921_s1 + $0x1ec8] sm:$0xff] }
 0x5c9   :  { %v3663_v14 = vpop.f32.mrb[20].mxu0 }
 0x5ca   :  { %18219 = vst [vmem:[#allocation18_spill] sm:$0xff] %v15099_v12  ;;  %v3664_v37 = vadd.f32 %v3663_v14, %v18220_v41  ;;  %v3665_v17 = vpop.f32.mrb[21].mxu0  ;;  %3927 = vmatmul.mubr.f32.gmra.mrb[170].mxu0 %v1033_v32  ;;  %v1047_v32 = vld [vmem:[%s17921_s1 + $0x1ec0] sm:$0xff] }
 0x5cb   :  { %3931 = vmatprep.mubr.f32.mxu0 %v1041_v8  ;;  %v18224_v17 = vld [vmem:[#allocation36_spill] sm:$0xff] }
 0x5cc   :  { %v15113_v62 = vadd.f32 %v14605_v3, %v3664_v37  ;;  %v1055_v3 = vld [vmem:[%s17921_s1 + $0x1f00] sm:$0xff] }
 0x5cd   :  { %v3668_v57 = vpop.f32.mrb[22].mxu0  ;;  %v15128_v14 = vpop.f32.mrb[20].mxu1 }
 0x5ce   :  { %18221 = vst [vmem:[#allocation19_spill] sm:$0xff] %v15113_v62  ;;  %v3669_v12 = vadd.f32 %v3668_v57, %v18222_v46  ;;  %v3670_v53 = vpop.f32.mrb[23].mxu0  ;;  %3932 = vmatmul.mubr.f32.gmra.mrb[172].mxu0 %v1040_v45  ;;  %v15130_v37 = vpop.f32.mrb[21].mxu1  ;;  %v18226_v46 = vld [vmem:[#allocation39_spill] sm:$0xff] }
 0x5cf   :  { %3936 = vmatprep.mubr.f32.mxu0 %v1048_v25  ;;  %v1054_v25 = vld [vmem:[%s17921_s1 + $0x1ef8] sm:$0xff] }
 0x5d0   :  { %v15123_v8 = vadd.f32 %v14656_v7, %v3669_v12  ;;  %v1062_v12 = vld [vmem:[%s17921_s1 + $0x1f38] sm:$0xff] }
 0x5d1   :  { %v3673_v41 = vpop.f32.mrb[24].mxu0 }
 0x5d2   :  { %18223 = vst [vmem:[#allocation20_spill] sm:$0xff] %v15123_v8  ;;  %v3674_v53 = vadd.f32 %v3673_v41, %v18224_v17  ;;  %v3675_v45 = vpop.f32.mrb[25].mxu0  ;;  %3937 = vmatmul.mubr.f32.gmra.mrb[174].mxu0 %v1047_v32  ;;  %v1061_v32 = vld [vmem:[%s17921_s1 + $0x1f30] sm:$0xff]  ;;  %v15152_v41 = vpop.f32.mrb[22].mxu1 }
 0x5d3   :  { %3941 = vmatprep.mubr.f32.mxu0 %v1055_v3  ;;  %18228 = vst [vmem:[#allocation23_spill] sm:$0xff] %v15152_v41  ;;  %v18230_v45 = vld [vmem:[#allocation42_spill] sm:$0xff] }
 0x5d4   :  { %v15137_v7 = vadd.f32 %v14651_v50, %v3674_v53  ;;  %v1069_v50 = vld [vmem:[%s17921_s1 + $0x1f70] sm:$0xff]  ;;  %v15154_v53 = vpop.f32.mrb[23].mxu1 }
 0x5d5   :  { %v3678_v57 = vpop.f32.mrb[26].mxu0  ;;  %18229 = vst [vmem:[#allocation24_spill] sm:$0xff] %v15154_v53 }
 0x5d6   :  { %18225 = vst [vmem:[#allocation21_spill] sm:$0xff] %v15137_v7  ;;  %v3679_v8 = vadd.f32 %v3678_v57, %v18226_v46  ;;  %v3680_v62 = vpop.f32.mrb[27].mxu0  ;;  %3942 = vmatmul.mubr.f32.gmra.mrb[176].mxu0 %v1054_v25  ;;  %v18232_v57 = vld [vmem:[#allocation45_spill] sm:$0xff] }
 0x5d7   :  { %3946 = vmatprep.mubr.f32.mxu0 %v1062_v12  ;;  %v1068_v12 = vld [vmem:[%s17921_s1 + $0x1f68] sm:$0xff] }
 0x5d8   :  { %v15147_v3 = vadd.f32 %v14702_v22, %v3679_v8 }
 0x5d9   :  { %v3683_v17 = vpop.f32.mrb[28].mxu0 }
 0x5da   :  { %18227 = vst [vmem:[#allocation22_spill] sm:$0xff] %v15147_v3  ;;  %v3684_v62 = vadd.f32 %v3683_v17, %v18230_v45  ;;  %v3685_v25 = vpop.f32.mrb[29].mxu0  ;;  %3947 = vmatmul.mubr.f32.gmra.mrb[178].mxu0 %v1061_v32 }
 0x5db   :  { %3951 = vmatprep.mubr.f32.mxu0 %v1069_v50  ;;  %v18235_v50 = vld [vmem:[#allocation28_spill] sm:$0xff] }
 0x5dc   :  { %v15161_v22 = vadd.f32 %v14697_v29, %v3684_v62  ;;  %v18237_v62 = vld [vmem:[#allocation29_spill] sm:$0xff] }
 0x5dd   :  { %v3688_v8 = vpop.f32.mrb[30].mxu0  ;;  %v15167_v41 = vpop.f32.mrb[24].mxu1 }
 0x5de   :  { %18231 = vst [vmem:[#allocation25_spill] sm:$0xff] %v15161_v22  ;;  %v3689_v46 = vadd.f32 %v3688_v8, %v18232_v57  ;;  %v3690_v3 = vpop.f32.mrb[31].mxu0  ;;  %3952 = vmatmul.mubr.f32.gmra.mrb[180].mxu0 %v1068_v12  ;;  %18234 = vst [vmem:[#allocation27_spill] sm:$0xff] %v15167_v41  ;;  %v15169_v32 = vpop.f32.mrb[25].mxu1 }
 0x5e0   :  { %v15165_v7 = vadd.f32 %v14753_v27, %v3689_v46  ;;  %v18239_v46 = vld [vmem:[#allocation31_spill] sm:$0xff] }
 0x5e1   :  { %v3693_v17 = vpop.f32.mrb[182].mxu0 }
 0x5e2   :  { %18233 = vst [vmem:[#allocation26_spill] sm:$0xff] %v15165_v7  ;;  %v10013_v45 = vadd.f32 %v3693_v17, %v18235_v50  ;;  %v3695_v25 = vpop.f32.mrb[183].mxu0  ;;  %v18241_v50 = vld [vmem:[#allocation32_spill] sm:$0xff] }
 0x5e4   :  { %v15173_v53 = vadd.f32 %v10013_v45, %v14746_v58 }
 0x5e5   :  { %v3698_v29 = vpop.f32.mrb[184].mxu0  ;;  %v15179_v27 = vpop.f32.mrb[26].mxu1 }
 0x5e6   :  { %18236 = vst [vmem:[#allocation30_spill] sm:$0xff] %v15173_v53  ;;  %v10014_v22 = vadd.f32 %v3698_v29, %v18237_v62  ;;  %v3700_v8 = vpop.f32.mrb[185].mxu0  ;;  %v15181_v57 = vpop.f32.mrb[27].mxu1 }
 0x5e7   :  { %v18243_v8 = vld [vmem:[#allocation34_spill] sm:$0xff] }
 0x5e8   :  { %v15177_v3 = vadd.f32 %v10014_v22, %v14791_v2 }
 0x5e9   :  { %v3703_v12 = vpop.f32.mrb[186].mxu0 }
 0x5ea   :  { %18238 = vst [vmem:[#allocation33_spill] sm:$0xff] %v15177_v3  ;;  %v10015_v7 = vadd.f32 %v3703_v12, %v18239_v46  ;;  %v3705_v41 = vpop.f32.mrb[187].mxu0 }
 0x5ec   :  { %v15185_v17 = vadd.f32 %v10015_v7, %v14784_v36  ;;  %v18245_v7 = vld [vmem:[#allocation35_spill] sm:$0xff] }
 0x5ed   :  { %v3708_v58 = vpop.f32.mrb[188].mxu0  ;;  %v15191_v2 = vpop.f32.mrb[28].mxu1 }
 0x5ee   :  { %18240 = vst [vmem:[#allocation36_spill] sm:$0xff] %v15185_v17  ;;  %v10016_v45 = vadd.f32 %v3708_v58, %v18241_v50  ;;  %v3710_v25 = vpop.f32.mrb[189].mxu0  ;;  %v15193_v62 = vpop.f32.mrb[29].mxu1 }
 0x5ef   :  { %v18247_v25 = vld [vmem:[#allocation37_spill] sm:$0xff] }
 0x5f0   :  { %v15189_v29 = vadd.f32 %v10016_v45, %v14826_v6 }
 0x5f1   :  { %v3713_v22 = vpop.f32.mrb[190].mxu0 }
 0x5f2   :  { %18242 = vst [vmem:[#allocation39_spill] sm:$0xff] %v15189_v29  ;;  %v10017_v3 = vadd.f32 %v3713_v22, %v18243_v8  ;;  %v3715_v53 = vpop.f32.mrb[191].mxu0 }
 0x5f4   :  { %v15197_v41 = vadd.f32 %v10017_v3, %v14819_v5  ;;  %v18249_v3 = vld [vmem:[#allocation38_spill] sm:$0xff] }
 0x5f5   :  { %v3718_v36 = vpop.f32.mrb[192].mxu0  ;;  %v15203_v6 = vpop.f32.mrb[30].mxu1 }
 0x5f6   :  { %18244 = vst [vmem:[#allocation42_spill] sm:$0xff] %v15197_v41  ;;  %v10018_v12 = vadd.f32 %v3718_v36, %v18245_v7  ;;  %v3720_v46 = vpop.f32.mrb[193].mxu0  ;;  %v15205_v45 = vpop.f32.mrb[31].mxu1 }
 0x5f7   :  { %v18251_v46 = vld [vmem:[#allocation40_spill] sm:$0xff] }
 0x5f8   :  { %v15201_v58 = vadd.f32 %v10018_v12, %v14852_v40 }
 0x5f9   :  { %v3723_v50 = vpop.f32.mrb[194].mxu0 }
 0x5fa   :  { %18246 = vst [vmem:[#allocation45_spill] sm:$0xff] %v15201_v58  ;;  %v10019_v29 = vadd.f32 %v3723_v50, %v18247_v25  ;;  %v3725_v17 = vpop.f32.mrb[195].mxu0 }
 0x5fc   :  { %v15209_v53 = vadd.f32 %v10019_v29, %v14845_v1  ;;  %v18253_v29 = vld [vmem:[#allocation41_spill] sm:$0xff] }
 0x5fd   :  { %v3728_v5 = vpop.f32.mrb[196].mxu0  ;;  %v15215_v40 = vpop.f32.mrb[32].mxu1 }
 0x5fe   :  { %18248 = vst [vmem:[#allocation28_spill] sm:$0xff] %v15209_v53  ;;  %v10020_v22 = vadd.f32 %v3728_v5, %v18249_v3  ;;  %v3730_v8 = vpop.f32.mrb[197].mxu0  ;;  %v15217_v12 = vpop.f32.mrb[33].mxu1 }
 0x5ff   :  { %v18255_v8 = vld [vmem:[#allocation43_spill] sm:$0xff] }
 0x600   :  { %v15213_v36 = vadd.f32 %v10020_v22, %v14878_v42 }
 0x601   :  { %v3733_v7 = vpop.f32.mrb[198].mxu0 }
 0x602   :  { %18250 = vst [vmem:[#allocation29_spill] sm:$0xff] %v15213_v36  ;;  %v10021_v58 = vadd.f32 %v3733_v7, %v18251_v46  ;;  %v3735_v41 = vpop.f32.mrb[199].mxu0 }
 0x604   :  { %v15221_v17 = vadd.f32 %v10021_v58, %v14870_v0  ;;  %v18257_v58 = vld [vmem:[#allocation44_spill] sm:$0xff] }
 0x605   :  { %v3738_v1 = vpop.f32.mrb[200].mxu0  ;;  %v15227_v42 = vpop.f32.mrb[34].mxu1 }
 0x606   :  { %18252 = vst [vmem:[#allocation31_spill] sm:$0xff] %v15221_v17  ;;  %v10022_v50 = vadd.f32 %v3738_v1, %v18253_v29  ;;  %v3740_v25 = vpop.f32.mrb[201].mxu0  ;;  %v15229_v22 = vpop.f32.mrb[35].mxu1 }
 0x607   :  { %v18259_v25 = vld [vmem:[#allocation46_spill] sm:$0xff] }
 0x608   :  { %v15225_v5 = vadd.f32 %v10022_v50, %v14906_v18 }
 0x609   :  { %v3743_v3 = vpop.f32.mrb[202].mxu0 }
 0x60a   :  { %18254 = vst [vmem:[#allocation32_spill] sm:$0xff] %v15225_v5  ;;  %v10023_v36 = vadd.f32 %v3743_v3, %v18255_v8  ;;  %v3745_v53 = vpop.f32.mrb[203].mxu0 }
 0x60c   :  { %v15233_v41 = vadd.f32 %v10023_v36, %v14898_v47  ;;  %v18261_v36 = vld [vmem:[#allocation47_spill] sm:$0xff] }
 0x60d   :  { %v3748_v0 = vpop.f32.mrb[204].mxu0  ;;  %v15239_v18 = vpop.f32.mrb[36].mxu1 }
 0x60e   :  { %18256 = vst [vmem:[#allocation34_spill] sm:$0xff] %v15233_v41  ;;  %v10024_v7 = vadd.f32 %v3748_v0, %v18257_v58  ;;  %v3750_v46 = vpop.f32.mrb[205].mxu0  ;;  %v15241_v50 = vpop.f32.mrb[37].mxu1 }
 0x60f   :  { %v18263_v46 = vld [vmem:[#allocation48_spill] sm:$0xff] }
 0x610   :  { %v15237_v1 = vadd.f32 %v10024_v7, %v14934_v51 }
 0x611   :  { %v3753_v29 = vpop.f32.mrb[206].mxu0 }
 0x612   :  { %18258 = vst [vmem:[#allocation35_spill] sm:$0xff] %v15237_v1  ;;  %v10025_v5 = vadd.f32 %v3753_v29, %v18259_v25  ;;  %v3755_v17 = vpop.f32.mrb[207].mxu0 }
 0x614   :  { %v15245_v53 = vadd.f32 %v10025_v5, %v14926_v49  ;;  %v18265_v5 = vld [vmem:[#allocation49_spill] sm:$0xff] }
 0x615   :  { %v3758_v47 = vpop.f32.mrb[208].mxu0  ;;  %v15251_v51 = vpop.f32.mrb[38].mxu1 }
 0x616   :  { %18260 = vst [vmem:[#allocation37_spill] sm:$0xff] %v15245_v53  ;;  %v10026_v3 = vadd.f32 %v3758_v47, %v18261_v36  ;;  %v3760_v8 = vpop.f32.mrb[209].mxu0  ;;  %v15253_v7 = vpop.f32.mrb[39].mxu1 }
 0x617   :  { %v18268_v8 = vld [vmem:[#allocation50_spill] sm:$0xff] }
 0x618   :  { %v15249_v0 = vadd.f32 %v10026_v3, %v14962_v44 }
 0x619   :  { %v3763_v58 = vpop.f32.mrb[210].mxu0 }
 0x61a   :  { %18262 = vst [vmem:[#allocation38_spill] sm:$0xff] %v15249_v0  ;;  %v10027_v1 = vadd.f32 %v3763_v58, %v18263_v46  ;;  %v3765_v41 = vpop.f32.mrb[211].mxu0 }
 0x61c   :  { %v15257_v17 = vadd.f32 %v10027_v1, %v14954_v24  ;;  %v18270_v1 = vld [vmem:[#allocation51_spill] sm:$0xff] }
 0x61d   :  { %v3768_v49 = vpop.f32.mrb[212].mxu0  ;;  %v15263_v44 = vpop.f32.mrb[40].mxu1 }
 0x61e   :  { %18264 = vst [vmem:[#allocation40_spill] sm:$0xff] %v15257_v17  ;;  %v10028_v29 = vadd.f32 %v3768_v49, %v18265_v5  ;;  %v3770_v25 = vpop.f32.mrb[213].mxu0  ;;  %18267 = vst [vmem:[#allocation43_spill] sm:$0xff] %v15263_v44  ;;  %v15265_v3 = vpop.f32.mrb[41].mxu1  ;;  %v18273_v17 = vld [vmem:[#allocation52_spill] sm:$0xff] }
 0x61f   :  { %v4889_v25 = vpop.permute.xlu0 %4888  ;;  %v18277_v44 = vld [vmem:[#allocation116_spill] sm:$0xff] }
 0x620   :  { %v15261_v47 = vadd.f32 %v10028_v29, %v14986_v16 }
 0x621   :  { %v3773_v36 = vpop.f32.mrb[214].mxu0 }
 0x622   :  { %18266 = vst [vmem:[#allocation41_spill] sm:$0xff] %v15261_v47  ;;  %v10029_v0 = vadd.f32 %v3773_v36, %v18268_v8  ;;  %v3775_v53 = vpop.f32.mrb[215].mxu0 }
 0x624   :  { %v15269_v41 = vadd.f32 %v10029_v0, %v14978_v10  ;;  %v18274_v10 = vld [vmem:[#allocation115_spill] sm:$0xff] }
 0x625   :  { %v3778_v24 = vpop.f32.mrb[216].mxu0  ;;  %v15273_v5 = vpop.f32.mrb[42].mxu1  ;;  %v18275_v0 = vmax.f32 %v13621_v23, %v18274_v10 }
 0x626   :  { %18269 = vst [vmem:[#allocation44_spill] sm:$0xff] %v15269_v41  ;;  %v10030_v58 = vadd.f32 %v3778_v24, %v18270_v1  ;;  %v3780_v46 = vpop.f32.mrb[217].mxu0  ;;  %18271 = vst [vmem:[#allocation46_spill] sm:$0xff] %v15273_v5  ;;  %v15275_v29 = vpop.f32.mrb[43].mxu1 }
 0x627   :  { %18272 = vst [vmem:[#allocation47_spill] sm:$0xff] %v15275_v29  ;;  %v4894_v5 = vpop.permute.xlu0 %4893 }
 0x628   :  { %v4564_v49 = vadd.f32 %v10030_v58, %v15010_v4  ;;  %v18276_v58 = vld [vmem:[#allocation53_spill] sm:$0xff] }
 0x629   :  { %v3783_v16 = vpop.f32.mrb[218].mxu0 }
 0x62a   :  { %v4778_v47 = vmax.f32 %v14957_v31, %v4564_v49  ;;  %v10031_v36 = vadd.f32 %v3783_v16, %v18273_v17  ;;  %v3785_v53 = vpop.f32.mrb[219].mxu0  ;;  %v18278_v31 = vmax.f32 %v13633_v56, %v18277_v44  ;;  %v4899_v56 = vpop.permute.xlu1 %4898 }
 0x62c   :  { %v4814_v8 = vmax.f32 %v18275_v0, %v4778_v47  ;;  %v4569_v24 = vadd.f32 %v10031_v36, %v15002_v38  ;;  %v18279_v36 = vld [vmem:[#allocation54_spill] sm:$0xff] }
 0x62d   :  { %v3788_v1 = vpop.f32.mrb[220].mxu0  ;;  %v15289_v16 = vpop.f32.mrb[44].mxu1 }
 0x62e   :  { %v4779_v4 = vmax.f32 %v14969_v59, %v4569_v24  ;;  %v10032_v46 = vadd.f32 %v3788_v1, %v18276_v58  ;;  %v3790_v41 = vpop.f32.mrb[221].mxu0  ;;  %v5066_v29 = vadd.f32 %v4889_v25, %v4814_v8  ;;  %v15291_v47 = vpop.f32.mrb[45].mxu1  ;;  %v5139_v59 = vld [vmem:[%s17923_s3 + $0x8] sm:$0xff]  ;;  %v18282_v58 = vld [vmem:[#allocation55_spill] sm:$0xff] }
 0x62f   :  { %5971 = vmatprep.mubr.f32.mxu1 %v5139_v59 }
 0x630   :  { %v4815_v49 = vmax.f32 %v18278_v31, %v4779_v4  ;;  %v4574_v17 = vadd.f32 %v10032_v46, %v15034_v13  ;;  %v18280_v13 = vld [vmem:[#allocation117_spill] sm:$0xff]  ;;  %v5102_v24 = vmax.f32 %v5066_v29, 0.0 }
 0x631   :  { %v3793_v23 = vpop.f32.mrb[222].mxu0  ;;  %v18281_v10 = vmax.f32 %v13651_v55, %v18280_v13  ;;  %v4904_v55 = vpop.permute.xlu1 %4903 }
 0x632   :  { %v5067_v38 = vadd.f32 %v4894_v5, %v4815_v49  ;;  %v4780_v41 = vmax.f32 %v14981_v54, %v4574_v17  ;;  %v10033_v25 = vadd.f32 %v3793_v23, %v18279_v36  ;;  %v3795_v53 = vpop.f32.mrb[223].mxu0  ;;  %v18283_v49 = vld [vmem:[#allocation118_spill] sm:$0xff] }
 0x633   :  { %v18284_v17 = vmax.f32 %v13663_v35, %v18283_v49 }
 0x634   :  { %v5103_v44 = vmax.f32 %v5067_v38, 0.0  ;;  %v4816_v0 = vmax.f32 %v18281_v10, %v4780_v41  ;;  %v4579_v8 = vadd.f32 %v10033_v25, %v15032_v33  ;;  %v18285_v41 = vmov 0.0|0.0  }
 0x635   :  { %v3798_v1 = vpop.f32.mrb[224].mxu0 }
 0x636   :  { %v4781_v4 = vmax.f32 %v14993_v52, %v4579_v8  ;;  %v10034_v5 = vadd.f32 %v3798_v1, %v18282_v58  ;;  %v3800_v46 = vpop.f32.mrb[225].mxu0  ;;  %v9840_v54 = vpack.c.bf16 %v5103_v44, %v5102_v24  ;;  %v5068_v31 = vadd.f32 %v4899_v56, %v4816_v0  ;;  %v18286_v52 = vld [vmem:[#allocation56_spill] sm:$0xff]  ;;  %v18287_v56 = vld [vmem:[#allocation119_spill] sm:$0xff]  ;;  %v18289_v8 = vld [vmem:[#allocation57_spill] sm:$0xff]  ;;  %v4909_v58 = vpop.permute.xlu0 %4908 }
 0x637   :  { %v18288_v44 = vmax.f32 %v13681_v34, %v18287_v56  ;;  %v4914_v34 = vpop.permute.xlu1 %4913 }
 0x638   :  { %v4817_v23 = vmax.f32 %v18284_v17, %v4781_v4  ;;  %v4584_v59 = vadd.f32 %v10034_v5, %v15058_v19  ;;  %9841 = vmatpush1.bf16.msra.mxu1 %v9840_v54  ;;  %v5104_v10 = vmax.f32 %v5068_v31, 0.0  ;;  %v18290_v5 = vld [vmem:[#allocation120_spill] sm:$0xff]  ;;  %v18292_v31 = vld [vmem:[#allocation58_spill] sm:$0xff] }
 0x639   :  { %v3803_v38 = vpop.f32.mrb[226].mxu0  ;;  %9842 = vmatprep.subr.bf16.mxu1 %v18285_v41  ;;  %v18291_v46 = vmax.f32 %v13693_v15, %v18290_v5 }
 0x63a   :  { %v5069_v33 = vadd.f32 %v4904_v55, %v4817_v23  ;;  %v4782_v29 = vmax.f32 %v15005_v30, %v4584_v59  ;;  %v10035_v36 = vadd.f32 %v3803_v38, %v18286_v52  ;;  %v3805_v25 = vpop.f32.mrb[227].mxu0  ;;  %v18293_v38 = vld [vmem:[#allocation121_spill] sm:$0xff] }
 0x63b   :  { %v18295_v25 = vld [vmem:[#allocation59_spill] sm:$0xff] }
 0x63c   :  { %v5105_v53 = vmax.f32 %v5069_v33, 0.0  ;;  %v4818_v13 = vmax.f32 %v18288_v44, %v4782_v29  ;;  %v4589_v35 = vadd.f32 %v10035_v36, %v15056_v60  ;;  %v18294_v33 = vmax.f32 %v13711_v26, %v18293_v38  ;;  %v4924_v26 = vpop.permute.xlu1 %4923 }
 0x63d   :  { %v3808_v19 = vpop.f32.mrb[228].mxu0 }
 0x63e   :  { %v4783_v0 = vmax.f32 %v15017_v20, %v4589_v35  ;;  %v10036_v24 = vadd.f32 %v3808_v19, %v18289_v8  ;;  %v3810_v1 = vpop.f32.mrb[229].mxu0  ;;  %v9843_v4 = vpack.c.bf16 %v5105_v53, %v5104_v10  ;;  %v5070_v30 = vadd.f32 %v4909_v58, %v4818_v13  ;;  %v4919_v13 = vpop.permute.xlu0 %4918  ;;  %v18296_v35 = vld [vmem:[#allocation122_spill] sm:$0xff] }
 0x63f   :  { %v18297_v10 = vmax.f32 %v13723_v61, %v18296_v35 }
 0x640   :  { %v4819_v54 = vmax.f32 %v18291_v46, %v4783_v0  ;;  %v4594_v49 = vadd.f32 %v10036_v24, %v15082_v28  ;;  %9844 = vmatpush1.bf16.msra.mxu1 %v9843_v4  ;;  %v5106_v52 = vmax.f32 %v5070_v30, 0.0  ;;  %v18298_v24 = vld [vmem:[#allocation60_spill] sm:$0xff]  ;;  %v18299_v30 = vld [vmem:[#allocation123_spill] sm:$0xff] }
 0x641   :  { %v3813_v17 = vpop.f32.mrb[230].mxu0  ;;  %9845 = vmatprep.subr.bf16.mxu1 %v18285_v41  ;;  %v18300_v5 = vmax.f32 %v13741_v9, %v18299_v30  ;;  %v4934_v9 = vpop.permute.xlu1 %4933  ;;  %v18314_v30 = vld [vmem:[#allocation126_spill] sm:$0xff] }
 0x642   :  { %v5071_v60 = vadd.f32 %v4914_v34, %v4819_v54  ;;  %v4784_v20 = vmax.f32 %v15027_v39, %v4594_v49  ;;  %v10037_v23 = vadd.f32 %v3813_v17, %v18292_v31  ;;  %v3815_v59 = vpop.f32.mrb[231].mxu0  ;;  %v18301_v49 = vld [vmem:[#allocation15_spill] sm:$0xff]  ;;  %v18302_v17 = vld [vmem:[#allocation61_spill] sm:$0xff] }
 0x643   :  { %v18303_v59 = vld [vmem:[#allocation87_spill] sm:$0xff] }
 0x644   :  { %v5107_v55 = vmax.f32 %v5071_v60, 0.0  ;;  %v4820_v29 = vmax.f32 %v18294_v33, %v4784_v20  ;;  %v4599_v15 = vadd.f32 %v10037_v23, %v15080_v48  ;;  %v4929_v23 = vpop.permute.xlu0 %4928 }
 0x645   :  { %v3818_v28 = vpop.f32.mrb[232].mxu0 }
 0x646   :  { %v4785_v36 = vmax.f32 %v15041_v21, %v4599_v15  ;;  %v10038_v53 = vadd.f32 %v3818_v28, %v18295_v25  ;;  %v3820_v56 = vpop.f32.mrb[233].mxu0  ;;  %v9846_v44 = vpack.c.bf16 %v5107_v55, %v5106_v52  ;;  %v5072_v39 = vadd.f32 %v4919_v13, %v4820_v29  ;;  %v18304_v55 = vld [vmem:[#allocation124_spill] sm:$0xff]  ;;  %v18309_v13 = vld [vmem:[#allocation125_spill] sm:$0xff] }
 0x647   :  { %v18305_v38 = vmax.f32 %v18303_v59, %v18304_v55  ;;  %v18306_v52 = vld [vmem:[#allocation16_spill] sm:$0xff]  ;;  %v18320_v59 = vld [vmem:[#allocation127_spill] sm:$0xff] }
 0x648   :  { %v4821_v19 = vmax.f32 %v18297_v10, %v4785_v36  ;;  %v4604_v0 = vadd.f32 %v10038_v53, %v15106_v43  ;;  %9847 = vmatpush1.bf16.msra.mxu1 %v9846_v44  ;;  %v5108_v54 = vmax.f32 %v5072_v39, 0.0  ;;  %v18307_v36 = vld [vmem:[#allocation62_spill] sm:$0xff]  ;;  %v18308_v44 = vld [vmem:[#allocation88_spill] sm:$0xff] }
 0x649   :  { %v3823_v8 = vpop.f32.mrb[234].mxu0  ;;  %9848 = vmatprep.subr.bf16.mxu1 %v18285_v41  ;;  %v18310_v39 = vmax.f32 %v18308_v44, %v18309_v13  ;;  %v18325_v13 = vld [vmem:[#allocation91_spill] sm:$0xff] }
 0x64a   :  { %v5073_v48 = vadd.f32 %v4924_v26, %v4821_v19  ;;  %v4786_v21 = vmax.f32 %v15051_v63, %v4604_v0  ;;  %v10039_v1 = vadd.f32 %v3823_v8, %v18298_v24  ;;  %v3825_v4 = vpop.f32.mrb[235].mxu0  ;;  %v18311_v0 = vld [vmem:[#allocation17_spill] sm:$0xff]  ;;  %v18312_v8 = vld [vmem:[#allocation63_spill] sm:$0xff] }
 0x64c   :  { %v5109_v58 = vmax.f32 %v5073_v48, 0.0  ;;  %v4822_v46 = vmax.f32 %v18300_v5, %v4786_v21  ;;  %v4609_v61 = vadd.f32 %v10039_v1, %v15104_v11  ;;  %v4939_v1 = vpop.permute.xlu0 %4938 }
 0x64d   :  { %v3828_v43 = vpop.f32.mrb[236].mxu0 }
 0x64e   :  { %v4787_v34 = vmax.f32 %v18301_v49, %v4609_v61  ;;  %v10040_v60 = vadd.f32 %v3828_v43, %v18302_v17  ;;  %v3830_v20 = vpop.f32.mrb[237].mxu0  ;;  %v9849_v31 = vpack.c.bf16 %v5109_v58, %v5108_v54  ;;  %v5074_v63 = vadd.f32 %v4929_v23, %v4822_v46  ;;  %v18313_v58 = vld [vmem:[#allocation89_spill] sm:$0xff]  ;;  %v18316_v61 = vld [vmem:[#allocation24_spill] sm:$0xff]  ;;  %v4944_v43 = vpop.permute.xlu1 %4943 }
 0x64f   :  { %v18315_v5 = vmax.f32 %v18313_v58, %v18314_v30  ;;  %v18330_v58 = vld [vmem:[#allocation92_spill] sm:$0xff]  ;;  %v18331_v30 = vld [vmem:[#allocation129_spill] sm:$0xff] }
 0x650   :  { %v4823_v33 = vmax.f32 %v18305_v38, %v4787_v34  ;;  %v4614_v29 = vadd.f32 %v10040_v60, %v15130_v37  ;;  %9850 = vmatpush1.bf16.msra.mxu1 %v9849_v31  ;;  %v5110_v19 = vmax.f32 %v5074_v63, 0.0  ;;  %v18317_v34 = vld [vmem:[#allocation18_spill] sm:$0xff]  ;;  %v18318_v60 = vld [vmem:[#allocation64_spill] sm:$0xff] }
 0x651   :  { %v3833_v15 = vpop.f32.mrb[238].mxu0  ;;  %9851 = vmatprep.subr.bf16.mxu1 %v18285_v41  ;;  %v18319_v63 = vld [vmem:[#allocation90_spill] sm:$0xff] }
 0x652   :  { %v5075_v11 = vadd.f32 %v4934_v9, %v4823_v33  ;;  %v4788_v28 = vmax.f32 %v18306_v52, %v4614_v29  ;;  %v10041_v25 = vadd.f32 %v3833_v15, %v18307_v36  ;;  %v3835_v53 = vpop.f32.mrb[239].mxu0  ;;  %v18321_v55 = vmax.f32 %v18319_v63, %v18320_v59  ;;  %v18322_v33 = vld [vmem:[#allocation23_spill] sm:$0xff]  ;;  %v18336_v63 = vld [vmem:[#allocation93_spill] sm:$0xff]  ;;  %v18337_v59 = vld [vmem:[#allocation130_spill] sm:$0xff] }
 0x654   :  { %v5111_v56 = vmax.f32 %v5075_v11, 0.0  ;;  %v4824_v35 = vmax.f32 %v18310_v39, %v4788_v28  ;;  %v4619_v10 = vadd.f32 %v10041_v25, %v15128_v14  ;;  %v18323_v11 = vld [vmem:[#allocation19_spill] sm:$0xff]  ;;  %v18324_v28 = vld [vmem:[#allocation65_spill] sm:$0xff]  ;;  %v18326_v39 = vld [vmem:[#allocation128_spill] sm:$0xff] }
 0x655   :  { %v3838_v37 = vpop.f32.mrb[240].mxu0 }
 0x656   :  { %v4789_v26 = vmax.f32 %v18311_v0, %v4619_v10  ;;  %v10042_v48 = vadd.f32 %v3838_v37, %v18312_v8  ;;  %v3840_v21 = vpop.f32.mrb[241].mxu0  ;;  %v9852_v24 = vpack.c.bf16 %v5111_v56, %v5110_v19  ;;  %v5076_v4 = vadd.f32 %v4939_v1, %v4824_v35  ;;  %v4949_v56 = vpop.permute.xlu0 %4948  ;;  %v18328_v8 = vld [vmem:[#allocation20_spill] sm:$0xff] }
 0x657   :  { %v18327_v35 = vmax.f32 %v18325_v13, %v18326_v39  ;;  %v4954_v37 = vpop.permute.xlu1 %4953  ;;  %v18329_v21 = vld [vmem:[#allocation66_spill] sm:$0xff] }
 0x658   :  { %v4825_v46 = vmax.f32 %v18315_v5, %v4789_v26  ;;  %v4624_v54 = vadd.f32 %v10042_v48, %v18316_v61  ;;  %9853 = vmatpush1.bf16.msra.mxu1 %v9852_v24  ;;  %v5112_v9 = vmax.f32 %v5076_v4, 0.0  ;;  %v18332_v5 = vmax.f32 %v18330_v58, %v18331_v30  ;;  %v18333_v61 = vld [vmem:[#allocation27_spill] sm:$0xff] }
 0x659   :  { %v3843_v49 = vpop.f32.mrb[242].mxu0  ;;  %9854 = vmatprep.subr.bf16.mxu1 %v18285_v41 }
 0x65a   :  { %v5077_v14 = vadd.f32 %v4944_v43, %v4825_v46  ;;  %v4790_v17 = vmax.f32 %v18317_v34, %v4624_v54  ;;  %v10043_v20 = vadd.f32 %v3843_v49, %v18318_v60  ;;  %v3845_v31 = vpop.f32.mrb[243].mxu0  ;;  %v18334_v49 = vld [vmem:[#allocation21_spill] sm:$0xff]  ;;  %v18335_v34 = vld [vmem:[#allocation67_spill] sm:$0xff] }
 0x65b   :  { %v4959_v31 = vpop.permute.xlu0 %4958 }
 0x65c   :  { %v5113_v23 = vmax.f32 %v5077_v14, 0.0  ;;  %v4826_v38 = vmax.f32 %v18321_v55, %v4790_v17  ;;  %v4629_v29 = vadd.f32 %v10043_v20, %v18322_v33  ;;  %v18338_v55 = vmax.f32 %v18336_v63, %v18337_v59  ;;  %v18354_v59 = vld [vmem:[#allocation30_spill] sm:$0xff] }
 0x65d   :  { %v3848_v15 = vpop.f32.mrb[244].mxu0 }
 0x65e   :  { %v4791_v52 = vmax.f32 %v18323_v11, %v4629_v29  ;;  %v10044_v36 = vadd.f32 %v3848_v15, %v18324_v28  ;;  %v3850_v25 = vpop.f32.mrb[245].mxu0  ;;  %v9855_v53 = vpack.c.bf16 %v5113_v23, %v5112_v9  ;;  %v5078_v44 = vadd.f32 %v4949_v56, %v4826_v38  ;;  %v4964_v29 = vpop.permute.xlu1 %4963  ;;  %v18339_v11 = vld [vmem:[#allocation22_spill] sm:$0xff]  ;;  %v18340_v28 = vld [vmem:[#allocation68_spill] sm:$0xff] }
 0x65f   :  { %v18341_v56 = vld [vmem:[#allocation94_spill] sm:$0xff] }
 0x660   :  { %v4827_v10 = vmax.f32 %v18327_v35, %v4791_v52  ;;  %v4634_v19 = vadd.f32 %v10044_v36, %v15169_v32  ;;  %9856 = vmatpush1.bf16.msra.mxu1 %v9855_v53  ;;  %v5114_v43 = vmax.f32 %v5078_v44, 0.0  ;;  %v18342_v44 = vld [vmem:[#allocation131_spill] sm:$0xff] }
 0x661   :  { %v3853_v0 = vpop.f32.mrb[246].mxu0  ;;  %9857 = vmatprep.subr.bf16.mxu1 %v18285_v41  ;;  %v18343_v13 = vmax.f32 %v18341_v56, %v18342_v44 }
 0x662   :  { %v5079_v26 = vadd.f32 %v4954_v37, %v4827_v10  ;;  %v4792_v48 = vmax.f32 %v18328_v8, %v4634_v19  ;;  %v10045_v24 = vadd.f32 %v3853_v0, %v18329_v21  ;;  %v3855_v1 = vpop.f32.mrb[247].mxu0  ;;  %v18344_v19 = vld [vmem:[#allocation25_spill] sm:$0xff]  ;;  %v4969_v21 = vpop.permute.xlu0 %4968 }
 0x663   :  { %v18345_v0 = vld [vmem:[#allocation69_spill] sm:$0xff]  ;;  %v18346_v1 = vld [vmem:[#allocation95_spill] sm:$0xff] }
 0x664   :  { %v5115_v4 = vmax.f32 %v5079_v26, 0.0  ;;  %v4828_v46 = vmax.f32 %v18332_v5, %v4792_v48  ;;  %v4639_v54 = vadd.f32 %v10045_v24, %v18333_v61 }
 0x665   :  { %v3858_v32 = vpop.f32.mrb[248].mxu0 }
 0x666   :  { %v4793_v14 = vmax.f32 %v18334_v49, %v4639_v54  ;;  %v10046_v17 = vadd.f32 %v3858_v32, %v18335_v34  ;;  %v3860_v60 = vpop.f32.mrb[249].mxu0  ;;  %v9858_v20 = vpack.c.bf16 %v5115_v4, %v5114_v43  ;;  %v5080_v23 = vadd.f32 %v4959_v31, %v4828_v46  ;;  %v18347_v4 = vld [vmem:[#allocation132_spill] sm:$0xff]  ;;  %v4974_v46 = vpop.permute.xlu1 %4973  ;;  %v18349_v54 = vld [vmem:[#allocation26_spill] sm:$0xff] }
 0x667   :  { %v18348_v58 = vmax.f32 %v18346_v1, %v18347_v4  ;;  %v18350_v32 = vld [vmem:[#allocation70_spill] sm:$0xff]  ;;  %v18352_v60 = vld [vmem:[#allocation133_spill] sm:$0xff] }
 0x668   :  { %v4829_v38 = vmax.f32 %v18338_v55, %v4793_v14  ;;  %v4644_v33 = vadd.f32 %v10046_v17, %v15181_v57  ;;  %9859 = vmatpush1.bf16.msra.mxu1 %v9858_v20  ;;  %v5116_v10 = vmax.f32 %v5080_v23, 0.0  ;;  %v18351_v17 = vld [vmem:[#allocation96_spill] sm:$0xff]  ;;  %v18365_v4 = vld [vmem:[#allocation73_spill] sm:$0xff] }
 0x669   :  { %v3863_v9 = vpop.f32.mrb[250].mxu0  ;;  %9860 = vmatprep.subr.bf16.mxu1 %v18285_v41  ;;  %v18353_v20 = vmax.f32 %v18351_v17, %v18352_v60  ;;  %v18369_v17 = vld [vmem:[#allocation39_spill] sm:$0xff] }
 0x66a   :  { %v5081_v15 = vadd.f32 %v4964_v29, %v4829_v38  ;;  %v4794_v52 = vmax.f32 %v18339_v11, %v4644_v33  ;;  %v10047_v36 = vadd.f32 %v3863_v9, %v18340_v28  ;;  %v3865_v25 = vpop.f32.mrb[251].mxu0  ;;  %v18355_v38 = vld [vmem:[#allocation71_spill] sm:$0xff]  ;;  %v18357_v28 = vld [vmem:[#allocation134_spill] sm:$0xff]  ;;  %v4984_v56 = vpop.permute.xlu1 %4983 }
 0x66c   :  { %v5117_v53 = vmax.f32 %v5081_v15, 0.0  ;;  %v4830_v39 = vmax.f32 %v18343_v13, %v4794_v52  ;;  %v4649_v35 = vadd.f32 %v10047_v36, %v15179_v27  ;;  %v4979_v15 = vpop.permute.xlu0 %4978  ;;  %v18356_v52 = vld [vmem:[#allocation97_spill] sm:$0xff] }
 0x66d   :  { %v3868_v57 = vpop.f32.mrb[252].mxu0  ;;  %v18358_v36 = vmax.f32 %v18356_v52, %v18357_v28  ;;  %v18359_v13 = vld [vmem:[#allocation33_spill] sm:$0xff] }
 0x66e   :  { %v4795_v37 = vmax.f32 %v18344_v19, %v4649_v35  ;;  %v10048_v26 = vadd.f32 %v3868_v57, %v18345_v0  ;;  %v3870_v8 = vpop.f32.mrb[253].mxu0  ;;  %v9861_v48 = vpack.c.bf16 %v5117_v53, %v5116_v10  ;;  %v5082_v24 = vadd.f32 %v4969_v21, %v4830_v39  ;;  %v18360_v35 = vld [vmem:[#allocation72_spill] sm:$0xff]  ;;  %v18362_v0 = vld [vmem:[#allocation135_spill] sm:$0xff] }
 0x670   :  { %v4831_v30 = vmax.f32 %v18348_v58, %v4795_v37  ;;  %v4654_v5 = vadd.f32 %v10048_v26, %v15193_v62  ;;  %9862 = vmatpush1.bf16.msra.mxu1 %v9861_v48  ;;  %v5118_v63 = vmax.f32 %v5082_v24, 0.0  ;;  %v18361_v37 = vld [vmem:[#allocation98_spill] sm:$0xff]  ;;  %v18364_v24 = vld [vmem:[#allocation36_spill] sm:$0xff] }
 0x671   :  { %v3873_v61 = vpop.f32.mrb[254].mxu0  ;;  %9863 = vmatprep.subr.bf16.mxu1 %v18285_v41  ;;  %v18363_v26 = vmax.f32 %v18361_v37, %v18362_v0  ;;  %v18380_v37 = vld [vmem:[#allocation76_spill] sm:$0xff] }
 0x672   :  { %v5083_v27 = vadd.f32 %v4974_v46, %v4831_v30  ;;  %v4796_v43 = vmax.f32 %v18349_v54, %v4654_v5  ;;  %v10049_v49 = vadd.f32 %v3873_v61, %v18350_v32  ;;  %v3875_v14 = vpop.f32.mrb[255].mxu0  ;;  %v4989_v46 = vpop.permute.xlu0 %4988  ;;  %v18367_v54 = vld [vmem:[#allocation136_spill] sm:$0xff] }
 0x673   :  { %v4994_v14 = vpop.permute.xlu1 %4993 }
 0x674   :  { %v5119_v34 = vmax.f32 %v5083_v27, 0.0  ;;  %v4832_v31 = vmax.f32 %v18353_v20, %v4796_v43  ;;  %v4659_v23 = vadd.f32 %v10049_v49, %v15191_v2  ;;  %v18366_v27 = vld [vmem:[#allocation99_spill] sm:$0xff]  ;;  %v18370_v20 = vld [vmem:[#allocation74_spill] sm:$0xff] }
 0x675   :  { %v3878_v62 = vpop.f32.mrb[150].mxu0  ;;  %v18368_v43 = vmax.f32 %v18366_v27, %v18367_v54 }
 0x676   :  { %v4797_v55 = vmax.f32 %v18354_v59, %v4659_v23  ;;  %v10050_v33 = vadd.f32 %v3878_v62, %v18355_v38  ;;  %v3880_v29 = vpop.f32.mrb[151].mxu0  ;;  %v9864_v9 = vpack.c.bf16 %v5119_v34, %v5118_v63  ;;  %v5084_v11 = vadd.f32 %v4979_v15, %v4832_v31  ;;  %v18371_v62 = vld [vmem:[#allocation100_spill] sm:$0xff]  ;;  %v18372_v59 = vld [vmem:[#allocation137_spill] sm:$0xff] }
 0x678   :  { %v4833_v25 = vmax.f32 %v18358_v36, %v4797_v55  ;;  %v4664_v53 = vadd.f32 %v10050_v33, %v15205_v45  ;;  %9865 = vmatpush1.bf16.msra.mxu1 %v9864_v9  ;;  %v5120_v21 = vmax.f32 %v5084_v11, 0.0  ;;  %v18373_v55 = vmax.f32 %v18371_v62, %v18372_v59  ;;  %v18374_v9 = vld [vmem:[#allocation42_spill] sm:$0xff]  ;;  %v18375_v11 = vld [vmem:[#allocation75_spill] sm:$0xff] }
 0x679   :  { %v3883_v44 = vpop.f32.mrb[152].mxu0  ;;  %9866 = vmatprep.subr.bf16.mxu1 %v18285_v41 }
 0x67a   :  { %v5085_v2 = vadd.f32 %v4984_v56, %v4833_v25  ;;  %v4798_v39 = vmax.f32 %v18359_v13, %v4664_v53  ;;  %v10051_v10 = vadd.f32 %v3883_v44, %v18360_v35  ;;  %v3885_v57 = vpop.f32.mrb[153].mxu0  ;;  %v4999_v25 = vpop.permute.xlu0 %4998  ;;  %v18376_v56 = vld [vmem:[#allocation101_spill] sm:$0xff]  ;;  %v18377_v44 = vld [vmem:[#allocation104_spill] sm:$0xff] }
 0x67b   :  { %v5004_v35 = vpop.permute.xlu1 %5003  ;;  %v18379_v57 = vld [vmem:[#allocation45_spill] sm:$0xff] }
 0x67c   :  { %v5121_v19 = vmax.f32 %v5085_v2, 0.0  ;;  %v4834_v8 = vmax.f32 %v18363_v26, %v4798_v39  ;;  %v4669_v48 = vadd.f32 %v10051_v10, %v15203_v6  ;;  %v18378_v2 = vmax.f32 %v18376_v56, %v18377_v44  ;;  %v18396_v44 = vld [vmem:[#allocation106_spill] sm:$0xff] }
 0x67d   :  { %v3888_v45 = vpop.f32.mrb[154].mxu0 }
 0x67e   :  { %v4799_v1 = vmax.f32 %v18364_v24, %v4669_v48  ;;  %v10052_v58 = vadd.f32 %v3888_v45, %v18365_v4  ;;  %v3890_v30 = vpop.f32.mrb[155].mxu0  ;;  %v9867_v5 = vpack.c.bf16 %v5121_v19, %v5120_v21  ;;  %v5086_v61 = vadd.f32 %v4989_v46, %v4834_v8  ;;  %v18381_v48 = vld [vmem:[#allocation102_spill] sm:$0xff]  ;;  %v5009_v54 = vpop.permute.xlu0 %5008 }
 0x67f   :  { %v18382_v21 = vld [vmem:[#allocation138_spill] sm:$0xff] }
 0x680   :  { %v4835_v32 = vmax.f32 %v18368_v43, %v4799_v1  ;;  %v4674_v49 = vadd.f32 %v10052_v58, %v15217_v12  ;;  %9868 = vmatpush1.bf16.msra.mxu1 %v9867_v5  ;;  %v5122_v29 = vmax.f32 %v5086_v61, 0.0  ;;  %v18383_v45 = vmax.f32 %v18381_v48, %v18382_v21  ;;  %v18384_v58 = vld [vmem:[#allocation28_spill] sm:$0xff]  ;;  %v18385_v5 = vld [vmem:[#allocation77_spill] sm:$0xff]  ;;  %v18401_v48 = vld [vmem:[#allocation107_spill] sm:$0xff] }
 0x681   :  { %v3893_v34 = vpop.f32.mrb[156].mxu0  ;;  %9869 = vmatprep.subr.bf16.mxu1 %v18285_v41  ;;  %v18402_v21 = vld [vmem:[#allocation142_spill] sm:$0xff] }
 0x682   :  { %v5087_v6 = vadd.f32 %v4994_v14, %v4835_v32  ;;  %v4800_v60 = vmax.f32 %v18369_v17, %v4674_v49  ;;  %v10053_v31 = vadd.f32 %v3893_v34, %v18370_v20  ;;  %v3895_v23 = vpop.f32.mrb[157].mxu0  ;;  %v18386_v32 = vld [vmem:[#allocation103_spill] sm:$0xff]  ;;  %v5014_v17 = vpop.permute.xlu1 %5013  ;;  %v18389_v20 = vld [vmem:[#allocation29_spill] sm:$0xff] }
 0x683   :  { %v18387_v49 = vld [vmem:[#allocation139_spill] sm:$0xff]  ;;  %v18390_v23 = vld [vmem:[#allocation78_spill] sm:$0xff] }
 0x684   :  { %v5123_v63 = vmax.f32 %v5087_v6, 0.0  ;;  %v4836_v38 = vmax.f32 %v18373_v55, %v4800_v60  ;;  %v4679_v33 = vadd.f32 %v10053_v31, %v15215_v40  ;;  %v18388_v14 = vmax.f32 %v18386_v32, %v18387_v49  ;;  %v18391_v55 = vld [vmem:[#allocation105_spill] sm:$0xff]  ;;  %v18407_v32 = vld [vmem:[#allocation8_spill] sm:$0xff] }
 0x685   :  { %v3898_v12 = vpop.f32.mrb[158].mxu0 }
 0x686   :  { %v4801_v15 = vmax.f32 %v18374_v9, %v4679_v33  ;;  %v10054_v52 = vadd.f32 %v3898_v12, %v18375_v11  ;;  %v3900_v28 = vpop.f32.mrb[159].mxu0  ;;  %v9870_v36 = vpack.c.bf16 %v5123_v63, %v5122_v29  ;;  %v5088_v53 = vadd.f32 %v4999_v25, %v4836_v38  ;;  %v18392_v38 = vld [vmem:[#allocation140_spill] sm:$0xff] }
 0x687   :  { %v18393_v33 = vmax.f32 %v18391_v55, %v18392_v38 }
 0x688   :  { %v4837_v13 = vmax.f32 %v18378_v2, %v4801_v15  ;;  %v4684_v39 = vadd.f32 %v10054_v52, %v15229_v22  ;;  %9871 = vmatpush1.bf16.msra.mxu1 %v9870_v36  ;;  %v5124_v4 = vmax.f32 %v5088_v53, 0.0  ;;  %v18394_v15 = vld [vmem:[#allocation31_spill] sm:$0xff]  ;;  %v5019_v53 = vpop.permute.xlu0 %5018  ;;  %v18397_v2 = vld [vmem:[#allocation141_spill] sm:$0xff] }
 0x689   :  { %v3903_v10 = vpop.f32.mrb[160].mxu0  ;;  %9872 = vmatprep.subr.bf16.mxu1 %v18285_v41  ;;  %v18395_v52 = vld [vmem:[#allocation79_spill] sm:$0xff] }
 0x68a   :  { %v5089_v40 = vadd.f32 %v5004_v35, %v4837_v13  ;;  %v4802_v19 = vmax.f32 %v18379_v57, %v4684_v39  ;;  %v10055_v0 = vadd.f32 %v3903_v10, %v18380_v37  ;;  %v3905_v26 = vpop.f32.mrb[161].mxu0  ;;  %v18398_v13 = vmax.f32 %v18396_v44, %v18397_v2  ;;  %v5024_v10 = vpop.permute.xlu1 %5023  ;;  %v18399_v57 = vld [vmem:[#allocation32_spill] sm:$0xff] }
 0x68b   :  { %v18400_v37 = vld [vmem:[#allocation80_spill] sm:$0xff] }
 0x68c   :  { %v5125_v8 = vmax.f32 %v5089_v40, 0.0  ;;  %v4838_v24 = vmax.f32 %v18383_v45, %v4802_v19  ;;  %v4689_v1 = vadd.f32 %v10055_v0, %v15227_v42  ;;  %v18403_v45 = vmax.f32 %v18401_v48, %v18402_v21  ;;  %v18424_v48 = vld [vmem:[#allocation11_spill] sm:$0xff] }
 0x68d   :  { %v3908_v22 = vpop.f32.mrb[162].mxu0 }
 0x68e   :  { %v4803_v30 = vmax.f32 %v18384_v58, %v4689_v1  ;;  %v10056_v46 = vadd.f32 %v3908_v22, %v18385_v5  ;;  %v3910_v61 = vpop.f32.mrb[163].mxu0  ;;  %v9873_v27 = vpack.c.bf16 %v5125_v8, %v5124_v4  ;;  %v5090_v43 = vadd.f32 %v5009_v54, %v4838_v24  ;;  %v18404_v22 = vld [vmem:[#allocation34_spill] sm:$0xff] }
 0x690   :  { %v4839_v34 = vmax.f32 %v18388_v14, %v4803_v30  ;;  %v4694_v6 = vadd.f32 %v10056_v46, %v15241_v50  ;;  %9874 = vmatpush1.bf16.msra.mxu1 %v9873_v27  ;;  %v5126_v9 = vmax.f32 %v5090_v43, 0.0  ;;  %v18405_v30 = vld [vmem:[#allocation81_spill] sm:$0xff]  ;;  %v5029_v27 = vpop.permute.xlu0 %5028  ;;  %v18406_v43 = vld [vmem:[#allocation108_spill] sm:$0xff] }
 0x691   :  { %v3913_v60 = vpop.f32.mrb[164].mxu0  ;;  %9875 = vmatprep.subr.bf16.mxu1 %v18285_v41  ;;  %v18408_v49 = vmax.f32 %v18406_v43, %v18407_v32  ;;  %v18430_v43 = vld [vmem:[#allocation12_spill] sm:$0xff] }
 0x692   :  { %v5091_v42 = vadd.f32 %v5014_v17, %v4839_v34  ;;  %v4804_v31 = vmax.f32 %v18389_v20, %v4694_v6  ;;  %v10057_v63 = vadd.f32 %v3913_v60, %v18390_v23  ;;  %v3915_v62 = vpop.f32.mrb[165].mxu0  ;;  %v5034_v6 = vpop.permute.xlu1 %5033  ;;  %v18409_v60 = vld [vmem:[#allocation35_spill] sm:$0xff]  ;;  %v18410_v20 = vld [vmem:[#allocation82_spill] sm:$0xff] }
 0x693   :  { %v18411_v62 = vld [vmem:[#allocation109_spill] sm:$0xff] }
 0x694   :  { %v5127_v59 = vmax.f32 %v5091_v42, 0.0  ;;  %v4840_v29 = vmax.f32 %v18393_v33, %v4804_v31  ;;  %v4699_v12 = vadd.f32 %v10057_v63, %v15239_v18  ;;  %v18414_v33 = vld [vmem:[#allocation43_spill] sm:$0xff] }
 0x695   :  { %v3918_v50 = vpop.f32.mrb[166].mxu0 }
 0x696   :  { %v4805_v11 = vmax.f32 %v18394_v15, %v4699_v12  ;;  %v10058_v28 = vadd.f32 %v3918_v50, %v18395_v52  ;;  %v3920_v36 = vpop.f32.mrb[167].mxu0  ;;  %v9876_v25 = vpack.c.bf16 %v5127_v59, %v5126_v9  ;;  %v5092_v56 = vadd.f32 %v5019_v53, %v4840_v29  ;;  %v18412_v59 = vld [vmem:[#allocation9_spill] sm:$0xff]  ;;  %v18416_v15 = vld [vmem:[#allocation83_spill] sm:$0xff]  ;;  %v18417_v53 = vld [vmem:[#allocation110_spill] sm:$0xff] }
 0x697   :  { %v18413_v55 = vmax.f32 %v18411_v62, %v18412_v59  ;;  %v18415_v9 = vld [vmem:[#allocation37_spill] sm:$0xff]  ;;  %v5039_v36 = vpop.permute.xlu0 %5038 }
 0x698   :  { %v4841_v39 = vmax.f32 %v18398_v13, %v4805_v11  ;;  %v4704_v35 = vadd.f32 %v10058_v28, %v15253_v7  ;;  %9877 = vmatpush1.bf16.msra.mxu1 %v9876_v25  ;;  %v5128_v4 = vmax.f32 %v5092_v56, 0.0  ;;  %v18418_v56 = vld [vmem:[#allocation10_spill] sm:$0xff]  ;;  %v18420_v13 = vld [vmem:[#allocation47_spill] sm:$0xff]  ;;  %v18435_v59 = vld [vmem:[#allocation13_spill] sm:$0xff] }
 0x699   :  { %v3923_v40 = vpop.f32.mrb[168].mxu0  ;;  %9878 = vmatprep.subr.bf16.mxu1 %v18285_v41  ;;  %v18419_v44 = vmax.f32 %v18417_v53, %v18418_v56  ;;  %v5144_v53 = vld [vmem:[%s17923_s3 + $0x30] sm:$0xff] }
 0x69a   :  { %v5093_v18 = vadd.f32 %v5024_v10, %v4841_v39  ;;  %v4806_v19 = vmax.f32 %v18399_v57, %v4704_v35  ;;  %v10059_v0 = vadd.f32 %v3923_v40, %v18400_v37  ;;  %v3925_v26 = vpop.f32.mrb[169].mxu0  ;;  %v5044_v35 = vpop.permute.xlu1 %5043 }
 0x69c   :  { %v5129_v8 = vmax.f32 %v5093_v18, 0.0  ;;  %v4842_v24 = vmax.f32 %v18403_v45, %v4806_v19  ;;  %v4709_v1 = vadd.f32 %v10059_v0, %v15251_v51  ;;  %v18421_v18 = vld [vmem:[#allocation38_spill] sm:$0xff]  ;;  %v18422_v19 = vld [vmem:[#allocation84_spill] sm:$0xff] }
 0x69d   :  { %v3928_v7 = vpop.f32.mrb[170].mxu0 }
 0x69e   :  { %v4807_v58 = vmax.f32 %v18404_v22, %v4709_v1  ;;  %v10060_v5 = vadd.f32 %v3928_v7, %v18405_v30  ;;  %v3930_v46 = vpop.f32.mrb[171].mxu0  ;;  %v9879_v61 = vpack.c.bf16 %v5129_v8, %v5128_v4  ;;  %v5094_v54 = vadd.f32 %v5029_v27, %v4842_v24  ;;  %v18423_v8 = vld [vmem:[#allocation111_spill] sm:$0xff]  ;;  %v18426_v24 = vld [vmem:[#allocation46_spill] sm:$0xff]  ;;  %v18427_v22 = vld [vmem:[#allocation40_spill] sm:$0xff]  ;;  %v5049_v27 = vpop.permute.xlu0 %5048 }
 0x69f   :  { %v18425_v21 = vmax.f32 %v18423_v8, %v18424_v48  ;;  %v18428_v30 = vld [vmem:[#allocation85_spill] sm:$0xff]  ;;  %v5160_v8 = vld [vmem:[%s17923_s3 + $0xb0] sm:$0xff] }
 0x6a0   :  { %v4843_v14 = vmax.f32 %v18408_v49, %v4807_v58  ;;  %v4714_v34 = vadd.f32 %v10060_v5, %v15265_v3  ;;  %9880 = vmatpush1.bf16.msra.mxu1 %v9879_v61  ;;  %v5130_v12 = vmax.f32 %v5094_v54, 0.0  ;;  %v18429_v54 = vld [vmem:[#allocation112_spill] sm:$0xff]  ;;  %v5159_v48 = vld [vmem:[%s17923_s3 + $0xa8] sm:$0xff] }
 0x6a1   :  { %v3933_v17 = vpop.f32.mrb[172].mxu0  ;;  %9881 = vmatprep.subr.bf16.mxu1 %v18285_v41  ;;  %v18431_v32 = vmax.f32 %v18429_v54, %v18430_v43  ;;  %v5180_v54 = vld [vmem:[%s17923_s3 + $0x150] sm:$0xff] }
 0x6a2   :  { %v5095_v51 = vadd.f32 %v5034_v6, %v4843_v14  ;;  %v4808_v42 = vmax.f32 %v18409_v60, %v4714_v34  ;;  %v10061_v31 = vadd.f32 %v3933_v17, %v18410_v20  ;;  %v3935_v23 = vpop.f32.mrb[173].mxu0  ;;  %v5138_v34 = vld [vmem:[%s17923_s3] sm:$0xff]  ;;  %v5054_v17 = vpop.permute.xlu1 %5053  ;;  %v5184_v43 = vld [vmem:[%s17923_s3 + $0x170] sm:$0xff] }
 0x6a3   :  { %v5142_v60 = vld [vmem:[%s17923_s3 + $0x20] sm:$0xff] }
 0x6a4   :  { %v5131_v63 = vmax.f32 %v5095_v51, 0.0  ;;  %v4844_v38 = vmax.f32 %v18413_v55, %v4808_v42  ;;  %v4719_v29 = vadd.f32 %v10061_v31, %v18414_v33  ;;  %v18432_v42 = vld [vmem:[#allocation41_spill] sm:$0xff]  ;;  %v18433_v31 = vld [vmem:[#allocation86_spill] sm:$0xff] }
 0x6a5   :  { %v3938_v3 = vpop.f32.mrb[174].mxu0 }
 0x6a6   :  { %v4809_v50 = vmax.f32 %v18415_v9, %v4719_v29  ;;  %v10062_v11 = vadd.f32 %v3938_v3, %v18416_v15  ;;  %v3940_v52 = vpop.f32.mrb[175].mxu0  ;;  %v9882_v28 = vpack.c.bf16 %v5131_v63, %v5130_v12  ;;  %v5096_v25 = vadd.f32 %v5039_v36, %v4844_v38  ;;  %v5141_v29 = vld [vmem:[%s17923_s3 + $0x18] sm:$0xff]  ;;  %v18439_v36 = vld [vmem:[#allocation14_spill] sm:$0xff] }
 0x6a7   :  { %v5145_v9 = vld [vmem:[%s17923_s3 + $0x38] sm:$0xff]  ;;  %v5059_v52 = vpop.permute.xlu0 %5058 }
 0x6a8   :  { %v4845_v2 = vmax.f32 %v18419_v44, %v4809_v50  ;;  %v4724_v39 = vadd.f32 %v10062_v11, %v18420_v13  ;;  %9883 = vmatpush1.bf16.msra.mxu1 %v9882_v28  ;;  %v5132_v4 = vmax.f32 %v5096_v25, 0.0  ;;  %v18437_v50 = vld [vmem:[#allocation44_spill] sm:$0xff]  ;;  %v18438_v28 = vld [vmem:[#allocation114_spill] sm:$0xff]  ;;  %v5064_v44 = vpop.permute.xlu1 %5063 }
 0x6a9   :  { %v3943_v10 = vpop.f32.mrb[176].mxu0  ;;  %9884 = vmatprep.subr.bf16.mxu1 %v18285_v41  ;;  %v18440_v25 = vmax.f32 %v18438_v28, %v18439_v36  ;;  %v5226_v28 = vld [vmem:[%s17923_s3 + $0x2c0] sm:$0xff]  ;;  %v5225_v36 = vld [vmem:[%s17923_s3 + $0x2b8] sm:$0xff]  ;;  %v5468_v41 = vld [vmem:[%s17923_s3 + $0xa50] sm:$0xff] }
 0x6aa   :  { %v5097_v40 = vadd.f32 %v5044_v35, %v4845_v2  ;;  %v4810_v57 = vmax.f32 %v18421_v18, %v4724_v39  ;;  %v10063_v37 = vadd.f32 %v3943_v10, %v18422_v19  ;;  %v3945_v0 = vpop.f32.mrb[177].mxu0  ;;  %v5148_v2 = vld [vmem:[%s17923_s3 + $0x50] sm:$0xff]  ;;  %v5147_v39 = vld [vmem:[%s17923_s3 + $0x48] sm:$0xff]  ;;  %v5154_v19 = vld [vmem:[%s17923_s3 + $0x80] sm:$0xff] }
 0x6ab   :  { %v5157_v0 = vld [vmem:[%s17923_s3 + $0x98] sm:$0xff] }
 0x6ac   :  { %v5133_v26 = vmax.f32 %v5097_v40, 0.0  ;;  %v4846_v45 = vmax.f32 %v18425_v21, %v4810_v57  ;;  %v4729_v1 = vadd.f32 %v10063_v37, %v18426_v24  ;;  %v5151_v40 = vld [vmem:[%s17923_s3 + $0x68] sm:$0xff]  ;;  %v5150_v57 = vld [vmem:[%s17923_s3 + $0x60] sm:$0xff]  ;;  %v5153_v37 = vld [vmem:[%s17923_s3 + $0x78] sm:$0xff] }
 0x6ad   :  { %v3948_v7 = vpop.f32.mrb[178].mxu0  ;;  %v5163_v21 = vld [vmem:[%s17923_s3 + $0xc8] sm:$0xff]  ;;  %v5166_v24 = vld [vmem:[%s17923_s3 + $0xe0] sm:$0xff] }
 0x6ae   :  { %v4811_v58 = vmax.f32 %v18427_v22, %v4729_v1  ;;  %v10064_v5 = vadd.f32 %v3948_v7, %v18428_v30  ;;  %v3950_v46 = vpop.f32.mrb[179].mxu0  ;;  %v9885_v61 = vpack.c.bf16 %v5133_v26, %v5132_v4  ;;  %v5098_v6 = vadd.f32 %v5049_v27, %v4846_v45  ;;  %v5156_v26 = vld [vmem:[%s17923_s3 + $0x90] sm:$0xff]  ;;  %v5162_v45 = vld [vmem:[%s17923_s3 + $0xc0] sm:$0xff]  ;;  %v5165_v1 = vld [vmem:[%s17923_s3 + $0xd8] sm:$0xff] }
 0x6af   :  { %v5169_v4 = vld [vmem:[%s17923_s3 + $0xf8] sm:$0xff]  ;;  %v5168_v7 = vld [vmem:[%s17923_s3 + $0xf0] sm:$0xff]  ;;  %v5175_v30 = vld [vmem:[%s17923_s3 + $0x128] sm:$0xff] }
 0x6b0   :  { %v4847_v49 = vmax.f32 %v18431_v32, %v4811_v58  ;;  %v4734_v14 = vadd.f32 %v10064_v5, %v15291_v47  ;;  %9886 = vmatpush1.bf16.msra.mxu1 %v9885_v61  ;;  %v18434_v47 = vld [vmem:[#allocation113_spill] sm:$0xff]  ;;  %v5134_v12 = vmax.f32 %v5098_v6, 0.0  ;;  %v5172_v22 = vld [vmem:[%s17923_s3 + $0x110] sm:$0xff]  ;;  %v5174_v5 = vld [vmem:[%s17923_s3 + $0x120] sm:$0xff] }
 0x6b1   :  { %v3953_v51 = vpop.f32.mrb[180].mxu0  ;;  %v18436_v55 = vmax.f32 %v18434_v47, %v18435_v59  ;;  %v5171_v58 = vld [vmem:[%s17923_s3 + $0x108] sm:$0xff]  ;;  %v5178_v46 = vld [vmem:[%s17923_s3 + $0x140] sm:$0xff]  ;;  %v5177_v61 = vld [vmem:[%s17923_s3 + $0x138] sm:$0xff] }
 0x6b2   :  { %v4812_v20 = vmax.f32 %v18432_v42, %v4734_v14  ;;  %v10065_v23 = vadd.f32 %v3953_v51, %v18433_v31  ;;  %v3955_v63 = vpop.f32.mrb[181].mxu0  ;;  %v5099_v62 = vadd.f32 %v5054_v17, %v4847_v49  ;;  %v5181_v27 = vld [vmem:[%s17923_s3 + $0x158] sm:$0xff]  ;;  %v5183_v32 = vld [vmem:[%s17923_s3 + $0x168] sm:$0xff]  ;;  %v5186_v14 = vld [vmem:[%s17923_s3 + $0x180] sm:$0xff] }
 0x6b3   :  { %5972 = vmatmul.mubr.f32.vlgmr.msra.gmra.mrb[46].mxu1 %v5138_v34  ;;  %v5187_v49 = vld [vmem:[%s17923_s3 + $0x188] sm:$0xff]  ;;  %v5190_v34 = vld [vmem:[%s17923_s3 + $0x1a0] sm:$0xff]  ;;  %v5189_v6 = vld [vmem:[%s17923_s3 + $0x198] sm:$0xff] }
 0x6b4   :  { %v4848_v38 = vmax.f32 %v18436_v55, %v4812_v20  ;;  %v4739_v33 = vadd.f32 %v10065_v23, %v15289_v16  ;;  %5976 = vmatprep.mubr.f32.mxu1 %v5142_v60  ;;  %v5135_v3 = vmax.f32 %v5099_v62, 0.0  ;;  %v5193_v17 = vld [vmem:[%s17923_s3 + $0x1b8] sm:$0xff]  ;;  %v5192_v51 = vld [vmem:[%s17923_s3 + $0x1b0] sm:$0xff]  ;;  %v5195_v42 = vld [vmem:[%s17923_s3 + $0x1c8] sm:$0xff] }
 0x6b5   :  { %v5196_v60 = vld [vmem:[%s17923_s3 + $0x1d0] sm:$0xff]  ;;  %v5199_v20 = vld [vmem:[%s17923_s3 + $0x1e8] sm:$0xff]  ;;  %v5198_v31 = vld [vmem:[%s17923_s3 + $0x1e0] sm:$0xff] }
 0x6b6   :  { %v4813_v15 = vmax.f32 %v18437_v50, %v4739_v33  ;;  %v9887_v11 = vpack.c.bf16 %v5135_v3, %v5134_v12  ;;  %v5100_v56 = vadd.f32 %v5059_v52, %v4848_v38  ;;  %v5202_v23 = vld [vmem:[%s17923_s3 + $0x200] sm:$0xff]  ;;  %v5201_v63 = vld [vmem:[%s17923_s3 + $0x1f8] sm:$0xff]  ;;  %v5204_v47 = vld [vmem:[%s17923_s3 + $0x210] sm:$0xff] }
 0x6b7   :  { %5977 = vmatmul.mubr.f32.gmra.mrb[48].mxu1 %v5141_v29  ;;  %v5205_v62 = vld [vmem:[%s17923_s3 + $0x218] sm:$0xff]  ;;  %v5208_v59 = vld [vmem:[%s17923_s3 + $0x230] sm:$0xff]  ;;  %v5207_v55 = vld [vmem:[%s17923_s3 + $0x228] sm:$0xff] }
 0x6b8   :  { %v4849_v16 = vmax.f32 %v18440_v25, %v4813_v15  ;;  %9888 = vmatprep.subr.bf16.mxu1 %v9887_v11  ;;  %5981 = vmatprep.mubr.f32.mxu1 %v5145_v9  ;;  %v5136_v35 = vmax.f32 %v5100_v56, 0.0  ;;  %v5211_v38 = vld [vmem:[%s17923_s3 + $0x248] sm:$0xff]  ;;  %v5210_v33 = vld [vmem:[%s17923_s3 + $0x240] sm:$0xff]  ;;  %v5213_v12 = vld [vmem:[%s17923_s3 + $0x258] sm:$0xff] }
 0x6b9   :  { %9890 = vmatpush3.bf16.msra.mxu1 %v9887_v11  ;;  %v5214_v29 = vld [vmem:[%s17923_s3 + $0x260] sm:$0xff]  ;;  %v5217_v3 = vld [vmem:[%s17923_s3 + $0x278] sm:$0xff]  ;;  %v5216_v9 = vld [vmem:[%s17923_s3 + $0x270] sm:$0xff] }
 0x6ba   :  { %v5101_v13 = vadd.f32 %v5064_v44, %v4849_v16  ;;  %v5220_v50 = vld [vmem:[%s17923_s3 + $0x290] sm:$0xff]  ;;  %v5219_v15 = vld [vmem:[%s17923_s3 + $0x288] sm:$0xff]  ;;  %v5222_v52 = vld [vmem:[%s17923_s3 + $0x2a0] sm:$0xff] }
 0x6bb   :  { %5982 = vmatmul.mubr.f32.gmra.mrb[50].mxu1 %v5144_v53  ;;  %v5223_v11 = vld [vmem:[%s17923_s3 + $0x2a8] sm:$0xff]  ;;  %v5229_v25 = vld [vmem:[%s17923_s3 + $0x2d8] sm:$0xff]  ;;  %v5228_v16 = vld [vmem:[%s17923_s3 + $0x2d0] sm:$0xff] }
 0x6bc   :  { %5986 = vmatprep.mubr.f32.mxu1 %v5148_v2  ;;  %v5137_v10 = vmax.f32 %v5101_v13, 0.0  ;;  %v5232_v53 = vld [vmem:[%s17923_s3 + $0x2f0] sm:$0xff]  ;;  %v5231_v56 = vld [vmem:[%s17923_s3 + $0x2e8] sm:$0xff]  ;;  %v5234_v2 = vld [vmem:[%s17923_s3 + $0x300] sm:$0xff] }
 0x6bd   :  { %v5235_v44 = vld [vmem:[%s17923_s3 + $0x308] sm:$0xff]  ;;  %v5238_v13 = vld [vmem:[%s17923_s3 + $0x320] sm:$0xff] }
 0x6be   :  { %v9891_v18 = vpack.c.bf16 %v5137_v10, %v5136_v35  ;;  %v5241_v35 = vld [vmem:[%s17923_s3 + $0x338] sm:$0xff]  ;;  %v5240_v10 = vld [vmem:[%s17923_s3 + $0x330] sm:$0xff] }
 0x6bf   :  { %5987 = vmatmul.mubr.f32.gmra.mrb[52].mxu1 %v5147_v39  ;;  %v5237_v39 = vld [vmem:[%s17923_s3 + $0x318] sm:$0xff] }
 0x6c0   :  { %9892 = vmatprep.subr.bf16.mxu1 %v9891_v18  ;;  %5991 = vmatprep.mubr.f32.mxu1 %v5151_v40  ;;  %v5244_v40 = vld [vmem:[%s17923_s3 + $0x350] sm:$0xff] }
 0x6c1   :  { %9894 = vmatpush3.bf16.msra.mxu1 %v9891_v18  ;;  %v5243_v18 = vld [vmem:[%s17923_s3 + $0x348] sm:$0xff] }
 0x6c3   :  { %5992 = vmatmul.mubr.f32.gmra.mrb[54].mxu1 %v5150_v57  ;;  %v5247_v57 = vld [vmem:[%s17923_s3 + $0x368] sm:$0xff] }
 0x6c4   :  { %5996 = vmatprep.mubr.f32.mxu1 %v5154_v19  ;;  %v5246_v19 = vld [vmem:[%s17923_s3 + $0x360] sm:$0xff] }
 0x6c7   :  { %5997 = vmatmul.mubr.f32.gmra.mrb[56].mxu1 %v5153_v37  ;;  %v5250_v37 = vld [vmem:[%s17923_s3 + $0x380] sm:$0xff] }
 0x6c8   :  { %6001 = vmatprep.mubr.f32.mxu1 %v5157_v0  ;;  %v5249_v0 = vld [vmem:[%s17923_s3 + $0x378] sm:$0xff] }
 0x6cb   :  { %6002 = vmatmul.mubr.f32.gmra.mrb[58].mxu1 %v5156_v26  ;;  %v5253_v26 = vld [vmem:[%s17923_s3 + $0x398] sm:$0xff] }
 0x6cc   :  { %6006 = vmatprep.mubr.f32.mxu1 %v5160_v8  ;;  %v5252_v8 = vld [vmem:[%s17923_s3 + $0x390] sm:$0xff] }
 0x6cf   :  { %6007 = vmatmul.mubr.f32.gmra.mrb[60].mxu1 %v5159_v48  ;;  %v5256_v48 = vld [vmem:[%s17923_s3 + $0x3b0] sm:$0xff] }
 0x6d0   :  { %6011 = vmatprep.mubr.f32.mxu1 %v5163_v21  ;;  %v5255_v21 = vld [vmem:[%s17923_s3 + $0x3a8] sm:$0xff] }
 0x6d3   :  { %6012 = vmatmul.mubr.f32.gmra.mrb[62].mxu1 %v5162_v45  ;;  %v5259_v45 = vld [vmem:[%s17923_s3 + $0x3c8] sm:$0xff] }
 0x6d4   :  { %6016 = vmatprep.mubr.f32.mxu1 %v5166_v24  ;;  %v5258_v24 = vld [vmem:[%s17923_s3 + $0x3c0] sm:$0xff] }
 0x6d7   :  { %6017 = vmatmul.mubr.f32.gmra.mrb[64].mxu1 %v5165_v1  ;;  %v5262_v1 = vld [vmem:[%s17923_s3 + $0x3e0] sm:$0xff] }
 0x6d8   :  { %6021 = vmatprep.mubr.f32.mxu1 %v5169_v4  ;;  %v5261_v4 = vld [vmem:[%s17923_s3 + $0x3d8] sm:$0xff] }
 0x6db   :  { %6022 = vmatmul.mubr.f32.gmra.mrb[66].mxu1 %v5168_v7  ;;  %v5265_v7 = vld [vmem:[%s17923_s3 + $0x3f8] sm:$0xff] }
 0x6dc   :  { %6026 = vmatprep.mubr.f32.mxu1 %v5172_v22  ;;  %v5264_v22 = vld [vmem:[%s17923_s3 + $0x3f0] sm:$0xff] }
 0x6df   :  { %6027 = vmatmul.mubr.f32.gmra.mrb[68].mxu1 %v5171_v58  ;;  %v5268_v58 = vld [vmem:[%s17923_s3 + $0x410] sm:$0xff] }
 0x6e0   :  { %6031 = vmatprep.mubr.f32.mxu1 %v5175_v30  ;;  %v5267_v30 = vld [vmem:[%s17923_s3 + $0x408] sm:$0xff] }
 0x6e3   :  { %6032 = vmatmul.mubr.f32.gmra.mrb[70].mxu1 %v5174_v5  ;;  %v5271_v5 = vld [vmem:[%s17923_s3 + $0x428] sm:$0xff] }
 0x6e4   :  { %6036 = vmatprep.mubr.f32.mxu1 %v5178_v46  ;;  %v5270_v46 = vld [vmem:[%s17923_s3 + $0x420] sm:$0xff] }
 0x6e7   :  { %6037 = vmatmul.mubr.f32.gmra.mrb[72].mxu1 %v5177_v61  ;;  %v5274_v61 = vld [vmem:[%s17923_s3 + $0x440] sm:$0xff] }
 0x6e8   :  { %6041 = vmatprep.mubr.f32.mxu1 %v5181_v27  ;;  %v5273_v27 = vld [vmem:[%s17923_s3 + $0x438] sm:$0xff] }
 0x6eb   :  { %6042 = vmatmul.mubr.f32.gmra.mrb[74].mxu1 %v5180_v54  ;;  %v5277_v54 = vld [vmem:[%s17923_s3 + $0x458] sm:$0xff] }
 0x6ec   :  { %6046 = vmatprep.mubr.f32.mxu1 %v5184_v43  ;;  %v5276_v43 = vld [vmem:[%s17923_s3 + $0x450] sm:$0xff] }
 0x6ef   :  { %6047 = vmatmul.mubr.f32.gmra.mrb[76].mxu1 %v5183_v32  ;;  %v5280_v32 = vld [vmem:[%s17923_s3 + $0x470] sm:$0xff] }
 0x6f0   :  { %6051 = vmatprep.mubr.f32.mxu1 %v5187_v49  ;;  %v5279_v49 = vld [vmem:[%s17923_s3 + $0x468] sm:$0xff] }
 0x6f3   :  { %6052 = vmatmul.mubr.f32.gmra.mrb[78].mxu1 %v5186_v14  ;;  %v5283_v14 = vld [vmem:[%s17923_s3 + $0x488] sm:$0xff] }
 0x6f4   :  { %6056 = vmatprep.mubr.f32.mxu1 %v5190_v34  ;;  %v5282_v34 = vld [vmem:[%s17923_s3 + $0x480] sm:$0xff] }
 0x6f7   :  { %6057 = vmatmul.mubr.f32.gmra.mrb[80].mxu1 %v5189_v6  ;;  %v5286_v6 = vld [vmem:[%s17923_s3 + $0x4a0] sm:$0xff] }
 0x6f8   :  { %6061 = vmatprep.mubr.f32.mxu1 %v5193_v17  ;;  %v5285_v17 = vld [vmem:[%s17923_s3 + $0x498] sm:$0xff] }
 0x6fb   :  { %6062 = vmatmul.mubr.f32.gmra.mrb[82].mxu1 %v5192_v51  ;;  %v5289_v51 = vld [vmem:[%s17923_s3 + $0x4b8] sm:$0xff] }
 0x6fc   :  { %6066 = vmatprep.mubr.f32.mxu1 %v5196_v60  ;;  %v5288_v60 = vld [vmem:[%s17923_s3 + $0x4b0] sm:$0xff] }
 0x6ff   :  { %6067 = vmatmul.mubr.f32.gmra.mrb[84].mxu1 %v5195_v42  ;;  %v5292_v42 = vld [vmem:[%s17923_s3 + $0x4d0] sm:$0xff] }
 0x700   :  { %6071 = vmatprep.mubr.f32.mxu1 %v5199_v20  ;;  %v5291_v20 = vld [vmem:[%s17923_s3 + $0x4c8] sm:$0xff] }
 0x703   :  { %6072 = vmatmul.mubr.f32.gmra.mrb[86].mxu1 %v5198_v31  ;;  %v5295_v31 = vld [vmem:[%s17923_s3 + $0x4e8] sm:$0xff] }
 0x704   :  { %6076 = vmatprep.mubr.f32.mxu1 %v5202_v23  ;;  %v5294_v23 = vld [vmem:[%s17923_s3 + $0x4e0] sm:$0xff] }
 0x707   :  { %6077 = vmatmul.mubr.f32.gmra.mrb[88].mxu1 %v5201_v63  ;;  %v5298_v63 = vld [vmem:[%s17923_s3 + $0x500] sm:$0xff] }
 0x708   :  { %6081 = vmatprep.mubr.f32.mxu1 %v5205_v62  ;;  %v5297_v62 = vld [vmem:[%s17923_s3 + $0x4f8] sm:$0xff] }
 0x70b   :  { %6082 = vmatmul.mubr.f32.gmra.mrb[90].mxu1 %v5204_v47  ;;  %v5301_v47 = vld [vmem:[%s17923_s3 + $0x518] sm:$0xff] }
 0x70c   :  { %6086 = vmatprep.mubr.f32.mxu1 %v5208_v59 }
 0x70f   :  { %6087 = vmatmul.mubr.f32.gmra.mrb[92].mxu1 %v5207_v55 }
 0x710   :  { %6091 = vmatprep.mubr.f32.mxu1 %v5211_v38  ;;  %v5300_v38 = vld [vmem:[%s17923_s3 + $0x510] sm:$0xff] }
 0x713   :  { %6092 = vmatmul.mubr.f32.gmra.mrb[94].mxu1 %v5210_v33  ;;  %v5304_v33 = vld [vmem:[%s17923_s3 + $0x530] sm:$0xff] }
 0x714   :  { %6096 = vmatprep.mubr.f32.mxu1 %v5214_v29 }
 0x717   :  { %6097 = vmatmul.mubr.f32.gmra.mrb[96].mxu1 %v5213_v12 }
 0x718   :  { %6101 = vmatprep.mubr.f32.mxu1 %v5217_v3  ;;  %v5303_v3 = vld [vmem:[%s17923_s3 + $0x528] sm:$0xff] }
 0x71b   :  { %6102 = vmatmul.mubr.f32.gmra.mrb[98].mxu1 %v5216_v9  ;;  %v5307_v9 = vld [vmem:[%s17923_s3 + $0x548] sm:$0xff] }
 0x71c   :  { %6106 = vmatprep.mubr.f32.mxu1 %v5220_v50 }
 0x71f   :  { %6107 = vmatmul.mubr.f32.gmra.mrb[100].mxu1 %v5219_v15 }
 0x720   :  { %6111 = vmatprep.mubr.f32.mxu1 %v5223_v11  ;;  %v5306_v11 = vld [vmem:[%s17923_s3 + $0x540] sm:$0xff] }
 0x723   :  { %6112 = vmatmul.mubr.f32.gmra.mrb[102].mxu1 %v5222_v52  ;;  %v5310_v52 = vld [vmem:[%s17923_s3 + $0x560] sm:$0xff] }
 0x724   :  { %6116 = vmatprep.mubr.f32.mxu1 %v5226_v28 }
 0x727   :  { %6117 = vmatmul.mubr.f32.gmra.mrb[104].mxu1 %v5225_v36 }
 0x728   :  { %6121 = vmatprep.mubr.f32.mxu1 %v5229_v25  ;;  %v5309_v25 = vld [vmem:[%s17923_s3 + $0x558] sm:$0xff] }
 0x72b   :  { %6122 = vmatmul.mubr.f32.gmra.mrb[106].mxu1 %v5228_v16  ;;  %v5313_v16 = vld [vmem:[%s17923_s3 + $0x578] sm:$0xff] }
 0x72c   :  { %6126 = vmatprep.mubr.f32.mxu1 %v5232_v53 }
 0x72f   :  { %6127 = vmatmul.mubr.f32.gmra.mrb[108].mxu1 %v5231_v56 }
 0x730   :  { %6131 = vmatprep.mubr.f32.mxu1 %v5235_v44  ;;  %v5312_v44 = vld [vmem:[%s17923_s3 + $0x570] sm:$0xff] }
 0x733   :  { %6132 = vmatmul.mubr.f32.gmra.mrb[110].mxu1 %v5234_v2  ;;  %v5316_v2 = vld [vmem:[%s17923_s3 + $0x590] sm:$0xff] }
 0x734   :  { %6136 = vmatprep.mubr.f32.mxu1 %v5238_v13 }
 0x737   :  { %6137 = vmatmul.mubr.f32.gmra.mrb[112].mxu1 %v5237_v39 }
 0x738   :  { %6141 = vmatprep.mubr.f32.mxu1 %v5241_v35  ;;  %v5315_v35 = vld [vmem:[%s17923_s3 + $0x588] sm:$0xff] }
 0x73b   :  { %6142 = vmatmul.mubr.f32.gmra.mrb[114].mxu1 %v5240_v10  ;;  %v5319_v10 = vld [vmem:[%s17923_s3 + $0x5a8] sm:$0xff] }
 0x73c   :  { %6146 = vmatprep.mubr.f32.mxu1 %v5244_v40 }
 0x73f   :  { %6147 = vmatmul.mubr.f32.gmra.mrb[116].mxu1 %v5243_v18 }
 0x740   :  { %6151 = vmatprep.mubr.f32.mxu1 %v5247_v57  ;;  %v5318_v57 = vld [vmem:[%s17923_s3 + $0x5a0] sm:$0xff] }
 0x743   :  { %6152 = vmatmul.mubr.f32.gmra.mrb[118].mxu1 %v5246_v19  ;;  %v5322_v19 = vld [vmem:[%s17923_s3 + $0x5c0] sm:$0xff] }
 0x744   :  { %6156 = vmatprep.mubr.f32.mxu1 %v5250_v37 }
 0x747   :  { %6157 = vmatmul.mubr.f32.gmra.mrb[120].mxu1 %v5249_v0 }
 0x748   :  { %6161 = vmatprep.mubr.f32.mxu1 %v5253_v26  ;;  %v5321_v26 = vld [vmem:[%s17923_s3 + $0x5b8] sm:$0xff] }
 0x74b   :  { %6162 = vmatmul.mubr.f32.gmra.mrb[122].mxu1 %v5252_v8  ;;  %v5325_v8 = vld [vmem:[%s17923_s3 + $0x5d8] sm:$0xff] }
 0x74c   :  { %6166 = vmatprep.mubr.f32.mxu1 %v5256_v48 }
 0x74f   :  { %6167 = vmatmul.mubr.f32.gmra.mrb[124].mxu1 %v5255_v21 }
 0x750   :  { %6171 = vmatprep.mubr.f32.mxu1 %v5259_v45  ;;  %v5324_v45 = vld [vmem:[%s17923_s3 + $0x5d0] sm:$0xff] }
 0x753   :  { %6172 = vmatmul.mubr.f32.gmra.mrb[126].mxu1 %v5258_v24  ;;  %v5328_v24 = vld [vmem:[%s17923_s3 + $0x5f0] sm:$0xff] }
 0x754   :  { %6176 = vmatprep.mubr.f32.mxu1 %v5262_v1 }
 0x757   :  { %6177 = vmatmul.mubr.f32.gmra.mrb[128].mxu1 %v5261_v4 }
 0x758   :  { %6181 = vmatprep.mubr.f32.mxu1 %v5265_v7  ;;  %v5327_v7 = vld [vmem:[%s17923_s3 + $0x5e8] sm:$0xff] }
 0x75b   :  { %6182 = vmatmul.mubr.f32.gmra.mrb[130].mxu1 %v5264_v22  ;;  %v5331_v22 = vld [vmem:[%s17923_s3 + $0x608] sm:$0xff] }
 0x75c   :  { %6186 = vmatprep.mubr.f32.mxu1 %v5268_v58 }
 0x75f   :  { %6187 = vmatmul.mubr.f32.gmra.mrb[132].mxu1 %v5267_v30 }
 0x760   :  { %6191 = vmatprep.mubr.f32.mxu1 %v5271_v5  ;;  %v5330_v5 = vld [vmem:[%s17923_s3 + $0x600] sm:$0xff] }
 0x763   :  { %6192 = vmatmul.mubr.f32.gmra.mrb[134].mxu1 %v5270_v46  ;;  %v5334_v46 = vld [vmem:[%s17923_s3 + $0x620] sm:$0xff] }
 0x764   :  { %6196 = vmatprep.mubr.f32.mxu1 %v5274_v61 }
 0x767   :  { %6197 = vmatmul.mubr.f32.gmra.mrb[136].mxu1 %v5273_v27 }
 0x768   :  { %6201 = vmatprep.mubr.f32.mxu1 %v5277_v54  ;;  %v5333_v54 = vld [vmem:[%s17923_s3 + $0x618] sm:$0xff] }
 0x76b   :  { %6202 = vmatmul.mubr.f32.gmra.mrb[138].mxu1 %v5276_v43  ;;  %v5337_v43 = vld [vmem:[%s17923_s3 + $0x638] sm:$0xff] }
 0x76c   :  { %6206 = vmatprep.mubr.f32.mxu1 %v5280_v32 }
 0x76f   :  { %6207 = vmatmul.mubr.f32.gmra.mrb[140].mxu1 %v5279_v49 }
 0x770   :  { %6211 = vmatprep.mubr.f32.mxu1 %v5283_v14  ;;  %v5336_v14 = vld [vmem:[%s17923_s3 + $0x630] sm:$0xff] }
 0x773   :  { %6212 = vmatmul.mubr.f32.gmra.mrb[142].mxu1 %v5282_v34  ;;  %v5340_v34 = vld [vmem:[%s17923_s3 + $0x650] sm:$0xff] }
 0x774   :  { %6216 = vmatprep.mubr.f32.mxu1 %v5286_v6 }
 0x777   :  { %6217 = vmatmul.mubr.f32.gmra.mrb[144].mxu1 %v5285_v17 }
 0x778   :  { %6221 = vmatprep.mubr.f32.mxu1 %v5289_v51  ;;  %v5339_v51 = vld [vmem:[%s17923_s3 + $0x648] sm:$0xff] }
 0x77b   :  { %6222 = vmatmul.mubr.f32.gmra.mrb[146].mxu1 %v5288_v60  ;;  %v5343_v60 = vld [vmem:[%s17923_s3 + $0x668] sm:$0xff] }
 0x77c   :  { %6226 = vmatprep.mubr.f32.mxu1 %v5292_v42 }
 0x77f   :  { %6227 = vmatmul.mubr.f32.gmra.mrb[148].mxu1 %v5291_v20 }
 0x780   :  { %6231 = vmatprep.mubr.f32.mxu1 %v5295_v31  ;;  %v5342_v31 = vld [vmem:[%s17923_s3 + $0x660] sm:$0xff] }
 0x783   :  { %6232 = vmatmul.mubr.f32.gmra.mrb[150].mxu1 %v5294_v23  ;;  %v5346_v23 = vld [vmem:[%s17923_s3 + $0x680] sm:$0xff] }
 0x784   :  { %6236 = vmatprep.mubr.f32.mxu1 %v5298_v63 }
 0x786   :  { %v15837_v59 = vpop.f32.mrb[46].mxu1 }
 0x787   :  { %v5975_v55 = vpop.f32.mrb[47].mxu1  ;;  %6237 = vmatmul.mubr.f32.gmra.mrb[152].mxu1 %v5297_v62 }
 0x788   :  { %6241 = vmatprep.mubr.f32.mxu1 %v5301_v47  ;;  %v5345_v47 = vld [vmem:[%s17923_s3 + $0x678] sm:$0xff] }
 0x789   :  { %v5349_v55 = vld [vmem:[%s17923_s3 + $0x698] sm:$0xff] }
 0x78a   :  { %v15845_v29 = vpop.f32.mrb[48].mxu1 }
 0x78b   :  { %v5980_v12 = vpop.f32.mrb[49].mxu1  ;;  %6242 = vmatmul.mubr.f32.gmra.mrb[154].mxu1 %v5300_v38 }
 0x78c   :  { %6246 = vmatprep.mubr.f32.mxu1 %v5304_v33  ;;  %v5348_v12 = vld [vmem:[%s17923_s3 + $0x690] sm:$0xff] }
 0x78e   :  { %v15853_v50 = vpop.f32.mrb[50].mxu1 }
 0x78f   :  { %v5985_v15 = vpop.f32.mrb[51].mxu1  ;;  %6247 = vmatmul.mubr.f32.gmra.mrb[156].mxu1 %v5303_v3  ;;  %v5352_v3 = vld [vmem:[%s17923_s3 + $0x6b0] sm:$0xff] }
 0x790   :  { %6251 = vmatprep.mubr.f32.mxu1 %v5307_v9 }
 0x792   :  { %v15861_v28 = vpop.f32.mrb[52].mxu1 }
 0x793   :  { %v5990_v36 = vpop.f32.mrb[53].mxu1  ;;  %6252 = vmatmul.mubr.f32.gmra.mrb[158].mxu1 %v5306_v11  ;;  %v5351_v11 = vld [vmem:[%s17923_s3 + $0x6a8] sm:$0xff] }
 0x794   :  { %6256 = vmatprep.mubr.f32.mxu1 %v5310_v52  ;;  %v5355_v52 = vld [vmem:[%s17923_s3 + $0x6c8] sm:$0xff] }
 0x796   :  { %v15869_v53 = vpop.f32.mrb[54].mxu1 }
 0x797   :  { %v5995_v56 = vpop.f32.mrb[55].mxu1  ;;  %6257 = vmatmul.mubr.f32.gmra.mrb[160].mxu1 %v5309_v25 }
 0x798   :  { %6261 = vmatprep.mubr.f32.mxu1 %v5313_v16  ;;  %v5354_v16 = vld [vmem:[%s17923_s3 + $0x6c0] sm:$0xff] }
 0x799   :  { %v5358_v56 = vld [vmem:[%s17923_s3 + $0x6e0] sm:$0xff] }
 0x79a   :  { %v15877_v13 = vpop.f32.mrb[56].mxu1 }
 0x79b   :  { %v6000_v39 = vpop.f32.mrb[57].mxu1  ;;  %6262 = vmatmul.mubr.f32.gmra.mrb[162].mxu1 %v5312_v44 }
 0x79c   :  { %6266 = vmatprep.mubr.f32.mxu1 %v5316_v2  ;;  %v5357_v39 = vld [vmem:[%s17923_s3 + $0x6d8] sm:$0xff] }
 0x79e   :  { %v15885_v40 = vpop.f32.mrb[58].mxu1 }
 0x79f   :  { %v6005_v18 = vpop.f32.mrb[59].mxu1  ;;  %6267 = vmatmul.mubr.f32.gmra.mrb[164].mxu1 %v5315_v35  ;;  %v5361_v35 = vld [vmem:[%s17923_s3 + $0x6f8] sm:$0xff] }
 0x7a0   :  { %6271 = vmatprep.mubr.f32.mxu1 %v5319_v10 }
 0x7a2   :  { %v15893_v37 = vpop.f32.mrb[60].mxu1 }
 0x7a3   :  { %v6010_v0 = vpop.f32.mrb[61].mxu1  ;;  %6272 = vmatmul.mubr.f32.gmra.mrb[166].mxu1 %v5318_v57  ;;  %v5360_v57 = vld [vmem:[%s17923_s3 + $0x6f0] sm:$0xff] }
 0x7a4   :  { %6276 = vmatprep.mubr.f32.mxu1 %v5322_v19  ;;  %v5364_v19 = vld [vmem:[%s17923_s3 + $0x710] sm:$0xff] }
 0x7a6   :  { %v15901_v48 = vpop.f32.mrb[62].mxu1 }
 0x7a7   :  { %v6015_v21 = vpop.f32.mrb[63].mxu1  ;;  %6277 = vmatmul.mubr.f32.gmra.mrb[168].mxu1 %v5321_v26 }
 0x7a8   :  { %6281 = vmatprep.mubr.f32.mxu1 %v5325_v8  ;;  %v5363_v8 = vld [vmem:[%s17923_s3 + $0x708] sm:$0xff] }
 0x7a9   :  { %v5367_v21 = vld [vmem:[%s17923_s3 + $0x728] sm:$0xff] }
 0x7aa   :  { %v15909_v1 = vpop.f32.mrb[64].mxu1 }
 0x7ab   :  { %v6020_v4 = vpop.f32.mrb[65].mxu1  ;;  %6282 = vmatmul.mubr.f32.gmra.mrb[170].mxu1 %v5324_v45 }
 0x7ac   :  { %6286 = vmatprep.mubr.f32.mxu1 %v5328_v24  ;;  %v5366_v4 = vld [vmem:[%s17923_s3 + $0x720] sm:$0xff] }
 0x7ae   :  { %v15917_v58 = vpop.f32.mrb[66].mxu1 }
 0x7af   :  { %v6025_v30 = vpop.f32.mrb[67].mxu1  ;;  %6287 = vmatmul.mubr.f32.gmra.mrb[172].mxu1 %v5327_v7  ;;  %v5370_v7 = vld [vmem:[%s17923_s3 + $0x740] sm:$0xff] }
 0x7b0   :  { %6291 = vmatprep.mubr.f32.mxu1 %v5331_v22 }
 0x7b2   :  { %v15925_v61 = vpop.f32.mrb[68].mxu1 }
 0x7b3   :  { %v6030_v27 = vpop.f32.mrb[69].mxu1  ;;  %6292 = vmatmul.mubr.f32.gmra.mrb[174].mxu1 %v5330_v5  ;;  %v5369_v5 = vld [vmem:[%s17923_s3 + $0x738] sm:$0xff] }
 0x7b4   :  { %6296 = vmatprep.mubr.f32.mxu1 %v5334_v46  ;;  %v5373_v46 = vld [vmem:[%s17923_s3 + $0x758] sm:$0xff] }
 0x7b6   :  { %v15933_v32 = vpop.f32.mrb[70].mxu1 }
 0x7b7   :  { %v6035_v49 = vpop.f32.mrb[71].mxu1  ;;  %6297 = vmatmul.mubr.f32.gmra.mrb[176].mxu1 %v5333_v54 }
 0x7b8   :  { %6301 = vmatprep.mubr.f32.mxu1 %v5337_v43  ;;  %v5372_v43 = vld [vmem:[%s17923_s3 + $0x750] sm:$0xff] }
 0x7b9   :  { %v5376_v49 = vld [vmem:[%s17923_s3 + $0x770] sm:$0xff] }
 0x7ba   :  { %v15941_v6 = vpop.f32.mrb[72].mxu1 }
 0x7bb   :  { %v6040_v17 = vpop.f32.mrb[73].mxu1  ;;  %6302 = vmatmul.mubr.f32.gmra.mrb[178].mxu1 %v5336_v14 }
 0x7bc   :  { %6306 = vmatprep.mubr.f32.mxu1 %v5340_v34  ;;  %v5375_v17 = vld [vmem:[%s17923_s3 + $0x768] sm:$0xff] }
 0x7be   :  { %v15949_v42 = vpop.f32.mrb[74].mxu1 }
 0x7bf   :  { %v6045_v20 = vpop.f32.mrb[75].mxu1  ;;  %6307 = vmatmul.mubr.f32.gmra.mrb[180].mxu1 %v5339_v51  ;;  %v5379_v51 = vld [vmem:[%s17923_s3 + $0x788] sm:$0xff] }
 0x7c0   :  { %6311 = vmatprep.mubr.f32.mxu1 %v5343_v60 }
 0x7c2   :  { %v15957_v63 = vpop.f32.mrb[76].mxu1 }
 0x7c3   :  { %v6050_v62 = vpop.f32.mrb[77].mxu1  ;;  %6312 = vmatmul.mubr.f32.gmra.mrb[182].mxu1 %v5342_v31  ;;  %v5378_v31 = vld [vmem:[%s17923_s3 + $0x780] sm:$0xff] }
 0x7c4   :  { %6316 = vmatprep.mubr.f32.mxu1 %v5346_v23  ;;  %v5382_v23 = vld [vmem:[%s17923_s3 + $0x7a0] sm:$0xff] }
 0x7c6   :  { %v15965_v38 = vpop.f32.mrb[78].mxu1 }
 0x7c7   :  { %v6055_v33 = vpop.f32.mrb[79].mxu1  ;;  %6317 = vmatmul.mubr.f32.gmra.mrb[184].mxu1 %v5345_v47 }
 0x7c8   :  { %6321 = vmatprep.mubr.f32.mxu1 %v5349_v55  ;;  %v5381_v55 = vld [vmem:[%s17923_s3 + $0x798] sm:$0xff] }
 0x7c9   :  { %v5385_v33 = vld [vmem:[%s17923_s3 + $0x7b8] sm:$0xff] }
 0x7ca   :  { %v15973_v9 = vpop.f32.mrb[80].mxu1 }
 0x7cb   :  { %v6060_v15 = vpop.f32.mrb[81].mxu1  ;;  %6322 = vmatmul.mubr.f32.gmra.mrb[186].mxu1 %v5348_v12 }
 0x7cc   :  { %6326 = vmatprep.mubr.f32.mxu1 %v5352_v3  ;;  %v5384_v15 = vld [vmem:[%s17923_s3 + $0x7b0] sm:$0xff] }
 0x7ce   :  { %v15981_v36 = vpop.f32.mrb[82].mxu1 }
 0x7cf   :  { %v6065_v25 = vpop.f32.mrb[83].mxu1  ;;  %6327 = vmatmul.mubr.f32.gmra.mrb[188].mxu1 %v5351_v11  ;;  %v5388_v11 = vld [vmem:[%s17923_s3 + $0x7d0] sm:$0xff] }
 0x7d0   :  { %6331 = vmatprep.mubr.f32.mxu1 %v5355_v52 }
 0x7d2   :  { %v15989_v44 = vpop.f32.mrb[84].mxu1 }
 0x7d3   :  { %v6070_v2 = vpop.f32.mrb[85].mxu1  ;;  %6332 = vmatmul.mubr.f32.gmra.mrb[190].mxu1 %v5354_v16  ;;  %v5387_v16 = vld [vmem:[%s17923_s3 + $0x7c8] sm:$0xff] }
 0x7d4   :  { %6336 = vmatprep.mubr.f32.mxu1 %v5358_v56  ;;  %v5391_v56 = vld [vmem:[%s17923_s3 + $0x7e8] sm:$0xff] }
 0x7d6   :  { %v15997_v10 = vpop.f32.mrb[86].mxu1 }
 0x7d7   :  { %v6075_v18 = vpop.f32.mrb[87].mxu1  ;;  %6337 = vmatmul.mubr.f32.gmra.mrb[192].mxu1 %v5357_v39 }
 0x7d8   :  { %6341 = vmatprep.mubr.f32.mxu1 %v5361_v35  ;;  %v5390_v35 = vld [vmem:[%s17923_s3 + $0x7e0] sm:$0xff] }
 0x7d9   :  { %v5394_v18 = vld [vmem:[%s17923_s3 + $0x800] sm:$0xff] }
 0x7da   :  { %v16005_v0 = vpop.f32.mrb[88].mxu1 }
 0x7db   :  { %v6080_v26 = vpop.f32.mrb[89].mxu1  ;;  %6342 = vmatmul.mubr.f32.gmra.mrb[194].mxu1 %v5360_v57 }
 0x7dc   :  { %6346 = vmatprep.mubr.f32.mxu1 %v5364_v19  ;;  %v5393_v26 = vld [vmem:[%s17923_s3 + $0x7f8] sm:$0xff] }
 0x7de   :  { %v16013_v45 = vpop.f32.mrb[90].mxu1 }
 0x7df   :  { %v6085_v24 = vpop.f32.mrb[91].mxu1  ;;  %6347 = vmatmul.mubr.f32.gmra.mrb[196].mxu1 %v5363_v8  ;;  %v5397_v8 = vld [vmem:[%s17923_s3 + $0x818] sm:$0xff] }
 0x7e0   :  { %6351 = vmatprep.mubr.f32.mxu1 %v5367_v21 }
 0x7e2   :  { %v16021_v22 = vpop.f32.mrb[92].mxu1 }
 0x7e3   :  { %v6090_v30 = vpop.f32.mrb[93].mxu1  ;;  %6352 = vmatmul.mubr.f32.gmra.mrb[198].mxu1 %v5366_v4  ;;  %v5396_v4 = vld [vmem:[%s17923_s3 + $0x810] sm:$0xff] }
 0x7e4   :  { %6356 = vmatprep.mubr.f32.mxu1 %v5370_v7  ;;  %v5400_v7 = vld [vmem:[%s17923_s3 + $0x830] sm:$0xff] }
 0x7e6   :  { %v16029_v27 = vpop.f32.mrb[94].mxu1 }
 0x7e7   :  { %v6095_v54 = vpop.f32.mrb[95].mxu1  ;;  %6357 = vmatmul.mubr.f32.gmra.mrb[200].mxu1 %v5369_v5 }
 0x7e8   :  { %6361 = vmatprep.mubr.f32.mxu1 %v5373_v46  ;;  %v5399_v46 = vld [vmem:[%s17923_s3 + $0x828] sm:$0xff] }
 0x7e9   :  { %v5403_v54 = vld [vmem:[%s17923_s3 + $0x848] sm:$0xff] }
 0x7ea   :  { %v16037_v14 = vpop.f32.mrb[96].mxu1 }
 0x7eb   :  { %v6100_v34 = vpop.f32.mrb[97].mxu1  ;;  %6362 = vmatmul.mubr.f32.gmra.mrb[202].mxu1 %v5372_v43 }
 0x7ec   :  { %6366 = vmatprep.mubr.f32.mxu1 %v5376_v49  ;;  %v5402_v34 = vld [vmem:[%s17923_s3 + $0x840] sm:$0xff] }
 0x7ee   :  { %v16045_v60 = vpop.f32.mrb[98].mxu1 }
 0x7ef   :  { %v6105_v20 = vpop.f32.mrb[99].mxu1  ;;  %6367 = vmatmul.mubr.f32.gmra.mrb[204].mxu1 %v5375_v17  ;;  %v5406_v17 = vld [vmem:[%s17923_s3 + $0x860] sm:$0xff] }
 0x7f0   :  { %6371 = vmatprep.mubr.f32.mxu1 %v5379_v51 }
 0x7f2   :  { %v16053_v62 = vpop.f32.mrb[100].mxu1 }
 0x7f3   :  { %v6110_v47 = vpop.f32.mrb[101].mxu1  ;;  %6372 = vmatmul.mubr.f32.gmra.mrb[206].mxu1 %v5378_v31  ;;  %v5405_v31 = vld [vmem:[%s17923_s3 + $0x858] sm:$0xff] }
 0x7f4   :  { %6376 = vmatprep.mubr.f32.mxu1 %v5382_v23  ;;  %v5409_v23 = vld [vmem:[%s17923_s3 + $0x878] sm:$0xff] }
 0x7f6   :  { %v16061_v12 = vpop.f32.mrb[102].mxu1 }
 0x7f7   :  { %v6115_v3 = vpop.f32.mrb[103].mxu1  ;;  %6377 = vmatmul.mubr.f32.gmra.mrb[208].mxu1 %v5381_v55 }
 0x7f8   :  { %6381 = vmatprep.mubr.f32.mxu1 %v5385_v33  ;;  %v5408_v33 = vld [vmem:[%s17923_s3 + $0x870] sm:$0xff] }
 0x7f9   :  { %v5412_v3 = vld [vmem:[%s17923_s3 + $0x890] sm:$0xff] }
 0x7fa   :  { %v16069_v52 = vpop.f32.mrb[104].mxu1 }
 0x7fb   :  { %v6120_v25 = vpop.f32.mrb[105].mxu1  ;;  %6382 = vmatmul.mubr.f32.gmra.mrb[210].mxu1 %v5384_v15 }
 0x7fc   :  { %6386 = vmatprep.mubr.f32.mxu1 %v5388_v11  ;;  %v5411_v25 = vld [vmem:[%s17923_s3 + $0x888] sm:$0xff] }
 0x7fe   :  { %v16077_v2 = vpop.f32.mrb[106].mxu1 }
 0x7ff   :  { %v6125_v39 = vpop.f32.mrb[107].mxu1  ;;  %6387 = vmatmul.mubr.f32.gmra.mrb[212].mxu1 %v5387_v16  ;;  %v5415_v16 = vld [vmem:[%s17923_s3 + $0x8a8] sm:$0xff] }
 0x800   :  { %6391 = vmatprep.mubr.f32.mxu1 %v5391_v56 }
 0x802   :  { %v16085_v57 = vpop.f32.mrb[108].mxu1 }
 0x803   :  { %v6130_v19 = vpop.f32.mrb[109].mxu1  ;;  %6392 = vmatmul.mubr.f32.gmra.mrb[214].mxu1 %v5390_v35  ;;  %v5414_v35 = vld [vmem:[%s17923_s3 + $0x8a0] sm:$0xff] }
 0x804   :  { %6396 = vmatprep.mubr.f32.mxu1 %v5394_v18  ;;  %v5418_v18 = vld [vmem:[%s17923_s3 + $0x8c0] sm:$0xff] }
 0x806   :  { %v16093_v21 = vpop.f32.mrb[110].mxu1 }
 0x807   :  { %v6135_v24 = vpop.f32.mrb[111].mxu1  ;;  %6397 = vmatmul.mubr.f32.gmra.mrb[216].mxu1 %v5393_v26 }
 0x808   :  { %6401 = vmatprep.mubr.f32.mxu1 %v5397_v8  ;;  %v5417_v8 = vld [vmem:[%s17923_s3 + $0x8b8] sm:$0xff] }
 0x809   :  { %v5421_v24 = vld [vmem:[%s17923_s3 + $0x8d8] sm:$0xff] }
 0x80a   :  { %v16101_v30 = vpop.f32.mrb[112].mxu1 }
 0x80b   :  { %v6140_v5 = vpop.f32.mrb[113].mxu1  ;;  %6402 = vmatmul.mubr.f32.gmra.mrb[218].mxu1 %v5396_v4 }
 0x80c   :  { %6406 = vmatprep.mubr.f32.mxu1 %v5400_v7  ;;  %v5420_v5 = vld [vmem:[%s17923_s3 + $0x8d0] sm:$0xff] }
 0x80e   :  { %v16109_v43 = vpop.f32.mrb[114].mxu1 }
 0x80f   :  { %v6145_v49 = vpop.f32.mrb[115].mxu1  ;;  %6407 = vmatmul.mubr.f32.gmra.mrb[220].mxu1 %v5399_v46  ;;  %v5424_v46 = vld [vmem:[%s17923_s3 + $0x8f0] sm:$0xff] }
 0x810   :  { %6411 = vmatprep.mubr.f32.mxu1 %v5403_v54 }
 0x812   :  { %v16117_v51 = vpop.f32.mrb[116].mxu1 }
 0x813   :  { %v6150_v20 = vpop.f32.mrb[117].mxu1  ;;  %6412 = vmatmul.mubr.f32.gmra.mrb[222].mxu1 %v5402_v34  ;;  %v5423_v34 = vld [vmem:[%s17923_s3 + $0x8e8] sm:$0xff] }
 0x814   :  { %6416 = vmatprep.mubr.f32.mxu1 %v5406_v17  ;;  %v5427_v17 = vld [vmem:[%s17923_s3 + $0x908] sm:$0xff] }
 0x816   :  { %v16125_v47 = vpop.f32.mrb[118].mxu1 }
 0x817   :  { %v6155_v55 = vpop.f32.mrb[119].mxu1  ;;  %6417 = vmatmul.mubr.f32.gmra.mrb[224].mxu1 %v5405_v31 }
 0x818   :  { %6421 = vmatprep.mubr.f32.mxu1 %v5409_v23  ;;  %v5426_v23 = vld [vmem:[%s17923_s3 + $0x900] sm:$0xff] }
 0x819   :  { %v5430_v55 = vld [vmem:[%s17923_s3 + $0x920] sm:$0xff] }
 0x81a   :  { %v16133_v15 = vpop.f32.mrb[120].mxu1 }
 0x81b   :  { %v6160_v11 = vpop.f32.mrb[121].mxu1  ;;  %6422 = vmatmul.mubr.f32.gmra.mrb[226].mxu1 %v5408_v33 }
 0x81c   :  { %6426 = vmatprep.mubr.f32.mxu1 %v5412_v3  ;;  %v5429_v11 = vld [vmem:[%s17923_s3 + $0x918] sm:$0xff] }
 0x81e   :  { %v16141_v56 = vpop.f32.mrb[122].mxu1 }
 0x81f   :  { %v6165_v39 = vpop.f32.mrb[123].mxu1  ;;  %6427 = vmatmul.mubr.f32.gmra.mrb[228].mxu1 %v5411_v25  ;;  %v5433_v25 = vld [vmem:[%s17923_s3 + $0x938] sm:$0xff] }
 0x820   :  { %6431 = vmatprep.mubr.f32.mxu1 %v5415_v16 }
 0x822   :  { %v16149_v19 = vpop.f32.mrb[124].mxu1 }
 0x823   :  { %v6170_v26 = vpop.f32.mrb[125].mxu1  ;;  %6432 = vmatmul.mubr.f32.gmra.mrb[230].mxu1 %v5414_v35  ;;  %v5432_v35 = vld [vmem:[%s17923_s3 + $0x930] sm:$0xff] }
 0x824   :  { %6436 = vmatprep.mubr.f32.mxu1 %v5418_v18  ;;  %v5436_v18 = vld [vmem:[%s17923_s3 + $0x950] sm:$0xff] }
 0x826   :  { %v16157_v4 = vpop.f32.mrb[126].mxu1 }
 0x827   :  { %v6175_v7 = vpop.f32.mrb[127].mxu1  ;;  %6437 = vmatmul.mubr.f32.gmra.mrb[232].mxu1 %v5417_v8 }
 0x828   :  { %6441 = vmatprep.mubr.f32.mxu1 %v5421_v24  ;;  %v5435_v24 = vld [vmem:[%s17923_s3 + $0x948] sm:$0xff] }
 0x829   :  { %v5439_v7 = vld [vmem:[%s17923_s3 + $0x968] sm:$0xff] }
 0x82a   :  { %v16165_v54 = vpop.f32.mrb[128].mxu1 }
 0x82b   :  { %v6180_v49 = vpop.f32.mrb[129].mxu1  ;;  %6442 = vmatmul.mubr.f32.gmra.mrb[234].mxu1 %v5420_v5 }
 0x82c   :  { %6446 = vmatprep.mubr.f32.mxu1 %v5424_v46  ;;  %v5438_v49 = vld [vmem:[%s17923_s3 + $0x960] sm:$0xff] }
 0x82e   :  { %v16173_v20 = vpop.f32.mrb[130].mxu1 }
 0x82f   :  { %v6185_v31 = vpop.f32.mrb[131].mxu1  ;;  %6447 = vmatmul.mubr.f32.gmra.mrb[236].mxu1 %v5423_v34  ;;  %v5442_v34 = vld [vmem:[%s17923_s3 + $0x980] sm:$0xff] }
 0x830   :  { %6451 = vmatprep.mubr.f32.mxu1 %v5427_v17 }
 0x832   :  { %v16181_v33 = vpop.f32.mrb[132].mxu1 }
 0x833   :  { %v6190_v3 = vpop.f32.mrb[133].mxu1  ;;  %6452 = vmatmul.mubr.f32.gmra.mrb[238].mxu1 %v5426_v23  ;;  %v5441_v23 = vld [vmem:[%s17923_s3 + $0x978] sm:$0xff] }
 0x834   :  { %6456 = vmatprep.mubr.f32.mxu1 %v5430_v55  ;;  %v5445_v55 = vld [vmem:[%s17923_s3 + $0x998] sm:$0xff] }
 0x836   :  { %v16189_v16 = vpop.f32.mrb[134].mxu1 }
 0x837   :  { %v6195_v39 = vpop.f32.mrb[135].mxu1  ;;  %6457 = vmatmul.mubr.f32.gmra.mrb[240].mxu1 %v5429_v11 }
 0x838   :  { %6461 = vmatprep.mubr.f32.mxu1 %v5433_v25  ;;  %v5444_v25 = vld [vmem:[%s17923_s3 + $0x990] sm:$0xff] }
 0x839   :  { %v5448_v39 = vld [vmem:[%s17923_s3 + $0x9b0] sm:$0xff] }
 0x83a   :  { %v16197_v26 = vpop.f32.mrb[136].mxu1 }
 0x83b   :  { %v6200_v8 = vpop.f32.mrb[137].mxu1  ;;  %6462 = vmatmul.mubr.f32.gmra.mrb[242].mxu1 %v5432_v35 }
 0x83c   :  { %6466 = vmatprep.mubr.f32.mxu1 %v5436_v18  ;;  %v5447_v8 = vld [vmem:[%s17923_s3 + $0x9a8] sm:$0xff] }
 0x83e   :  { %v16205_v5 = vpop.f32.mrb[138].mxu1 }
 0x83f   :  { %v6205_v46 = vpop.f32.mrb[139].mxu1  ;;  %6467 = vmatmul.mubr.f32.gmra.mrb[244].mxu1 %v5435_v24  ;;  %v5451_v24 = vld [vmem:[%s17923_s3 + $0x9c8] sm:$0xff] }
 0x840   :  { %6471 = vmatprep.mubr.f32.mxu1 %v5439_v7 }
 0x842   :  { %v16213_v17 = vpop.f32.mrb[140].mxu1 }
 0x843   :  { %v6210_v31 = vpop.f32.mrb[141].mxu1  ;;  %6472 = vmatmul.mubr.f32.gmra.mrb[246].mxu1 %v5438_v49  ;;  %v5450_v49 = vld [vmem:[%s17923_s3 + $0x9c0] sm:$0xff] }
 0x844   :  { %6476 = vmatprep.mubr.f32.mxu1 %v5442_v34  ;;  %v5454_v34 = vld [vmem:[%s17923_s3 + $0x9e0] sm:$0xff] }
 0x846   :  { %v16221_v3 = vpop.f32.mrb[142].mxu1 }
 0x847   :  { %v6215_v11 = vpop.f32.mrb[143].mxu1  ;;  %6477 = vmatmul.mubr.f32.gmra.mrb[248].mxu1 %v5441_v23 }
 0x848   :  { %6481 = vmatprep.mubr.f32.mxu1 %v5445_v55  ;;  %v5453_v55 = vld [vmem:[%s17923_s3 + $0x9d8] sm:$0xff] }
 0x849   :  { %v5457_v11 = vld [vmem:[%s17923_s3 + $0x9f8] sm:$0xff] }
 0x84a   :  { %v16229_v35 = vpop.f32.mrb[144].mxu1 }
 0x84b   :  { %v6220_v18 = vpop.f32.mrb[145].mxu1  ;;  %6482 = vmatmul.mubr.f32.gmra.mrb[250].mxu1 %v5444_v25 }
 0x84c   :  { %6486 = vmatprep.mubr.f32.mxu1 %v5448_v39  ;;  %v5456_v18 = vld [vmem:[%s17923_s3 + $0x9f0] sm:$0xff] }
 0x84e   :  { %v16237_v7 = vpop.f32.mrb[146].mxu1 }
 0x84f   :  { %v6225_v46 = vpop.f32.mrb[147].mxu1  ;;  %6487 = vmatmul.mubr.f32.gmra.mrb[252].mxu1 %v5447_v8  ;;  %v5460_v8 = vld [vmem:[%s17923_s3 + $0xa10] sm:$0xff] }
 0x850   :  { %6491 = vmatprep.mubr.f32.mxu1 %v5451_v24 }
 0x852   :  { %v16245_v31 = vpop.f32.mrb[148].mxu1 }
 0x853   :  { %v6230_v23 = vpop.f32.mrb[149].mxu1  ;;  %6492 = vmatmul.mubr.f32.gmra.mrb[254].mxu1 %v5450_v49  ;;  %v5459_v49 = vld [vmem:[%s17923_s3 + $0xa08] sm:$0xff] }
 0x854   :  { %6496 = vmatprep.mubr.f32.mxu1 %v5454_v34  ;;  %v5463_v34 = vld [vmem:[%s17923_s3 + $0xa28] sm:$0xff] }
 0x856   :  { %v16253_v25 = vpop.f32.mrb[150].mxu1 }
 0x857   :  { %18441 = vst [vmem:[#allocation48_spill] sm:$0xff] %v16253_v25  ;;  %v6235_v39 = vpop.f32.mrb[151].mxu1  ;;  %6497 = vmatmul.mubr.f32.gmra.mrb[0].mxu1 %v5453_v55 }
 0x858   :  { %6501 = vmatprep.mubr.f32.mxu1 %v5457_v11  ;;  %v5462_v11 = vld [vmem:[%s17923_s3 + $0xa20] sm:$0xff] }
 0x859   :  { %v5466_v39 = vld [vmem:[%s17923_s3 + $0xa40] sm:$0xff] }
 0x85a   :  { %v16261_v24 = vpop.f32.mrb[152].mxu1 }
 0x85b   :  { %v6240_v46 = vpop.f32.mrb[153].mxu1  ;;  %6502 = vmatmul.mubr.f32.gmra.mrb[2].mxu1 %v5456_v18 }
 0x85c   :  { %6506 = vmatprep.mubr.f32.mxu1 %v5460_v8  ;;  %v5465_v46 = vld [vmem:[%s17923_s3 + $0xa38] sm:$0xff] }
 0x85e   :  { %v16269_v23 = vpop.f32.mrb[154].mxu1 }
 0x85f   :  { %18442 = vst [vmem:[#allocation49_spill] sm:$0xff] %v16269_v23  ;;  %v6245_v55 = vpop.f32.mrb[155].mxu1  ;;  %6507 = vmatmul.mubr.f32.gmra.mrb[4].mxu1 %v5459_v49  ;;  %v5469_v49 = vld [vmem:[%s17923_s3 + $0xa58] sm:$0xff] }
 0x860   :  { %6511 = vmatprep.mubr.f32.mxu1 %v5463_v34 }
 0x862   :  { %v16277_v18 = vpop.f32.mrb[156].mxu1 }
 0x863   :  { %18443 = vst [vmem:[#allocation50_spill] sm:$0xff] %v16277_v18  ;;  %v6250_v8 = vpop.f32.mrb[157].mxu1  ;;  %6512 = vmatmul.mubr.f32.gmra.mrb[6].mxu1 %v5462_v11  ;;  %v5472_v11 = vld [vmem:[%s17923_s3 + $0xa70] sm:$0xff] }
 0x864   :  { %6516 = vmatprep.mubr.f32.mxu1 %v5466_v39 }
 0x866   :  { %v16285_v34 = vpop.f32.mrb[158].mxu1 }
 0x867   :  { %18444 = vst [vmem:[#allocation51_spill] sm:$0xff] %v16285_v34  ;;  %v6255_v55 = vpop.f32.mrb[159].mxu1  ;;  %6517 = vmatmul.mubr.f32.gmra.mrb[8].mxu1 %v5465_v46  ;;  %v5471_v34 = vld [vmem:[%s17923_s3 + $0xa68] sm:$0xff] }
 0x868   :  { %6521 = vmatprep.mubr.f32.mxu1 %v5469_v49  ;;  %v5475_v46 = vld [vmem:[%s17923_s3 + $0xa88] sm:$0xff] }
 0x86a   :  { %v16293_v39 = vpop.f32.mrb[160].mxu1 }
 0x86b   :  { %18445 = vst [vmem:[#allocation52_spill] sm:$0xff] %v16293_v39  ;;  %v6260_v8 = vpop.f32.mrb[161].mxu1  ;;  %6522 = vmatmul.mubr.f32.gmra.mrb[10].mxu1 %v5468_v41  ;;  %v5474_v39 = vld [vmem:[%s17923_s3 + $0xa80] sm:$0xff] }
 0x86c   :  { %6526 = vmatprep.mubr.f32.mxu1 %v5472_v11  ;;  %v5478_v41 = vld [vmem:[%s17923_s3 + $0xaa0] sm:$0xff] }
 0x86e   :  { %v16301_v49 = vpop.f32.mrb[162].mxu1 }
 0x86f   :  { %18446 = vst [vmem:[#allocation115_spill] sm:$0xff] %v16301_v49  ;;  %v6265_v55 = vpop.f32.mrb[163].mxu1  ;;  %6527 = vmatmul.mubr.f32.gmra.mrb[12].mxu1 %v5471_v34  ;;  %v5477_v49 = vld [vmem:[%s17923_s3 + $0xa98] sm:$0xff] }
 0x870   :  { %6531 = vmatprep.mubr.f32.mxu1 %v5475_v46  ;;  %v5481_v34 = vld [vmem:[%s17923_s3 + $0xab8] sm:$0xff] }
 0x872   :  { %v16309_v11 = vpop.f32.mrb[164].mxu1 }
 0x873   :  { %18447 = vst [vmem:[#allocation53_spill] sm:$0xff] %v16309_v11  ;;  %v6270_v8 = vpop.f32.mrb[165].mxu1  ;;  %6532 = vmatmul.mubr.f32.gmra.mrb[14].mxu1 %v5474_v39  ;;  %v5480_v11 = vld [vmem:[%s17923_s3 + $0xab0] sm:$0xff] }
 0x874   :  { %6536 = vmatprep.mubr.f32.mxu1 %v5478_v41  ;;  %v5484_v39 = vld [vmem:[%s17923_s3 + $0xad0] sm:$0xff] }
 0x876   :  { %v16317_v46 = vpop.f32.mrb[166].mxu1 }
 0x877   :  { %18448 = vst [vmem:[#allocation116_spill] sm:$0xff] %v16317_v46  ;;  %v6275_v55 = vpop.f32.mrb[167].mxu1  ;;  %6537 = vmatmul.mubr.f32.gmra.mrb[16].mxu1 %v5477_v49  ;;  %v5483_v46 = vld [vmem:[%s17923_s3 + $0xac8] sm:$0xff] }
 0x878   :  { %6541 = vmatprep.mubr.f32.mxu1 %v5481_v34  ;;  %v5487_v49 = vld [vmem:[%s17923_s3 + $0xae8] sm:$0xff] }
 0x87a   :  { %v16325_v41 = vpop.f32.mrb[168].mxu1 }
 0x87b   :  { %18449 = vst [vmem:[#allocation54_spill] sm:$0xff] %v16325_v41  ;;  %v6280_v8 = vpop.f32.mrb[169].mxu1  ;;  %6542 = vmatmul.mubr.f32.gmra.mrb[18].mxu1 %v5480_v11  ;;  %v5486_v41 = vld [vmem:[%s17923_s3 + $0xae0] sm:$0xff] }
 0x87c   :  { %6546 = vmatprep.mubr.f32.mxu1 %v5484_v39  ;;  %v5490_v11 = vld [vmem:[%s17923_s3 + $0xb00] sm:$0xff] }
 0x87e   :  { %v16333_v34 = vpop.f32.mrb[170].mxu1 }
 0x87f   :  { %18450 = vst [vmem:[#allocation117_spill] sm:$0xff] %v16333_v34  ;;  %v6285_v55 = vpop.f32.mrb[171].mxu1  ;;  %6547 = vmatmul.mubr.f32.gmra.mrb[20].mxu1 %v5483_v46  ;;  %v5489_v34 = vld [vmem:[%s17923_s3 + $0xaf8] sm:$0xff] }
 0x880   :  { %6551 = vmatprep.mubr.f32.mxu1 %v5487_v49  ;;  %v5493_v46 = vld [vmem:[%s17923_s3 + $0xb18] sm:$0xff] }
 0x882   :  { %v16341_v39 = vpop.f32.mrb[172].mxu1 }
 0x883   :  { %18451 = vst [vmem:[#allocation55_spill] sm:$0xff] %v16341_v39  ;;  %v6290_v8 = vpop.f32.mrb[173].mxu1  ;;  %6552 = vmatmul.mubr.f32.gmra.mrb[22].mxu1 %v5486_v41  ;;  %v5492_v39 = vld [vmem:[%s17923_s3 + $0xb10] sm:$0xff] }
 0x884   :  { %6556 = vmatprep.mubr.f32.mxu1 %v5490_v11  ;;  %v5496_v41 = vld [vmem:[%s17923_s3 + $0xb30] sm:$0xff] }
 0x886   :  { %v16349_v49 = vpop.f32.mrb[174].mxu1 }
 0x887   :  { %18452 = vst [vmem:[#allocation118_spill] sm:$0xff] %v16349_v49  ;;  %v6295_v55 = vpop.f32.mrb[175].mxu1  ;;  %6557 = vmatmul.mubr.f32.gmra.mrb[24].mxu1 %v5489_v34  ;;  %v5495_v49 = vld [vmem:[%s17923_s3 + $0xb28] sm:$0xff] }
 0x888   :  { %6561 = vmatprep.mubr.f32.mxu1 %v5493_v46  ;;  %v5499_v34 = vld [vmem:[%s17923_s3 + $0xb48] sm:$0xff] }
 0x88a   :  { %v16357_v11 = vpop.f32.mrb[176].mxu1 }
 0x88b   :  { %18453 = vst [vmem:[#allocation56_spill] sm:$0xff] %v16357_v11  ;;  %v6300_v8 = vpop.f32.mrb[177].mxu1  ;;  %6562 = vmatmul.mubr.f32.gmra.mrb[26].mxu1 %v5492_v39  ;;  %v5498_v11 = vld [vmem:[%s17923_s3 + $0xb40] sm:$0xff] }
 0x88c   :  { %6566 = vmatprep.mubr.f32.mxu1 %v5496_v41  ;;  %v5502_v39 = vld [vmem:[%s17923_s3 + $0xb60] sm:$0xff] }
 0x88e   :  { %v16365_v46 = vpop.f32.mrb[178].mxu1 }
 0x88f   :  { %18454 = vst [vmem:[#allocation119_spill] sm:$0xff] %v16365_v46  ;;  %v6305_v55 = vpop.f32.mrb[179].mxu1  ;;  %6567 = vmatmul.mubr.f32.gmra.mrb[28].mxu1 %v5495_v49  ;;  %v5501_v46 = vld [vmem:[%s17923_s3 + $0xb58] sm:$0xff] }
 0x890   :  { %6571 = vmatprep.mubr.f32.mxu1 %v5499_v34  ;;  %v5505_v49 = vld [vmem:[%s17923_s3 + $0xb78] sm:$0xff] }
 0x892   :  { %v16373_v41 = vpop.f32.mrb[180].mxu1 }
 0x893   :  { %18455 = vst [vmem:[#allocation57_spill] sm:$0xff] %v16373_v41  ;;  %v6310_v8 = vpop.f32.mrb[181].mxu1  ;;  %6572 = vmatmul.mubr.f32.gmra.mrb[30].mxu1 %v5498_v11  ;;  %v5504_v41 = vld [vmem:[%s17923_s3 + $0xb70] sm:$0xff] }
 0x894   :  { %6576 = vmatprep.mubr.f32.mxu1 %v5502_v39  ;;  %v5508_v11 = vld [vmem:[%s17923_s3 + $0xb90] sm:$0xff] }
 0x896   :  { %v16381_v34 = vpop.f32.mrb[182].mxu1 }
 0x897   :  { %18456 = vst [vmem:[#allocation120_spill] sm:$0xff] %v16381_v34  ;;  %v6315_v55 = vpop.f32.mrb[183].mxu1  ;;  %6577 = vmatmul.mubr.f32.gmra.mrb[32].mxu1 %v5501_v46  ;;  %v5507_v34 = vld [vmem:[%s17923_s3 + $0xb88] sm:$0xff] }
 0x898   :  { %6581 = vmatprep.mubr.f32.mxu1 %v5505_v49  ;;  %v5511_v46 = vld [vmem:[%s17923_s3 + $0xba8] sm:$0xff] }
 0x89a   :  { %v16389_v39 = vpop.f32.mrb[184].mxu1 }
 0x89b   :  { %18457 = vst [vmem:[#allocation58_spill] sm:$0xff] %v16389_v39  ;;  %v6320_v8 = vpop.f32.mrb[185].mxu1  ;;  %6582 = vmatmul.mubr.f32.gmra.mrb[34].mxu1 %v5504_v41  ;;  %v5510_v39 = vld [vmem:[%s17923_s3 + $0xba0] sm:$0xff] }
 0x89c   :  { %6586 = vmatprep.mubr.f32.mxu1 %v5508_v11  ;;  %v5514_v41 = vld [vmem:[%s17923_s3 + $0xbc0] sm:$0xff] }
 0x89e   :  { %v16397_v49 = vpop.f32.mrb[186].mxu1 }
 0x89f   :  { %18458 = vst [vmem:[#allocation121_spill] sm:$0xff] %v16397_v49  ;;  %v6325_v55 = vpop.f32.mrb[187].mxu1  ;;  %6587 = vmatmul.mubr.f32.gmra.mrb[36].mxu1 %v5507_v34  ;;  %v5513_v49 = vld [vmem:[%s17923_s3 + $0xbb8] sm:$0xff] }
 0x8a0   :  { %6591 = vmatprep.mubr.f32.mxu1 %v5511_v46  ;;  %v5517_v34 = vld [vmem:[%s17923_s3 + $0xbd8] sm:$0xff] }
 0x8a2   :  { %v16405_v11 = vpop.f32.mrb[188].mxu1 }
 0x8a3   :  { %18459 = vst [vmem:[#allocation59_spill] sm:$0xff] %v16405_v11  ;;  %v6330_v8 = vpop.f32.mrb[189].mxu1  ;;  %6592 = vmatmul.mubr.f32.gmra.mrb[38].mxu1 %v5510_v39  ;;  %v5516_v11 = vld [vmem:[%s17923_s3 + $0xbd0] sm:$0xff] }
 0x8a4   :  { %6596 = vmatprep.mubr.f32.mxu1 %v5514_v41  ;;  %v5520_v39 = vld [vmem:[%s17923_s3 + $0xbf0] sm:$0xff] }
 0x8a6   :  { %v16413_v46 = vpop.f32.mrb[190].mxu1 }
 0x8a7   :  { %18460 = vst [vmem:[#allocation122_spill] sm:$0xff] %v16413_v46  ;;  %v6335_v55 = vpop.f32.mrb[191].mxu1  ;;  %6597 = vmatmul.mubr.f32.gmra.mrb[40].mxu1 %v5513_v49  ;;  %v5519_v46 = vld [vmem:[%s17923_s3 + $0xbe8] sm:$0xff]  ;;  %v5140_v49 = vld [vmem:[%s17923_s3 + $0x10] sm:$0xff] }
 0x8a8   :  { %6601 = vmatprep.mubr.f32.mxu1 %v5517_v34 }
 0x8aa   :  { %v16421_v41 = vpop.f32.mrb[192].mxu1 }
 0x8ab   :  { %18461 = vst [vmem:[#allocation60_spill] sm:$0xff] %v16421_v41  ;;  %v6340_v8 = vpop.f32.mrb[193].mxu1  ;;  %6602 = vmatmul.mubr.f32.gmra.mrb[42].mxu1 %v5516_v11  ;;  %v5143_v11 = vld [vmem:[%s17923_s3 + $0x28] sm:$0xff] }
 0x8ac   :  { %6606 = vmatprep.mubr.f32.mxu1 %v5520_v39  ;;  %v5146_v39 = vld [vmem:[%s17923_s3 + $0x40] sm:$0xff] }
 0x8ae   :  { %v16429_v34 = vpop.f32.mrb[194].mxu1 }
 0x8af   :  { %18462 = vst [vmem:[#allocation123_spill] sm:$0xff] %v16429_v34  ;;  %v6345_v55 = vpop.f32.mrb[195].mxu1  ;;  %6607 = vmatmul.mubr.f32.gmra.mrb[44].mxu1 %v5519_v46  ;;  %v5149_v46 = vld [vmem:[%s17923_s3 + $0x58] sm:$0xff] }
 0x8b0   :  { %9480 = vmatprep.mubr.msk.f32.mxu1 %vm5522_vm1, %v5140_v49  ;;  %v5152_v49 = vld [vmem:[%s17923_s3 + $0x70] sm:$0xff] }
 0x8b2   :  { %v16438_v8 = vpop.f32.mrb[196].mxu1 }
 0x8b3   :  { %18463 = vst [vmem:[#allocation15_spill] sm:$0xff] %v16438_v8  ;;  %v6350_v41 = vpop.f32.mrb[197].mxu1  ;;  %9481 = vmatmul.mubr.msk.f32.vlgmr.msra.gmra.mrb[46].mxu1 %vm5522_vm1, %v5143_v11  ;;  %v5158_v11 = vld [vmem:[%s17923_s3 + $0xa0] sm:$0xff] }
 0x8b4   :  { %9483 = vmatprep.mubr.msk.f32.mxu1 %vm5522_vm1, %v5146_v39  ;;  %v5155_v41 = vld [vmem:[%s17923_s3 + $0x88] sm:$0xff] }
 0x8b6   :  { %v16448_v55 = vpop.f32.mrb[198].mxu1 }
 0x8b7   :  { %18464 = vst [vmem:[#allocation61_spill] sm:$0xff] %v16448_v55  ;;  %v6355_v34 = vpop.f32.mrb[199].mxu1  ;;  %9484 = vmatmul.mubr.msk.f32.gmra.mrb[48].mxu1 %vm5522_vm1, %v5149_v46  ;;  %v5164_v46 = vld [vmem:[%s17923_s3 + $0xd0] sm:$0xff] }
 0x8b8   :  { %9486 = vmatprep.mubr.msk.f32.mxu1 %vm5522_vm1, %v5152_v49  ;;  %v5161_v34 = vld [vmem:[%s17923_s3 + $0xb8] sm:$0xff] }
 0x8ba   :  { %v16458_v39 = vpop.f32.mrb[200].mxu1 }
 0x8bb   :  { %18465 = vst [vmem:[#allocation87_spill] sm:$0xff] %v16458_v39  ;;  %v6360_v8 = vpop.f32.mrb[201].mxu1  ;;  %9487 = vmatmul.mubr.msk.f32.gmra.mrb[50].mxu1 %vm5522_vm1, %v5155_v41  ;;  %v5170_v41 = vld [vmem:[%s17923_s3 + $0x100] sm:$0xff] }
 0x8bc   :  { %9489 = vmatprep.mubr.msk.f32.mxu1 %vm5522_vm1, %v5158_v11  ;;  %v5167_v8 = vld [vmem:[%s17923_s3 + $0xe8] sm:$0xff] }
 0x8be   :  { %v16468_v49 = vpop.f32.mrb[202].mxu1 }
 0x8bf   :  { %18466 = vst [vmem:[#allocation124_spill] sm:$0xff] %v16468_v49  ;;  %v6365_v55 = vpop.f32.mrb[203].mxu1  ;;  %9490 = vmatmul.mubr.msk.f32.gmra.mrb[52].mxu1 %vm5522_vm1, %v5161_v34  ;;  %v5176_v34 = vld [vmem:[%s17923_s3 + $0x130] sm:$0xff] }
 0x8c0   :  { %9492 = vmatprep.mubr.msk.f32.mxu1 %vm5522_vm1, %v5164_v46  ;;  %v5173_v55 = vld [vmem:[%s17923_s3 + $0x118] sm:$0xff] }
 0x8c2   :  { %v16478_v11 = vpop.f32.mrb[204].mxu1 }
 0x8c3   :  { %18467 = vst [vmem:[#allocation16_spill] sm:$0xff] %v16478_v11  ;;  %v6370_v39 = vpop.f32.mrb[205].mxu1  ;;  %9493 = vmatmul.mubr.msk.f32.gmra.mrb[54].mxu1 %vm5522_vm1, %v5167_v8  ;;  %v5182_v8 = vld [vmem:[%s17923_s3 + $0x160] sm:$0xff] }
 0x8c4   :  { %9495 = vmatprep.mubr.msk.f32.mxu1 %vm5522_vm1, %v5170_v41  ;;  %v5179_v39 = vld [vmem:[%s17923_s3 + $0x148] sm:$0xff] }
 0x8c6   :  { %v16488_v46 = vpop.f32.mrb[206].mxu1 }
 0x8c7   :  { %18468 = vst [vmem:[#allocation62_spill] sm:$0xff] %v16488_v46  ;;  %v6375_v49 = vpop.f32.mrb[207].mxu1  ;;  %9496 = vmatmul.mubr.msk.f32.gmra.mrb[56].mxu1 %vm5522_vm1, %v5173_v55  ;;  %v5188_v55 = vld [vmem:[%s17923_s3 + $0x190] sm:$0xff] }
 0x8c8   :  { %9498 = vmatprep.mubr.msk.f32.mxu1 %vm5522_vm1, %v5176_v34  ;;  %v5185_v49 = vld [vmem:[%s17923_s3 + $0x178] sm:$0xff] }
 0x8ca   :  { %v16498_v41 = vpop.f32.mrb[208].mxu1 }
 0x8cb   :  { %18469 = vst [vmem:[#allocation88_spill] sm:$0xff] %v16498_v41  ;;  %v6380_v11 = vpop.f32.mrb[209].mxu1  ;;  %9499 = vmatmul.mubr.msk.f32.gmra.mrb[58].mxu1 %vm5522_vm1, %v5179_v39  ;;  %v5194_v39 = vld [vmem:[%s17923_s3 + $0x1c0] sm:$0xff] }
 0x8cc   :  { %9501 = vmatprep.mubr.msk.f32.mxu1 %vm5522_vm1, %v5182_v8  ;;  %v5191_v11 = vld [vmem:[%s17923_s3 + $0x1a8] sm:$0xff] }
 0x8ce   :  { %v16508_v34 = vpop.f32.mrb[210].mxu1 }
 0x8cf   :  { %18470 = vst [vmem:[#allocation125_spill] sm:$0xff] %v16508_v34  ;;  %v6385_v46 = vpop.f32.mrb[211].mxu1  ;;  %9502 = vmatmul.mubr.msk.f32.gmra.mrb[60].mxu1 %vm5522_vm1, %v5185_v49  ;;  %v5200_v49 = vld [vmem:[%s17923_s3 + $0x1f0] sm:$0xff] }
 0x8d0   :  { %9504 = vmatprep.mubr.msk.f32.mxu1 %vm5522_vm1, %v5188_v55  ;;  %v5197_v46 = vld [vmem:[%s17923_s3 + $0x1d8] sm:$0xff] }
 0x8d2   :  { %v16518_v8 = vpop.f32.mrb[212].mxu1 }
 0x8d3   :  { %18471 = vst [vmem:[#allocation17_spill] sm:$0xff] %v16518_v8  ;;  %v6390_v41 = vpop.f32.mrb[213].mxu1  ;;  %9505 = vmatmul.mubr.msk.f32.gmra.mrb[62].mxu1 %vm5522_vm1, %v5191_v11  ;;  %v5206_v11 = vld [vmem:[%s17923_s3 + $0x220] sm:$0xff] }
 0x8d4   :  { %9507 = vmatprep.mubr.msk.f32.mxu1 %vm5522_vm1, %v5194_v39  ;;  %v5203_v41 = vld [vmem:[%s17923_s3 + $0x208] sm:$0xff] }
 0x8d6   :  { %v16528_v55 = vpop.f32.mrb[214].mxu1 }
 0x8d7   :  { %18472 = vst [vmem:[#allocation63_spill] sm:$0xff] %v16528_v55  ;;  %v6395_v34 = vpop.f32.mrb[215].mxu1  ;;  %9508 = vmatmul.mubr.msk.f32.gmra.mrb[64].mxu1 %vm5522_vm1, %v5197_v46  ;;  %v5212_v46 = vld [vmem:[%s17923_s3 + $0x250] sm:$0xff] }
 0x8d8   :  { %9510 = vmatprep.mubr.msk.f32.mxu1 %vm5522_vm1, %v5200_v49  ;;  %v5209_v34 = vld [vmem:[%s17923_s3 + $0x238] sm:$0xff] }
 0x8da   :  { %v16538_v39 = vpop.f32.mrb[216].mxu1 }
 0x8db   :  { %18473 = vst [vmem:[#allocation89_spill] sm:$0xff] %v16538_v39  ;;  %v6400_v8 = vpop.f32.mrb[217].mxu1  ;;  %9511 = vmatmul.mubr.msk.f32.gmra.mrb[66].mxu1 %vm5522_vm1, %v5203_v41  ;;  %v5218_v41 = vld [vmem:[%s17923_s3 + $0x280] sm:$0xff] }
 0x8dc   :  { %9513 = vmatprep.mubr.msk.f32.mxu1 %vm5522_vm1, %v5206_v11  ;;  %v5215_v8 = vld [vmem:[%s17923_s3 + $0x268] sm:$0xff] }
 0x8de   :  { %v16548_v49 = vpop.f32.mrb[218].mxu1 }
 0x8df   :  { %18474 = vst [vmem:[#allocation126_spill] sm:$0xff] %v16548_v49  ;;  %v6405_v55 = vpop.f32.mrb[219].mxu1  ;;  %9514 = vmatmul.mubr.msk.f32.gmra.mrb[68].mxu1 %vm5522_vm1, %v5209_v34  ;;  %v5224_v34 = vld [vmem:[%s17923_s3 + $0x2b0] sm:$0xff] }
 0x8e0   :  { %9516 = vmatprep.mubr.msk.f32.mxu1 %vm5522_vm1, %v5212_v46  ;;  %v5221_v55 = vld [vmem:[%s17923_s3 + $0x298] sm:$0xff] }
 0x8e2   :  { %v16558_v11 = vpop.f32.mrb[220].mxu1 }
 0x8e3   :  { %18475 = vst [vmem:[#allocation24_spill] sm:$0xff] %v16558_v11  ;;  %v6410_v39 = vpop.f32.mrb[221].mxu1  ;;  %9517 = vmatmul.mubr.msk.f32.gmra.mrb[70].mxu1 %vm5522_vm1, %v5215_v8  ;;  %v5230_v8 = vld [vmem:[%s17923_s3 + $0x2e0] sm:$0xff] }
 0x8e4   :  { %9519 = vmatprep.mubr.msk.f32.mxu1 %vm5522_vm1, %v5218_v41  ;;  %v5227_v39 = vld [vmem:[%s17923_s3 + $0x2c8] sm:$0xff] }
 0x8e6   :  { %v16568_v46 = vpop.f32.mrb[222].mxu1 }
 0x8e7   :  { %18476 = vst [vmem:[#allocation18_spill] sm:$0xff] %v16568_v46  ;;  %v6415_v49 = vpop.f32.mrb[223].mxu1  ;;  %9520 = vmatmul.mubr.msk.f32.gmra.mrb[72].mxu1 %vm5522_vm1, %v5221_v55  ;;  %v5236_v55 = vld [vmem:[%s17923_s3 + $0x310] sm:$0xff] }
 0x8e8   :  { %9522 = vmatprep.mubr.msk.f32.mxu1 %vm5522_vm1, %v5224_v34  ;;  %v5233_v49 = vld [vmem:[%s17923_s3 + $0x2f8] sm:$0xff] }
 0x8ea   :  { %v16578_v41 = vpop.f32.mrb[224].mxu1 }
 0x8eb   :  { %18477 = vst [vmem:[#allocation64_spill] sm:$0xff] %v16578_v41  ;;  %v6420_v11 = vpop.f32.mrb[225].mxu1  ;;  %9523 = vmatmul.mubr.msk.f32.gmra.mrb[74].mxu1 %vm5522_vm1, %v5227_v39  ;;  %v5242_v39 = vld [vmem:[%s17923_s3 + $0x340] sm:$0xff] }
 0x8ec   :  { %9525 = vmatprep.mubr.msk.f32.mxu1 %vm5522_vm1, %v5230_v8  ;;  %v5239_v11 = vld [vmem:[%s17923_s3 + $0x328] sm:$0xff] }
 0x8ee   :  { %v16588_v34 = vpop.f32.mrb[226].mxu1 }
 0x8ef   :  { %18478 = vst [vmem:[#allocation90_spill] sm:$0xff] %v16588_v34  ;;  %v6425_v46 = vpop.f32.mrb[227].mxu1  ;;  %9526 = vmatmul.mubr.msk.f32.gmra.mrb[76].mxu1 %vm5522_vm1, %v5233_v49  ;;  %v5248_v49 = vld [vmem:[%s17923_s3 + $0x370] sm:$0xff] }
 0x8f0   :  { %9528 = vmatprep.mubr.msk.f32.mxu1 %vm5522_vm1, %v5236_v55  ;;  %v5245_v46 = vld [vmem:[%s17923_s3 + $0x358] sm:$0xff] }
 0x8f2   :  { %v16598_v8 = vpop.f32.mrb[228].mxu1 }
 0x8f3   :  { %18479 = vst [vmem:[#allocation127_spill] sm:$0xff] %v16598_v8  ;;  %v6430_v41 = vpop.f32.mrb[229].mxu1  ;;  %9529 = vmatmul.mubr.msk.f32.gmra.mrb[78].mxu1 %vm5522_vm1, %v5239_v11  ;;  %v5254_v11 = vld [vmem:[%s17923_s3 + $0x3a0] sm:$0xff] }
 0x8f4   :  { %9531 = vmatprep.mubr.msk.f32.mxu1 %vm5522_vm1, %v5242_v39  ;;  %v5251_v41 = vld [vmem:[%s17923_s3 + $0x388] sm:$0xff] }
 0x8f6   :  { %v16608_v55 = vpop.f32.mrb[230].mxu1 }
 0x8f7   :  { %18480 = vst [vmem:[#allocation23_spill] sm:$0xff] %v16608_v55  ;;  %v6435_v34 = vpop.f32.mrb[231].mxu1  ;;  %9532 = vmatmul.mubr.msk.f32.gmra.mrb[80].mxu1 %vm5522_vm1, %v5245_v46  ;;  %v5260_v46 = vld [vmem:[%s17923_s3 + $0x3d0] sm:$0xff] }
 0x8f8   :  { %9534 = vmatprep.mubr.msk.f32.mxu1 %vm5522_vm1, %v5248_v49  ;;  %v5257_v34 = vld [vmem:[%s17923_s3 + $0x3b8] sm:$0xff] }
 0x8fa   :  { %v16618_v39 = vpop.f32.mrb[232].mxu1 }
 0x8fb   :  { %18481 = vst [vmem:[#allocation19_spill] sm:$0xff] %v16618_v39  ;;  %v6440_v8 = vpop.f32.mrb[233].mxu1  ;;  %9535 = vmatmul.mubr.msk.f32.gmra.mrb[82].mxu1 %vm5522_vm1, %v5251_v41  ;;  %v5266_v41 = vld [vmem:[%s17923_s3 + $0x400] sm:$0xff] }
 0x8fc   :  { %9537 = vmatprep.mubr.msk.f32.mxu1 %vm5522_vm1, %v5254_v11  ;;  %v5263_v8 = vld [vmem:[%s17923_s3 + $0x3e8] sm:$0xff] }
 0x8fe   :  { %v16628_v49 = vpop.f32.mrb[234].mxu1 }
 0x8ff   :  { %18482 = vst [vmem:[#allocation65_spill] sm:$0xff] %v16628_v49  ;;  %v6445_v55 = vpop.f32.mrb[235].mxu1  ;;  %9538 = vmatmul.mubr.msk.f32.gmra.mrb[84].mxu1 %vm5522_vm1, %v5257_v34  ;;  %v5272_v34 = vld [vmem:[%s17923_s3 + $0x430] sm:$0xff] }
 0x900   :  { %9540 = vmatprep.mubr.msk.f32.mxu1 %vm5522_vm1, %v5260_v46  ;;  %v5269_v55 = vld [vmem:[%s17923_s3 + $0x418] sm:$0xff] }
 0x902   :  { %v16638_v11 = vpop.f32.mrb[236].mxu1 }
 0x903   :  { %18483 = vst [vmem:[#allocation91_spill] sm:$0xff] %v16638_v11  ;;  %v6450_v39 = vpop.f32.mrb[237].mxu1  ;;  %9541 = vmatmul.mubr.msk.f32.gmra.mrb[86].mxu1 %vm5522_vm1, %v5263_v8  ;;  %v5278_v8 = vld [vmem:[%s17923_s3 + $0x460] sm:$0xff] }
 0x904   :  { %9543 = vmatprep.mubr.msk.f32.mxu1 %vm5522_vm1, %v5266_v41  ;;  %v5275_v39 = vld [vmem:[%s17923_s3 + $0x448] sm:$0xff] }
 0x906   :  { %v16648_v46 = vpop.f32.mrb[238].mxu1 }
 0x907   :  { %18484 = vst [vmem:[#allocation128_spill] sm:$0xff] %v16648_v46  ;;  %v6455_v49 = vpop.f32.mrb[239].mxu1  ;;  %9544 = vmatmul.mubr.msk.f32.gmra.mrb[88].mxu1 %vm5522_vm1, %v5269_v55  ;;  %v5284_v55 = vld [vmem:[%s17923_s3 + $0x490] sm:$0xff] }
 0x908   :  { %9546 = vmatprep.mubr.msk.f32.mxu1 %vm5522_vm1, %v5272_v34  ;;  %v5281_v49 = vld [vmem:[%s17923_s3 + $0x478] sm:$0xff] }
 0x90a   :  { %v16658_v41 = vpop.f32.mrb[240].mxu1 }
 0x90b   :  { %18485 = vst [vmem:[#allocation20_spill] sm:$0xff] %v16658_v41  ;;  %v6460_v11 = vpop.f32.mrb[241].mxu1  ;;  %9547 = vmatmul.mubr.msk.f32.gmra.mrb[90].mxu1 %vm5522_vm1, %v5275_v39  ;;  %v5290_v39 = vld [vmem:[%s17923_s3 + $0x4c0] sm:$0xff] }
 0x90c   :  { %9549 = vmatprep.mubr.msk.f32.mxu1 %vm5522_vm1, %v5278_v8  ;;  %v5287_v11 = vld [vmem:[%s17923_s3 + $0x4a8] sm:$0xff] }
 0x90e   :  { %v16668_v34 = vpop.f32.mrb[242].mxu1 }
 0x90f   :  { %18486 = vst [vmem:[#allocation66_spill] sm:$0xff] %v16668_v34  ;;  %v6465_v46 = vpop.f32.mrb[243].mxu1  ;;  %9550 = vmatmul.mubr.msk.f32.gmra.mrb[92].mxu1 %vm5522_vm1, %v5281_v49  ;;  %v5296_v49 = vld [vmem:[%s17923_s3 + $0x4f0] sm:$0xff] }
 0x910   :  { %9552 = vmatprep.mubr.msk.f32.mxu1 %vm5522_vm1, %v5284_v55  ;;  %v5293_v46 = vld [vmem:[%s17923_s3 + $0x4d8] sm:$0xff] }
 0x912   :  { %v16678_v8 = vpop.f32.mrb[244].mxu1 }
 0x913   :  { %18487 = vst [vmem:[#allocation92_spill] sm:$0xff] %v16678_v8  ;;  %v6470_v41 = vpop.f32.mrb[245].mxu1  ;;  %9553 = vmatmul.mubr.msk.f32.gmra.mrb[94].mxu1 %vm5522_vm1, %v5287_v11  ;;  %v5302_v11 = vld [vmem:[%s17923_s3 + $0x520] sm:$0xff] }
 0x914   :  { %9555 = vmatprep.mubr.msk.f32.mxu1 %vm5522_vm1, %v5290_v39  ;;  %v5299_v41 = vld [vmem:[%s17923_s3 + $0x508] sm:$0xff] }
 0x916   :  { %v16688_v55 = vpop.f32.mrb[246].mxu1 }
 0x917   :  { %18488 = vst [vmem:[#allocation129_spill] sm:$0xff] %v16688_v55  ;;  %v6475_v34 = vpop.f32.mrb[247].mxu1  ;;  %9556 = vmatmul.mubr.msk.f32.gmra.mrb[96].mxu1 %vm5522_vm1, %v5293_v46  ;;  %v5308_v46 = vld [vmem:[%s17923_s3 + $0x550] sm:$0xff] }
 0x918   :  { %9558 = vmatprep.mubr.msk.f32.mxu1 %vm5522_vm1, %v5296_v49  ;;  %v5305_v34 = vld [vmem:[%s17923_s3 + $0x538] sm:$0xff] }
 0x91a   :  { %v16698_v39 = vpop.f32.mrb[248].mxu1 }
 0x91b   :  { %18489 = vst [vmem:[#allocation27_spill] sm:$0xff] %v16698_v39  ;;  %v6480_v8 = vpop.f32.mrb[249].mxu1  ;;  %9559 = vmatmul.mubr.msk.f32.gmra.mrb[98].mxu1 %vm5522_vm1, %v5299_v41  ;;  %v5314_v41 = vld [vmem:[%s17923_s3 + $0x580] sm:$0xff] }
 0x91c   :  { %9561 = vmatprep.mubr.msk.f32.mxu1 %vm5522_vm1, %v5302_v11  ;;  %v5311_v8 = vld [vmem:[%s17923_s3 + $0x568] sm:$0xff] }
 0x91e   :  { %v16708_v49 = vpop.f32.mrb[250].mxu1 }
 0x91f   :  { %18490 = vst [vmem:[#allocation21_spill] sm:$0xff] %v16708_v49  ;;  %v6485_v55 = vpop.f32.mrb[251].mxu1  ;;  %9562 = vmatmul.mubr.msk.f32.gmra.mrb[100].mxu1 %vm5522_vm1, %v5305_v34  ;;  %v5320_v34 = vld [vmem:[%s17923_s3 + $0x5b0] sm:$0xff] }
 0x920   :  { %9564 = vmatprep.mubr.msk.f32.mxu1 %vm5522_vm1, %v5308_v46  ;;  %v5317_v55 = vld [vmem:[%s17923_s3 + $0x598] sm:$0xff] }
 0x922   :  { %v16718_v11 = vpop.f32.mrb[252].mxu1 }
 0x923   :  { %18491 = vst [vmem:[#allocation67_spill] sm:$0xff] %v16718_v11  ;;  %v6490_v39 = vpop.f32.mrb[253].mxu1  ;;  %9565 = vmatmul.mubr.msk.f32.gmra.mrb[102].mxu1 %vm5522_vm1, %v5311_v8  ;;  %v5326_v8 = vld [vmem:[%s17923_s3 + $0x5e0] sm:$0xff] }
 0x924   :  { %9567 = vmatprep.mubr.msk.f32.mxu1 %vm5522_vm1, %v5314_v41  ;;  %v5323_v39 = vld [vmem:[%s17923_s3 + $0x5c8] sm:$0xff] }
 0x926   :  { %v16728_v46 = vpop.f32.mrb[254].mxu1 }
 0x927   :  { %18492 = vst [vmem:[#allocation93_spill] sm:$0xff] %v16728_v46  ;;  %v6495_v49 = vpop.f32.mrb[255].mxu1  ;;  %9568 = vmatmul.mubr.msk.f32.gmra.mrb[104].mxu1 %vm5522_vm1, %v5317_v55  ;;  %v5332_v55 = vld [vmem:[%s17923_s3 + $0x610] sm:$0xff] }
 0x928   :  { %9570 = vmatprep.mubr.msk.f32.mxu1 %vm5522_vm1, %v5320_v34  ;;  %v5329_v49 = vld [vmem:[%s17923_s3 + $0x5f8] sm:$0xff] }
 0x92a   :  { %v16738_v41 = vpop.f32.mrb[0].mxu1 }
 0x92b   :  { %18493 = vst [vmem:[#allocation130_spill] sm:$0xff] %v16738_v41  ;;  %v6500_v11 = vpop.f32.mrb[1].mxu1  ;;  %9571 = vmatmul.mubr.msk.f32.gmra.mrb[106].mxu1 %vm5522_vm1, %v5323_v39  ;;  %v5338_v39 = vld [vmem:[%s17923_s3 + $0x640] sm:$0xff] }
 0x92c   :  { %9573 = vmatprep.mubr.msk.f32.mxu1 %vm5522_vm1, %v5326_v8  ;;  %v5335_v11 = vld [vmem:[%s17923_s3 + $0x628] sm:$0xff] }
 0x92e   :  { %v16748_v34 = vpop.f32.mrb[2].mxu1 }
 0x92f   :  { %18494 = vst [vmem:[#allocation22_spill] sm:$0xff] %v16748_v34  ;;  %v6505_v46 = vpop.f32.mrb[3].mxu1  ;;  %9574 = vmatmul.mubr.msk.f32.gmra.mrb[108].mxu1 %vm5522_vm1, %v5329_v49  ;;  %v5344_v49 = vld [vmem:[%s17923_s3 + $0x670] sm:$0xff] }
 0x930   :  { %9576 = vmatprep.mubr.msk.f32.mxu1 %vm5522_vm1, %v5332_v55  ;;  %v5341_v46 = vld [vmem:[%s17923_s3 + $0x658] sm:$0xff] }
 0x932   :  { %v16758_v8 = vpop.f32.mrb[4].mxu1 }
 0x933   :  { %18495 = vst [vmem:[#allocation68_spill] sm:$0xff] %v16758_v8  ;;  %v6510_v41 = vpop.f32.mrb[5].mxu1  ;;  %9577 = vmatmul.mubr.msk.f32.gmra.mrb[110].mxu1 %vm5522_vm1, %v5335_v11  ;;  %v5350_v11 = vld [vmem:[%s17923_s3 + $0x6a0] sm:$0xff] }
 0x934   :  { %9579 = vmatprep.mubr.msk.f32.mxu1 %vm5522_vm1, %v5338_v39  ;;  %v5347_v41 = vld [vmem:[%s17923_s3 + $0x688] sm:$0xff] }
 0x936   :  { %v16768_v55 = vpop.f32.mrb[6].mxu1 }
 0x937   :  { %18496 = vst [vmem:[#allocation94_spill] sm:$0xff] %v16768_v55  ;;  %v6515_v34 = vpop.f32.mrb[7].mxu1  ;;  %9580 = vmatmul.mubr.msk.f32.gmra.mrb[112].mxu1 %vm5522_vm1, %v5341_v46  ;;  %v5356_v46 = vld [vmem:[%s17923_s3 + $0x6d0] sm:$0xff] }
 0x938   :  { %9582 = vmatprep.mubr.msk.f32.mxu1 %vm5522_vm1, %v5344_v49  ;;  %v5353_v34 = vld [vmem:[%s17923_s3 + $0x6b8] sm:$0xff] }
 0x93a   :  { %v16778_v39 = vpop.f32.mrb[8].mxu1 }
 0x93b   :  { %18497 = vst [vmem:[#allocation131_spill] sm:$0xff] %v16778_v39  ;;  %v6520_v8 = vpop.f32.mrb[9].mxu1  ;;  %9583 = vmatmul.mubr.msk.f32.gmra.mrb[114].mxu1 %vm5522_vm1, %v5347_v41  ;;  %v5362_v41 = vld [vmem:[%s17923_s3 + $0x700] sm:$0xff] }
 0x93c   :  { %9585 = vmatprep.mubr.msk.f32.mxu1 %vm5522_vm1, %v5350_v11  ;;  %v5359_v8 = vld [vmem:[%s17923_s3 + $0x6e8] sm:$0xff] }
 0x93e   :  { %v16788_v49 = vpop.f32.mrb[10].mxu1 }
 0x93f   :  { %18498 = vst [vmem:[#allocation25_spill] sm:$0xff] %v16788_v49  ;;  %v6525_v55 = vpop.f32.mrb[11].mxu1  ;;  %9586 = vmatmul.mubr.msk.f32.gmra.mrb[116].mxu1 %vm5522_vm1, %v5353_v34  ;;  %v5368_v34 = vld [vmem:[%s17923_s3 + $0x730] sm:$0xff] }
 0x940   :  { %9588 = vmatprep.mubr.msk.f32.mxu1 %vm5522_vm1, %v5356_v46  ;;  %v5365_v55 = vld [vmem:[%s17923_s3 + $0x718] sm:$0xff] }
 0x942   :  { %v16798_v11 = vpop.f32.mrb[12].mxu1 }
 0x943   :  { %18499 = vst [vmem:[#allocation69_spill] sm:$0xff] %v16798_v11  ;;  %v6530_v39 = vpop.f32.mrb[13].mxu1  ;;  %9589 = vmatmul.mubr.msk.f32.gmra.mrb[118].mxu1 %vm5522_vm1, %v5359_v8  ;;  %v5374_v8 = vld [vmem:[%s17923_s3 + $0x760] sm:$0xff] }
 0x944   :  { %9591 = vmatprep.mubr.msk.f32.mxu1 %vm5522_vm1, %v5362_v41  ;;  %v5371_v39 = vld [vmem:[%s17923_s3 + $0x748] sm:$0xff] }
 0x946   :  { %v16808_v46 = vpop.f32.mrb[14].mxu1 }
 0x947   :  { %18500 = vst [vmem:[#allocation95_spill] sm:$0xff] %v16808_v46  ;;  %v6535_v49 = vpop.f32.mrb[15].mxu1  ;;  %9592 = vmatmul.mubr.msk.f32.gmra.mrb[120].mxu1 %vm5522_vm1, %v5365_v55  ;;  %v5380_v55 = vld [vmem:[%s17923_s3 + $0x790] sm:$0xff] }
 0x948   :  { %9594 = vmatprep.mubr.msk.f32.mxu1 %vm5522_vm1, %v5368_v34  ;;  %v5377_v49 = vld [vmem:[%s17923_s3 + $0x778] sm:$0xff] }
 0x94a   :  { %v16818_v41 = vpop.f32.mrb[16].mxu1 }
 0x94b   :  { %18501 = vst [vmem:[#allocation132_spill] sm:$0xff] %v16818_v41  ;;  %v6540_v11 = vpop.f32.mrb[17].mxu1  ;;  %9595 = vmatmul.mubr.msk.f32.gmra.mrb[122].mxu1 %vm5522_vm1, %v5371_v39  ;;  %v5386_v39 = vld [vmem:[%s17923_s3 + $0x7c0] sm:$0xff] }
 0x94c   :  { %9597 = vmatprep.mubr.msk.f32.mxu1 %vm5522_vm1, %v5374_v8  ;;  %v5383_v11 = vld [vmem:[%s17923_s3 + $0x7a8] sm:$0xff] }
 0x94e   :  { %v16828_v34 = vpop.f32.mrb[18].mxu1 }
 0x94f   :  { %18502 = vst [vmem:[#allocation26_spill] sm:$0xff] %v16828_v34  ;;  %v6545_v46 = vpop.f32.mrb[19].mxu1  ;;  %9598 = vmatmul.mubr.msk.f32.gmra.mrb[124].mxu1 %vm5522_vm1, %v5377_v49  ;;  %v5392_v49 = vld [vmem:[%s17923_s3 + $0x7f0] sm:$0xff] }
 0x950   :  { %9600 = vmatprep.mubr.msk.f32.mxu1 %vm5522_vm1, %v5380_v55  ;;  %v5389_v46 = vld [vmem:[%s17923_s3 + $0x7d8] sm:$0xff] }
 0x952   :  { %v16838_v8 = vpop.f32.mrb[20].mxu1 }
 0x953   :  { %18503 = vst [vmem:[#allocation70_spill] sm:$0xff] %v16838_v8  ;;  %v6550_v41 = vpop.f32.mrb[21].mxu1  ;;  %9601 = vmatmul.mubr.msk.f32.gmra.mrb[126].mxu1 %vm5522_vm1, %v5383_v11  ;;  %v5398_v11 = vld [vmem:[%s17923_s3 + $0x820] sm:$0xff] }
 0x954   :  { %9603 = vmatprep.mubr.msk.f32.mxu1 %vm5522_vm1, %v5386_v39  ;;  %v5395_v41 = vld [vmem:[%s17923_s3 + $0x808] sm:$0xff] }
 0x956   :  { %v16848_v55 = vpop.f32.mrb[22].mxu1 }
 0x957   :  { %18504 = vst [vmem:[#allocation96_spill] sm:$0xff] %v16848_v55  ;;  %v6555_v34 = vpop.f32.mrb[23].mxu1  ;;  %9604 = vmatmul.mubr.msk.f32.gmra.mrb[128].mxu1 %vm5522_vm1, %v5389_v46  ;;  %v5404_v46 = vld [vmem:[%s17923_s3 + $0x850] sm:$0xff] }
 0x958   :  { %9606 = vmatprep.mubr.msk.f32.mxu1 %vm5522_vm1, %v5392_v49  ;;  %v5401_v34 = vld [vmem:[%s17923_s3 + $0x838] sm:$0xff] }
 0x95a   :  { %v16858_v39 = vpop.f32.mrb[24].mxu1 }
 0x95b   :  { %18505 = vst [vmem:[#allocation133_spill] sm:$0xff] %v16858_v39  ;;  %v6560_v8 = vpop.f32.mrb[25].mxu1  ;;  %9607 = vmatmul.mubr.msk.f32.gmra.mrb[130].mxu1 %vm5522_vm1, %v5395_v41  ;;  %v5410_v41 = vld [vmem:[%s17923_s3 + $0x880] sm:$0xff] }
 0x95c   :  { %9609 = vmatprep.mubr.msk.f32.mxu1 %vm5522_vm1, %v5398_v11  ;;  %v5407_v8 = vld [vmem:[%s17923_s3 + $0x868] sm:$0xff] }
 0x95e   :  { %v16868_v49 = vpop.f32.mrb[26].mxu1 }
 0x95f   :  { %18506 = vst [vmem:[#allocation30_spill] sm:$0xff] %v16868_v49  ;;  %v6565_v55 = vpop.f32.mrb[27].mxu1  ;;  %9610 = vmatmul.mubr.msk.f32.gmra.mrb[132].mxu1 %vm5522_vm1, %v5401_v34  ;;  %v5416_v34 = vld [vmem:[%s17923_s3 + $0x8b0] sm:$0xff] }
 0x960   :  { %9612 = vmatprep.mubr.msk.f32.mxu1 %vm5522_vm1, %v5404_v46  ;;  %v5413_v55 = vld [vmem:[%s17923_s3 + $0x898] sm:$0xff] }
 0x962   :  { %v16878_v11 = vpop.f32.mrb[28].mxu1 }
 0x963   :  { %18507 = vst [vmem:[#allocation71_spill] sm:$0xff] %v16878_v11  ;;  %v6570_v39 = vpop.f32.mrb[29].mxu1  ;;  %9613 = vmatmul.mubr.msk.f32.gmra.mrb[134].mxu1 %vm5522_vm1, %v5407_v8  ;;  %v5422_v8 = vld [vmem:[%s17923_s3 + $0x8e0] sm:$0xff] }
 0x964   :  { %9615 = vmatprep.mubr.msk.f32.mxu1 %vm5522_vm1, %v5410_v41  ;;  %v5419_v39 = vld [vmem:[%s17923_s3 + $0x8c8] sm:$0xff] }
 0x966   :  { %v16888_v46 = vpop.f32.mrb[30].mxu1 }
 0x967   :  { %18508 = vst [vmem:[#allocation97_spill] sm:$0xff] %v16888_v46  ;;  %v6575_v49 = vpop.f32.mrb[31].mxu1  ;;  %9616 = vmatmul.mubr.msk.f32.gmra.mrb[136].mxu1 %vm5522_vm1, %v5413_v55  ;;  %v5428_v55 = vld [vmem:[%s17923_s3 + $0x910] sm:$0xff] }
 0x968   :  { %9618 = vmatprep.mubr.msk.f32.mxu1 %vm5522_vm1, %v5416_v34  ;;  %v5425_v49 = vld [vmem:[%s17923_s3 + $0x8f8] sm:$0xff] }
 0x96a   :  { %v16898_v41 = vpop.f32.mrb[32].mxu1 }
 0x96b   :  { %18509 = vst [vmem:[#allocation134_spill] sm:$0xff] %v16898_v41  ;;  %v6580_v11 = vpop.f32.mrb[33].mxu1  ;;  %9619 = vmatmul.mubr.msk.f32.gmra.mrb[138].mxu1 %vm5522_vm1, %v5419_v39  ;;  %v5434_v39 = vld [vmem:[%s17923_s3 + $0x940] sm:$0xff] }
 0x96c   :  { %9621 = vmatprep.mubr.msk.f32.mxu1 %vm5522_vm1, %v5422_v8  ;;  %v5431_v11 = vld [vmem:[%s17923_s3 + $0x928] sm:$0xff] }
 0x96e   :  { %v16908_v34 = vpop.f32.mrb[34].mxu1 }
 0x96f   :  { %18510 = vst [vmem:[#allocation33_spill] sm:$0xff] %v16908_v34  ;;  %v6585_v46 = vpop.f32.mrb[35].mxu1  ;;  %9622 = vmatmul.mubr.msk.f32.gmra.mrb[140].mxu1 %vm5522_vm1, %v5425_v49  ;;  %v5440_v49 = vld [vmem:[%s17923_s3 + $0x970] sm:$0xff] }
 0x970   :  { %9624 = vmatprep.mubr.msk.f32.mxu1 %vm5522_vm1, %v5428_v55  ;;  %v5437_v46 = vld [vmem:[%s17923_s3 + $0x958] sm:$0xff] }
 0x972   :  { %v16918_v8 = vpop.f32.mrb[36].mxu1 }
 0x973   :  { %18511 = vst [vmem:[#allocation72_spill] sm:$0xff] %v16918_v8  ;;  %v6590_v41 = vpop.f32.mrb[37].mxu1  ;;  %9625 = vmatmul.mubr.msk.f32.gmra.mrb[142].mxu1 %vm5522_vm1, %v5431_v11  ;;  %v5446_v11 = vld [vmem:[%s17923_s3 + $0x9a0] sm:$0xff] }
 0x974   :  { %9627 = vmatprep.mubr.msk.f32.mxu1 %vm5522_vm1, %v5434_v39  ;;  %v5443_v41 = vld [vmem:[%s17923_s3 + $0x988] sm:$0xff] }
 0x976   :  { %v16928_v55 = vpop.f32.mrb[38].mxu1 }
 0x977   :  { %18512 = vst [vmem:[#allocation98_spill] sm:$0xff] %v16928_v55  ;;  %v6595_v34 = vpop.f32.mrb[39].mxu1  ;;  %9628 = vmatmul.mubr.msk.f32.gmra.mrb[144].mxu1 %vm5522_vm1, %v5437_v46  ;;  %v5452_v46 = vld [vmem:[%s17923_s3 + $0x9d0] sm:$0xff] }
 0x978   :  { %9630 = vmatprep.mubr.msk.f32.mxu1 %vm5522_vm1, %v5440_v49  ;;  %v5449_v34 = vld [vmem:[%s17923_s3 + $0x9b8] sm:$0xff] }
 0x97a   :  { %v16938_v39 = vpop.f32.mrb[40].mxu1 }
 0x97b   :  { %18513 = vst [vmem:[#allocation135_spill] sm:$0xff] %v16938_v39  ;;  %v6600_v8 = vpop.f32.mrb[41].mxu1  ;;  %9631 = vmatmul.mubr.msk.f32.gmra.mrb[146].mxu1 %vm5522_vm1, %v5443_v41  ;;  %v5458_v41 = vld [vmem:[%s17923_s3 + $0xa00] sm:$0xff] }
 0x97c   :  { %9633 = vmatprep.mubr.msk.f32.mxu1 %vm5522_vm1, %v5446_v11  ;;  %v5455_v8 = vld [vmem:[%s17923_s3 + $0x9e8] sm:$0xff] }
 0x97e   :  { %v16948_v49 = vpop.f32.mrb[42].mxu1 }
 0x97f   :  { %18514 = vst [vmem:[#allocation36_spill] sm:$0xff] %v16948_v49  ;;  %v6605_v55 = vpop.f32.mrb[43].mxu1  ;;  %9634 = vmatmul.mubr.msk.f32.gmra.mrb[148].mxu1 %vm5522_vm1, %v5449_v34  ;;  %v5464_v34 = vld [vmem:[%s17923_s3 + $0xa30] sm:$0xff] }
 0x980   :  { %9636 = vmatprep.mubr.msk.f32.mxu1 %vm5522_vm1, %v5452_v46  ;;  %v5461_v55 = vld [vmem:[%s17923_s3 + $0xa18] sm:$0xff] }
 0x982   :  { %v16958_v11 = vpop.f32.mrb[44].mxu1 }
 0x983   :  { %18515 = vst [vmem:[#allocation73_spill] sm:$0xff] %v16958_v11  ;;  %v6610_v39 = vpop.f32.mrb[45].mxu1  ;;  %9637 = vmatmul.mubr.msk.f32.gmra.mrb[150].mxu1 %vm5522_vm1, %v5455_v8  ;;  %v5467_v8 = vld [vmem:[%s17923_s3 + $0xa48] sm:$0xff] }
 0x984   :  { %9639 = vmatprep.mubr.msk.f32.mxu1 %vm5522_vm1, %v5458_v41  ;;  %v5470_v41 = vld [vmem:[%s17923_s3 + $0xa60] sm:$0xff] }
 0x986   :  { %v9482_v46 = vpop.f32.mrb[46].mxu1 }
 0x987   :  { %v16969_v49 = vadd.f32 %v9482_v46, %v15845_v29  ;;  %v6678_v23 = vpop.f32.mrb[47].mxu1  ;;  %9640 = vmatmul.mubr.msk.f32.gmra.mrb[152].mxu1 %vm5522_vm1, %v5461_v55  ;;  %v5476_v55 = vld [vmem:[%s17923_s3 + $0xa90] sm:$0xff] }
 0x988   :  { %v16973_v39 = vadd.f32 %v6678_v23, %v15837_v59  ;;  %9642 = vmatprep.mubr.msk.f32.mxu1 %vm5522_vm1, %v5464_v34  ;;  %v5473_v23 = vld [vmem:[%s17923_s3 + $0xa78] sm:$0xff] }
 0x98a   :  { %v9485_v11 = vpop.f32.mrb[48].mxu1 }
 0x98b   :  { %v16983_v29 = vadd.f32 %v9485_v11, %v15861_v28  ;;  %v6688_v46 = vpop.f32.mrb[49].mxu1  ;;  %9643 = vmatmul.mubr.msk.f32.gmra.mrb[154].mxu1 %vm5522_vm1, %v5467_v8  ;;  %v5479_v8 = vld [vmem:[%s17923_s3 + $0xaa8] sm:$0xff] }
 0x98c   :  { %v16987_v59 = vadd.f32 %v6688_v46, %v15853_v50  ;;  %9645 = vmatprep.mubr.msk.f32.mxu1 %vm5522_vm1, %v5470_v41  ;;  %v5482_v41 = vld [vmem:[%s17923_s3 + $0xac0] sm:$0xff] }
 0x98e   :  { %v9488_v34 = vpop.f32.mrb[50].mxu1 }
 0x98f   :  { %v16997_v28 = vadd.f32 %v9488_v34, %v15877_v13  ;;  %v6698_v11 = vpop.f32.mrb[51].mxu1  ;;  %9646 = vmatmul.mubr.msk.f32.gmra.mrb[156].mxu1 %vm5522_vm1, %v5473_v23  ;;  %v5485_v23 = vld [vmem:[%s17923_s3 + $0xad8] sm:$0xff] }
 0x990   :  { %v17001_v50 = vadd.f32 %v6698_v11, %v15869_v53  ;;  %9648 = vmatprep.mubr.msk.f32.mxu1 %vm5522_vm1, %v5476_v55  ;;  %v5488_v55 = vld [vmem:[%s17923_s3 + $0xaf0] sm:$0xff] }
 0x992   :  { %v9491_v46 = vpop.f32.mrb[52].mxu1 }
 0x993   :  { %v17011_v13 = vadd.f32 %v9491_v46, %v15893_v37  ;;  %v6708_v34 = vpop.f32.mrb[53].mxu1  ;;  %9649 = vmatmul.mubr.msk.f32.gmra.mrb[158].mxu1 %vm5522_vm1, %v5479_v8  ;;  %v5491_v8 = vld [vmem:[%s17923_s3 + $0xb08] sm:$0xff] }
 0x994   :  { %v17015_v53 = vadd.f32 %v6708_v34, %v15885_v40  ;;  %9651 = vmatprep.mubr.msk.f32.mxu1 %vm5522_vm1, %v5482_v41  ;;  %v5494_v41 = vld [vmem:[%s17923_s3 + $0xb20] sm:$0xff] }
 0x996   :  { %v9494_v11 = vpop.f32.mrb[54].mxu1 }
 0x997   :  { %v17025_v37 = vadd.f32 %v9494_v11, %v15909_v1  ;;  %v6718_v46 = vpop.f32.mrb[55].mxu1  ;;  %9652 = vmatmul.mubr.msk.f32.gmra.mrb[160].mxu1 %vm5522_vm1, %v5485_v23  ;;  %v5497_v23 = vld [vmem:[%s17923_s3 + $0xb38] sm:$0xff] }
 0x998   :  { %v17029_v40 = vadd.f32 %v6718_v46, %v15901_v48  ;;  %9654 = vmatprep.mubr.msk.f32.mxu1 %vm5522_vm1, %v5488_v55  ;;  %v5500_v55 = vld [vmem:[%s17923_s3 + $0xb50] sm:$0xff] }
 0x99a   :  { %v9497_v34 = vpop.f32.mrb[56].mxu1 }
 0x99b   :  { %v17039_v1 = vadd.f32 %v9497_v34, %v15925_v61  ;;  %v6728_v11 = vpop.f32.mrb[57].mxu1  ;;  %9655 = vmatmul.mubr.msk.f32.gmra.mrb[162].mxu1 %vm5522_vm1, %v5491_v8  ;;  %v5503_v8 = vld [vmem:[%s17923_s3 + $0xb68] sm:$0xff] }
 0x99c   :  { %v17043_v48 = vadd.f32 %v6728_v11, %v15917_v58  ;;  %9657 = vmatprep.mubr.msk.f32.mxu1 %vm5522_vm1, %v5494_v41  ;;  %v5506_v41 = vld [vmem:[%s17923_s3 + $0xb80] sm:$0xff] }
 0x99e   :  { %v9500_v46 = vpop.f32.mrb[58].mxu1 }
 0x99f   :  { %v17053_v61 = vadd.f32 %v9500_v46, %v15941_v6  ;;  %v6738_v34 = vpop.f32.mrb[59].mxu1  ;;  %9658 = vmatmul.mubr.msk.f32.gmra.mrb[164].mxu1 %vm5522_vm1, %v5497_v23  ;;  %v5509_v23 = vld [vmem:[%s17923_s3 + $0xb98] sm:$0xff] }
 0x9a0   :  { %v17057_v58 = vadd.f32 %v6738_v34, %v15933_v32  ;;  %9660 = vmatprep.mubr.msk.f32.mxu1 %vm5522_vm1, %v5500_v55  ;;  %v5512_v55 = vld [vmem:[%s17923_s3 + $0xbb0] sm:$0xff] }
 0x9a1   :  { %18516 = vst [vmem:[#allocation99_spill] sm:$0xff] %v17053_v61 }
 0x9a2   :  { %18517 = vst [vmem:[#allocation136_spill] sm:$0xff] %v17057_v58  ;;  %v9503_v11 = vpop.f32.mrb[60].mxu1  ;;  %v18623_v58 = vld [vmem:[#allocation91_spill] sm:$0xff] }
 0x9a3   :  { %v17067_v6 = vadd.f32 %v9503_v11, %v15957_v63  ;;  %v6748_v46 = vpop.f32.mrb[61].mxu1  ;;  %9661 = vmatmul.mubr.msk.f32.gmra.mrb[166].mxu1 %vm5522_vm1, %v5503_v8  ;;  %v5515_v8 = vld [vmem:[%s17923_s3 + $0xbc8] sm:$0xff] }
 0x9a4   :  { %v17071_v32 = vadd.f32 %v6748_v46, %v15949_v42  ;;  %9663 = vmatprep.mubr.msk.f32.mxu1 %vm5522_vm1, %v5506_v41  ;;  %v5518_v41 = vld [vmem:[%s17923_s3 + $0xbe0] sm:$0xff] }
 0x9a5   :  { %18518 = vst [vmem:[#allocation39_spill] sm:$0xff] %v17067_v6  ;;  %v18599_v6 = vld [vmem:[#allocation89_spill] sm:$0xff] }
 0x9a6   :  { %18519 = vst [vmem:[#allocation74_spill] sm:$0xff] %v17071_v32  ;;  %v9506_v34 = vpop.f32.mrb[62].mxu1  ;;  %v18595_v32 = vld [vmem:[#allocation17_spill] sm:$0xff] }
 0x9a7   :  { %v17081_v63 = vadd.f32 %v9506_v34, %v15973_v9  ;;  %v6758_v11 = vpop.f32.mrb[63].mxu1  ;;  %9664 = vmatmul.mubr.msk.f32.gmra.mrb[168].mxu1 %vm5522_vm1, %v5509_v23  ;;  %v5521_v23 = vld [vmem:[%s17923_s3 + $0xbf8] sm:$0xff] }
 0x9a8   :  { %v17085_v42 = vadd.f32 %v6758_v11, %v15965_v38  ;;  %9666 = vmatprep.mubr.msk.f32.mxu1 %vm5522_vm1, %v5512_v55 }
 0x9a9   :  { %18520 = vst [vmem:[#allocation100_spill] sm:$0xff] %v17081_v63 }
 0x9aa   :  { %18521 = vst [vmem:[#allocation137_spill] sm:$0xff] %v17085_v42  ;;  %v9509_v46 = vpop.f32.mrb[64].mxu1  ;;  %v18591_v42 = vld [vmem:[#allocation88_spill] sm:$0xff] }
 0x9ab   :  { %v17095_v9 = vadd.f32 %v9509_v46, %v15989_v44  ;;  %v6768_v34 = vpop.f32.mrb[65].mxu1  ;;  %9667 = vmatmul.mubr.msk.f32.gmra.mrb[170].mxu1 %vm5522_vm1, %v5515_v8 }
 0x9ac   :  { %v17099_v38 = vadd.f32 %v6768_v34, %v15981_v36  ;;  %9669 = vmatprep.mubr.msk.f32.mxu1 %vm5522_vm1, %v5518_v41 }
 0x9ad   :  { %18522 = vst [vmem:[#allocation42_spill] sm:$0xff] %v17095_v9  ;;  %v18583_v9 = vld [vmem:[#allocation87_spill] sm:$0xff] }
 0x9ae   :  { %18523 = vst [vmem:[#allocation75_spill] sm:$0xff] %v17099_v38  ;;  %v9512_v55 = vpop.f32.mrb[66].mxu1 }
 0x9af   :  { %v17106_v11 = vadd.f32 %v9512_v55, %v16005_v0  ;;  %v6778_v18 = vpop.f32.mrb[67].mxu1  ;;  %9670 = vmatmul.mubr.msk.f32.gmra.mrb[172].mxu1 %vm5522_vm1, %v5521_v23 }
 0x9b0   :  { %v17110_v44 = vadd.f32 %v6778_v18, %v15997_v10 }
 0x9b1   :  { %18524 = vst [vmem:[#allocation101_spill] sm:$0xff] %v17106_v11 }
 0x9b2   :  { %18525 = vst [vmem:[#allocation104_spill] sm:$0xff] %v17110_v44  ;;  %v9515_v8 = vpop.f32.mrb[68].mxu1 }
 0x9b3   :  { %v17113_v36 = vadd.f32 %v9515_v8, %v16021_v22  ;;  %v6788_v46 = vpop.f32.mrb[69].mxu1 }
 0x9b4   :  { %v17116_v41 = vadd.f32 %v6788_v46, %v16013_v45 }
 0x9b5   :  { %18526 = vst [vmem:[#allocation45_spill] sm:$0xff] %v17113_v36  ;;  %v18581_v36 = vld [vmem:[#allocation15_spill] sm:$0xff] }
 0x9b6   :  { %18527 = vst [vmem:[#allocation76_spill] sm:$0xff] %v17116_v41  ;;  %v9518_v34 = vpop.f32.mrb[70].mxu1 }
 0x9b7   :  { %v17119_v25 = vadd.f32 %v9518_v34, %v16037_v14  ;;  %v6798_v0 = vpop.f32.mrb[71].mxu1 }
 0x9b8   :  { %v17122_v55 = vadd.f32 %v6798_v0, %v16029_v27 }
 0x9b9   :  { %18528 = vst [vmem:[#allocation102_spill] sm:$0xff] %v17119_v25  ;;  %v18578_v25 = vld [vmem:[#allocation122_spill] sm:$0xff] }
 0x9ba   :  { %18529 = vst [vmem:[#allocation138_spill] sm:$0xff] %v17122_v55  ;;  %v9521_v23 = vpop.f32.mrb[72].mxu1 }
 0x9bb   :  { %v17125_v10 = vadd.f32 %v9521_v23, %v16053_v62  ;;  %v6808_v18 = vpop.f32.mrb[73].mxu1 }
 0x9bc   :  { %v17128_v22 = vadd.f32 %v6808_v18, %v16045_v60 }
 0x9bd   :  { %18530 = vst [vmem:[#allocation28_spill] sm:$0xff] %v17125_v10 }
 0x9be   :  { %18531 = vst [vmem:[#allocation77_spill] sm:$0xff] %v17128_v22  ;;  %v9524_v8 = vpop.f32.mrb[74].mxu1  ;;  %v18576_v22 = vld [vmem:[#allocation121_spill] sm:$0xff] }
 0x9bf   :  { %v17131_v45 = vadd.f32 %v9524_v8, %v16069_v52  ;;  %v6818_v46 = vpop.f32.mrb[75].mxu1 }
 0x9c0   :  { %v17134_v14 = vadd.f32 %v6818_v46, %v16061_v12 }
 0x9c1   :  { %18532 = vst [vmem:[#allocation103_spill] sm:$0xff] %v17131_v45 }
 0x9c2   :  { %18533 = vst [vmem:[#allocation139_spill] sm:$0xff] %v17134_v14  ;;  %v9527_v34 = vpop.f32.mrb[76].mxu1 }
 0x9c3   :  { %v17137_v27 = vadd.f32 %v9527_v34, %v16085_v57  ;;  %v6828_v0 = vpop.f32.mrb[77].mxu1 }
 0x9c4   :  { %v17140_v62 = vadd.f32 %v6828_v0, %v16077_v2 }
 0x9c5   :  { %18534 = vst [vmem:[#allocation29_spill] sm:$0xff] %v17137_v27 }
 0x9c6   :  { %18535 = vst [vmem:[#allocation78_spill] sm:$0xff] %v17140_v62  ;;  %v9530_v23 = vpop.f32.mrb[78].mxu1  ;;  %v18574_v62 = vld [vmem:[#allocation120_spill] sm:$0xff] }
 0x9c7   :  { %v17143_v60 = vadd.f32 %v9530_v23, %v16101_v30  ;;  %v6838_v18 = vpop.f32.mrb[79].mxu1 }
 0x9c8   :  { %v17146_v52 = vadd.f32 %v6838_v18, %v16093_v21 }
 0x9ca   :  { %v9533_v57 = vpop.f32.mrb[80].mxu1 }
 0x9cb   :  { %v17153_v46 = vadd.f32 %v9533_v57, %v16117_v51  ;;  %v6848_v2 = vpop.f32.mrb[81].mxu1 }
 0x9cc   :  { %v17156_v34 = vadd.f32 %v6848_v2, %v16109_v43 }
 0x9ce   :  { %v9536_v0 = vpop.f32.mrb[82].mxu1 }
 0x9cf   :  { %v17163_v23 = vadd.f32 %v9536_v0, %v16133_v15  ;;  %v6858_v18 = vpop.f32.mrb[83].mxu1 }
 0x9d0   :  { %v17166_v8 = vadd.f32 %v6858_v18, %v16125_v47 }
 0x9d2   :  { %v9539_v57 = vpop.f32.mrb[84].mxu1 }
 0x9d3   :  { %v17173_v2 = vadd.f32 %v9539_v57, %v16149_v19  ;;  %v6868_v30 = vpop.f32.mrb[85].mxu1 }
 0x9d4   :  { %v17176_v21 = vadd.f32 %v6868_v30, %v16141_v56 }
 0x9d6   :  { %v9542_v0 = vpop.f32.mrb[86].mxu1 }
 0x9d7   :  { %v17183_v18 = vadd.f32 %v9542_v0, %v16165_v54  ;;  %v6878_v51 = vpop.f32.mrb[87].mxu1 }
 0x9d8   :  { %v17186_v43 = vadd.f32 %v6878_v51, %v16157_v4 }
 0x9da   :  { %v9545_v30 = vpop.f32.mrb[88].mxu1 }
 0x9db   :  { %v17193_v57 = vadd.f32 %v9545_v30, %v16181_v33  ;;  %v6888_v15 = vpop.f32.mrb[89].mxu1 }
 0x9dc   :  { %v17196_v47 = vadd.f32 %v6888_v15, %v16173_v20 }
 0x9de   :  { %v9548_v51 = vpop.f32.mrb[90].mxu1 }
 0x9df   :  { %v17203_v0 = vadd.f32 %v9548_v51, %v16197_v26  ;;  %v6898_v19 = vpop.f32.mrb[91].mxu1 }
 0x9e0   :  { %v17206_v56 = vadd.f32 %v6898_v19, %v16189_v16 }
 0x9e1   :  { %18536 = vst [vmem:[#allocation105_spill] sm:$0xff] %v17203_v0 }
 0x9e2   :  { %18537 = vst [vmem:[#allocation140_spill] sm:$0xff] %v17206_v56  ;;  %v9551_v15 = vpop.f32.mrb[92].mxu1 }
 0x9e3   :  { %v17213_v30 = vadd.f32 %v9551_v15, %v16213_v17  ;;  %v6908_v54 = vpop.f32.mrb[93].mxu1 }
 0x9e4   :  { %v17216_v4 = vadd.f32 %v6908_v54, %v16205_v5  ;;  %v18545_v5 = vld [vmem:[#allocation48_spill] sm:$0xff] }
 0x9e5   :  { %18538 = vst [vmem:[#allocation31_spill] sm:$0xff] %v17213_v30 }
 0x9e6   :  { %18539 = vst [vmem:[#allocation79_spill] sm:$0xff] %v17216_v4  ;;  %v9554_v19 = vpop.f32.mrb[94].mxu1 }
 0x9e7   :  { %v17223_v51 = vadd.f32 %v9554_v19, %v16229_v35  ;;  %v6918_v33 = vpop.f32.mrb[95].mxu1 }
 0x9e8   :  { %v17226_v20 = vadd.f32 %v6918_v33, %v16221_v3  ;;  %v18549_v3 = vld [vmem:[#allocation49_spill] sm:$0xff] }
 0x9e9   :  { %18540 = vst [vmem:[#allocation106_spill] sm:$0xff] %v17223_v51 }
 0x9ea   :  { %18541 = vst [vmem:[#allocation141_spill] sm:$0xff] %v17226_v20  ;;  %v9557_v54 = vpop.f32.mrb[96].mxu1  ;;  %v18587_v20 = vld [vmem:[#allocation124_spill] sm:$0xff] }
 0x9eb   :  { %v17233_v15 = vadd.f32 %v9557_v54, %v16245_v31  ;;  %v6928_v26 = vpop.f32.mrb[97].mxu1  ;;  %v18547_v54 = vld [vmem:[#allocation50_spill] sm:$0xff] }
 0x9ec   :  { %v17236_v16 = vadd.f32 %v6928_v26, %v16237_v7  ;;  %v18553_v7 = vld [vmem:[#allocation51_spill] sm:$0xff] }
 0x9ed   :  { %18542 = vst [vmem:[#allocation32_spill] sm:$0xff] %v17233_v15 }
 0x9ee   :  { %18543 = vst [vmem:[#allocation80_spill] sm:$0xff] %v17236_v16  ;;  %v9560_v33 = vpop.f32.mrb[98].mxu1 }
 0x9ef   :  { %v17243_v19 = vadd.f32 %v9560_v33, %v16261_v24  ;;  %v6938_v17 = vpop.f32.mrb[99].mxu1  ;;  %v18551_v33 = vld [vmem:[#allocation52_spill] sm:$0xff] }
 0x9f0   :  { %v17246_v12 = vadd.f32 %v6938_v17, %v18545_v5  ;;  %v18557_v17 = vld [vmem:[#allocation115_spill] sm:$0xff] }
 0x9f1   :  { %18544 = vst [vmem:[#allocation107_spill] sm:$0xff] %v17243_v19 }
 0x9f2   :  { %18546 = vst [vmem:[#allocation142_spill] sm:$0xff] %v17246_v12  ;;  %v9563_v26 = vpop.f32.mrb[100].mxu1 }
 0x9f3   :  { %v17253_v35 = vadd.f32 %v9563_v26, %v18547_v54  ;;  %v6948_v15 = vpop.f32.mrb[101].mxu1  ;;  %v18555_v54 = vld [vmem:[#allocation53_spill] sm:$0xff] }
 0x9f4   :  { %v17256_v16 = vadd.f32 %v6948_v15, %v18549_v3  ;;  %v18561_v15 = vld [vmem:[#allocation116_spill] sm:$0xff] }
 0x9f5   :  { %18548 = vst [vmem:[#allocation34_spill] sm:$0xff] %v17253_v35 }
 0x9f6   :  { %18550 = vst [vmem:[#allocation81_spill] sm:$0xff] %v17256_v16  ;;  %v9566_v5 = vpop.f32.mrb[102].mxu1 }
 0x9f7   :  { %v17263_v31 = vadd.f32 %v9566_v5, %v18551_v33  ;;  %v6958_v19 = vpop.f32.mrb[103].mxu1  ;;  %v18559_v33 = vld [vmem:[#allocation54_spill] sm:$0xff] }
 0x9f8   :  { %v17266_v12 = vadd.f32 %v6958_v19, %v18553_v7  ;;  %v18565_v19 = vld [vmem:[#allocation117_spill] sm:$0xff] }
 0x9f9   :  { %18552 = vst [vmem:[#allocation108_spill] sm:$0xff] %v17263_v31 }
 0x9fa   :  { %18554 = vst [vmem:[#allocation8_spill] sm:$0xff] %v17266_v12  ;;  %v9569_v3 = vpop.f32.mrb[104].mxu1 }
 0x9fb   :  { %v17273_v24 = vadd.f32 %v9569_v3, %v18555_v54  ;;  %v6968_v35 = vpop.f32.mrb[105].mxu1  ;;  %v18563_v54 = vld [vmem:[#allocation55_spill] sm:$0xff] }
 0x9fc   :  { %v17276_v16 = vadd.f32 %v6968_v35, %v18557_v17  ;;  %v18568_v35 = vld [vmem:[#allocation118_spill] sm:$0xff] }
 0x9fd   :  { %18556 = vst [vmem:[#allocation35_spill] sm:$0xff] %v17273_v24 }
 0x9fe   :  { %18558 = vst [vmem:[#allocation82_spill] sm:$0xff] %v17276_v16  ;;  %v9572_v7 = vpop.f32.mrb[106].mxu1 }
 0x9ff   :  { %v17283_v26 = vadd.f32 %v9572_v7, %v18559_v33  ;;  %v6978_v31 = vpop.f32.mrb[107].mxu1  ;;  %v18567_v33 = vld [vmem:[#allocation56_spill] sm:$0xff]  ;;  %v17314_v7 = vpop.permute.xlu1 %7532 }
 0xa00   :  { %v17286_v12 = vadd.f32 %v6978_v31, %v18561_v15  ;;  %18571 = vst [vmem:[#allocation83_spill] sm:$0xff] %v17314_v7  ;;  %v17316_v31 = vpop.permute.xlu0 %7527  ;;  %v18585_v7 = vld [vmem:[#allocation16_spill] sm:$0xff] }
 0xa01   :  { %18560 = vst [vmem:[#allocation109_spill] sm:$0xff] %v17283_v26  ;;  %18572 = vst [vmem:[#allocation110_spill] sm:$0xff] %v17316_v31 }
 0xa02   :  { %18562 = vst [vmem:[#allocation9_spill] sm:$0xff] %v17286_v12  ;;  %v9575_v17 = vpop.f32.mrb[108].mxu1 }
 0xa03   :  { %v17293_v5 = vadd.f32 %v9575_v17, %v18563_v54  ;;  %v6988_v24 = vpop.f32.mrb[109].mxu1  ;;  %v18569_v54 = vld [vmem:[#allocation57_spill] sm:$0xff]  ;;  %v17330_v27 = vpop.permute.xlu1 %7452 }
 0xa04   :  { %v17296_v16 = vadd.f32 %v6988_v24, %v18565_v19  ;;  %v18570_v19 = vld [vmem:[#allocation119_spill] sm:$0xff] }
 0xa05   :  { %18564 = vst [vmem:[#allocation43_spill] sm:$0xff] %v17293_v5 }
 0xa06   :  { %18566 = vst [vmem:[#allocation37_spill] sm:$0xff] %v17296_v16  ;;  %v9578_v15 = vpop.f32.mrb[110].mxu1  ;;  %v18573_v16 = vld [vmem:[#allocation58_spill] sm:$0xff] }
 0xa07   :  { %v17303_v3 = vadd.f32 %v9578_v15, %v18567_v33  ;;  %v6998_v26 = vpop.f32.mrb[111].mxu1 }
 0xa08   :  { %v17306_v12 = vadd.f32 %v6998_v26, %v18568_v35  ;;  %v7670_v35 = vld [vmem:[%s17925_s5 + $0x8] sm:$0xff] }
 0xa09   :  { %7797 = vmatprep.mubr.f32.mxu1 %v7670_v35  ;;  %v17343_v35 = vpop.permute.xlu1 %7542 }
 0xa0a   :  { %v9581_v17 = vpop.f32.mrb[112].mxu1  ;;  %18579 = vst [vmem:[#allocation10_spill] sm:$0xff] %v17343_v35 }
 0xa0b   :  { %v17309_v14 = vadd.f32 %v9581_v17, %v18569_v54  ;;  %v7008_v24 = vpop.f32.mrb[113].mxu1  ;;  %v18575_v54 = vld [vmem:[#allocation59_spill] sm:$0xff] }
 0xa0c   :  { %v17312_v45 = vadd.f32 %v7008_v24, %v18570_v19 }
 0xa0d   :  { %v17356_v31 = vpop.permute.xlu1 %7462 }
 0xa0e   :  { %v9584_v5 = vpop.f32.mrb[114].mxu1 }
 0xa0f   :  { %v17319_v15 = vadd.f32 %v9584_v5, %v18573_v16  ;;  %v7018_v33 = vpop.f32.mrb[115].mxu1  ;;  %v17335_v16 = vpop.permute.xlu0 %7447 }
 0xa10   :  { %v17322_v26 = vadd.f32 %v7018_v33, %v18574_v62  ;;  %v18577_v62 = vld [vmem:[#allocation60_spill] sm:$0xff] }
 0xa12   :  { %v9587_v17 = vpop.f32.mrb[116].mxu1 }
 0xa13   :  { %v17328_v24 = vadd.f32 %v9587_v17, %v18575_v54  ;;  %v7028_v19 = vpop.f32.mrb[117].mxu1  ;;  %v17345_v54 = vpop.permute.xlu0 %7537 }
 0xa14   :  { %v17333_v10 = vadd.f32 %v7028_v19, %v18576_v22  ;;  %18580 = vst [vmem:[#allocation47_spill] sm:$0xff] %v17345_v54  ;;  %v18582_v19 = vld [vmem:[#allocation123_spill] sm:$0xff] }
 0xa16   :  { %v9590_v5 = vpop.f32.mrb[118].mxu1 }
 0xa17   :  { %v17338_v33 = vadd.f32 %v9590_v5, %v18577_v62  ;;  %v7038_v55 = vpop.f32.mrb[119].mxu1  ;;  %v17361_v35 = vpop.permute.xlu0 %7457 }
 0xa18   :  { %v17341_v41 = vadd.f32 %v7038_v55, %v18578_v25  ;;  %v18584_v25 = vld [vmem:[#allocation61_spill] sm:$0xff] }
 0xa1a   :  { %v9593_v17 = vpop.f32.mrb[120].mxu1 }
 0xa1b   :  { %v17348_v44 = vadd.f32 %v9593_v17, %v18581_v36  ;;  %v7048_v22 = vpop.f32.mrb[121].mxu1 }
 0xa1c   :  { %v17351_v11 = vadd.f32 %v7048_v22, %v18582_v19  ;;  %v17369_v19 = vpop.permute.xlu1 %7552 }
 0xa1d   :  { %18589 = vst [vmem:[#allocation111_spill] sm:$0xff] %v17369_v19 }
 0xa1e   :  { %v9596_v38 = vpop.f32.mrb[122].mxu1 }
 0xa1f   :  { %v17354_v5 = vadd.f32 %v9596_v38, %v18583_v9  ;;  %v7058_v62 = vpop.f32.mrb[123].mxu1  ;;  %v17371_v38 = vpop.permute.xlu0 %7547 }
 0xa20   :  { %v17359_v55 = vadd.f32 %v7058_v62, %v18584_v25  ;;  %18590 = vst [vmem:[#allocation11_spill] sm:$0xff] %v17371_v38  ;;  %v18593_v25 = vld [vmem:[#allocation62_spill] sm:$0xff]  ;;  %v17382_v30 = vpop.permute.xlu1 %7472 }
 0xa22   :  { %v9599_v54 = vpop.f32.mrb[124].mxu1 }
 0xa23   :  { %v17364_v36 = vadd.f32 %v9599_v54, %v18585_v7  ;;  %v7068_v17 = vpop.f32.mrb[125].mxu1  ;;  %v17387_v19 = vpop.permute.xlu0 %7467 }
 0xa24   :  { %v17367_v22 = vadd.f32 %v7068_v17, %v18587_v20  ;;  %v18597_v20 = vld [vmem:[#allocation125_spill] sm:$0xff] }
 0xa25   :  { %18586 = vst [vmem:[#allocation38_spill] sm:$0xff] %v17364_v36  ;;  %v18609_v36 = vld [vmem:[#allocation64_spill] sm:$0xff] }
 0xa26   :  { %18588 = vst [vmem:[#allocation84_spill] sm:$0xff] %v17367_v22  ;;  %v9602_v9 = vpop.f32.mrb[126].mxu1 }
 0xa27   :  { %v17374_v51 = vadd.f32 %v9602_v9, %v18591_v42  ;;  %v7078_v62 = vpop.f32.mrb[127].mxu1 }
 0xa28   :  { %v17377_v63 = vadd.f32 %v7078_v62, %v18593_v25  ;;  %v17395_v25 = vpop.permute.xlu1 %7562 }
 0xa29   :  { %18592 = vst [vmem:[#allocation46_spill] sm:$0xff] %v17374_v51  ;;  %v18601_v51 = vld [vmem:[#allocation63_spill] sm:$0xff]  ;;  %18603 = vst [vmem:[#allocation86_spill] sm:$0xff] %v17395_v25 }
 0xa2a   :  { %18594 = vst [vmem:[#allocation40_spill] sm:$0xff] %v17377_v63  ;;  %v9605_v4 = vpop.f32.mrb[128].mxu1 }
 0xa2b   :  { %v17380_v7 = vadd.f32 %v9605_v4, %v18595_v32  ;;  %v7088_v54 = vpop.f32.mrb[129].mxu1  ;;  %v17397_v4 = vpop.permute.xlu0 %7557 }
 0xa2c   :  { %v17385_v17 = vadd.f32 %v7088_v54, %v18597_v20  ;;  %18604 = vst [vmem:[#allocation113_spill] sm:$0xff] %v17397_v4  ;;  %v18607_v20 = vld [vmem:[#allocation126_spill] sm:$0xff] }
 0xa2d   :  { %18596 = vst [vmem:[#allocation85_spill] sm:$0xff] %v17380_v7  ;;  %v18605_v7 = vld [vmem:[#allocation24_spill] sm:$0xff] }
 0xa2e   :  { %18598 = vst [vmem:[#allocation112_spill] sm:$0xff] %v17385_v17  ;;  %v9608_v38 = vpop.f32.mrb[130].mxu1 }
 0xa2f   :  { %v17390_v42 = vadd.f32 %v9608_v38, %v18599_v6  ;;  %v7098_v9 = vpop.f32.mrb[131].mxu1  ;;  %v17413_v25 = vpop.permute.xlu0 %7477 }
 0xa30   :  { %v17393_v62 = vadd.f32 %v7098_v9, %v18601_v51  ;;  %v18611_v51 = vld [vmem:[#allocation18_spill] sm:$0xff] }
 0xa31   :  { %18600 = vst [vmem:[#allocation12_spill] sm:$0xff] %v17390_v42  ;;  %v17408_v42 = vpop.permute.xlu1 %7482 }
 0xa32   :  { %18602 = vst [vmem:[#allocation41_spill] sm:$0xff] %v17393_v62  ;;  %v9611_v32 = vpop.f32.mrb[132].mxu1  ;;  %v18613_v62 = vld [vmem:[#allocation127_spill] sm:$0xff] }
 0xa33   :  { %v17400_v63 = vadd.f32 %v9611_v32, %v18605_v7  ;;  %v7108_v54 = vpop.f32.mrb[133].mxu1 }
 0xa34   :  { %v17403_v17 = vadd.f32 %v7108_v54, %v18607_v20 }
 0xa35   :  { %18606 = vst [vmem:[#allocation13_spill] sm:$0xff] %v17400_v63  ;;  %v18615_v63 = vld [vmem:[#allocation90_spill] sm:$0xff]  ;;  %v17421_v20 = vpop.permute.xlu1 %7572 }
 0xa36   :  { %18608 = vst [vmem:[#allocation44_spill] sm:$0xff] %v17403_v17  ;;  %v9614_v22 = vpop.f32.mrb[134].mxu1  ;;  %18617 = vst [vmem:[#allocation49_spill] sm:$0xff] %v17421_v20  ;;  %v18627_v20 = vld [vmem:[#allocation20_spill] sm:$0xff] }
 0xa37   :  { %v17406_v6 = vadd.f32 %v9614_v22, %v18609_v36  ;;  %v7118_v38 = vpop.f32.mrb[135].mxu1  ;;  %v17423_v22 = vpop.permute.xlu0 %7567 }
 0xa38   :  { %v17411_v9 = vadd.f32 %v7118_v38, %v18611_v51  ;;  %18618 = vst [vmem:[#allocation52_spill] sm:$0xff] %v17423_v22  ;;  %v18621_v51 = vld [vmem:[#allocation23_spill] sm:$0xff] }
 0xa39   :  { %18610 = vst [vmem:[#allocation114_spill] sm:$0xff] %v17406_v6  ;;  %v18619_v6 = vld [vmem:[#allocation19_spill] sm:$0xff] }
 0xa3a   :  { %18612 = vst [vmem:[#allocation14_spill] sm:$0xff] %v17411_v9  ;;  %v9617_v4 = vpop.f32.mrb[136].mxu1 }
 0xa3b   :  { %v17416_v7 = vadd.f32 %v9617_v4, %v18613_v62  ;;  %v7128_v32 = vpop.f32.mrb[137].mxu1 }
 0xa3c   :  { %v17419_v54 = vadd.f32 %v7128_v32, %v18615_v63  ;;  %v18625_v63 = vld [vmem:[#allocation65_spill] sm:$0xff] }
 0xa3d   :  { %18614 = vst [vmem:[#allocation48_spill] sm:$0xff] %v17416_v7  ;;  %v17434_v7 = vpop.permute.xlu1 %7492 }
 0xa3e   :  { %18616 = vst [vmem:[#allocation50_spill] sm:$0xff] %v17419_v54  ;;  %v9620_v36 = vpop.f32.mrb[138].mxu1  ;;  %v17439_v54 = vpop.permute.xlu0 %7487 }
 0xa3f   :  { %v17426_v17 = vadd.f32 %v9620_v36, %v18619_v6  ;;  %v7138_v38 = vpop.f32.mrb[139].mxu1 }
 0xa40   :  { %v17429_v9 = vadd.f32 %v7138_v38, %v18621_v51 }
 0xa41   :  { %18620 = vst [vmem:[#allocation51_spill] sm:$0xff] %v17426_v17  ;;  %v18628_v17 = vld [vmem:[#allocation128_spill] sm:$0xff]  ;;  %v17444_v51 = vpop.permute.xlu1 %7582 }
 0xa42   :  { %18622 = vst [vmem:[#allocation53_spill] sm:$0xff] %v17429_v9  ;;  %v9623_v56 = vpop.f32.mrb[140].mxu1 }
 0xa43   :  { %v17432_v62 = vadd.f32 %v9623_v56, %v18623_v58  ;;  %v7148_v4 = vpop.f32.mrb[141].mxu1 }
 0xa44   :  { %v17437_v32 = vadd.f32 %v7148_v4, %v18625_v63  ;;  %v18630_v4 = vmax.f32 %v16969_v49, %v17143_v60  ;;  %v18634_v60 = vmax.f32 %v16983_v29, %v17153_v46 }
 0xa45   :  { %18624 = vst [vmem:[#allocation115_spill] sm:$0xff] %v17432_v62  ;;  %v17447_v62 = vpop.permute.xlu0 %7577 }
 0xa46   :  { %18626 = vst [vmem:[#allocation54_spill] sm:$0xff] %v17437_v32  ;;  %v9626_v22 = vpop.f32.mrb[142].mxu1  ;;  %18629 = vst [vmem:[#allocation116_spill] sm:$0xff] %v17447_v62  ;;  %v18631_v32 = vld [vmem:[#allocation92_spill] sm:$0xff] }
 0xa47   :  { %v7164_v6 = vadd.f32 %v9626_v22, %v18627_v20  ;;  %v7158_v36 = vpop.f32.mrb[143].mxu1  ;;  %v18632_v20 = vmax.f32 %v16973_v39, %v17146_v52  ;;  %v18633_v22 = vld [vmem:[#allocation66_spill] sm:$0xff]  ;;  %v7503_v52 = vpop.permute.xlu1 %7502 }
 0xa48   :  { %v7159_v0 = vadd.f32 %v7158_v36, %v18628_v17 }
 0xa49   :  { %v7350_v38 = vmax.f32 %v17303_v3, %v7164_v6 }
 0xa4a   :  { %v7349_v58 = vmax.f32 %v17306_v12, %v7159_v0  ;;  %v9629_v56 = vpop.f32.mrb[144].mxu1 }
 0xa4b   :  { %v7382_v63 = vmax.f32 %v18630_v4, %v7350_v38  ;;  %v7174_v9 = vadd.f32 %v9629_v56, %v18631_v32  ;;  %v7168_v61 = vpop.f32.mrb[145].mxu1  ;;  %v18635_v38 = vld [vmem:[#allocation27_spill] sm:$0xff] }
 0xa4c   :  { %v7381_v17 = vmax.f32 %v18632_v20, %v7349_v58  ;;  %v7169_v3 = vadd.f32 %v7168_v61, %v18633_v22  ;;  %v18636_v61 = vmax.f32 %v16987_v59, %v17156_v34  ;;  %v18639_v34 = vld [vmem:[#allocation67_spill] sm:$0xff] }
 0xa4d   :  { %v7606_v6 = vadd.f32 %v17330_v27, %v7382_v63  ;;  %v7352_v12 = vmax.f32 %v17309_v14, %v7174_v9  ;;  %v18637_v14 = vld [vmem:[#allocation129_spill] sm:$0xff] }
 0xa4e   :  { %v7605_v0 = vadd.f32 %v17335_v16, %v7381_v17  ;;  %v7351_v36 = vmax.f32 %v17312_v45, %v7169_v3  ;;  %v9632_v62 = vpop.f32.mrb[146].mxu1  ;;  %v7498_v16 = vpop.permute.xlu0 %7497  ;;  %v18638_v17 = vmax.f32 %v16997_v28, %v17163_v23 }
 0xa4f   :  { %v7638_v49 = vmax.f32 %v7606_v6, 0.0  ;;  %v7384_v32 = vmax.f32 %v18634_v60, %v7352_v12  ;;  %v7184_v56 = vadd.f32 %v9632_v62, %v18635_v38  ;;  %v7178_v39 = vpop.f32.mrb[147].mxu1  ;;  %v18641_v12 = vld [vmem:[#allocation21_spill] sm:$0xff] }
 0xa50   :  { %v7637_v58 = vmax.f32 %v7605_v0, 0.0  ;;  %v7383_v27 = vmax.f32 %v18636_v61, %v7351_v36  ;;  %v7179_v9 = vadd.f32 %v7178_v39, %v18637_v14  ;;  %v17485_v36 = vpop.permute.xlu1 %7592  ;;  %v18645_v61 = vld [vmem:[#allocation93_spill] sm:$0xff] }
 0xa51   :  { %v7608_v45 = vadd.f32 %v17356_v31, %v7384_v32  ;;  %v7354_v4 = vmax.f32 %v17319_v15, %v7184_v56  ;;  %v18640_v31 = vmax.f32 %v17001_v50, %v17166_v8  ;;  %v18642_v50 = vmax.f32 %v17011_v13, %v17173_v2  ;;  %v18643_v56 = vld [vmem:[#allocation130_spill] sm:$0xff] }
 0xa52   :  { %v7607_v63 = vadd.f32 %v17361_v35, %v7383_v27  ;;  %v7353_v29 = vmax.f32 %v17322_v26, %v7179_v9  ;;  %v9635_v46 = vpop.f32.mrb[148].mxu1  ;;  %v17473_v62 = vpack.c.bf16 %v7638_v49, %v7637_v58  ;;  %v17491_v32 = vpop.permute.xlu0 %7587  ;;  %v18644_v58 = vmax.f32 %v17015_v53, %v17176_v21  ;;  %v18647_v53 = vld [vmem:[#allocation68_spill] sm:$0xff] }
 0xa53   :  { %v7640_v20 = vmax.f32 %v7608_v45, 0.0  ;;  %v7386_v59 = vmax.f32 %v18638_v17, %v7354_v4  ;;  %v7194_v22 = vadd.f32 %v9635_v46, %v18639_v34  ;;  %v7188_v3 = vpop.f32.mrb[149].mxu1 }
 0xa54   :  { %v7639_v6 = vmax.f32 %v7607_v63, 0.0  ;;  %v7385_v15 = vmax.f32 %v18640_v31, %v7353_v29  ;;  %v7189_v35 = vadd.f32 %v7188_v3, %v18641_v12  ;;  %v18646_v63 = vmax.f32 %v17025_v37, %v17183_v18 }
 0xa55   :  { %v7610_v26 = vadd.f32 %v17382_v30, %v7386_v59  ;;  %v7356_v0 = vmax.f32 %v17328_v24, %v7194_v22 }
 0xa56   :  { %v7609_v49 = vadd.f32 %v17387_v19, %v7385_v15  ;;  %v7355_v28 = vmax.f32 %v17333_v10, %v7189_v35  ;;  %v9638_v23 = vpop.f32.mrb[150].mxu1  ;;  %v17489_v60 = vpack.c.bf16 %v7640_v20, %v7639_v6  ;;  %v7513_v20 = vpop.permute.xlu1 %7512  ;;  %v18650_v15 = vmax.f32 %v17039_v1, %v17193_v57 }
 0xa57   :  { %v7642_v38 = vmax.f32 %v7610_v26, 0.0  ;;  %v7388_v8 = vmax.f32 %v18642_v50, %v7356_v0  ;;  %v7204_v30 = vadd.f32 %v9638_v23, %v18643_v56  ;;  %v7198_v39 = vpop.f32.mrb[151].mxu1  ;;  %v18653_v0 = vld [vmem:[#allocation94_spill] sm:$0xff]  ;;  %v18654_v56 = vld [vmem:[#allocation99_spill] sm:$0xff] }
 0xa58   :  { %v7641_v24 = vmax.f32 %v7609_v49, 0.0  ;;  %v7387_v19 = vmax.f32 %v18644_v58, %v7355_v28  ;;  %v7199_v10 = vadd.f32 %v7198_v39, %v18645_v61  ;;  %v18657_v39 = vld [vmem:[#allocation69_spill] sm:$0xff] }
 0xa59   :  { %v7612_v27 = vadd.f32 %v17408_v42, %v7388_v8  ;;  %v7358_v14 = vmax.f32 %v17338_v33, %v7204_v30  ;;  %v18648_v33 = vmax.f32 %v17029_v40, %v17186_v43  ;;  %v18651_v43 = vld [vmem:[#allocation131_spill] sm:$0xff]  ;;  %v18655_v30 = vld [vmem:[#allocation105_spill] sm:$0xff] }
 0xa5a   :  { %v7611_v9 = vadd.f32 %v17413_v25, %v7387_v19  ;;  %v7357_v45 = vmax.f32 %v17341_v41, %v7199_v10  ;;  %v9641_v13 = vpop.f32.mrb[152].mxu1  ;;  %v17505_v2 = vpack.c.bf16 %v7642_v38, %v7641_v24  ;;  %v18649_v25 = vld [vmem:[#allocation22_spill] sm:$0xff]  ;;  %v7508_v41 = vpop.permute.xlu0 %7507  ;;  %v18659_v19 = vld [vmem:[#allocation140_spill] sm:$0xff]  ;;  %v18661_v10 = vld [vmem:[#allocation25_spill] sm:$0xff] }
 0xa5b   :  { %v7644_v4 = vmax.f32 %v7612_v27, 0.0  ;;  %v7390_v29 = vmax.f32 %v18646_v63, %v7358_v14  ;;  %v7214_v21 = vadd.f32 %v9641_v13, %v18647_v53  ;;  %v7208_v46 = vpop.f32.mrb[153].mxu1  ;;  %v17530_v28 = vpop.permute.xlu1 %7602  ;;  %v18662_v14 = vld [vmem:[#allocation38_spill] sm:$0xff]  ;;  %v18663_v13 = vld [vmem:[#allocation84_spill] sm:$0xff] }
 0xa5c   :  { %v7643_v17 = vmax.f32 %v7611_v9, 0.0  ;;  %v7389_v42 = vmax.f32 %v18648_v33, %v7357_v45  ;;  %v7209_v59 = vadd.f32 %v7208_v46, %v18649_v25  ;;  %v18665_v46 = vld [vmem:[#allocation31_spill] sm:$0xff] }
 0xa5d   :  { %v7614_v34 = vadd.f32 %v17434_v7, %v7390_v29  ;;  %v7360_v22 = vmax.f32 %v17348_v44, %v7214_v21  ;;  %v18652_v7 = vmax.f32 %v17043_v48, %v17196_v47  ;;  %v18656_v48 = vmax.f32 %v18654_v56, %v18655_v30  ;;  %v18664_v21 = vld [vmem:[#allocation39_spill] sm:$0xff] }
 0xa5e   :  { %v7613_v3 = vadd.f32 %v17439_v54, %v7389_v42  ;;  %v7359_v37 = vmax.f32 %v17351_v11, %v7209_v59  ;;  %v9644_v18 = vpop.f32.mrb[154].mxu1  ;;  %v17519_v6 = vpack.c.bf16 %v7644_v4, %v7643_v17  ;;  %v17535_v50 = vpop.permute.xlu0 %7597  ;;  %v18666_v17 = vmax.f32 %v18664_v21, %v18665_v46  ;;  %v18667_v42 = vld [vmem:[#allocation132_spill] sm:$0xff]  ;;  %v18689_v21 = vld [vmem:[#allocation133_spill] sm:$0xff] }
 0xa5f   :  { %v7646_v31 = vmax.f32 %v7614_v34, 0.0  ;;  %v7392_v40 = vmax.f32 %v18650_v15, %v7360_v22  ;;  %v7224_v12 = vadd.f32 %v9644_v18, %v18651_v43  ;;  %v7218_v35 = vpop.f32.mrb[155].mxu1  ;;  %v7523_v34 = vpop.permute.xlu1 %7522  ;;  %v18672_v43 = vld [vmem:[#allocation46_spill] sm:$0xff] }
 0xa60   :  { %v7645_v26 = vmax.f32 %v7613_v3, 0.0  ;;  %v7391_v44 = vmax.f32 %v18652_v7, %v7359_v37  ;;  %v7219_v54 = vadd.f32 %v7218_v35, %v18653_v0  ;;  %v18668_v3 = vld [vmem:[#allocation74_spill] sm:$0xff] }
 0xa61   :  { %v7616_v49 = vadd.f32 %v7503_v52, %v7392_v40  ;;  %v7362_v11 = vmax.f32 %v17354_v5, %v7224_v12  ;;  %v18658_v5 = vld [vmem:[#allocation136_spill] sm:$0xff] }
 0xa62   :  { %v7615_v23 = vadd.f32 %v7498_v16, %v7391_v44  ;;  %v7361_v38 = vmax.f32 %v17359_v55, %v7219_v54  ;;  %v9647_v1 = vpop.f32.mrb[156].mxu1  ;;  %v17533_v57 = vpack.c.bf16 %v7646_v31, %v7645_v26  ;;  %v18660_v61 = vmax.f32 %v18658_v5, %v18659_v19  ;;  %v7518_v15 = vpop.permute.xlu0 %7517  ;;  %v18673_v26 = vld [vmem:[#allocation40_spill] sm:$0xff]  ;;  %v18682_v5 = vld [vmem:[#allocation85_spill] sm:$0xff] }
 0xa63   :  { %v7648_v8 = vmax.f32 %v7616_v49, 0.0  ;;  %v7394_v47 = vmax.f32 %v18656_v48, %v7362_v11  ;;  %v7234_v24 = vadd.f32 %v9647_v1, %v18657_v39  ;;  %v7228_v52 = vpop.f32.mrb[157].mxu1  ;;  %v18674_v49 = vld [vmem:[#allocation100_spill] sm:$0xff]  ;;  %v18675_v11 = vld [vmem:[#allocation106_spill] sm:$0xff]  ;;  %v18678_v48 = vld [vmem:[#allocation137_spill] sm:$0xff] }
 0xa64   :  { %v7647_v58 = vmax.f32 %v7615_v23, 0.0  ;;  %v7393_v16 = vmax.f32 %v18660_v61, %v7361_v38  ;;  %v7229_v55 = vadd.f32 %v7228_v52, %v18661_v10  ;;  %v18676_v23 = vmax.f32 %v18674_v49, %v18675_v11  ;;  %v18677_v1 = vld [vmem:[#allocation70_spill] sm:$0xff]  ;;  %v18683_v61 = vld [vmem:[#allocation83_spill] sm:$0xff]  ;;  %v18684_v10 = vld [vmem:[#allocation112_spill] sm:$0xff] }
 0xa65   :  { %v7618_v27 = vadd.f32 %v7513_v20, %v7394_v47  ;;  %v7364_v9 = vmax.f32 %v18662_v14, %v7234_v24  ;;  %v18669_v20 = vld [vmem:[#allocation79_spill] sm:$0xff]  ;;  %v18679_v47 = vld [vmem:[#allocation141_spill] sm:$0xff]  ;;  %v18681_v52 = vld [vmem:[#allocation26_spill] sm:$0xff] }
 0xa66   :  { %v7617_v45 = vadd.f32 %v7508_v41, %v7393_v16  ;;  %v7363_v4 = vmax.f32 %v18663_v13, %v7229_v55  ;;  %v9650_v63 = vpop.f32.mrb[158].mxu1  ;;  %v17547_v29 = vpack.c.bf16 %v7648_v8, %v7647_v58  ;;  %v18670_v37 = vmax.f32 %v18668_v3, %v18669_v20  ;;  %v18671_v41 = vld [vmem:[#allocation95_spill] sm:$0xff]  ;;  %v18685_v14 = vld [vmem:[#allocation110_spill] sm:$0xff] }
 0xa67   :  { %v7650_v53 = vmax.f32 %v7618_v27, 0.0  ;;  %v7396_v33 = vmax.f32 %v18666_v17, %v7364_v9  ;;  %v7244_v25 = vadd.f32 %v9650_v63, %v18667_v42  ;;  %v7238_v59 = vpop.f32.mrb[159].mxu1  ;;  %v18680_v39 = vmax.f32 %v18678_v48, %v18679_v47  ;;  %v18686_v13 = vld [vmem:[#allocation42_spill] sm:$0xff]  ;;  %v18690_v42 = vld [vmem:[#allocation75_spill] sm:$0xff] }
 0xa68   :  { %v7649_v22 = vmax.f32 %v7617_v45, 0.0  ;;  %v7395_v18 = vmax.f32 %v18670_v37, %v7363_v4  ;;  %v7239_v31 = vadd.f32 %v7238_v59, %v18671_v41  ;;  %v18687_v4 = vld [vmem:[#allocation32_spill] sm:$0xff]  ;;  %v18695_v41 = vld [vmem:[#allocation10_spill] sm:$0xff]  ;;  %v18701_v11 = vld [vmem:[#allocation71_spill] sm:$0xff] }
 0xa69   :  { %v7620_v40 = vadd.f32 %v7523_v34, %v7396_v33  ;;  %v7366_v12 = vmax.f32 %v18672_v43, %v7244_v25  ;;  %v18688_v63 = vmax.f32 %v18686_v13, %v18687_v4  ;;  %v18691_v25 = vld [vmem:[#allocation80_spill] sm:$0xff]  ;;  %v18705_v47 = vld [vmem:[#allocation30_spill] sm:$0xff] }
 0xa6a   :  { %v7619_v35 = vadd.f32 %v7518_v15, %v7395_v18  ;;  %v7365_v7 = vmax.f32 %v18673_v26, %v7239_v31  ;;  %v9653_v44 = vpop.f32.mrb[160].mxu1  ;;  %v17559_v0 = vpack.c.bf16 %v7650_v53, %v7649_v22  ;;  %v18692_v59 = vmax.f32 %v18690_v42, %v18691_v25  ;;  %v18693_v22 = vld [vmem:[#allocation96_spill] sm:$0xff]  ;;  %v18696_v15 = vld [vmem:[#allocation41_spill] sm:$0xff]  ;;  %v18711_v13 = vld [vmem:[#allocation34_spill] sm:$0xff] }
 0xa6b   :  { %v7652_v54 = vmax.f32 %v7620_v40, 0.0  ;;  %v7398_v38 = vmax.f32 %v18676_v23, %v7366_v12  ;;  %v7254_v8 = vadd.f32 %v9653_v44, %v18677_v1  ;;  %v7248_v56 = vpop.f32.mrb[161].mxu1  ;;  %v18694_v37 = vld [vmem:[#allocation12_spill] sm:$0xff]  ;;  %v18699_v44 = vld [vmem:[#allocation107_spill] sm:$0xff]  ;;  %v18715_v42 = vld [vmem:[#allocation81_spill] sm:$0xff] }
 0xa6c   :  { %v7651_v30 = vmax.f32 %v7619_v35, 0.0  ;;  %v7397_v24 = vmax.f32 %v18680_v39, %v7365_v7  ;;  %v7249_v58 = vadd.f32 %v7248_v56, %v18681_v52  ;;  %v18697_v35 = vld [vmem:[#allocation47_spill] sm:$0xff]  ;;  %v18698_v7 = vld [vmem:[#allocation101_spill] sm:$0xff]  ;;  %v18703_v56 = vld [vmem:[#allocation142_spill] sm:$0xff] }
 0xa6d   :  { %v7368_v19 = vmax.f32 %v18682_v5, %v7254_v8  ;;  %v7622_v16 = vadd.f32 %v18683_v61, %v7398_v38  ;;  %v18702_v8 = vld [vmem:[#allocation104_spill] sm:$0xff]  ;;  %v18706_v52 = vld [vmem:[#allocation13_spill] sm:$0xff]  ;;  %v18707_v5 = vld [vmem:[#allocation111_spill] sm:$0xff] }
 0xa6e   :  { %v7367_v55 = vmax.f32 %v18684_v10, %v7249_v58  ;;  %v9656_v27 = vpop.f32.mrb[162].mxu1  ;;  %v7621_v9 = vadd.f32 %v18685_v14, %v7397_v24  ;;  %v17573_v45 = vpack.c.bf16 %v7652_v54, %v7651_v30  ;;  %v18700_v54 = vmax.f32 %v18698_v7, %v18699_v44  ;;  %v18708_v61 = vld [vmem:[#allocation44_spill] sm:$0xff] }
 0xa6f   :  { %v7400_v53 = vmax.f32 %v18688_v63, %v7368_v19  ;;  %v7264_v46 = vadd.f32 %v9656_v27, %v18689_v21  ;;  %v7258_v17 = vpop.f32.mrb[163].mxu1  ;;  %v7654_v33 = vmax.f32 %v7622_v16, 0.0  ;;  %v18704_v30 = vmax.f32 %v18702_v8, %v18703_v56  ;;  %v18709_v27 = vld [vmem:[#allocation11_spill] sm:$0xff]  ;;  %v18729_v56 = vld [vmem:[#allocation33_spill] sm:$0xff] }
 0xa70   :  { %v7399_v34 = vmax.f32 %v18692_v59, %v7367_v55  ;;  %v7259_v3 = vadd.f32 %v7258_v17, %v18693_v22  ;;  %v7653_v20 = vmax.f32 %v7621_v9, 0.0  ;;  %v18710_v9 = vld [vmem:[#allocation45_spill] sm:$0xff] }
 0xa71   :  { %v7370_v18 = vmax.f32 %v18694_v37, %v7264_v46  ;;  %v7624_v31 = vadd.f32 %v18695_v41, %v7400_v53  ;;  %v18712_v4 = vmax.f32 %v18710_v9, %v18711_v13  ;;  %v18713_v53 = vld [vmem:[#allocation134_spill] sm:$0xff]  ;;  %v18717_v59 = vld [vmem:[#allocation97_spill] sm:$0xff]  ;;  %v18737_v13 = vld [vmem:[#allocation135_spill] sm:$0xff] }
 0xa72   :  { %v7369_v40 = vmax.f32 %v18696_v15, %v7259_v3  ;;  %v9659_v43 = vpop.f32.mrb[164].mxu1  ;;  %v9895_v12 = vpack.c.bf16 %v7654_v33, %v7653_v20  ;;  %v7623_v26 = vadd.f32 %v18697_v35, %v7399_v34  ;;  %v18714_v33 = vld [vmem:[#allocation76_spill] sm:$0xff]  ;;  %v18718_v3 = vld [vmem:[#allocation114_spill] sm:$0xff] }
 0xa73   :  { %v7402_v49 = vmax.f32 %v18700_v54, %v7370_v18  ;;  %v7274_v23 = vadd.f32 %v9659_v43, %v18701_v11  ;;  %v7268_v38 = vpop.f32.mrb[165].mxu1  ;;  %v7656_v1 = vmax.f32 %v7624_v31, 0.0  ;;  %v18716_v25 = vmax.f32 %v18714_v33, %v18715_v42  ;;  %v18719_v37 = vld [vmem:[#allocation86_spill] sm:$0xff]  ;;  %v18721_v43 = vld [vmem:[#allocation113_spill] sm:$0xff]  ;;  %v18725_v54 = vld [vmem:[#allocation72_spill] sm:$0xff] }
 0xa74   :  { %v7401_v48 = vmax.f32 %v18704_v30, %v7369_v40  ;;  %v7269_v39 = vadd.f32 %v7268_v38, %v18705_v47  ;;  %9896 = vmatprep.subr.bf16.mxu1 %v9895_v12  ;;  %v7655_v24 = vmax.f32 %v7623_v26, 0.0  ;;  %v18720_v41 = vld [vmem:[#allocation14_spill] sm:$0xff]  ;;  %v18723_v26 = vld [vmem:[#allocation108_spill] sm:$0xff] }
 0xa75   :  { %v7372_v58 = vmax.f32 %v18706_v52, %v7274_v23  ;;  %9898 = vmatpush3.bf16.msra.mxu1 %v17473_v62  ;;  %v7626_v19 = vadd.f32 %v18707_v5, %v7402_v49  ;;  %v18722_v35 = vld [vmem:[#allocation102_spill] sm:$0xff]  ;;  %v18730_v47 = vld [vmem:[#allocation48_spill] sm:$0xff] }
 0xa76   :  { %v7371_v16 = vmax.f32 %v18708_v61, %v7269_v39  ;;  %v9662_v10 = vpop.f32.mrb[166].mxu1  ;;  %v9899_v55 = vpack.c.bf16 %v7656_v1, %v7655_v24  ;;  %v7625_v14 = vadd.f32 %v18709_v27, %v7401_v48  ;;  %v18724_v7 = vmax.f32 %v18722_v35, %v18723_v26  ;;  %v18726_v38 = vld [vmem:[#allocation138_spill] sm:$0xff]  ;;  %v18727_v1 = vld [vmem:[#allocation8_spill] sm:$0xff]  ;;  %v18731_v24 = vld [vmem:[#allocation49_spill] sm:$0xff] }
 0xa77   :  { %v7404_v63 = vmax.f32 %v18712_v4, %v7372_v58  ;;  %v7284_v21 = vadd.f32 %v9662_v10, %v18713_v53  ;;  %v7278_v46 = vpop.f32.mrb[167].mxu1  ;;  %v7658_v17 = vmax.f32 %v7626_v19, 0.0  ;;  %v18728_v8 = vmax.f32 %v18726_v38, %v18727_v1  ;;  %v18732_v58 = vld [vmem:[#allocation50_spill] sm:$0xff]  ;;  %v18735_v27 = vld [vmem:[#allocation35_spill] sm:$0xff] }
 0xa78   :  { %v7403_v62 = vmax.f32 %v18716_v25, %v7371_v16  ;;  %v7279_v34 = vadd.f32 %v7278_v46, %v18717_v59  ;;  %9900 = vmatprep.subr.bf16.mxu1 %v9899_v55  ;;  %v7657_v22 = vmax.f32 %v7625_v14, 0.0  ;;  %v18733_v16 = vld [vmem:[#allocation52_spill] sm:$0xff]  ;;  %v18739_v46 = vld [vmem:[#allocation82_spill] sm:$0xff]  ;;  %v18753_v38 = vld [vmem:[#allocation115_spill] sm:$0xff] }
 0xa79   :  { %v7374_v20 = vmax.f32 %v18718_v3, %v7284_v21  ;;  %9902 = vmatpush3.bf16.msra.mxu1 %v17489_v60  ;;  %v7628_v18 = vadd.f32 %v18719_v37, %v7404_v63  ;;  %v18734_v55 = vld [vmem:[#allocation28_spill] sm:$0xff]  ;;  %v18738_v21 = vld [vmem:[#allocation77_spill] sm:$0xff]  ;;  %v18741_v33 = vld [vmem:[#allocation98_spill] sm:$0xff] }
 0xa7a   :  { %v7373_v31 = vmax.f32 %v18720_v41, %v7279_v34  ;;  %v9665_v15 = vpop.f32.mrb[168].mxu1  ;;  %v9903_v40 = vpack.c.bf16 %v7658_v17, %v7657_v22  ;;  %v7627_v12 = vadd.f32 %v18721_v43, %v7403_v62  ;;  %v18736_v14 = vmax.f32 %v18734_v55, %v18735_v27  ;;  %v18742_v62 = vld [vmem:[#allocation51_spill] sm:$0xff]  ;;  %v18743_v22 = vld [vmem:[#allocation53_spill] sm:$0xff] }
 0xa7b   :  { %v7406_v44 = vmax.f32 %v18724_v7, %v7374_v20  ;;  %v7294_v49 = vadd.f32 %v9665_v15, %v18725_v54  ;;  %v7288_v11 = vpop.f32.mrb[169].mxu1  ;;  %v7660_v23 = vmax.f32 %v7628_v18, 0.0  ;;  %v18740_v17 = vmax.f32 %v18738_v21, %v18739_v46  ;;  %v18744_v18 = vld [vmem:[#allocation116_spill] sm:$0xff]  ;;  %v18746_v15 = vld [vmem:[#allocation109_spill] sm:$0xff]  ;;  %v7680_v21 = vld [vmem:[%s17925_s5 + $0x58] sm:$0xff] }
 0xa7c   :  { %v7405_v60 = vmax.f32 %v18728_v8, %v7373_v31  ;;  %v7289_v30 = vadd.f32 %v7288_v11, %v18729_v56  ;;  %9904 = vmatprep.subr.bf16.mxu1 %v9903_v40  ;;  %v7659_v48 = vmax.f32 %v7627_v12, 0.0  ;;  %v18745_v31 = vld [vmem:[#allocation103_spill] sm:$0xff]  ;;  %v18748_v12 = vld [vmem:[#allocation73_spill] sm:$0xff]  ;;  %v18752_v11 = vld [vmem:[#allocation36_spill] sm:$0xff] }
 0xa7d   :  { %v7376_v39 = vmax.f32 %v18730_v47, %v7294_v49  ;;  %9906 = vmatpush3.bf16.msra.mxu1 %v17505_v2  ;;  %v7630_v52 = vadd.f32 %v18731_v24, %v7406_v44  ;;  %v18747_v40 = vmax.f32 %v18745_v31, %v18746_v15  ;;  %v18749_v44 = vld [vmem:[#allocation139_spill] sm:$0xff]  ;;  %v18750_v54 = vld [vmem:[#allocation9_spill] sm:$0xff]  ;;  %v7679_v46 = vld [vmem:[%s17925_s5 + $0x50] sm:$0xff] }
 0xa7e   :  { %v7375_v5 = vmax.f32 %v18732_v58, %v7289_v30  ;;  %v9668_v19 = vpop.f32.mrb[170].mxu1  ;;  %v9907_v61 = vpack.c.bf16 %v7660_v23, %v7659_v48  ;;  %v7629_v10 = vadd.f32 %v18733_v16, %v7405_v60  ;;  %v18751_v49 = vmax.f32 %v18749_v44, %v18750_v54  ;;  %v18754_v60 = vld [vmem:[#allocation54_spill] sm:$0xff]  ;;  %v18755_v47 = vld [vmem:[#allocation29_spill] sm:$0xff] }
 0xa7f   :  { %v7408_v9 = vmax.f32 %v18736_v14, %v7376_v39  ;;  %v7304_v4 = vadd.f32 %v9668_v19, %v18737_v13  ;;  %v7298_v63 = vpop.f32.mrb[171].mxu1  ;;  %v7662_v53 = vmax.f32 %v7630_v52, 0.0  ;;  %v18756_v39 = vld [vmem:[#allocation43_spill] sm:$0xff]  ;;  %v18759_v19 = vld [vmem:[#allocation37_spill] sm:$0xff] }
 0xa80   :  { %v7407_v2 = vmax.f32 %v18740_v17, %v7375_v5  ;;  %v7299_v42 = vadd.f32 %v7298_v63, %v18741_v33  ;;  %9908 = vmatprep.subr.bf16.mxu1 %v9907_v61  ;;  %v7661_v25 = vmax.f32 %v7629_v10, 0.0  ;;  %v18757_v24 = vmax.f32 %v18755_v47, %v18756_v39  ;;  %v18758_v5 = vld [vmem:[#allocation78_spill] sm:$0xff]  ;;  %v7676_v13 = vld [vmem:[%s17925_s5 + $0x38] sm:$0xff]  ;;  %v7678_v63 = vld [vmem:[%s17925_s5 + $0x48] sm:$0xff] }
 0xa81   :  { %v7378_v59 = vmax.f32 %v18742_v62, %v7304_v4  ;;  %9910 = vmatpush3.bf16.msra.mxu1 %v17519_v6  ;;  %v7632_v34 = vadd.f32 %v17444_v51, %v7408_v9  ;;  %v18760_v61 = vmax.f32 %v18758_v5, %v18759_v19  ;;  %v7669_v9 = vld [vmem:[%s17925_s5] sm:$0xff]  ;;  %v7675_v4 = vld [vmem:[%s17925_s5 + $0x30] sm:$0xff]  ;;  %v7682_v17 = vld [vmem:[%s17925_s5 + $0x68] sm:$0xff] }
 0xa82   :  { %v7377_v3 = vmax.f32 %v18743_v22, %v7299_v42  ;;  %v9671_v20 = vpop.f32.mrb[172].mxu1  ;;  %v9911_v37 = vpack.c.bf16 %v7662_v53, %v7661_v25  ;;  %v7631_v41 = vadd.f32 %v18744_v18, %v7407_v2  ;;  %v7677_v53 = vld [vmem:[%s17925_s5 + $0x40] sm:$0xff]  ;;  %v7684_v33 = vld [vmem:[%s17925_s5 + $0x78] sm:$0xff]  ;;  %v7683_v42 = vld [vmem:[%s17925_s5 + $0x70] sm:$0xff]  ;;  %v10515_v25 = vmov 0.0  }
 0xa83   :  { %v7410_v43 = vmax.f32 %v18747_v40, %v7378_v59  ;;  %v7314_v35 = vadd.f32 %v9671_v20, %v18748_v12  ;;  %v7308_v26 = vpop.f32.mrb[173].mxu1  ;;  %v7664_v7 = vmax.f32 %v7632_v34, 0.0  ;;  %v7681_v2 = vld [vmem:[%s17925_s5 + $0x60] sm:$0xff] }
 0xa84   :  { %v7409_v6 = vmax.f32 %v18751_v49, %v7377_v3  ;;  %v7309_v51 = vadd.f32 %v7308_v26, %v18752_v11  ;;  %9912 = vmatprep.subr.bf16.mxu1 %v9911_v37  ;;  %v7663_v23 = vmax.f32 %v7631_v41, 0.0  ;;  %v7696_v3 = vpop.permute.xlu0 %7695  ;;  %v7701_v41 = vpop.permute.xlu1 %7700 }
 0xa85   :  { %v7380_v1 = vmax.f32 %v18753_v38, %v7314_v35  ;;  %9914 = vmatpush3.bf16.msra.mxu1 %v17533_v57  ;;  %v7634_v8 = vadd.f32 %v17485_v36, %v7410_v43 }
 0xa86   :  { %v7379_v56 = vmax.f32 %v18754_v60, %v7309_v51  ;;  %v9915_v30 = vpack.c.bf16 %v7664_v7, %v7663_v23  ;;  %v7633_v48 = vadd.f32 %v17491_v32, %v7409_v6 }
 0xa87   :  { %v7412_v52 = vmax.f32 %v18757_v24, %v7380_v1  ;;  %v7666_v58 = vmax.f32 %v7634_v8, 0.0 }
 0xa88   :  { %v7411_v16 = vmax.f32 %v18760_v61, %v7379_v56  ;;  %9916 = vmatprep.subr.bf16.mxu1 %v9915_v30  ;;  %v7665_v10 = vmax.f32 %v7633_v48, 0.0  ;;  %v7706_v44 = vpop.permute.xlu0 %7705  ;;  %v7711_v11 = vpop.permute.xlu1 %7710 }
 0xa89   :  { %9918 = vmatpush3.bf16.msra.mxu1 %v17547_v29  ;;  %v7636_v36 = vadd.f32 %v17530_v28, %v7412_v52  ;;  %v7672_v28 = vld [vmem:[%s17925_s5 + $0x18] sm:$0xff]  ;;  %v18761_v29 = vmov 0.0|0.0  }
 0xa8a   :  { %v9919_v57 = vpack.c.bf16 %v7666_v58, %v7665_v10  ;;  %v7635_v55 = vadd.f32 %v17535_v50, %v7411_v16  ;;  %v7671_v50 = vld [vmem:[%s17925_s5 + $0x10] sm:$0xff] }
 0xa8b   :  { %v7668_v27 = vmax.f32 %v7636_v36, 0.0 }
 0xa8c   :  { %9920 = vmatprep.subr.bf16.mxu1 %v9919_v57  ;;  %v7667_v32 = vmax.f32 %v7635_v55, 0.0  ;;  %v7716_v48 = vpop.permute.xlu0 %7715  ;;  %v7721_v52 = vpop.permute.xlu1 %7720 }
 0xa8d   :  { %9922 = vmatpush3.bf16.msra.mxu1 %v17559_v0  ;;  %v7674_v0 = vld [vmem:[%s17925_s5 + $0x28] sm:$0xff] }
 0xa8e   :  { %v9923_v14 = vpack.c.bf16 %v7668_v27, %v7667_v32 }
 0xa90   :  { %9924 = vmatprep.subr.bf16.mxu1 %v9923_v14  ;;  %v7726_v55 = vpop.permute.xlu0 %7725 }
 0xa91   :  { %9926 = vmatpush3.bf16.msra.mxu1 %v17573_v45  ;;  %v7673_v45 = vld [vmem:[%s17925_s5 + $0x20] sm:$0xff] }
 0xa92   :  { %9927 = vmatprep.subr.bf16.mxu1 %v18761_v29 }
 0xa94   :  { %7798 = vmatmul.mubr.f32.vlgmr.msra.gmra.mrb[174].mxu1 %v7669_v9  ;;  %v7731_v9 = vpop.permute.xlu1 %7730 }
 0xa95   :  { %7802 = vmatprep.mubr.f32.mxu1 %v7672_v28 }
 0xa98   :  { %7803 = vmatmul.mubr.f32.gmra.mrb[176].mxu1 %v7671_v50 }
 0xa99   :  { %7807 = vmatprep.mubr.f32.mxu1 %v7674_v0 }
 0xa9c   :  { %7808 = vmatmul.mubr.f32.gmra.mrb[178].mxu1 %v7673_v45 }
 0xa9d   :  { %7812 = vmatprep.mubr.f32.mxu1 %v7676_v13  ;;  %v7846_v13 = vld [vmem:[%s17927_s7] sm:$0x3]  ;;  %s8470_s7 = sld [smem:[#allocation2]] }
 0xaa0   :  { %7813 = vmatmul.mubr.f32.gmra.mrb[180].mxu1 %v7675_v4  ;;  %v7851_v4 = vpop.permute.xlu0 %7850 }
 0xaa1   :  { %7817 = vmatprep.mubr.f32.mxu1 %v7678_v63 }
 0xaa4   :  { %7818 = vmatmul.mubr.f32.gmra.mrb[182].mxu1 %v7677_v53 }
 0xaa5   :  { %7822 = vmatprep.mubr.f32.mxu1 %v7680_v21 }
 0xaa8   :  { %7823 = vmatmul.mubr.f32.gmra.mrb[184].mxu1 %v7679_v46 }
 0xaa9   :  { %7827 = vmatprep.mubr.f32.mxu1 %v7682_v17 }
 0xaac   :  { %7828 = vmatmul.mubr.f32.gmra.mrb[186].mxu1 %v7681_v2 }
 0xaad   :  { %7832 = vmatprep.mubr.f32.mxu1 %v7684_v33 }
 0xab0   :  { %7833 = vmatmul.mubr.f32.gmra.mrb[188].mxu1 %v7683_v42 }
 0xab1   :  { %9688 = vmatprep.mubr.msk.f32.mxu1 %vm10514_vm2, %v10515_v25 }
 0xb67   :  { %v9219_v62 = vpop.f32.mrb[174].mxu1 }
 0xb68   :  { %v9220_v59 = vpop.f32.mrb[175].mxu1 }
 0xb69   :  { %v9221_v34 = vadd.f32 %v9220_v59, %v9219_v62 }
 0xb6b   :  { %v9222_v22 = vpop.f32.mrb[176].mxu1  ;;  %v7800_v37 = vadd.f32 %v9221_v34, %v7696_v3 }
 0xb6c   :  { %v9223_v20 = vpop.f32.mrb[177].mxu1 }
 0xb6d   :  { %v9224_v18 = vadd.f32 %v9223_v20, %v9222_v22  ;;  %v7838_v43 = vmax.f32 %v7800_v37, 0.0 }
 0xb6f   :  { %v7805_v31 = vadd.f32 %v9224_v18, %v7701_v41  ;;  %v9225_v15 = vpop.f32.mrb[178].mxu1 }
 0xb70   :  { %v9226_v40 = vpop.f32.mrb[179].mxu1 }
 0xb71   :  { %v7839_v12 = vmax.f32 %v7805_v31, 0.0  ;;  %v9227_v35 = vadd.f32 %v9226_v40, %v9225_v15 }
 0xb73   :  { %v9928_v26 = vpack.c.bf16 %v7839_v12, %v7838_v43  ;;  %v9228_v7 = vpop.f32.mrb[180].mxu1  ;;  %v7810_v49 = vadd.f32 %v9227_v35, %v7706_v44  ;;  %v10516_v35 = vmov 683565275  }
 0xb74   :  { %v9229_v54 = vpop.f32.mrb[181].mxu1 }
 0xb75   :  { %v9230_v6 = vadd.f32 %v9229_v54, %v9228_v7  ;;  %9929 = vmatpush3.bf16.msra.mxu1 %v9928_v26  ;;  %v7840_v1 = vmax.f32 %v7810_v49, 0.0  ;;  %v10517_v54 = vmov 2475754826  }
 0xb76   :  { %9930 = vmatprep.subr.bf16.mxu1 %v18761_v29 }
 0xb77   :  { %v7815_v51 = vadd.f32 %v9230_v6, %v7711_v11  ;;  %v9231_v23 = vpop.f32.mrb[182].mxu1  ;;  %v10518_v6 = vmov 2131351028  }
 0xb78   :  { %v9232_v38 = vpop.f32.mrb[183].mxu1 }
 0xb79   :  { %v7841_v8 = vmax.f32 %v7815_v51, 0.0  ;;  %v9233_v60 = vadd.f32 %v9232_v38, %v9231_v23  ;;  %v10519_v51 = vmov 2102212464   ;;  %v10520_v38 = vmov 920167782  }
 0xb7b   :  { %v9931_v56 = vpack.c.bf16 %v7841_v8, %v7840_v1  ;;  %v9234_v30 = vpop.f32.mrb[184].mxu1  ;;  %v7820_v39 = vadd.f32 %v9233_v60, %v7716_v48 }
 0xb7c   :  { %v9235_v47 = vpop.f32.mrb[185].mxu1 }
 0xb7d   :  { %v9236_v24 = vadd.f32 %v9235_v47, %v9234_v30  ;;  %9932 = vmatpush3.bf16.msra.mxu1 %v9931_v56  ;;  %v7842_v61 = vmax.f32 %v7820_v39, 0.0  ;;  %v10521_v47 = vmov 1326507024  }
 0xb7e   :  { %9933 = vmatprep.subr.bf16.mxu1 %v18761_v29 }
 0xb7f   :  { %v7825_v58 = vadd.f32 %v9236_v24, %v7721_v52  ;;  %v9237_v5 = vpop.f32.mrb[186].mxu1 }
 0xb80   :  { %v9238_v19 = vpop.f32.mrb[187].mxu1 }
 0xb81   :  { %v7843_v16 = vmax.f32 %v7825_v58, 0.0  ;;  %v9239_v10 = vadd.f32 %v9238_v19, %v9237_v5 }
 0xb83   :  { %v9934_v36 = vpack.c.bf16 %v7843_v16, %v7842_v61  ;;  %v9240_v57 = vpop.f32.mrb[188].mxu1  ;;  %v7830_v32 = vadd.f32 %v9239_v10, %v7726_v55 }
 0xb84   :  { %v9241_v27 = vpop.f32.mrb[189].mxu1 }
 0xb85   :  { %v9242_v14 = vadd.f32 %v9241_v27, %v9240_v57  ;;  %9935 = vmatpush3.bf16.msra.mxu1 %v9934_v36  ;;  %v7844_v50 = vmax.f32 %v7830_v32, 0.0 }
 0xb86   :  { %9936 = vmatprep.subr.bf16.mxu1 %v18761_v29 }
 0xb87   :  { %v7835_v28 = vadd.f32 %v9242_v14, %v7731_v9 }
 0xb89   :  { %v7845_v0 = vmax.f32 %v7835_v28, 0.0 }
 0xb8b   :  { %v9937_v45 = vpack.c.bf16 %v7845_v0, %v7844_v50 }
 0xb8d   :  { %9938 = vmatpush3.bf16.msra.mxu1 %v9937_v45 }
 0xb90   :  { %9689 = vmatmul.mubr.msk.f32.vlgmr.msra.gmra.mrb[190].mxu1 %vm7853_vm3, %v7846_v13 }
 0xc63   :  { %v7923_v63 = vpop.f32.mrb[190].mxu1 }
 0xc64   :  { %v7924_v53 = vadd.f32 %v7923_v63, %v7851_v4  ;;  %v9690_v21 = vpop.f32.mrb[191].mxu1 }
 0xc66   :  { %v17715_v46 = vmul.f32 2.0, %v7924_v53  ;;  %v8153_v17 = vsub.f32 3.1415927, %v7924_v53 }
 0xc68   :  { %v7928_v29 = vand.u32 2147483647, %v17715_v46  ;;  %v7931_v2 = vand.u32 2139095040, %v17715_v46  ;;  %v8154_v33 = vmul.f32 2.0, %v8153_v17  ;;  %v8156_v42 = vrot.slane %v8153_v17, 1 }
 0xc69   :  { %vm7930_vm2 = vcmp.lt.s32.totalorder %v17715_v46, 0 }
 0xc6a   :  { %v7932_v25 = vshrl.u32 %v7931_v2, 23  ;;  %v7935_v62 = vand.u32 8388607, %v7928_v29  ;;  %v17721_v59 = vmul.f32 %v8156_v42, %v8154_v33  ;;  %vm7929_vm3 = vcmp.le.f32.partialorder %v7928_v29, 0.7853982 }
 0xc6c   :  { %v8885_v34 = vadd.s32 4294967169, %v7932_v25  ;;  %v8162_v22 = vand.u32 2139095040, %v17721_v59  ;;  %v7936_v20 = vor.u32 8388608, %v7935_v62  ;;  %v8159_v18 = vand.u32 2147483647, %v17721_v59 }
 0xc6e   :  { %v7938_v3 = vadd.s32 1, %v8885_v34  ;;  %v8163_v37 = vshrl.u32 %v8162_v22, 23  ;;  %v17725_v43 = vshll.u32 %v7936_v20, 8  ;;  %v8166_v7 = vand.u32 8388607, %v8159_v18 }
 0xc70   :  { %vm7939_vm4 = vcmp.gt.s32.totalorder %v7938_v3, 0  ;;  %v8893_v31 = vadd.s32 4294967169, %v8163_v37  ;;  %v8167_v14 = vor.u32 8388608, %v8166_v7 }
 0xc71   :  { %v7940_v41 = vsel %vm7939_vm4, %v7938_v3, 0  ;;  %vm8161_vm4 = vcmp.lt.s32.totalorder %v17721_v59, 0 }
 0xc72   :  { %v7941_v15 = vshrl.u32 %v7940_v41, 5  ;;  %v7942_v40 = vand.u32 31, %v7940_v41  ;;  %v8169_v44 = vadd.s32 1, %v8893_v31  ;;  %v8207_v33 = vshll.u32 %v8167_v14, 8 }
 0xc74   :  { %v7943_v12 = vsub.s32 32, %v7942_v40  ;;  %v7945_v26 = vshll.u32 %v10516_v35, %v7942_v40  ;;  %v7948_v49 = vshll.u32 %v10517_v54, %v7942_v40  ;;  %v7951_v11 = vshll.u32 %v10518_v6, %v7942_v40 }
 0xc75   :  { %v7954_v23 = vshll.u32 %v10519_v51, %v7942_v40  ;;  %v7957_v1 = vshll.u32 %v10520_v38, %v7942_v40  ;;  %vm7960_vm5 = vcmp.lt.s32.totalorder %v7941_v15, 1  ;;  %vm7962_vm6 = vcmp.lt.s32.totalorder %v7941_v15, 3 }
 0xc76   :  { %v7946_v8 = vshrl.u32 %v10517_v54, %v7943_v12  ;;  %v7949_v60 = vshrl.u32 %v10518_v6, %v7943_v12  ;;  %v7952_v56 = vshrl.u32 %v10519_v51, %v7943_v12  ;;  %v7944_v30 = vshrl.u32 %v10516_v35, %v7943_v12 }
 0xc77   :  { %v7955_v48 = vshrl.u32 %v10520_v38, %v7943_v12  ;;  %v7958_v39 = vshrl.u32 %v10521_v47, %v7943_v12  ;;  %vm8170_vm7 = vcmp.gt.s32.totalorder %v8169_v44, 0  ;;  %vm7963_vm8 = vcmp.lt.s32.totalorder %v7941_v15, 4 }
 0xc78   :  { %v7947_v24 = vor.u32 %v7946_v8, %v7945_v26  ;;  %v7950_v52 = vor.u32 %v7949_v60, %v7948_v49  ;;  %v7953_v58 = vor.u32 %v7952_v56, %v7951_v11  ;;  %v8171_v61 = vsel %vm8170_vm7, %v8169_v44, 0 }
 0xc79   :  { %v7956_v5 = vor.u32 %v7955_v48, %v7954_v23  ;;  %v7959_v19 = vor.u32 %v7958_v39, %v7957_v1  ;;  %vm7961_vm9 = vcmp.lt.s32.totalorder %v7941_v15, 2  ;;  %v8173_v50 = vand.u32 31, %v8171_v61 }
 0xc7a   :  { %v7964_v16 = vsel %vm7960_vm5, %v7944_v30, %v7947_v24  ;;  %v7965_v10 = vsel %vm7963_vm8, %v7953_v58, 2102212464  ;;  %v7968_v36 = vsel %vm7960_vm5, %v7947_v24, %v7950_v52  ;;  %v7972_v57 = vsel %vm7960_vm5, %v7950_v52, %v7953_v58 }
 0xc7b   :  { %v7966_v55 = vsel %vm7962_vm6, %v7950_v52, %v7965_v10  ;;  %v7969_v27 = vsel %vm7963_vm8, %v7956_v5, 920167782  ;;  %v7973_v32 = vsel %vm7963_vm8, %v7959_v19, 1326507024  ;;  %v8172_v17 = vshrl.u32 %v8171_v61, 5 }
 0xc7c   :  { %v7970_v9 = vsel %vm7962_vm6, %v7953_v58, %v7969_v27  ;;  %v7974_v28 = vsel %vm7962_vm6, %v7956_v5, %v7973_v32  ;;  %v7967_v0 = vsel %vm7961_vm9, %v7964_v16, %v7966_v55  ;;  %v8174_v2 = vsub.s32 32, %v8173_v50 }
 0xc7d   :  { %v7971_v45 = vsel %vm7961_vm9, %v7968_v36, %v7970_v9  ;;  %v7975_v13 = vsel %vm7961_vm9, %v7972_v57, %v7974_v28  ;;  %v7983_v42 = vmul.u32 %v17725_v43, %v7967_v0  ;;  %v8176_v25 = vshll.u32 %v10516_v35, %v8173_v50 }
 0xc7e   :  { %v17738_v4 = vmul.u32.u64.low %v17725_v43, %v7975_v13  ;;  %v17739_v63 = vmul.u32.u64.high %v17725_v43, %v7975_v13, %v17738_v4  ;;  %v17742_v53 = vmul.u32.u64.low %v17725_v43, %v7971_v45  ;;  %v17743_v21 = vmul.u32.u64.high %v17725_v43, %v7971_v45, %v17742_v53 }
 0xc7f   :  { %v8179_v62 = vshll.u32 %v10517_v54, %v8173_v50  ;;  %v8182_v34 = vshll.u32 %v10518_v6, %v8173_v50  ;;  %v8177_v22 = vshrl.u32 %v10517_v54, %v8174_v2  ;;  %v8180_v3 = vshrl.u32 %v10518_v6, %v8174_v2 }
 0xc80   :  { %v8183_v20 = vshrl.u32 %v10519_v51, %v8174_v2  ;;  %v8185_v37 = vshll.u32 %v10519_v51, %v8173_v50  ;;  %vm7985_vm10 = vc.u32 %v17739_v63, %v17742_v53  ;;  %v7986_v41 = vadd.s32 1, %v17743_v21 }
 0xc81   :  { %v8186_v31 = vshrl.u32 %v10520_v38, %v8174_v2  ;;  %v8188_v15 = vshll.u32 %v10520_v38, %v8173_v50  ;;  %v8178_v40 = vor.u32 %v8177_v22, %v8176_v25  ;;  %v8181_v12 = vor.u32 %v8180_v3, %v8179_v62 }
 0xc82   :  { %v8184_v26 = vor.u32 %v8183_v20, %v8182_v34  ;;  %v8189_v7 = vshrl.u32 %v10521_v47, %v8174_v2  ;;  %v7987_v43 = vsel %vm7985_vm10, %v7986_v41, %v17743_v21  ;;  %vm8191_vm11 = vcmp.lt.s32.totalorder %v8172_v17, 1 }
 0xc83   :  { %v8187_v44 = vor.u32 %v8186_v31, %v8185_v37  ;;  %vm8194_vm12 = vcmp.lt.s32.totalorder %v8172_v17, 4  ;;  %v7988_v54 = vadd.s32 %v7987_v43, %v7983_v42  ;;  %vm8193_vm13 = vcmp.lt.s32.totalorder %v8172_v17, 3 }
 0xc84   :  { %v8190_v49 = vor.u32 %v8189_v7, %v8188_v15  ;;  %v8196_v6 = vsel %vm8194_vm12, %v8184_v26, 2102212464  ;;  %v8175_v11 = vshrl.u32 %v10516_v35, %v8174_v2  ;;  %v8199_v51 = vsel %vm8191_vm11, %v8178_v40, %v8181_v12 }
 0xc85   :  { %v8200_v23 = vsel %vm8194_vm12, %v8187_v44, 920167782  ;;  %v8203_v1 = vsel %vm8191_vm11, %v8181_v12, %v8184_v26  ;;  %v7989_v8 = vadd.s32 536870912, %v7988_v54  ;;  %vm8192_vm14 = vcmp.lt.s32.totalorder %v8172_v17, 2 }
 0xc86   :  { %v8201_v38 = vsel %vm8193_vm13, %v8184_v26, %v8200_v23  ;;  %v8204_v60 = vsel %vm8194_vm12, %v8190_v49, 1326507024  ;;  %v8195_v56 = vsel %vm8191_vm11, %v8175_v11, %v8178_v40  ;;  %v8197_v30 = vsel %vm8193_vm13, %v8181_v12, %v8196_v6 }
 0xc87   :  { %v8202_v48 = vsel %vm8192_vm14, %v8199_v51, %v8201_v38  ;;  %v8205_v47 = vsel %vm8193_vm13, %v8187_v44, %v8204_v60  ;;  %v7990_v39 = vshrl.u32 %v7989_v8, 30  ;;  %v8198_v61 = vsel %vm8192_vm14, %v8195_v56, %v8197_v30 }
 0xc88   :  { %v8206_v24 = vsel %vm8192_vm14, %v8203_v1, %v8205_v47  ;;  %v17753_v52 = vmul.u32.u64.low %v8207_v33, %v8202_v48  ;;  %v17754_v58 = vmul.u32.u64.high %v8207_v33, %v8202_v48, %v17753_v52  ;;  %v8214_v36 = vmul.u32 %v8207_v33, %v8198_v61 }
 0xc89   :  { %v17756_v5 = vmul.u32.u64.low %v8207_v33, %v8206_v24  ;;  %v17757_v19 = vmul.u32.u64.high %v8207_v33, %v8206_v24, %v17756_v5  ;;  %v7991_v35 = vshll.u32 %v7990_v39, 30  ;;  %v7984_v4 = vadd.s32 %v17742_v53, %v17739_v63 }
 0xc8a   :  { %v8217_v10 = vadd.s32 1, %v17754_v58  ;;  %v8014_v40 = vsub.s32 4, %v7990_v39  ;;  %vm8160_vm5 = vcmp.le.f32.partialorder %v8159_v18, 0.7853982  ;;  %vm8020_vm12 = vweird.f32 %v17715_v46 }
 0xc8b   :  { %v7992_v16 = vsub.s32 %v7988_v54, %v7991_v35  ;;  %vm8216_vm15 = vc.u32 %v17757_v19, %v17753_v52  ;;  %v8215_v63 = vadd.s32 %v17753_v52, %v17757_v19 }
 0xc8c   :  { %v8218_v55 = vsel %vm8216_vm15, %v8217_v10, %v17754_v58  ;;  %v8015_v6 = vsel %vm7930_vm2, %v8014_v40, %v7990_v39 }
 0xc8d   :  { %v7994_v57 = vsub.s32 0, %v7992_v16  ;;  %v8219_v27 = vadd.s32 %v8218_v55, %v8214_v36  ;;  %v8017_v1 = vsel %vm7929_vm3, 0, %v8015_v6 }
 0xc8e   :  { %v8124_v56 = vadd.s32 3, %v8017_v1  ;;  %v8021_v47 = vand.u32 3, %v8017_v1 }
 0xc8f   :  { %v8886_v32 = vmin.u32 %v7994_v57, %v7992_v16  ;;  %v8220_v14 = vadd.s32 536870912, %v8219_v27 }
 0xc90   :  { %v8125_v29 = vand.u32 3, %v8124_v56  ;;  %vm8022_vm6 = vcmp.lt.s32.totalorder %v8021_v47, 2  ;;  %vm8026_vm7 = vcmp.eq.s32.totalorder %v8021_v47, 2  ;;  %vm8023_vm9 = vcmp.eq.s32.totalorder %v8021_v47, 0 }
 0xc91   :  { %v7996_v9 = vclz %v8886_v32  ;;  %v8221_v28 = vshrl.u32 %v8220_v14, 30  ;;  %v17804_v47 = vstv %s8470_s7 }
 0xc92   :  { %vm8130_vm8 = vcmp.eq.s32.totalorder %v8125_v29, 2  ;;  %vm8127_vm10 = vcmp.eq.s32.totalorder %v8125_v29, 0  ;;  %vm8126_vm11 = vcmp.lt.s32.totalorder %v8125_v29, 2 }
 0xc93   :  { %v8887_v50 = vadd.s32 4294967294, %v7996_v9  ;;  %v8222_v0 = vshll.u32 %v8221_v28, 30  ;;  %v8245_v30 = vsub.s32 4, %v8221_v28 }
 0xc95   :  { %vm8888_vm0 = vcmp.lt.s32.totalorder %v8887_v50, 0  ;;  %v8223_v13 = vsub.s32 %v8219_v27, %v8222_v0  ;;  %v8246_v52 = vsel %vm8161_vm4, %v8245_v30, %v8221_v28 }
 0xc96   :  { %v7999_v45 = vsel %vm8888_vm0, 0, %v8887_v50  ;;  %v8248_v61 = vsel %vm8160_vm5, 0, %v8246_v52 }
 0xc97   :  { %v8000_v21 = vsub.s32 32, %v7999_v45  ;;  %v8004_v17 = vsub.s32 4294967266, %v7999_v45  ;;  %v8225_v2 = vsub.s32 0, %v8223_v13  ;;  %v8001_v33 = vshll.u32 %v7992_v16, %v7999_v45 }
 0xc98   :  { %v8355_v55 = vadd.s32 3, %v8248_v61 }
 0xc99   :  { %v8002_v42 = vshrl.u32 %v7984_v4, %v8000_v21  ;;  %v8005_v25 = vadd.s32 127, %v8004_v17  ;;  %v8894_v62 = vmin.u32 %v8225_v2, %v8223_v13 }
 0xc9a   :  { %v8356_v4 = vand.u32 3, %v8355_v55  ;;  %v17816_v55 = vstv %s8904_s8 }
 0xc9b   :  { %v8003_v34 = vor.u32 %v8002_v42, %v8001_v33  ;;  %v8006_v22 = vshll.u32 %v8005_v25, 23  ;;  %v8227_v3 = vclz %v8894_v62 }
 0xc9c   :  { %vm8361_vm14 = vcmp.eq.s32.totalorder %v8356_v4, 2  ;;  %vm8358_vm0 = vcmp.eq.s32.totalorder %v8356_v4, 0 }
 0xc9d   :  { %v8007_v20 = vor.u32 4788187, %v8006_v22  ;;  %v8895_v37 = vadd.s32 4294967294, %v8227_v3  ;;  %v8010_v31 = vcvt.s32.f32 %v8003_v34 }
 0xc9f   :  { %v8008_v41 = vand.u32 2147483647, %v8007_v20  ;;  %vm8896_vm1 = vcmp.lt.s32.totalorder %v8895_v37, 0 }
 0xca0   :  { %v8230_v12 = vsel %vm8896_vm1, 0, %v8895_v37 }
 0xca1   :  { %v8011_v15 = vmul.f32 %v8010_v31, %v8008_v41  ;;  %v8231_v53 = vsub.s32 32, %v8230_v12  ;;  %v8235_v26 = vsub.s32 4294967266, %v8230_v12  ;;  %v8232_v43 = vshll.u32 %v8223_v13, %v8230_v12 }
 0xca2   :  { %v8252_v13 = vand.u32 3, %v8248_v61 }
 0xca3   :  { %v8012_v7 = vxor.u32 2147483648, %v8011_v15  ;;  %v8233_v44 = vshrl.u32 %v8215_v63, %v8231_v53  ;;  %v8236_v54 = vadd.s32 127, %v8235_v26 }
 0xca4   :  { %vm8257_vm13 = vcmp.eq.s32.totalorder %v8252_v13, 2  ;;  %vm8254_vm15 = vcmp.eq.s32.totalorder %v8252_v13, 0  ;;  %vm8253_vm1 = vcmp.lt.s32.totalorder %v8252_v13, 2 }
 0xca5   :  { %v8013_v49 = vsel %vm7930_vm2, %v8012_v7, %v8011_v15  ;;  %v8234_v51 = vor.u32 %v8233_v44, %v8232_v43  ;;  %v8237_v23 = vshll.u32 %v8236_v54, 23  ;;  %vm8357_vm2 = vcmp.lt.s32.totalorder %v8356_v4, 2 }
 0xca6   :  { %v8016_v11 = vsel %vm7929_vm3, %v17715_v46, %v8013_v49  ;;  %vm8251_vm3 = vweird.f32 %v17721_v59 }
 0xca7   :  { %10474 = vcosq.f32 %v8016_v11  ;;  %v8238_v8 = vor.u32 4788187, %v8237_v23  ;;  %v8241_v60 = vcvt.s32.f32 %v8234_v51 }
 0xca8   :  { %10476 = vsinq.f32 %v8016_v11 }
 0xca9   :  { %v8239_v38 = vand.u32 2147483647, %v8238_v8 }
 0xcab   :  { %v8242_v48 = vmul.f32 %v8241_v60, %v8239_v38 }
 0xcad   :  { %v8243_v24 = vxor.u32 2147483648, %v8242_v48 }
 0xcaf   :  { %v8244_v39 = vsel %vm8161_vm4, %v8243_v24, %v8242_v48 }
 0xcb0   :  { %v8247_v5 = vsel %vm8160_vm5, %v17721_v59, %v8244_v39 }
 0xcb1   :  { %v10475_v58 = vpop.eup %10474  ;;  %10478 = vcosq.f32 %v8247_v5 }
 0xcb2   :  { %v10477_v19 = vpop.eup %10476  ;;  %v8027_v35 = vxor.u32 2147483648, %v10475_v58  ;;  %10480 = vsinq.f32 %v8247_v5 }
 0xcb3   :  { %v8024_v16 = vxor.u32 2147483648, %v10477_v19 }
 0xcb4   :  { %v8028_v10 = vsel %vm8026_vm7, %v8027_v35, %v10477_v19  ;;  %v8132_v36 = vsel %vm8130_vm8, %v8027_v35, %v10477_v19  ;;  %v17808_v35 = vstv %s8901_s17 }
 0xcb5   :  { %v8025_v57 = vsel %vm8023_vm9, %v10475_v58, %v8024_v16  ;;  %v8129_v18 = vsel %vm8127_vm10, %v10475_v58, %v8024_v16 }
 0xcb6   :  { %v8029_v27 = vsel %vm8022_vm6, %v8025_v57, %v8028_v10  ;;  %v8133_v32 = vsel %vm8126_vm11, %v8129_v18, %v8132_v36  ;;  %v17812_v10 = vstv %s8902_s4  ;;  %v17814_v36 = vstv %s8903_s18 }
 0xcb7   :  { %v17775_v14 = vsel %vm8020_vm12, nan, %v8029_v27  ;;  %v17777_v9 = vsel %vm8020_vm12, nan, %v8133_v32  ;;  %v17818_v27 = vstv %s8905_s2 }
 0xcb8   :  { %v8135_v28 = vmul.f32 0.49999997, %v17775_v14  ;;  %v8136_v50 = vmul.f32 0.0, %v17777_v9  ;;  %v8138_v0 = vmul.f32 0.49999997, %v17777_v9  ;;  %v8139_v45 = vmul.f32 0.0, %v17775_v14 }
 0xcb9   :  { %v17784_v46 = vrot.slane %v17775_v14, 1  ;;  %v17787_v2 = vrot.slane %v17777_v9, 1 }
 0xcba   :  { %v8137_v21 = vsub.f32 %v8135_v28, %v8136_v50  ;;  %v8140_v17 = vadd.f32 %v8139_v45, %v8138_v0 }
 0xcbb   :  { %v10479_v33 = vpop.eup %10478 }
 0xcbc   :  { %v8144_v42 = vmul.f32 %v17784_v46, %v8137_v21  ;;  %v8148_v25 = vmul.f32 %v17787_v2, %v8140_v17  ;;  %v8150_v62 = vmul.f32 %v17787_v2, %v8137_v21  ;;  %v8151_v34 = vmul.f32 %v17784_v46, %v8140_v17  ;;  %v10481_v22 = vpop.eup %10480 }
 0xcbd   :  { %v8258_v3 = vxor.u32 2147483648, %v10479_v33  ;;  %v8255_v41 = vxor.u32 2147483648, %v10481_v22 }
 0xcbe   :  { %v8149_v20 = vsub.f32 %v8144_v42, %v8148_v25  ;;  %v8152_v37 = vadd.f32 %v8151_v34, %v8150_v62 }
 0xcbf   :  { %v8259_v31 = vsel %vm8257_vm13, %v8258_v3, %v10481_v22  ;;  %v8363_v15 = vsel %vm8361_vm14, %v8258_v3, %v10481_v22  ;;  %v8256_v40 = vsel %vm8254_vm15, %v10479_v33, %v8255_v41  ;;  %v8360_v12 = vsel %vm8358_vm0, %v10479_v33, %v8255_v41 }
 0xcc0   :  { %v8260_v63 = vsel %vm8253_vm1, %v8256_v40, %v8259_v31  ;;  %v8364_v53 = vsel %vm8357_vm2, %v8360_v12, %v8363_v15  ;;  %v8393_v11 = vrot.slane %v8149_v20, 7  ;;  %v8398_v51 = vrot.slane %v8152_v37, 7 }
 0xcc1   :  { %v17794_v26 = vsel %vm8251_vm3, nan, %v8260_v63  ;;  %v17796_v7 = vsel %vm8251_vm3, nan, %v8364_v53  ;;  %v17821_v31 = vstv %s17806_s19  ;;  %v17824_v63 = vstv %s17810_s20 }
 0xcc2   :  { %v8367_v43 = vrot.slane %v17794_v26, 7  ;;  %v8371_v44 = vrot.slane %v17796_v7, 7  ;;  %v8378_v54 = vmul.f32 %v17794_v26, %v8137_v21  ;;  %v8379_v49 = vmul.f32 %v17796_v7, %v8140_v17 }
 0xcc3   :  { %v8381_v6 = vmul.f32 %v17796_v7, %v8137_v21  ;;  %v8382_v59 = vmul.f32 %v17794_v26, %v8140_v17 }
 0xcc4   :  { %v8369_v23 = vmul.f32 %v8367_v43, %v8137_v21  ;;  %v8373_v1 = vmul.f32 %v8371_v44, %v8140_v17  ;;  %v8375_v8 = vmul.f32 %v8371_v44, %v8137_v21  ;;  %v8376_v38 = vmul.f32 %v8367_v43, %v8140_v17 }
 0xcc5   :  { %v8380_v60 = vsub.f32 %v8378_v54, %v8379_v49  ;;  %v8383_v56 = vadd.f32 %v8382_v59, %v8381_v6 }
 0xcc6   :  { %v8374_v30 = vsub.f32 %v8369_v23, %v8373_v1  ;;  %v8377_v48 = vadd.f32 %v8376_v38, %v8375_v8 }
 0xcc7   :  { %v8384_v24 = vadd.f32 0.49999997, %v8380_v60  ;;  %v8388_v58 = vsub.f32 0.49999997, %v8380_v60  ;;  %v8390_v5 = vsub.f32 0.0, %v8383_v56 }
 0xcc8   :  { %v8395_v29 = vadd.f32 %v8393_v11, %v8374_v30  ;;  %v8400_v52 = vadd.f32 %v8398_v51, %v8377_v48  ;;  %v8402_v39 = vsub.f32 %v8374_v30, %v8393_v11  ;;  %v8404_v19 = vsub.f32 %v8377_v48, %v8398_v51 }
 0xcc9   :  { %v8385_v32 = vmul.f32 0.70710677, %v8384_v24  ;;  %v8387_v28 = vmul.f32 0.70710677, %v8383_v56  ;;  %v8389_v45 = vmul.f32 0.70710677, %v8388_v58 }
 0xcca   :  { %v8396_v61 = vmul.f32 0.70710677, %v8395_v29  ;;  %v8401_v16 = vmul.f32 0.70710677, %v8400_v52  ;;  %v8403_v57 = vmul.f32 0.70710677, %v8402_v39 }
 0xccb   :  { %v8405_v18 = vmul.f32 0.70710677, %v8404_v19  ;;  %v8391_v13 = vmul.f32 0.70710677, %v8390_v5 }
 0xccc   :  { %v8407_v50 = vrot.slane %v8396_v61, 1  ;;  %v8412_v0 = vrot.slane %v8401_v16, 1  ;;  %v8417_v4 = vrot.slane %v8403_v57, 1 }
 0xccd   :  { %v8422_v21 = vrot.slane %v8405_v18, 1 }
 0xcce   :  { %v8409_v17 = vadd.f32 %v8407_v50, %v8385_v32  ;;  %v8414_v33 = vadd.f32 %v8412_v0, %v8387_v28  ;;  %v8426_v42 = vsub.f32 %v8385_v32, %v8407_v50  ;;  %v8428_v25 = vsub.f32 %v8387_v28, %v8412_v0 }
 0xccf   :  { %v8419_v62 = vadd.f32 %v8417_v4, %v8389_v45  ;;  %v8424_v34 = vadd.f32 %v8422_v21, %v8391_v13  ;;  %v8430_v22 = vsub.f32 %v8389_v45, %v8417_v4  ;;  %v8432_v3 = vsub.f32 %v8391_v13, %v8422_v21 }
 0xcd0   :  { %v8410_v20 = vmul.f32 0.70710677, %v8409_v17  ;;  %v8415_v37 = vmul.f32 0.70710677, %v8414_v33  ;;  %v8427_v41 = vmul.f32 0.70710677, %v8426_v42 }
 0xcd1   :  { %v8420_v15 = vmul.f32 0.70710677, %v8419_v62  ;;  %v8425_v40 = vmul.f32 0.70710677, %v8424_v34  ;;  %v8429_v12 = vmul.f32 0.70710677, %v8428_v25 }
 0xcd2   :  { %v8431_v53 = vmul.f32 0.70710677, %v8430_v22  ;;  %v8433_v43 = vmul.f32 0.70710677, %v8432_v3  ;;  %v8446_v44 = vmul.f32 %v8427_v41, %v17784_v46  ;;  %v8449_v54 = vmul.f32 %v8427_v41, %v17787_v2 }
 0xcd3   :  { %v8434_v49 = vmul.f32 %v8420_v15, %v17775_v14  ;;  %v8435_v6 = vmul.f32 %v8425_v40, %v17777_v9  ;;  %v8437_v59 = vmul.f32 %v8420_v15, %v17777_v9  ;;  %v8438_v11 = vmul.f32 %v8425_v40, %v17775_v14 }
 0xcd4   :  { %v8440_v51 = vmul.f32 %v8431_v53, %v17775_v14  ;;  %v8441_v23 = vmul.f32 %v8433_v43, %v17777_v9  ;;  %v8443_v1 = vmul.f32 %v8431_v53, %v17777_v9  ;;  %v8444_v8 = vmul.f32 %v8433_v43, %v17775_v14 }
 0xcd5   :  { %v8436_v38 = vsub.f32 %v8434_v49, %v8435_v6  ;;  %v8439_v60 = vadd.f32 %v8438_v11, %v8437_v59  ;;  %v8447_v56 = vmul.f32 %v8429_v12, %v17787_v2  ;;  %v8450_v30 = vmul.f32 %v8429_v12, %v17784_v46 }
 0xcd6   :  { %v8442_v48 = vsub.f32 %v8440_v51, %v8441_v23  ;;  %v8445_v24 = vadd.f32 %v8444_v8, %v8443_v1  ;;  %v8473_v29 = vmul.f32 %v17804_v47, %v8410_v20  ;;  %v8477_v52 = vmul.f32 %v17804_v47, %v8415_v37 }
 0xcd7   :  { %v8448_v39 = vsub.f32 %v8446_v44, %v8447_v56  ;;  %v8451_v58 = vadd.f32 %v8450_v30, %v8449_v54  ;;  %v8464_v5 = vmul.f32 %v8436_v38, %v17794_v26  ;;  %v8465_v9 = vmul.f32 %v8439_v60, %v17796_v7 }
 0xcd8   :  { %v8452_v14 = vmul.f32 %v8442_v48, %v17784_v46  ;;  %v8453_v19 = vmul.f32 %v8445_v24, %v17787_v2  ;;  %v8455_v61 = vmul.f32 %v8442_v48, %v17787_v2  ;;  %v8456_v16 = vmul.f32 %v8445_v24, %v17784_v46 }
 0xcd9   :  { %v8458_v57 = vmul.f32 %v8448_v39, %v17794_v26  ;;  %v8459_v18 = vmul.f32 %v8451_v58, %v17796_v7  ;;  %v8461_v32 = vmul.f32 %v8448_v39, %v17796_v7  ;;  %v8462_v28 = vmul.f32 %v8451_v58, %v17794_v26 }
 0xcda   :  { %v8454_v50 = vsub.f32 %v8452_v14, %v8453_v19  ;;  %v8457_v0 = vadd.f32 %v8456_v16, %v8455_v61  ;;  %v8466_v45 = vsub.f32 %v8464_v5, %v8465_v9  ;;  %v8467_v13 = vmul.f32 %v8436_v38, %v17796_v7 }
 0xcdb   :  { %v8460_v4 = vsub.f32 %v8458_v57, %v8459_v18  ;;  %v8463_v21 = vadd.f32 %v8462_v28, %v8461_v32  ;;  %v8468_v17 = vmul.f32 %v8439_v60, %v17794_v26  ;;  %v8480_v2 = vmul.f32 %v17808_v35, %v8410_v20 }
 0xcdc   :  { %v8475_v46 = vmul.f32 %v17808_v35, %v8466_v45  ;;  %v8481_v33 = vmul.f32 %v17804_v47, %v8466_v45  ;;  %v8483_v42 = vmul.f32 %v17808_v35, %v8415_v37  ;;  %v8487_v25 = vmul.f32 %v17808_v35, %v8454_v50 }
 0xcdd   :  { %v8469_v62 = vadd.f32 %v8468_v17, %v8467_v13  ;;  %v8486_v34 = vmul.f32 %v17804_v47, %v8460_v4  ;;  %v8489_v22 = vmul.f32 %v17804_v47, %v8463_v21  ;;  %v8490_v7 = vmul.f32 %v17808_v35, %v8457_v0 }
 0xcde   :  { %v8476_v3 = vsub.f32 %v8473_v29, %v8475_v46  ;;  %v8482_v41 = vadd.f32 %v8481_v33, %v8480_v2  ;;  %v8492_v26 = vmul.f32 %v17808_v35, %v8460_v4  ;;  %v8493_v20 = vmul.f32 %v17804_v47, %v8454_v50 }
 0xcdf   :  { %v8478_v15 = vmul.f32 %v17808_v35, %v8469_v62  ;;  %v8484_v40 = vmul.f32 %v17804_v47, %v8469_v62  ;;  %v8488_v37 = vsub.f32 %v8486_v34, %v8487_v25  ;;  %v8491_v12 = vsub.f32 %v8489_v22, %v8490_v7 }
 0xce0   :  { %v8494_v53 = vadd.f32 %v8493_v20, %v8492_v26  ;;  %v8495_v43 = vmul.f32 %v17808_v35, %v8463_v21  ;;  %v8496_v44 = vmul.f32 %v17804_v47, %v8457_v0  ;;  %v8501_v54 = vmul.f32 %v17812_v10, %v8476_v3 }
 0xce1   :  { %v8479_v49 = vsub.f32 %v8477_v52, %v8478_v15  ;;  %v8485_v6 = vadd.f32 %v8484_v40, %v8483_v42  ;;  %v8503_v59 = vmul.f32 %v17814_v36, %v8488_v37  ;;  %v8506_v11 = vmul.f32 %v17814_v36, %v8491_v12 }
 0xce2   :  { %v8497_v51 = vadd.f32 %v8496_v44, %v8495_v43  ;;  %v8508_v23 = vmul.f32 %v17812_v10, %v8482_v41  ;;  %v8509_v1 = vmul.f32 %v17814_v36, %v8494_v53  ;;  %v8514_v8 = vmul.f32 %v17814_v36, %v8476_v3 }
 0xce3   :  { %v8504_v38 = vsub.f32 %v8501_v54, %v8503_v59  ;;  %v8505_v35 = vmul.f32 %v17812_v10, %v8479_v49  ;;  %v8511_v47 = vmul.f32 %v17812_v10, %v8485_v6  ;;  %v8515_v60 = vmul.f32 %v17812_v10, %v8488_v37 }
 0xce4   :  { %v8510_v56 = vsub.f32 %v8508_v23, %v8509_v1  ;;  %v8512_v30 = vmul.f32 %v17814_v36, %v8497_v51  ;;  %v8517_v48 = vmul.f32 %v17814_v36, %v8479_v49  ;;  %v8518_v24 = vmul.f32 %v17812_v10, %v8491_v12 }
 0xce5   :  { %v8507_v29 = vsub.f32 %v8505_v35, %v8506_v11  ;;  %v8516_v52 = vadd.f32 %v8515_v60, %v8514_v8  ;;  %v8520_v39 = vmul.f32 %v17814_v36, %v8482_v41  ;;  %v8521_v58 = vmul.f32 %v17812_v10, %v8494_v53 }
 0xce6   :  { %v8513_v5 = vsub.f32 %v8511_v47, %v8512_v30  ;;  %v8519_v9 = vadd.f32 %v8518_v24, %v8517_v48  ;;  %v8523_v14 = vmul.f32 %v17814_v36, %v8485_v6  ;;  %v8524_v19 = vmul.f32 %v17812_v10, %v8497_v51 }
 0xce7   :  { %v8522_v61 = vadd.f32 %v8521_v58, %v8520_v39  ;;  %v8529_v16 = vmul.f32 %v17816_v55, %v8504_v38  ;;  %v8533_v57 = vmul.f32 %v17816_v55, %v8507_v29  ;;  %v8536_v18 = vmul.f32 %v17818_v27, %v8504_v38 }
 0xce8   :  { %v8525_v32 = vadd.f32 %v8524_v19, %v8523_v14  ;;  %v8539_v28 = vmul.f32 %v17818_v27, %v8507_v29  ;;  %v8542_v50 = vmul.f32 %v17816_v55, %v8516_v52  ;;  %v8543_v0 = vmul.f32 %v17818_v27, %v8510_v56 }
 0xce9   :  { %v8531_v45 = vmul.f32 %v17818_v27, %v8522_v61  ;;  %v8537_v36 = vmul.f32 %v17816_v55, %v8522_v61  ;;  %v8545_v10 = vmul.f32 %v17816_v55, %v8519_v9  ;;  %v8546_v13 = vmul.f32 %v17818_v27, %v8513_v5 }
 0xcea   :  { %v8534_v4 = vmul.f32 %v17818_v27, %v8525_v32  ;;  %v8540_v21 = vmul.f32 %v17816_v55, %v8525_v32  ;;  %v8544_v17 = vsub.f32 %v8542_v50, %v8543_v0  ;;  %v8548_v2 = vmul.f32 %v17818_v27, %v8516_v52 }
 0xceb   :  { %v8532_v46 = vsub.f32 %v8529_v16, %v8531_v45  ;;  %v8538_v33 = vadd.f32 %v8537_v36, %v8536_v18  ;;  %v8547_v42 = vsub.f32 %v8545_v10, %v8546_v13  ;;  %v8549_v25 = vmul.f32 %v17816_v55, %v8510_v56 }
 0xcec   :  { %v8535_v62 = vsub.f32 %v8533_v57, %v8534_v4  ;;  %v8541_v34 = vadd.f32 %v8540_v21, %v8539_v28  ;;  %v8551_v22 = vmul.f32 %v17818_v27, %v8519_v9  ;;  %v8552_v7 = vmul.f32 %v17816_v55, %v8513_v5 }
 0xced   :  { %v8550_v3 = vadd.f32 %v8549_v25, %v8548_v2  ;;  %v8557_v41 = vmul.f32 %v17821_v31, %v8532_v46  ;;  %v8559_v26 = vmul.f32 %v17824_v63, %v8544_v17  ;;  %v8562_v20 = vmul.f32 %v17824_v63, %v8547_v42 }
 0xcee   :  { %v8553_v15 = vadd.f32 %v8552_v7, %v8551_v22  ;;  %v8561_v40 = vmul.f32 %v17821_v31, %v8535_v62  ;;  %v8564_v37 = vmul.f32 %v17821_v31, %v8538_v33  ;;  %v8567_v12 = vmul.f32 %v17821_v31, %v8541_v34 }
 0xcef   :  { %v8560_v53 = vsub.f32 %v8557_v41, %v8559_v26  ;;  %v8565_v43 = vmul.f32 %v17824_v63, %v8550_v3  ;;  %v8570_v27 = vmul.f32 %v17824_v63, %v8532_v46  ;;  %v8571_v55 = vmul.f32 %v17821_v31, %v8544_v17 }
 0xcf0   :  { %v8563_v44 = vsub.f32 %v8561_v40, %v8562_v20  ;;  %v8568_v54 = vmul.f32 %v17824_v63, %v8553_v15  ;;  %v8573_v49 = vmul.f32 %v17824_v63, %v8535_v62  ;;  %v8574_v6 = vmul.f32 %v17821_v31, %v8547_v42 }
 0xcf1   :  { %v8566_v59 = vsub.f32 %v8564_v37, %v8565_v43  ;;  %v8572_v11 = vadd.f32 %v8571_v55, %v8570_v27  ;;  %v8576_v51 = vmul.f32 %v17824_v63, %v8538_v33  ;;  %v8577_v23 = vmul.f32 %v17821_v31, %v8550_v3 }
 0xcf2   :  { %v8569_v1 = vsub.f32 %v8567_v12, %v8568_v54  ;;  %v8575_v8 = vadd.f32 %v8574_v6, %v8573_v49  ;;  %v8579_v38 = vmul.f32 %v17824_v63, %v8541_v34  ;;  %v8580_v35 = vmul.f32 %v17821_v31, %v8553_v15 }
 0xcf3   :  { %v8578_v47 = vadd.f32 %v8577_v23, %v8576_v51  ;;  %v8582_v60 = vmul.f32 %v8560_v53, %v8560_v53  ;;  %v8583_v56 = vmul.f32 %v8563_v44, %v8563_v44  ;;  %v8585_v30 = vmul.f32 %v8566_v59, %v8566_v59 }
 0xcf4   :  { %v8581_v48 = vadd.f32 %v8580_v35, %v8579_v38  ;;  %v8586_v24 = vmul.f32 %v8569_v1, %v8569_v1  ;;  %v8589_v29 = vmul.f32 %v8572_v11, %v8572_v11  ;;  %v8590_v52 = vmul.f32 %v8575_v8, %v8575_v8 }
 0xcf5   :  { %v8584_v39 = vadd.f32 %v8583_v56, %v8582_v60  ;;  %v8593_v58 = vmul.f32 %v8578_v47, %v8578_v47  ;;  %v8598_v16 = vstv %s8597_s21  ;;  %v8601_v57 = vstv %s8908_s22 }
 0xcf6   :  { %v8587_v5 = vadd.f32 %v8586_v24, %v8585_v30  ;;  %v8591_v9 = vadd.f32 %v8590_v52, %v8589_v29  ;;  %v8594_v14 = vmul.f32 %v8581_v48, %v8581_v48 }
 0xcf8   :  { %v8588_v19 = vsub.f32 %v8584_v39, %v8587_v5  ;;  %v8595_v61 = vadd.f32 %v8594_v14, %v8593_v58 }
 0xcfa   :  { %v8592_v63 = vsub.f32 %v8588_v19, %v8591_v9 }
 0xcfc   :  { %v8596_v31 = vadd.f32 %v8595_v61, %v8592_v63 }
 0xcfe   :  { %v8599_v18 = vmul.f32 %v8598_v16, %v8596_v31 }
 0xd00   :  { %v8602_v32 = vadd.f32 %v8601_v57, %v8599_v18 }
 0xd02   :  { %8603 = vst [vmem:[%s17931_s11] sm:$0x1] %v8602_v32  ;;  %v8604_v28 = vsub.f32 1.0, %v8602_v32 }
 0xd04   :  { %8605 = vst [vmem:[%s17931_s11 + $0x1] sm:$0x1] %v8604_v28 }
 0xd05   :  { %8610 = vsyncpa [#allocation3], 1 }
 0xd06   :  { %8611 = vsyncpa [#allocation5], 1 }

</bundles_post_ra>
